<compile_context>
chip_gen: v7x
topology: tpu7x:2x2x1
jax: 0.10.0
libtpu: 0.0.40
codegen_flags: <defaults>
</compile_context>

<pallas_src>
import jax
import jax.numpy as jnp
from jax import lax
from jax.experimental import pallas as pl
from jax.experimental.pallas import tpu as pltpu

# ---- static geometry of the module (Conv 5x5 pad 2 on 20x20, fc1 = 16*20*20) ----
KSIZE = 5
PAD = 2
H = W = 20
HP = WP = H + 2 * PAD              # 24 : spatially padded grid
NPIX = HP * WP                     # 576: flattened padded grid (= conv output columns)
MAXSHIFT = (KSIZE - 1) * (WP + 1)  # 100: largest conv tap lane shift
LPAD = MAXSHIFT // 2               # 50 : left zero-pad so conv1 output lands centered
FLAT = NPIX + MAXSHIFT             # 676: width of the shifted-read buffers
CONV_CH = 16                       # conv out channels
HID = 32                           # fc1 hidden


# ------------------------------ fused Pallas kernel ------------------------------

def fused_net_kernel(x_ref, w1_ref, b1_ref, w2_ref, b2_ref, mask_ref,
                     wf3_ref, bf_ref, wav_ref, bav_ref,
                     q_ref, x2_ref):
    """One batch element per grid step; all intermediates live in vregs/VMEM."""
    act = q_ref.shape[2]

    # ---------- conv1: 25 tap-dots over lane-shifted input slices (no im2col) ----------
    h1 = jnp.zeros((CONV_CH, NPIX), jnp.float32)
    for kh in range(KSIZE):
        for kw in range(KSIZE):
            t = kh * KSIZE + kw
            s = kh * WP + kw
            h1 = h1 + jnp.dot(w1_ref[t], x_ref[0, :, s:s + NPIX],
                              preferred_element_type=jnp.float32)
    # bias + ReLU, then zero the border columns so h1 *is* conv2's padded input.
    h1 = jnp.maximum(h1 + b1_ref[...], 0.0) * mask_ref[...]

    # Stage conv1 output as bf16.  Only the 100-column shift-overrun tail needs to be
    # zero (finite): the conv2 outputs it feeds multiply zero fc1 weight rows.
    x2_ref[:, NPIX:FLAT] = jnp.zeros((CONV_CH, FLAT - NPIX), jnp.bfloat16)
    x2_ref[:, 0:NPIX] = h1.astype(jnp.bfloat16)

    # ---------- conv2: same 25 tap-dot trick on the staged conv1 grid ----------
    h2 = jnp.zeros((CONV_CH, NPIX), jnp.float32)
    for kh in range(KSIZE):
        for kw in range(KSIZE):
            t = kh * KSIZE + kw
            s = kh * WP + kw
            h2 = h2 + jnp.dot(w2_ref[t], x2_ref[:, s:s + NPIX],
                              preferred_element_type=jnp.float32)
    h2 = jnp.maximum(h2 + b2_ref[...], 0.0)

    # ---------- fc1: per-channel (1,576)@(576,32); wf3 consumed as bf16 ----------
    # wf3 is pre-packed per channel with zero rows on the 24x24 padding columns, so the
    # torch NCHW flatten is folded into the weight layout (no transpose, no casts).
    y = jnp.zeros((1, HID), jnp.float32)
    for c in range(CONV_CH):
        y = y + jnp.dot(h2[c:c + 1, :].astype(jnp.bfloat16), wf3_ref[c],
                        preferred_element_type=jnp.float32)
    y = jnp.maximum(y + bf_ref[...], 0.0)                      # fc1 + ReLU -> (1, 32)

    # ---------- dueling head (tiny, f32) ----------
    av = jnp.dot(y, wav_ref[...], preferred_element_type=jnp.float32) + bav_ref[...]
    adv = av[:, :act]
    val = av[:, act:act + 1]
    q_ref[0] = val + adv - jnp.mean(adv, axis=-1, keepdims=True)


# ------------------------------ one-time weight packing ------------------------------

def pack_params(params):
    """Host-side re-packing done once, outside the per-call forward path."""
    cout, c1 = params['w1'].shape[0], params['w1'].shape[1]
    act = params['wa'].shape[0]
    cp = ((max(c1, 1) + 15) // 16) * 16      # input channels padded to a full bf16 tile

    # conv weights -> per-tap (25, Cout, Cin) bf16, tap index t = kh*5 + kw.
    w1t = jnp.transpose(params['w1'], (2, 3, 0, 1)).reshape(KSIZE * KSIZE, cout, c1)
    w1t = jnp.pad(w1t, ((0, 0), (0, 0), (0, cp - c1))).astype(jnp.bfloat16)
    w2t = jnp.transpose(params['w2'], (2, 3, 0, 1)).reshape(KSIZE * KSIZE, CONV_CH, CONV_CH)
    w2t = w2t.astype(jnp.bfloat16)

    # fc1 weight -> (16, 576, 32): row (c, r*24+cc) holds the torch column
    # c*400 + r*20 + cc; rows on the 24x24 padding columns are zero.
    wf3 = params['wf'].T.reshape(CONV_CH, H, W, HID)
    wf3 = jnp.pad(wf3, ((0, 0), (0, HP - H), (0, WP - W), (0, 0)))
    wf3 = wf3.reshape(CONV_CH, NPIX, HID).astype(jnp.bfloat16)

    # outA / outV fused into one small f32 weight (32, act+1).
    wav = jnp.concatenate([params['wa'].T, params['wv'].T], axis=1).astype(jnp.float32)
    bav = jnp.concatenate([params['ba'], params['bv']]).reshape(1, act + 1).astype(jnp.float32)

    # interior mask of the padded 24x24 grid (valid conv1-output positions).
    mask = jnp.pad(jnp.ones((H, W), jnp.float32),
                   ((PAD, PAD), (PAD, PAD))).reshape(1, NPIX)

    return {
        'w1t': w1t, 'b1': params['b1'].reshape(CONV_CH, 1).astype(jnp.float32),
        'w2t': w2t, 'b2': params['b2'].reshape(CONV_CH, 1).astype(jnp.float32),
        'mask': mask, 'wf3': wf3,
        'bf': params['bf'].reshape(1, HID).astype(jnp.float32),
        'wav': wav, 'bav': bav,
    }


# ------------------------------ forward wrapper ------------------------------

def net_forward(x_nchw, packed):
    B, C1 = x_nchw.shape[0], x_nchw.shape[1]
    act = packed['bav'].shape[1] - 1
    cp = packed['w1t'].shape[2]

    # Thin input glue: zero-pad channels to the tap-GEMM K (16), spatial pad by 2,
    # flatten to (cp, 576), add LPAD zero columns each side so every conv tap is a
    # static lane-shifted slice, cast bf16 (halves input DMA, native MXU operand).
    xp = jnp.pad(x_nchw, ((0, 0), (0, cp - C1), (PAD, PAD), (PAD, PAD)))
    xf = jnp.pad(xp.reshape(B, cp, NPIX),
                 ((0, 0), (0, 0), (LPAD, LPAD))).astype(jnp.bfloat16)

    args = (xf, packed['w1t'], packed['b1'], packed['w2t'], packed['b2'],
            packed['mask'], packed['wf3'], packed['bf'], packed['wav'], packed['bav'])

    # Input: one batch element per grid step.  Weights: full-array blocks with constant
    # index_maps -> DMA'd once, revisited (no per-iteration re-transfer).
    in_specs = [pl.BlockSpec((1, cp, FLAT), lambda b: (b, 0, 0))]
    for a in args[1:]:
        in_specs.append(pl.BlockSpec(a.shape, lambda b, _n=a.ndim: (0,) * _n))

    k1 = KSIZE * KSIZE * cp
    k2 = KSIZE * KSIZE * CONV_CH
    flops = 2 * B * (NPIX * CONV_CH * (k1 + k2)      # conv tap GEMMs
                     + CONV_CH * NPIX * HID          # fc1
                     + HID * (act + 1))              # outA / outV
    bytes_accessed = sum(a.size * a.dtype.itemsize for a in args) + B * act * 4

    out = pl.pallas_call(
        fused_net_kernel,
        out_shape=jax.ShapeDtypeStruct((B, 1, act), jnp.float32),
        grid=(B,),
        in_specs=in_specs,
        out_specs=pl.BlockSpec((1, 1, act), lambda b: (b, 0, 0)),
        scratch_shapes=[
            pltpu.VMEM((CONV_CH, FLAT), jnp.bfloat16),   # padded conv1 output (conv2 input)
        ],
        compiler_params=pltpu.CompilerParams(
            dimension_semantics=("parallel",),
            vmem_limit_bytes=32 * 1024 * 1024),
        cost_estimate=pl.CostEstimate(flops=flops, transcendentals=0,
                                      bytes_accessed=bytes_accessed),
    )(*args)
    return out[:, 0, :]


# ---------------- pure-JAX reference (sanity check only) ----------------

def net_forward_ref(x_nchw, params):
    dn = ('NCHW', 'OIHW', 'NCHW')
    hp = lax.Precision.HIGHEST
    h = lax.conv_general_dilated(x_nchw, params['w1'], (1, 1), ((PAD, PAD), (PAD, PAD)),
                                 dimension_numbers=dn, precision=hp)
    h = jnp.maximum(h + params['b1'][None, :, None, None], 0.0)
    h = lax.conv_general_dilated(h, params['w2'], (1, 1), ((PAD, PAD), (PAD, PAD)),
                                 dimension_numbers=dn, precision=hp)
    h = jnp.maximum(h + params['b2'][None, :, None, None], 0.0)
    flat = h.reshape(h.shape[0], -1)
    y = jnp.maximum(jnp.dot(flat, params['wf'].T, precision=hp) + params['bf'], 0.0)
    adv = jnp.dot(y, params['wa'].T, precision=hp) + params['ba']
    val = jnp.dot(y, params['wv'].T, precision=hp) + params['bv']
    return val + adv - adv.mean(-1, keepdims=True)


# ---------------- deterministic synthetic parameters (torch shapes) ----------------

def init_params(key, obs_dim, act_dim):
    ks = jax.random.split(key, 10)
    f32 = jnp.float32
    return {
        'w1': jax.random.normal(ks[0], (CONV_CH, obs_dim, KSIZE, KSIZE), f32) * 0.1,
        'b1': jax.random.normal(ks[1], (CONV_CH,), f32) * 0.01,
        'w2': jax.random.normal(ks[2], (CONV_CH, CONV_CH, KSIZE, KSIZE), f32) * 0.1,
        'b2': jax.random.normal(ks[3], (CONV_CH,), f32) * 0.01,
        'wf': jax.random.normal(ks[4], (HID, CONV_CH * H * W), f32) * 0.1,  # fc1: 6400 -> 32
        'bf': jax.random.normal(ks[5], (HID,), f32) * 0.01,
        'wa': jax.random.normal(ks[6], (act_dim, HID), f32) * 0.1,          # outA
        'ba': jax.random.normal(ks[7], (act_dim,), f32) * 0.01,
        'wv': jax.random.normal(ks[8], (1, HID), f32) * 0.1,                # outV
        'bv': jax.random.normal(ks[9], (1,), f32) * 0.01,
    }


if __name__ == "__main__":
    key = jax.random.PRNGKey(0)
    obs_dim, act_dim = 4, 4
    B = 2                                   # fc1 expects 16*20*20 = 6400 features

    pkey, xkey = jax.random.split(key)
    params = init_params(pkey, obs_dim, act_dim)
    packed = pack_params(params)            # one-time weight re-packing
    x = jax.random.normal(xkey, (B, obs_dim, H, W), jnp.float32)

    fwd = jax.jit(net_forward)
    q = jax.block_until_ready(fwd(x, packed))

    q_ref = net_forward_ref(x, params)
    rel_err = float(jnp.max(jnp.abs(q - q_ref)) / (jnp.max(jnp.abs(q_ref)) + 1e-6))
    assert rel_err < 2e-2, f"kernel/reference mismatch: rel_err={rel_err}"

    print("KERNEL_OK")
</pallas_src>

<mosaic_0001>
module attributes {stable_mosaic.version = 11 : i64} {
  func.func @fused_net_kernel(%arg0: i32, %arg1: memref<1x16x676xbf16, #tpu.memory_space<vmem>>, %arg2: memref<25x16x16xbf16, #tpu.memory_space<vmem>>, %arg3: memref<16x1xf32, #tpu.memory_space<vmem>>, %arg4: memref<25x16x16xbf16, #tpu.memory_space<vmem>>, %arg5: memref<16x1xf32, #tpu.memory_space<vmem>>, %arg6: memref<1x576xf32, #tpu.memory_space<vmem>>, %arg7: memref<16x576x32xbf16, #tpu.memory_space<vmem>>, %arg8: memref<1x32xf32, #tpu.memory_space<vmem>>, %arg9: memref<32x5xf32, #tpu.memory_space<vmem>>, %arg10: memref<1x5xf32, #tpu.memory_space<vmem>>, %arg11: memref<1x1x4xf32, #tpu.memory_space<vmem>>, %arg12: memref<16x676xbf16, #tpu.memory_space<vmem>>) attributes {dimension_semantics = [#tpu.dimension_semantics<parallel>], iteration_bounds = array<i64: 2>, scalar_prefetch = 0 : i64, scratch_operands = 1 : i64, tpu.core_type = #tpu.core_type<tc>, window_params = [{transform_indices = @transform_0, window_bounds = array<i64: 1, 16, 676>}, {pipeline_mode = #tpu.pipeline_mode<synchronous>, transform_indices = @transform_1, window_bounds = array<i64: 25, 16, 16>}, {pipeline_mode = #tpu.pipeline_mode<synchronous>, transform_indices = @transform_2, window_bounds = array<i64: 16, 1>}, {pipeline_mode = #tpu.pipeline_mode<synchronous>, transform_indices = @transform_3, window_bounds = array<i64: 25, 16, 16>}, {pipeline_mode = #tpu.pipeline_mode<synchronous>, transform_indices = @transform_4, window_bounds = array<i64: 16, 1>}, {pipeline_mode = #tpu.pipeline_mode<synchronous>, transform_indices = @transform_5, window_bounds = array<i64: 1, 576>}, {pipeline_mode = #tpu.pipeline_mode<synchronous>, transform_indices = @transform_6, window_bounds = array<i64: 16, 576, 32>}, {pipeline_mode = #tpu.pipeline_mode<synchronous>, transform_indices = @transform_7, window_bounds = array<i64: 1, 32>}, {pipeline_mode = #tpu.pipeline_mode<synchronous>, transform_indices = @transform_8, window_bounds = array<i64: 32, 5>}, {pipeline_mode = #tpu.pipeline_mode<synchronous>, transform_indices = @transform_9, window_bounds = array<i64: 1, 5>}, {transform_indices = @transform_10, window_bounds = array<i64: 1, 1, 4>}]} {
    %cst = arith.constant 0.000000e+00 : f32
    %0 = vector.broadcast %cst : f32 to vector<16x576xf32>
    %c0 = arith.constant 0 : index
    %c0_0 = arith.constant 0 : index
    %c0_1 = arith.constant 0 : index
    %1 = vector.load %arg2[%c0, %c0_0, %c0_1] : memref<25x16x16xbf16, #tpu.memory_space<vmem>>, vector<1x16x16xbf16>
    %2 = vector.shape_cast %1 : vector<1x16x16xbf16> to vector<16x16xbf16>
    %c0_2 = arith.constant 0 : index
    %c0_3 = arith.constant 0 : index
    %c0_4 = arith.constant 0 : index
    %3 = vector.load %arg1[%c0_2, %c0_3, %c0_4] : memref<1x16x676xbf16, #tpu.memory_space<vmem>>, vector<1x16x576xbf16>
    %4 = vector.shape_cast %3 : vector<1x16x576xbf16> to vector<16x576xbf16>
    %cst_5 = arith.constant dense<0.000000e+00> : vector<16x576xf32>
    %5 = tpu.matmul %2, %4, %cst_5 {dimension_numbers = #tpu.dot_dimension_numbers<[1], [0], [0], [1], [0, 0, 1, 1], [], []>} : vector<16x16xbf16>, vector<16x576xbf16>, vector<16x576xf32> -> vector<16x576xf32>
    %6 = arith.addf %0, %5 : vector<16x576xf32>
    %c1 = arith.constant 1 : index
    %c0_6 = arith.constant 0 : index
    %c0_7 = arith.constant 0 : index
    %7 = vector.load %arg2[%c1, %c0_6, %c0_7] : memref<25x16x16xbf16, #tpu.memory_space<vmem>>, vector<1x16x16xbf16>
    %8 = vector.shape_cast %7 : vector<1x16x16xbf16> to vector<16x16xbf16>
    %c0_8 = arith.constant 0 : index
    %c0_9 = arith.constant 0 : index
    %c1_10 = arith.constant 1 : index
    %9 = vector.load %arg1[%c0_8, %c0_9, %c1_10] : memref<1x16x676xbf16, #tpu.memory_space<vmem>>, vector<1x16x576xbf16>
    %10 = vector.shape_cast %9 : vector<1x16x576xbf16> to vector<16x576xbf16>
    %cst_11 = arith.constant dense<0.000000e+00> : vector<16x576xf32>
    %11 = tpu.matmul %8, %10, %cst_11 {dimension_numbers = #tpu.dot_dimension_numbers<[1], [0], [0], [1], [0, 0, 1, 1], [], []>} : vector<16x16xbf16>, vector<16x576xbf16>, vector<16x576xf32> -> vector<16x576xf32>
    %12 = arith.addf %6, %11 : vector<16x576xf32>
    %c2 = arith.constant 2 : index
    %c0_12 = arith.constant 0 : index
    %c0_13 = arith.constant 0 : index
    %13 = vector.load %arg2[%c2, %c0_12, %c0_13] : memref<25x16x16xbf16, #tpu.memory_space<vmem>>, vector<1x16x16xbf16>
    %14 = vector.shape_cast %13 : vector<1x16x16xbf16> to vector<16x16xbf16>
    %c0_14 = arith.constant 0 : index
    %c0_15 = arith.constant 0 : index
    %c2_16 = arith.constant 2 : index
    %15 = vector.load %arg1[%c0_14, %c0_15, %c2_16] : memref<1x16x676xbf16, #tpu.memory_space<vmem>>, vector<1x16x576xbf16>
    %16 = vector.shape_cast %15 : vector<1x16x576xbf16> to vector<16x576xbf16>
    %cst_17 = arith.constant dense<0.000000e+00> : vector<16x576xf32>
    %17 = tpu.matmul %14, %16, %cst_17 {dimension_numbers = #tpu.dot_dimension_numbers<[1], [0], [0], [1], [0, 0, 1, 1], [], []>} : vector<16x16xbf16>, vector<16x576xbf16>, vector<16x576xf32> -> vector<16x576xf32>
    %18 = arith.addf %12, %17 : vector<16x576xf32>
    %c3 = arith.constant 3 : index
    %c0_18 = arith.constant 0 : index
    %c0_19 = arith.constant 0 : index
    %19 = vector.load %arg2[%c3, %c0_18, %c0_19] : memref<25x16x16xbf16, #tpu.memory_space<vmem>>, vector<1x16x16xbf16>
    %20 = vector.shape_cast %19 : vector<1x16x16xbf16> to vector<16x16xbf16>
    %c0_20 = arith.constant 0 : index
    %c0_21 = arith.constant 0 : index
    %c3_22 = arith.constant 3 : index
    %21 = vector.load %arg1[%c0_20, %c0_21, %c3_22] : memref<1x16x676xbf16, #tpu.memory_space<vmem>>, vector<1x16x576xbf16>
    %22 = vector.shape_cast %21 : vector<1x16x576xbf16> to vector<16x576xbf16>
    %cst_23 = arith.constant dense<0.000000e+00> : vector<16x576xf32>
    %23 = tpu.matmul %20, %22, %cst_23 {dimension_numbers = #tpu.dot_dimension_numbers<[1], [0], [0], [1], [0, 0, 1, 1], [], []>} : vector<16x16xbf16>, vector<16x576xbf16>, vector<16x576xf32> -> vector<16x576xf32>
    %24 = arith.addf %18, %23 : vector<16x576xf32>
    %c4 = arith.constant 4 : index
    %c0_24 = arith.constant 0 : index
    %c0_25 = arith.constant 0 : index
    %25 = vector.load %arg2[%c4, %c0_24, %c0_25] : memref<25x16x16xbf16, #tpu.memory_space<vmem>>, vector<1x16x16xbf16>
    %26 = vector.shape_cast %25 : vector<1x16x16xbf16> to vector<16x16xbf16>
    %c0_26 = arith.constant 0 : index
    %c0_27 = arith.constant 0 : index
    %c4_28 = arith.constant 4 : index
    %27 = vector.load %arg1[%c0_26, %c0_27, %c4_28] : memref<1x16x676xbf16, #tpu.memory_space<vmem>>, vector<1x16x576xbf16>
    %28 = vector.shape_cast %27 : vector<1x16x576xbf16> to vector<16x576xbf16>
    %cst_29 = arith.constant dense<0.000000e+00> : vector<16x576xf32>
    %29 = tpu.matmul %26, %28, %cst_29 {dimension_numbers = #tpu.dot_dimension_numbers<[1], [0], [0], [1], [0, 0, 1, 1], [], []>} : vector<16x16xbf16>, vector<16x576xbf16>, vector<16x576xf32> -> vector<16x576xf32>
    %30 = arith.addf %24, %29 : vector<16x576xf32>
    %c5 = arith.constant 5 : index
    %c0_30 = arith.constant 0 : index
    %c0_31 = arith.constant 0 : index
    %31 = vector.load %arg2[%c5, %c0_30, %c0_31] : memref<25x16x16xbf16, #tpu.memory_space<vmem>>, vector<1x16x16xbf16>
    %32 = vector.shape_cast %31 : vector<1x16x16xbf16> to vector<16x16xbf16>
    %c0_32 = arith.constant 0 : index
    %c0_33 = arith.constant 0 : index
    %c24 = arith.constant 24 : index
    %33 = vector.load %arg1[%c0_32, %c0_33, %c24] : memref<1x16x676xbf16, #tpu.memory_space<vmem>>, vector<1x16x576xbf16>
    %34 = vector.shape_cast %33 : vector<1x16x576xbf16> to vector<16x576xbf16>
    %cst_34 = arith.constant dense<0.000000e+00> : vector<16x576xf32>
    %35 = tpu.matmul %32, %34, %cst_34 {dimension_numbers = #tpu.dot_dimension_numbers<[1], [0], [0], [1], [0, 0, 1, 1], [], []>} : vector<16x16xbf16>, vector<16x576xbf16>, vector<16x576xf32> -> vector<16x576xf32>
    %36 = arith.addf %30, %35 : vector<16x576xf32>
    %c6 = arith.constant 6 : index
    %c0_35 = arith.constant 0 : index
    %c0_36 = arith.constant 0 : index
    %37 = vector.load %arg2[%c6, %c0_35, %c0_36] : memref<25x16x16xbf16, #tpu.memory_space<vmem>>, vector<1x16x16xbf16>
    %38 = vector.shape_cast %37 : vector<1x16x16xbf16> to vector<16x16xbf16>
    %c0_37 = arith.constant 0 : index
    %c0_38 = arith.constant 0 : index
    %c25 = arith.constant 25 : index
    %39 = vector.load %arg1[%c0_37, %c0_38, %c25] : memref<1x16x676xbf16, #tpu.memory_space<vmem>>, vector<1x16x576xbf16>
    %40 = vector.shape_cast %39 : vector<1x16x576xbf16> to vector<16x576xbf16>
    %cst_39 = arith.constant dense<0.000000e+00> : vector<16x576xf32>
    %41 = tpu.matmul %38, %40, %cst_39 {dimension_numbers = #tpu.dot_dimension_numbers<[1], [0], [0], [1], [0, 0, 1, 1], [], []>} : vector<16x16xbf16>, vector<16x576xbf16>, vector<16x576xf32> -> vector<16x576xf32>
    %42 = arith.addf %36, %41 : vector<16x576xf32>
    %c7 = arith.constant 7 : index
    %c0_40 = arith.constant 0 : index
    %c0_41 = arith.constant 0 : index
    %43 = vector.load %arg2[%c7, %c0_40, %c0_41] : memref<25x16x16xbf16, #tpu.memory_space<vmem>>, vector<1x16x16xbf16>
    %44 = vector.shape_cast %43 : vector<1x16x16xbf16> to vector<16x16xbf16>
    %c0_42 = arith.constant 0 : index
    %c0_43 = arith.constant 0 : index
    %c26 = arith.constant 26 : index
    %45 = vector.load %arg1[%c0_42, %c0_43, %c26] : memref<1x16x676xbf16, #tpu.memory_space<vmem>>, vector<1x16x576xbf16>
    %46 = vector.shape_cast %45 : vector<1x16x576xbf16> to vector<16x576xbf16>
    %cst_44 = arith.constant dense<0.000000e+00> : vector<16x576xf32>
    %47 = tpu.matmul %44, %46, %cst_44 {dimension_numbers = #tpu.dot_dimension_numbers<[1], [0], [0], [1], [0, 0, 1, 1], [], []>} : vector<16x16xbf16>, vector<16x576xbf16>, vector<16x576xf32> -> vector<16x576xf32>
    %48 = arith.addf %42, %47 : vector<16x576xf32>
    %c8 = arith.constant 8 : index
    %c0_45 = arith.constant 0 : index
    %c0_46 = arith.constant 0 : index
    %49 = vector.load %arg2[%c8, %c0_45, %c0_46] : memref<25x16x16xbf16, #tpu.memory_space<vmem>>, vector<1x16x16xbf16>
    %50 = vector.shape_cast %49 : vector<1x16x16xbf16> to vector<16x16xbf16>
    %c0_47 = arith.constant 0 : index
    %c0_48 = arith.constant 0 : index
    %c27 = arith.constant 27 : index
    %51 = vector.load %arg1[%c0_47, %c0_48, %c27] : memref<1x16x676xbf16, #tpu.memory_space<vmem>>, vector<1x16x576xbf16>
    %52 = vector.shape_cast %51 : vector<1x16x576xbf16> to vector<16x576xbf16>
    %cst_49 = arith.constant dense<0.000000e+00> : vector<16x576xf32>
    %53 = tpu.matmul %50, %52, %cst_49 {dimension_numbers = #tpu.dot_dimension_numbers<[1], [0], [0], [1], [0, 0, 1, 1], [], []>} : vector<16x16xbf16>, vector<16x576xbf16>, vector<16x576xf32> -> vector<16x576xf32>
    %54 = arith.addf %48, %53 : vector<16x576xf32>
    %c9 = arith.constant 9 : index
    %c0_50 = arith.constant 0 : index
    %c0_51 = arith.constant 0 : index
    %55 = vector.load %arg2[%c9, %c0_50, %c0_51] : memref<25x16x16xbf16, #tpu.memory_space<vmem>>, vector<1x16x16xbf16>
    %56 = vector.shape_cast %55 : vector<1x16x16xbf16> to vector<16x16xbf16>
    %c0_52 = arith.constant 0 : index
    %c0_53 = arith.constant 0 : index
    %c28 = arith.constant 28 : index
    %57 = vector.load %arg1[%c0_52, %c0_53, %c28] : memref<1x16x676xbf16, #tpu.memory_space<vmem>>, vector<1x16x576xbf16>
    %58 = vector.shape_cast %57 : vector<1x16x576xbf16> to vector<16x576xbf16>
    %cst_54 = arith.constant dense<0.000000e+00> : vector<16x576xf32>
    %59 = tpu.matmul %56, %58, %cst_54 {dimension_numbers = #tpu.dot_dimension_numbers<[1], [0], [0], [1], [0, 0, 1, 1], [], []>} : vector<16x16xbf16>, vector<16x576xbf16>, vector<16x576xf32> -> vector<16x576xf32>
    %60 = arith.addf %54, %59 : vector<16x576xf32>
    %c10 = arith.constant 10 : index
    %c0_55 = arith.constant 0 : index
    %c0_56 = arith.constant 0 : index
    %61 = vector.load %arg2[%c10, %c0_55, %c0_56] : memref<25x16x16xbf16, #tpu.memory_space<vmem>>, vector<1x16x16xbf16>
    %62 = vector.shape_cast %61 : vector<1x16x16xbf16> to vector<16x16xbf16>
    %c0_57 = arith.constant 0 : index
    %c0_58 = arith.constant 0 : index
    %c48 = arith.constant 48 : index
    %63 = vector.load %arg1[%c0_57, %c0_58, %c48] : memref<1x16x676xbf16, #tpu.memory_space<vmem>>, vector<1x16x576xbf16>
    %64 = vector.shape_cast %63 : vector<1x16x576xbf16> to vector<16x576xbf16>
    %cst_59 = arith.constant dense<0.000000e+00> : vector<16x576xf32>
    %65 = tpu.matmul %62, %64, %cst_59 {dimension_numbers = #tpu.dot_dimension_numbers<[1], [0], [0], [1], [0, 0, 1, 1], [], []>} : vector<16x16xbf16>, vector<16x576xbf16>, vector<16x576xf32> -> vector<16x576xf32>
    %66 = arith.addf %60, %65 : vector<16x576xf32>
    %c11 = arith.constant 11 : index
    %c0_60 = arith.constant 0 : index
    %c0_61 = arith.constant 0 : index
    %67 = vector.load %arg2[%c11, %c0_60, %c0_61] : memref<25x16x16xbf16, #tpu.memory_space<vmem>>, vector<1x16x16xbf16>
    %68 = vector.shape_cast %67 : vector<1x16x16xbf16> to vector<16x16xbf16>
    %c0_62 = arith.constant 0 : index
    %c0_63 = arith.constant 0 : index
    %c49 = arith.constant 49 : index
    %69 = vector.load %arg1[%c0_62, %c0_63, %c49] : memref<1x16x676xbf16, #tpu.memory_space<vmem>>, vector<1x16x576xbf16>
    %70 = vector.shape_cast %69 : vector<1x16x576xbf16> to vector<16x576xbf16>
    %cst_64 = arith.constant dense<0.000000e+00> : vector<16x576xf32>
    %71 = tpu.matmul %68, %70, %cst_64 {dimension_numbers = #tpu.dot_dimension_numbers<[1], [0], [0], [1], [0, 0, 1, 1], [], []>} : vector<16x16xbf16>, vector<16x576xbf16>, vector<16x576xf32> -> vector<16x576xf32>
    %72 = arith.addf %66, %71 : vector<16x576xf32>
    %c12 = arith.constant 12 : index
    %c0_65 = arith.constant 0 : index
    %c0_66 = arith.constant 0 : index
    %73 = vector.load %arg2[%c12, %c0_65, %c0_66] : memref<25x16x16xbf16, #tpu.memory_space<vmem>>, vector<1x16x16xbf16>
    %74 = vector.shape_cast %73 : vector<1x16x16xbf16> to vector<16x16xbf16>
    %c0_67 = arith.constant 0 : index
    %c0_68 = arith.constant 0 : index
    %c50 = arith.constant 50 : index
    %75 = vector.load %arg1[%c0_67, %c0_68, %c50] : memref<1x16x676xbf16, #tpu.memory_space<vmem>>, vector<1x16x576xbf16>
    %76 = vector.shape_cast %75 : vector<1x16x576xbf16> to vector<16x576xbf16>
    %cst_69 = arith.constant dense<0.000000e+00> : vector<16x576xf32>
    %77 = tpu.matmul %74, %76, %cst_69 {dimension_numbers = #tpu.dot_dimension_numbers<[1], [0], [0], [1], [0, 0, 1, 1], [], []>} : vector<16x16xbf16>, vector<16x576xbf16>, vector<16x576xf32> -> vector<16x576xf32>
    %78 = arith.addf %72, %77 : vector<16x576xf32>
    %c13 = arith.constant 13 : index
    %c0_70 = arith.constant 0 : index
    %c0_71 = arith.constant 0 : index
    %79 = vector.load %arg2[%c13, %c0_70, %c0_71] : memref<25x16x16xbf16, #tpu.memory_space<vmem>>, vector<1x16x16xbf16>
    %80 = vector.shape_cast %79 : vector<1x16x16xbf16> to vector<16x16xbf16>
    %c0_72 = arith.constant 0 : index
    %c0_73 = arith.constant 0 : index
    %c51 = arith.constant 51 : index
    %81 = vector.load %arg1[%c0_72, %c0_73, %c51] : memref<1x16x676xbf16, #tpu.memory_space<vmem>>, vector<1x16x576xbf16>
    %82 = vector.shape_cast %81 : vector<1x16x576xbf16> to vector<16x576xbf16>
    %cst_74 = arith.constant dense<0.000000e+00> : vector<16x576xf32>
    %83 = tpu.matmul %80, %82, %cst_74 {dimension_numbers = #tpu.dot_dimension_numbers<[1], [0], [0], [1], [0, 0, 1, 1], [], []>} : vector<16x16xbf16>, vector<16x576xbf16>, vector<16x576xf32> -> vector<16x576xf32>
    %84 = arith.addf %78, %83 : vector<16x576xf32>
    %c14 = arith.constant 14 : index
    %c0_75 = arith.constant 0 : index
    %c0_76 = arith.constant 0 : index
    %85 = vector.load %arg2[%c14, %c0_75, %c0_76] : memref<25x16x16xbf16, #tpu.memory_space<vmem>>, vector<1x16x16xbf16>
    %86 = vector.shape_cast %85 : vector<1x16x16xbf16> to vector<16x16xbf16>
    %c0_77 = arith.constant 0 : index
    %c0_78 = arith.constant 0 : index
    %c52 = arith.constant 52 : index
    %87 = vector.load %arg1[%c0_77, %c0_78, %c52] : memref<1x16x676xbf16, #tpu.memory_space<vmem>>, vector<1x16x576xbf16>
    %88 = vector.shape_cast %87 : vector<1x16x576xbf16> to vector<16x576xbf16>
    %cst_79 = arith.constant dense<0.000000e+00> : vector<16x576xf32>
    %89 = tpu.matmul %86, %88, %cst_79 {dimension_numbers = #tpu.dot_dimension_numbers<[1], [0], [0], [1], [0, 0, 1, 1], [], []>} : vector<16x16xbf16>, vector<16x576xbf16>, vector<16x576xf32> -> vector<16x576xf32>
    %90 = arith.addf %84, %89 : vector<16x576xf32>
    %c15 = arith.constant 15 : index
    %c0_80 = arith.constant 0 : index
    %c0_81 = arith.constant 0 : index
    %91 = vector.load %arg2[%c15, %c0_80, %c0_81] : memref<25x16x16xbf16, #tpu.memory_space<vmem>>, vector<1x16x16xbf16>
    %92 = vector.shape_cast %91 : vector<1x16x16xbf16> to vector<16x16xbf16>
    %c0_82 = arith.constant 0 : index
    %c0_83 = arith.constant 0 : index
    %c72 = arith.constant 72 : index
    %93 = vector.load %arg1[%c0_82, %c0_83, %c72] : memref<1x16x676xbf16, #tpu.memory_space<vmem>>, vector<1x16x576xbf16>
    %94 = vector.shape_cast %93 : vector<1x16x576xbf16> to vector<16x576xbf16>
    %cst_84 = arith.constant dense<0.000000e+00> : vector<16x576xf32>
    %95 = tpu.matmul %92, %94, %cst_84 {dimension_numbers = #tpu.dot_dimension_numbers<[1], [0], [0], [1], [0, 0, 1, 1], [], []>} : vector<16x16xbf16>, vector<16x576xbf16>, vector<16x576xf32> -> vector<16x576xf32>
    %96 = arith.addf %90, %95 : vector<16x576xf32>
    %c16 = arith.constant 16 : index
    %c0_85 = arith.constant 0 : index
    %c0_86 = arith.constant 0 : index
    %97 = vector.load %arg2[%c16, %c0_85, %c0_86] : memref<25x16x16xbf16, #tpu.memory_space<vmem>>, vector<1x16x16xbf16>
    %98 = vector.shape_cast %97 : vector<1x16x16xbf16> to vector<16x16xbf16>
    %c0_87 = arith.constant 0 : index
    %c0_88 = arith.constant 0 : index
    %c73 = arith.constant 73 : index
    %99 = vector.load %arg1[%c0_87, %c0_88, %c73] : memref<1x16x676xbf16, #tpu.memory_space<vmem>>, vector<1x16x576xbf16>
    %100 = vector.shape_cast %99 : vector<1x16x576xbf16> to vector<16x576xbf16>
    %cst_89 = arith.constant dense<0.000000e+00> : vector<16x576xf32>
    %101 = tpu.matmul %98, %100, %cst_89 {dimension_numbers = #tpu.dot_dimension_numbers<[1], [0], [0], [1], [0, 0, 1, 1], [], []>} : vector<16x16xbf16>, vector<16x576xbf16>, vector<16x576xf32> -> vector<16x576xf32>
    %102 = arith.addf %96, %101 : vector<16x576xf32>
    %c17 = arith.constant 17 : index
    %c0_90 = arith.constant 0 : index
    %c0_91 = arith.constant 0 : index
    %103 = vector.load %arg2[%c17, %c0_90, %c0_91] : memref<25x16x16xbf16, #tpu.memory_space<vmem>>, vector<1x16x16xbf16>
    %104 = vector.shape_cast %103 : vector<1x16x16xbf16> to vector<16x16xbf16>
    %c0_92 = arith.constant 0 : index
    %c0_93 = arith.constant 0 : index
    %c74 = arith.constant 74 : index
    %105 = vector.load %arg1[%c0_92, %c0_93, %c74] : memref<1x16x676xbf16, #tpu.memory_space<vmem>>, vector<1x16x576xbf16>
    %106 = vector.shape_cast %105 : vector<1x16x576xbf16> to vector<16x576xbf16>
    %cst_94 = arith.constant dense<0.000000e+00> : vector<16x576xf32>
    %107 = tpu.matmul %104, %106, %cst_94 {dimension_numbers = #tpu.dot_dimension_numbers<[1], [0], [0], [1], [0, 0, 1, 1], [], []>} : vector<16x16xbf16>, vector<16x576xbf16>, vector<16x576xf32> -> vector<16x576xf32>
    %108 = arith.addf %102, %107 : vector<16x576xf32>
    %c18 = arith.constant 18 : index
    %c0_95 = arith.constant 0 : index
    %c0_96 = arith.constant 0 : index
    %109 = vector.load %arg2[%c18, %c0_95, %c0_96] : memref<25x16x16xbf16, #tpu.memory_space<vmem>>, vector<1x16x16xbf16>
    %110 = vector.shape_cast %109 : vector<1x16x16xbf16> to vector<16x16xbf16>
    %c0_97 = arith.constant 0 : index
    %c0_98 = arith.constant 0 : index
    %c75 = arith.constant 75 : index
    %111 = vector.load %arg1[%c0_97, %c0_98, %c75] : memref<1x16x676xbf16, #tpu.memory_space<vmem>>, vector<1x16x576xbf16>
    %112 = vector.shape_cast %111 : vector<1x16x576xbf16> to vector<16x576xbf16>
    %cst_99 = arith.constant dense<0.000000e+00> : vector<16x576xf32>
    %113 = tpu.matmul %110, %112, %cst_99 {dimension_numbers = #tpu.dot_dimension_numbers<[1], [0], [0], [1], [0, 0, 1, 1], [], []>} : vector<16x16xbf16>, vector<16x576xbf16>, vector<16x576xf32> -> vector<16x576xf32>
    %114 = arith.addf %108, %113 : vector<16x576xf32>
    %c19 = arith.constant 19 : index
    %c0_100 = arith.constant 0 : index
    %c0_101 = arith.constant 0 : index
    %115 = vector.load %arg2[%c19, %c0_100, %c0_101] : memref<25x16x16xbf16, #tpu.memory_space<vmem>>, vector<1x16x16xbf16>
    %116 = vector.shape_cast %115 : vector<1x16x16xbf16> to vector<16x16xbf16>
    %c0_102 = arith.constant 0 : index
    %c0_103 = arith.constant 0 : index
    %c76 = arith.constant 76 : index
    %117 = vector.load %arg1[%c0_102, %c0_103, %c76] : memref<1x16x676xbf16, #tpu.memory_space<vmem>>, vector<1x16x576xbf16>
    %118 = vector.shape_cast %117 : vector<1x16x576xbf16> to vector<16x576xbf16>
    %cst_104 = arith.constant dense<0.000000e+00> : vector<16x576xf32>
    %119 = tpu.matmul %116, %118, %cst_104 {dimension_numbers = #tpu.dot_dimension_numbers<[1], [0], [0], [1], [0, 0, 1, 1], [], []>} : vector<16x16xbf16>, vector<16x576xbf16>, vector<16x576xf32> -> vector<16x576xf32>
    %120 = arith.addf %114, %119 : vector<16x576xf32>
    %c20 = arith.constant 20 : index
    %c0_105 = arith.constant 0 : index
    %c0_106 = arith.constant 0 : index
    %121 = vector.load %arg2[%c20, %c0_105, %c0_106] : memref<25x16x16xbf16, #tpu.memory_space<vmem>>, vector<1x16x16xbf16>
    %122 = vector.shape_cast %121 : vector<1x16x16xbf16> to vector<16x16xbf16>
    %c0_107 = arith.constant 0 : index
    %c0_108 = arith.constant 0 : index
    %c96 = arith.constant 96 : index
    %123 = vector.load %arg1[%c0_107, %c0_108, %c96] : memref<1x16x676xbf16, #tpu.memory_space<vmem>>, vector<1x16x576xbf16>
    %124 = vector.shape_cast %123 : vector<1x16x576xbf16> to vector<16x576xbf16>
    %cst_109 = arith.constant dense<0.000000e+00> : vector<16x576xf32>
    %125 = tpu.matmul %122, %124, %cst_109 {dimension_numbers = #tpu.dot_dimension_numbers<[1], [0], [0], [1], [0, 0, 1, 1], [], []>} : vector<16x16xbf16>, vector<16x576xbf16>, vector<16x576xf32> -> vector<16x576xf32>
    %126 = arith.addf %120, %125 : vector<16x576xf32>
    %c21 = arith.constant 21 : index
    %c0_110 = arith.constant 0 : index
    %c0_111 = arith.constant 0 : index
    %127 = vector.load %arg2[%c21, %c0_110, %c0_111] : memref<25x16x16xbf16, #tpu.memory_space<vmem>>, vector<1x16x16xbf16>
    %128 = vector.shape_cast %127 : vector<1x16x16xbf16> to vector<16x16xbf16>
    %c0_112 = arith.constant 0 : index
    %c0_113 = arith.constant 0 : index
    %c97 = arith.constant 97 : index
    %129 = vector.load %arg1[%c0_112, %c0_113, %c97] : memref<1x16x676xbf16, #tpu.memory_space<vmem>>, vector<1x16x576xbf16>
    %130 = vector.shape_cast %129 : vector<1x16x576xbf16> to vector<16x576xbf16>
    %cst_114 = arith.constant dense<0.000000e+00> : vector<16x576xf32>
    %131 = tpu.matmul %128, %130, %cst_114 {dimension_numbers = #tpu.dot_dimension_numbers<[1], [0], [0], [1], [0, 0, 1, 1], [], []>} : vector<16x16xbf16>, vector<16x576xbf16>, vector<16x576xf32> -> vector<16x576xf32>
    %132 = arith.addf %126, %131 : vector<16x576xf32>
    %c22 = arith.constant 22 : index
    %c0_115 = arith.constant 0 : index
    %c0_116 = arith.constant 0 : index
    %133 = vector.load %arg2[%c22, %c0_115, %c0_116] : memref<25x16x16xbf16, #tpu.memory_space<vmem>>, vector<1x16x16xbf16>
    %134 = vector.shape_cast %133 : vector<1x16x16xbf16> to vector<16x16xbf16>
    %c0_117 = arith.constant 0 : index
    %c0_118 = arith.constant 0 : index
    %c98 = arith.constant 98 : index
    %135 = vector.load %arg1[%c0_117, %c0_118, %c98] : memref<1x16x676xbf16, #tpu.memory_space<vmem>>, vector<1x16x576xbf16>
    %136 = vector.shape_cast %135 : vector<1x16x576xbf16> to vector<16x576xbf16>
    %cst_119 = arith.constant dense<0.000000e+00> : vector<16x576xf32>
    %137 = tpu.matmul %134, %136, %cst_119 {dimension_numbers = #tpu.dot_dimension_numbers<[1], [0], [0], [1], [0, 0, 1, 1], [], []>} : vector<16x16xbf16>, vector<16x576xbf16>, vector<16x576xf32> -> vector<16x576xf32>
    %138 = arith.addf %132, %137 : vector<16x576xf32>
    %c23 = arith.constant 23 : index
    %c0_120 = arith.constant 0 : index
    %c0_121 = arith.constant 0 : index
    %139 = vector.load %arg2[%c23, %c0_120, %c0_121] : memref<25x16x16xbf16, #tpu.memory_space<vmem>>, vector<1x16x16xbf16>
    %140 = vector.shape_cast %139 : vector<1x16x16xbf16> to vector<16x16xbf16>
    %c0_122 = arith.constant 0 : index
    %c0_123 = arith.constant 0 : index
    %c99 = arith.constant 99 : index
    %141 = vector.load %arg1[%c0_122, %c0_123, %c99] : memref<1x16x676xbf16, #tpu.memory_space<vmem>>, vector<1x16x576xbf16>
    %142 = vector.shape_cast %141 : vector<1x16x576xbf16> to vector<16x576xbf16>
    %cst_124 = arith.constant dense<0.000000e+00> : vector<16x576xf32>
    %143 = tpu.matmul %140, %142, %cst_124 {dimension_numbers = #tpu.dot_dimension_numbers<[1], [0], [0], [1], [0, 0, 1, 1], [], []>} : vector<16x16xbf16>, vector<16x576xbf16>, vector<16x576xf32> -> vector<16x576xf32>
    %144 = arith.addf %138, %143 : vector<16x576xf32>
    %c24_125 = arith.constant 24 : index
    %c0_126 = arith.constant 0 : index
    %c0_127 = arith.constant 0 : index
    %145 = vector.load %arg2[%c24_125, %c0_126, %c0_127] : memref<25x16x16xbf16, #tpu.memory_space<vmem>>, vector<1x16x16xbf16>
    %146 = vector.shape_cast %145 : vector<1x16x16xbf16> to vector<16x16xbf16>
    %c0_128 = arith.constant 0 : index
    %c0_129 = arith.constant 0 : index
    %c100 = arith.constant 100 : index
    %147 = vector.load %arg1[%c0_128, %c0_129, %c100] : memref<1x16x676xbf16, #tpu.memory_space<vmem>>, vector<1x16x576xbf16>
    %148 = vector.shape_cast %147 : vector<1x16x576xbf16> to vector<16x576xbf16>
    %cst_130 = arith.constant dense<0.000000e+00> : vector<16x576xf32>
    %149 = tpu.matmul %146, %148, %cst_130 {dimension_numbers = #tpu.dot_dimension_numbers<[1], [0], [0], [1], [0, 0, 1, 1], [], []>} : vector<16x16xbf16>, vector<16x576xbf16>, vector<16x576xf32> -> vector<16x576xf32>
    %150 = arith.addf %144, %149 : vector<16x576xf32>
    %c0_131 = arith.constant 0 : index
    %c0_132 = arith.constant 0 : index
    %151 = vector.load %arg3[%c0_131, %c0_132] : memref<16x1xf32, #tpu.memory_space<vmem>>, vector<16x1xf32>
    %152 = vector.broadcast %151 : vector<16x1xf32> to vector<16x576xf32>
    %153 = arith.addf %150, %152 : vector<16x576xf32>
    %cst_133 = arith.constant 0.000000e+00 : f32
    %154 = vector.broadcast %cst_133 : f32 to vector<16x576xf32>
    %155 = arith.maximumf %153, %154 : vector<16x576xf32>
    %c0_134 = arith.constant 0 : index
    %c0_135 = arith.constant 0 : index
    %156 = vector.load %arg6[%c0_134, %c0_135] : memref<1x576xf32, #tpu.memory_space<vmem>>, vector<1x576xf32>
    %157 = vector.broadcast %156 : vector<1x576xf32> to vector<16x576xf32>
    %158 = arith.mulf %155, %157 : vector<16x576xf32>
    %cst_136 = arith.constant 0.000000e+00 : bf16
    %159 = vector.broadcast %cst_136 : bf16 to vector<16x100xbf16>
    %c0_137 = arith.constant 0 : index
    %c576 = arith.constant 576 : index
    %160 = vector.load %arg12[%c0_137, %c576] : memref<16x676xbf16, #tpu.memory_space<vmem>>, vector<16x100xbf16>
    tpu.vector_store %arg12[%c0_137, %c576], %159 {strides = array<i32>} : memref<16x676xbf16, #tpu.memory_space<vmem>>, vector<16x100xbf16>,
    %161 = arith.truncf %158 : vector<16x576xf32> to vector<16x576xbf16>
    %c0_138 = arith.constant 0 : index
    %c0_139 = arith.constant 0 : index
    %162 = vector.load %arg12[%c0_138, %c0_139] : memref<16x676xbf16, #tpu.memory_space<vmem>>, vector<16x576xbf16>
    tpu.vector_store %arg12[%c0_138, %c0_139], %161 {strides = array<i32>} : memref<16x676xbf16, #tpu.memory_space<vmem>>, vector<16x576xbf16>,
    %cst_140 = arith.constant 0.000000e+00 : f32
    %163 = vector.broadcast %cst_140 : f32 to vector<16x576xf32>
    %c0_141 = arith.constant 0 : index
    %c0_142 = arith.constant 0 : index
    %c0_143 = arith.constant 0 : index
    %164 = vector.load %arg4[%c0_141, %c0_142, %c0_143] : memref<25x16x16xbf16, #tpu.memory_space<vmem>>, vector<1x16x16xbf16>
    %165 = vector.shape_cast %164 : vector<1x16x16xbf16> to vector<16x16xbf16>
    %c0_144 = arith.constant 0 : index
    %c0_145 = arith.constant 0 : index
    %166 = vector.load %arg12[%c0_144, %c0_145] : memref<16x676xbf16, #tpu.memory_space<vmem>>, vector<16x576xbf16>
    %cst_146 = arith.constant dense<0.000000e+00> : vector<16x576xf32>
    %167 = tpu.matmul %165, %166, %cst_146 {dimension_numbers = #tpu.dot_dimension_numbers<[1], [0], [0], [1], [0, 0, 1, 1], [], []>} : vector<16x16xbf16>, vector<16x576xbf16>, vector<16x576xf32> -> vector<16x576xf32>
    %168 = arith.addf %163, %167 : vector<16x576xf32>
    %c1_147 = arith.constant 1 : index
    %c0_148 = arith.constant 0 : index
    %c0_149 = arith.constant 0 : index
    %169 = vector.load %arg4[%c1_147, %c0_148, %c0_149] : memref<25x16x16xbf16, #tpu.memory_space<vmem>>, vector<1x16x16xbf16>
    %170 = vector.shape_cast %169 : vector<1x16x16xbf16> to vector<16x16xbf16>
    %c0_150 = arith.constant 0 : index
    %c1_151 = arith.constant 1 : index
    %171 = vector.load %arg12[%c0_150, %c1_151] : memref<16x676xbf16, #tpu.memory_space<vmem>>, vector<16x576xbf16>
    %cst_152 = arith.constant dense<0.000000e+00> : vector<16x576xf32>
    %172 = tpu.matmul %170, %171, %cst_152 {dimension_numbers = #tpu.dot_dimension_numbers<[1], [0], [0], [1], [0, 0, 1, 1], [], []>} : vector<16x16xbf16>, vector<16x576xbf16>, vector<16x576xf32> -> vector<16x576xf32>
    %173 = arith.addf %168, %172 : vector<16x576xf32>
    %c2_153 = arith.constant 2 : index
    %c0_154 = arith.constant 0 : index
    %c0_155 = arith.constant 0 : index
    %174 = vector.load %arg4[%c2_153, %c0_154, %c0_155] : memref<25x16x16xbf16, #tpu.memory_space<vmem>>, vector<1x16x16xbf16>
    %175 = vector.shape_cast %174 : vector<1x16x16xbf16> to vector<16x16xbf16>
    %c0_156 = arith.constant 0 : index
    %c2_157 = arith.constant 2 : index
    %176 = vector.load %arg12[%c0_156, %c2_157] : memref<16x676xbf16, #tpu.memory_space<vmem>>, vector<16x576xbf16>
    %cst_158 = arith.constant dense<0.000000e+00> : vector<16x576xf32>
    %177 = tpu.matmul %175, %176, %cst_158 {dimension_numbers = #tpu.dot_dimension_numbers<[1], [0], [0], [1], [0, 0, 1, 1], [], []>} : vector<16x16xbf16>, vector<16x576xbf16>, vector<16x576xf32> -> vector<16x576xf32>
    %178 = arith.addf %173, %177 : vector<16x576xf32>
    %c3_159 = arith.constant 3 : index
    %c0_160 = arith.constant 0 : index
    %c0_161 = arith.constant 0 : index
    %179 = vector.load %arg4[%c3_159, %c0_160, %c0_161] : memref<25x16x16xbf16, #tpu.memory_space<vmem>>, vector<1x16x16xbf16>
    %180 = vector.shape_cast %179 : vector<1x16x16xbf16> to vector<16x16xbf16>
    %c0_162 = arith.constant 0 : index
    %c3_163 = arith.constant 3 : index
    %181 = vector.load %arg12[%c0_162, %c3_163] : memref<16x676xbf16, #tpu.memory_space<vmem>>, vector<16x576xbf16>
    %cst_164 = arith.constant dense<0.000000e+00> : vector<16x576xf32>
    %182 = tpu.matmul %180, %181, %cst_164 {dimension_numbers = #tpu.dot_dimension_numbers<[1], [0], [0], [1], [0, 0, 1, 1], [], []>} : vector<16x16xbf16>, vector<16x576xbf16>, vector<16x576xf32> -> vector<16x576xf32>
    %183 = arith.addf %178, %182 : vector<16x576xf32>
    %c4_165 = arith.constant 4 : index
    %c0_166 = arith.constant 0 : index
    %c0_167 = arith.constant 0 : index
    %184 = vector.load %arg4[%c4_165, %c0_166, %c0_167] : memref<25x16x16xbf16, #tpu.memory_space<vmem>>, vector<1x16x16xbf16>
    %185 = vector.shape_cast %184 : vector<1x16x16xbf16> to vector<16x16xbf16>
    %c0_168 = arith.constant 0 : index
    %c4_169 = arith.constant 4 : index
    %186 = vector.load %arg12[%c0_168, %c4_169] : memref<16x676xbf16, #tpu.memory_space<vmem>>, vector<16x576xbf16>
    %cst_170 = arith.constant dense<0.000000e+00> : vector<16x576xf32>
    %187 = tpu.matmul %185, %186, %cst_170 {dimension_numbers = #tpu.dot_dimension_numbers<[1], [0], [0], [1], [0, 0, 1, 1], [], []>} : vector<16x16xbf16>, vector<16x576xbf16>, vector<16x576xf32> -> vector<16x576xf32>
    %188 = arith.addf %183, %187 : vector<16x576xf32>
    %c5_171 = arith.constant 5 : index
    %c0_172 = arith.constant 0 : index
    %c0_173 = arith.constant 0 : index
    %189 = vector.load %arg4[%c5_171, %c0_172, %c0_173] : memref<25x16x16xbf16, #tpu.memory_space<vmem>>, vector<1x16x16xbf16>
    %190 = vector.shape_cast %189 : vector<1x16x16xbf16> to vector<16x16xbf16>
    %c0_174 = arith.constant 0 : index
    %c24_175 = arith.constant 24 : index
    %191 = vector.load %arg12[%c0_174, %c24_175] : memref<16x676xbf16, #tpu.memory_space<vmem>>, vector<16x576xbf16>
    %cst_176 = arith.constant dense<0.000000e+00> : vector<16x576xf32>
    %192 = tpu.matmul %190, %191, %cst_176 {dimension_numbers = #tpu.dot_dimension_numbers<[1], [0], [0], [1], [0, 0, 1, 1], [], []>} : vector<16x16xbf16>, vector<16x576xbf16>, vector<16x576xf32> -> vector<16x576xf32>
    %193 = arith.addf %188, %192 : vector<16x576xf32>
    %c6_177 = arith.constant 6 : index
    %c0_178 = arith.constant 0 : index
    %c0_179 = arith.constant 0 : index
    %194 = vector.load %arg4[%c6_177, %c0_178, %c0_179] : memref<25x16x16xbf16, #tpu.memory_space<vmem>>, vector<1x16x16xbf16>
    %195 = vector.shape_cast %194 : vector<1x16x16xbf16> to vector<16x16xbf16>
    %c0_180 = arith.constant 0 : index
    %c25_181 = arith.constant 25 : index
    %196 = vector.load %arg12[%c0_180, %c25_181] : memref<16x676xbf16, #tpu.memory_space<vmem>>, vector<16x576xbf16>
    %cst_182 = arith.constant dense<0.000000e+00> : vector<16x576xf32>
    %197 = tpu.matmul %195, %196, %cst_182 {dimension_numbers = #tpu.dot_dimension_numbers<[1], [0], [0], [1], [0, 0, 1, 1], [], []>} : vector<16x16xbf16>, vector<16x576xbf16>, vector<16x576xf32> -> vector<16x576xf32>
    %198 = arith.addf %193, %197 : vector<16x576xf32>
    %c7_183 = arith.constant 7 : index
    %c0_184 = arith.constant 0 : index
    %c0_185 = arith.constant 0 : index
    %199 = vector.load %arg4[%c7_183, %c0_184, %c0_185] : memref<25x16x16xbf16, #tpu.memory_space<vmem>>, vector<1x16x16xbf16>
    %200 = vector.shape_cast %199 : vector<1x16x16xbf16> to vector<16x16xbf16>
    %c0_186 = arith.constant 0 : index
    %c26_187 = arith.constant 26 : index
    %201 = vector.load %arg12[%c0_186, %c26_187] : memref<16x676xbf16, #tpu.memory_space<vmem>>, vector<16x576xbf16>
    %cst_188 = arith.constant dense<0.000000e+00> : vector<16x576xf32>
    %202 = tpu.matmul %200, %201, %cst_188 {dimension_numbers = #tpu.dot_dimension_numbers<[1], [0], [0], [1], [0, 0, 1, 1], [], []>} : vector<16x16xbf16>, vector<16x576xbf16>, vector<16x576xf32> -> vector<16x576xf32>
    %203 = arith.addf %198, %202 : vector<16x576xf32>
    %c8_189 = arith.constant 8 : index
    %c0_190 = arith.constant 0 : index
    %c0_191 = arith.constant 0 : index
    %204 = vector.load %arg4[%c8_189, %c0_190, %c0_191] : memref<25x16x16xbf16, #tpu.memory_space<vmem>>, vector<1x16x16xbf16>
    %205 = vector.shape_cast %204 : vector<1x16x16xbf16> to vector<16x16xbf16>
    %c0_192 = arith.constant 0 : index
    %c27_193 = arith.constant 27 : index
    %206 = vector.load %arg12[%c0_192, %c27_193] : memref<16x676xbf16, #tpu.memory_space<vmem>>, vector<16x576xbf16>
    %cst_194 = arith.constant dense<0.000000e+00> : vector<16x576xf32>
    %207 = tpu.matmul %205, %206, %cst_194 {dimension_numbers = #tpu.dot_dimension_numbers<[1], [0], [0], [1], [0, 0, 1, 1], [], []>} : vector<16x16xbf16>, vector<16x576xbf16>, vector<16x576xf32> -> vector<16x576xf32>
    %208 = arith.addf %203, %207 : vector<16x576xf32>
    %c9_195 = arith.constant 9 : index
    %c0_196 = arith.constant 0 : index
    %c0_197 = arith.constant 0 : index
    %209 = vector.load %arg4[%c9_195, %c0_196, %c0_197] : memref<25x16x16xbf16, #tpu.memory_space<vmem>>, vector<1x16x16xbf16>
    %210 = vector.shape_cast %209 : vector<1x16x16xbf16> to vector<16x16xbf16>
    %c0_198 = arith.constant 0 : index
    %c28_199 = arith.constant 28 : index
    %211 = vector.load %arg12[%c0_198, %c28_199] : memref<16x676xbf16, #tpu.memory_space<vmem>>, vector<16x576xbf16>
    %cst_200 = arith.constant dense<0.000000e+00> : vector<16x576xf32>
    %212 = tpu.matmul %210, %211, %cst_200 {dimension_numbers = #tpu.dot_dimension_numbers<[1], [0], [0], [1], [0, 0, 1, 1], [], []>} : vector<16x16xbf16>, vector<16x576xbf16>, vector<16x576xf32> -> vector<16x576xf32>
    %213 = arith.addf %208, %212 : vector<16x576xf32>
    %c10_201 = arith.constant 10 : index
    %c0_202 = arith.constant 0 : index
    %c0_203 = arith.constant 0 : index
    %214 = vector.load %arg4[%c10_201, %c0_202, %c0_203] : memref<25x16x16xbf16, #tpu.memory_space<vmem>>, vector<1x16x16xbf16>
    %215 = vector.shape_cast %214 : vector<1x16x16xbf16> to vector<16x16xbf16>
    %c0_204 = arith.constant 0 : index
    %c48_205 = arith.constant 48 : index
    %216 = vector.load %arg12[%c0_204, %c48_205] : memref<16x676xbf16, #tpu.memory_space<vmem>>, vector<16x576xbf16>
    %cst_206 = arith.constant dense<0.000000e+00> : vector<16x576xf32>
    %217 = tpu.matmul %215, %216, %cst_206 {dimension_numbers = #tpu.dot_dimension_numbers<[1], [0], [0], [1], [0, 0, 1, 1], [], []>} : vector<16x16xbf16>, vector<16x576xbf16>, vector<16x576xf32> -> vector<16x576xf32>
    %218 = arith.addf %213, %217 : vector<16x576xf32>
    %c11_207 = arith.constant 11 : index
    %c0_208 = arith.constant 0 : index
    %c0_209 = arith.constant 0 : index
    %219 = vector.load %arg4[%c11_207, %c0_208, %c0_209] : memref<25x16x16xbf16, #tpu.memory_space<vmem>>, vector<1x16x16xbf16>
    %220 = vector.shape_cast %219 : vector<1x16x16xbf16> to vector<16x16xbf16>
    %c0_210 = arith.constant 0 : index
    %c49_211 = arith.constant 49 : index
    %221 = vector.load %arg12[%c0_210, %c49_211] : memref<16x676xbf16, #tpu.memory_space<vmem>>, vector<16x576xbf16>
    %cst_212 = arith.constant dense<0.000000e+00> : vector<16x576xf32>
    %222 = tpu.matmul %220, %221, %cst_212 {dimension_numbers = #tpu.dot_dimension_numbers<[1], [0], [0], [1], [0, 0, 1, 1], [], []>} : vector<16x16xbf16>, vector<16x576xbf16>, vector<16x576xf32> -> vector<16x576xf32>
    %223 = arith.addf %218, %222 : vector<16x576xf32>
    %c12_213 = arith.constant 12 : index
    %c0_214 = arith.constant 0 : index
    %c0_215 = arith.constant 0 : index
    %224 = vector.load %arg4[%c12_213, %c0_214, %c0_215] : memref<25x16x16xbf16, #tpu.memory_space<vmem>>, vector<1x16x16xbf16>
    %225 = vector.shape_cast %224 : vector<1x16x16xbf16> to vector<16x16xbf16>
    %c0_216 = arith.constant 0 : index
    %c50_217 = arith.constant 50 : index
    %226 = vector.load %arg12[%c0_216, %c50_217] : memref<16x676xbf16, #tpu.memory_space<vmem>>, vector<16x576xbf16>
    %cst_218 = arith.constant dense<0.000000e+00> : vector<16x576xf32>
    %227 = tpu.matmul %225, %226, %cst_218 {dimension_numbers = #tpu.dot_dimension_numbers<[1], [0], [0], [1], [0, 0, 1, 1], [], []>} : vector<16x16xbf16>, vector<16x576xbf16>, vector<16x576xf32> -> vector<16x576xf32>
    %228 = arith.addf %223, %227 : vector<16x576xf32>
    %c13_219 = arith.constant 13 : index
    %c0_220 = arith.constant 0 : index
    %c0_221 = arith.constant 0 : index
    %229 = vector.load %arg4[%c13_219, %c0_220, %c0_221] : memref<25x16x16xbf16, #tpu.memory_space<vmem>>, vector<1x16x16xbf16>
    %230 = vector.shape_cast %229 : vector<1x16x16xbf16> to vector<16x16xbf16>
    %c0_222 = arith.constant 0 : index
    %c51_223 = arith.constant 51 : index
    %231 = vector.load %arg12[%c0_222, %c51_223] : memref<16x676xbf16, #tpu.memory_space<vmem>>, vector<16x576xbf16>
    %cst_224 = arith.constant dense<0.000000e+00> : vector<16x576xf32>
    %232 = tpu.matmul %230, %231, %cst_224 {dimension_numbers = #tpu.dot_dimension_numbers<[1], [0], [0], [1], [0, 0, 1, 1], [], []>} : vector<16x16xbf16>, vector<16x576xbf16>, vector<16x576xf32> -> vector<16x576xf32>
    %233 = arith.addf %228, %232 : vector<16x576xf32>
    %c14_225 = arith.constant 14 : index
    %c0_226 = arith.constant 0 : index
    %c0_227 = arith.constant 0 : index
    %234 = vector.load %arg4[%c14_225, %c0_226, %c0_227] : memref<25x16x16xbf16, #tpu.memory_space<vmem>>, vector<1x16x16xbf16>
    %235 = vector.shape_cast %234 : vector<1x16x16xbf16> to vector<16x16xbf16>
    %c0_228 = arith.constant 0 : index
    %c52_229 = arith.constant 52 : index
    %236 = vector.load %arg12[%c0_228, %c52_229] : memref<16x676xbf16, #tpu.memory_space<vmem>>, vector<16x576xbf16>
    %cst_230 = arith.constant dense<0.000000e+00> : vector<16x576xf32>
    %237 = tpu.matmul %235, %236, %cst_230 {dimension_numbers = #tpu.dot_dimension_numbers<[1], [0], [0], [1], [0, 0, 1, 1], [], []>} : vector<16x16xbf16>, vector<16x576xbf16>, vector<16x576xf32> -> vector<16x576xf32>
    %238 = arith.addf %233, %237 : vector<16x576xf32>
    %c15_231 = arith.constant 15 : index
    %c0_232 = arith.constant 0 : index
    %c0_233 = arith.constant 0 : index
    %239 = vector.load %arg4[%c15_231, %c0_232, %c0_233] : memref<25x16x16xbf16, #tpu.memory_space<vmem>>, vector<1x16x16xbf16>
    %240 = vector.shape_cast %239 : vector<1x16x16xbf16> to vector<16x16xbf16>
    %c0_234 = arith.constant 0 : index
    %c72_235 = arith.constant 72 : index
    %241 = vector.load %arg12[%c0_234, %c72_235] : memref<16x676xbf16, #tpu.memory_space<vmem>>, vector<16x576xbf16>
    %cst_236 = arith.constant dense<0.000000e+00> : vector<16x576xf32>
    %242 = tpu.matmul %240, %241, %cst_236 {dimension_numbers = #tpu.dot_dimension_numbers<[1], [0], [0], [1], [0, 0, 1, 1], [], []>} : vector<16x16xbf16>, vector<16x576xbf16>, vector<16x576xf32> -> vector<16x576xf32>
    %243 = arith.addf %238, %242 : vector<16x576xf32>
    %c16_237 = arith.constant 16 : index
    %c0_238 = arith.constant 0 : index
    %c0_239 = arith.constant 0 : index
    %244 = vector.load %arg4[%c16_237, %c0_238, %c0_239] : memref<25x16x16xbf16, #tpu.memory_space<vmem>>, vector<1x16x16xbf16>
    %245 = vector.shape_cast %244 : vector<1x16x16xbf16> to vector<16x16xbf16>
    %c0_240 = arith.constant 0 : index
    %c73_241 = arith.constant 73 : index
    %246 = vector.load %arg12[%c0_240, %c73_241] : memref<16x676xbf16, #tpu.memory_space<vmem>>, vector<16x576xbf16>
    %cst_242 = arith.constant dense<0.000000e+00> : vector<16x576xf32>
    %247 = tpu.matmul %245, %246, %cst_242 {dimension_numbers = #tpu.dot_dimension_numbers<[1], [0], [0], [1], [0, 0, 1, 1], [], []>} : vector<16x16xbf16>, vector<16x576xbf16>, vector<16x576xf32> -> vector<16x576xf32>
    %248 = arith.addf %243, %247 : vector<16x576xf32>
    %c17_243 = arith.constant 17 : index
    %c0_244 = arith.constant 0 : index
    %c0_245 = arith.constant 0 : index
    %249 = vector.load %arg4[%c17_243, %c0_244, %c0_245] : memref<25x16x16xbf16, #tpu.memory_space<vmem>>, vector<1x16x16xbf16>
    %250 = vector.shape_cast %249 : vector<1x16x16xbf16> to vector<16x16xbf16>
    %c0_246 = arith.constant 0 : index
    %c74_247 = arith.constant 74 : index
    %251 = vector.load %arg12[%c0_246, %c74_247] : memref<16x676xbf16, #tpu.memory_space<vmem>>, vector<16x576xbf16>
    %cst_248 = arith.constant dense<0.000000e+00> : vector<16x576xf32>
    %252 = tpu.matmul %250, %251, %cst_248 {dimension_numbers = #tpu.dot_dimension_numbers<[1], [0], [0], [1], [0, 0, 1, 1], [], []>} : vector<16x16xbf16>, vector<16x576xbf16>, vector<16x576xf32> -> vector<16x576xf32>
    %253 = arith.addf %248, %252 : vector<16x576xf32>
    %c18_249 = arith.constant 18 : index
    %c0_250 = arith.constant 0 : index
    %c0_251 = arith.constant 0 : index
    %254 = vector.load %arg4[%c18_249, %c0_250, %c0_251] : memref<25x16x16xbf16, #tpu.memory_space<vmem>>, vector<1x16x16xbf16>
    %255 = vector.shape_cast %254 : vector<1x16x16xbf16> to vector<16x16xbf16>
    %c0_252 = arith.constant 0 : index
    %c75_253 = arith.constant 75 : index
    %256 = vector.load %arg12[%c0_252, %c75_253] : memref<16x676xbf16, #tpu.memory_space<vmem>>, vector<16x576xbf16>
    %cst_254 = arith.constant dense<0.000000e+00> : vector<16x576xf32>
    %257 = tpu.matmul %255, %256, %cst_254 {dimension_numbers = #tpu.dot_dimension_numbers<[1], [0], [0], [1], [0, 0, 1, 1], [], []>} : vector<16x16xbf16>, vector<16x576xbf16>, vector<16x576xf32> -> vector<16x576xf32>
    %258 = arith.addf %253, %257 : vector<16x576xf32>
    %c19_255 = arith.constant 19 : index
    %c0_256 = arith.constant 0 : index
    %c0_257 = arith.constant 0 : index
    %259 = vector.load %arg4[%c19_255, %c0_256, %c0_257] : memref<25x16x16xbf16, #tpu.memory_space<vmem>>, vector<1x16x16xbf16>
    %260 = vector.shape_cast %259 : vector<1x16x16xbf16> to vector<16x16xbf16>
    %c0_258 = arith.constant 0 : index
    %c76_259 = arith.constant 76 : index
    %261 = vector.load %arg12[%c0_258, %c76_259] : memref<16x676xbf16, #tpu.memory_space<vmem>>, vector<16x576xbf16>
    %cst_260 = arith.constant dense<0.000000e+00> : vector<16x576xf32>
    %262 = tpu.matmul %260, %261, %cst_260 {dimension_numbers = #tpu.dot_dimension_numbers<[1], [0], [0], [1], [0, 0, 1, 1], [], []>} : vector<16x16xbf16>, vector<16x576xbf16>, vector<16x576xf32> -> vector<16x576xf32>
    %263 = arith.addf %258, %262 : vector<16x576xf32>
    %c20_261 = arith.constant 20 : index
    %c0_262 = arith.constant 0 : index
    %c0_263 = arith.constant 0 : index
    %264 = vector.load %arg4[%c20_261, %c0_262, %c0_263] : memref<25x16x16xbf16, #tpu.memory_space<vmem>>, vector<1x16x16xbf16>
    %265 = vector.shape_cast %264 : vector<1x16x16xbf16> to vector<16x16xbf16>
    %c0_264 = arith.constant 0 : index
    %c96_265 = arith.constant 96 : index
    %266 = vector.load %arg12[%c0_264, %c96_265] : memref<16x676xbf16, #tpu.memory_space<vmem>>, vector<16x576xbf16>
    %cst_266 = arith.constant dense<0.000000e+00> : vector<16x576xf32>
    %267 = tpu.matmul %265, %266, %cst_266 {dimension_numbers = #tpu.dot_dimension_numbers<[1], [0], [0], [1], [0, 0, 1, 1], [], []>} : vector<16x16xbf16>, vector<16x576xbf16>, vector<16x576xf32> -> vector<16x576xf32>
    %268 = arith.addf %263, %267 : vector<16x576xf32>
    %c21_267 = arith.constant 21 : index
    %c0_268 = arith.constant 0 : index
    %c0_269 = arith.constant 0 : index
    %269 = vector.load %arg4[%c21_267, %c0_268, %c0_269] : memref<25x16x16xbf16, #tpu.memory_space<vmem>>, vector<1x16x16xbf16>
    %270 = vector.shape_cast %269 : vector<1x16x16xbf16> to vector<16x16xbf16>
    %c0_270 = arith.constant 0 : index
    %c97_271 = arith.constant 97 : index
    %271 = vector.load %arg12[%c0_270, %c97_271] : memref<16x676xbf16, #tpu.memory_space<vmem>>, vector<16x576xbf16>
    %cst_272 = arith.constant dense<0.000000e+00> : vector<16x576xf32>
    %272 = tpu.matmul %270, %271, %cst_272 {dimension_numbers = #tpu.dot_dimension_numbers<[1], [0], [0], [1], [0, 0, 1, 1], [], []>} : vector<16x16xbf16>, vector<16x576xbf16>, vector<16x576xf32> -> vector<16x576xf32>
    %273 = arith.addf %268, %272 : vector<16x576xf32>
    %c22_273 = arith.constant 22 : index
    %c0_274 = arith.constant 0 : index
    %c0_275 = arith.constant 0 : index
    %274 = vector.load %arg4[%c22_273, %c0_274, %c0_275] : memref<25x16x16xbf16, #tpu.memory_space<vmem>>, vector<1x16x16xbf16>
    %275 = vector.shape_cast %274 : vector<1x16x16xbf16> to vector<16x16xbf16>
    %c0_276 = arith.constant 0 : index
    %c98_277 = arith.constant 98 : index
    %276 = vector.load %arg12[%c0_276, %c98_277] : memref<16x676xbf16, #tpu.memory_space<vmem>>, vector<16x576xbf16>
    %cst_278 = arith.constant dense<0.000000e+00> : vector<16x576xf32>
    %277 = tpu.matmul %275, %276, %cst_278 {dimension_numbers = #tpu.dot_dimension_numbers<[1], [0], [0], [1], [0, 0, 1, 1], [], []>} : vector<16x16xbf16>, vector<16x576xbf16>, vector<16x576xf32> -> vector<16x576xf32>
    %278 = arith.addf %273, %277 : vector<16x576xf32>
    %c23_279 = arith.constant 23 : index
    %c0_280 = arith.constant 0 : index
    %c0_281 = arith.constant 0 : index
    %279 = vector.load %arg4[%c23_279, %c0_280, %c0_281] : memref<25x16x16xbf16, #tpu.memory_space<vmem>>, vector<1x16x16xbf16>
    %280 = vector.shape_cast %279 : vector<1x16x16xbf16> to vector<16x16xbf16>
    %c0_282 = arith.constant 0 : index
    %c99_283 = arith.constant 99 : index
    %281 = vector.load %arg12[%c0_282, %c99_283] : memref<16x676xbf16, #tpu.memory_space<vmem>>, vector<16x576xbf16>
    %cst_284 = arith.constant dense<0.000000e+00> : vector<16x576xf32>
    %282 = tpu.matmul %280, %281, %cst_284 {dimension_numbers = #tpu.dot_dimension_numbers<[1], [0], [0], [1], [0, 0, 1, 1], [], []>} : vector<16x16xbf16>, vector<16x576xbf16>, vector<16x576xf32> -> vector<16x576xf32>
    %283 = arith.addf %278, %282 : vector<16x576xf32>
    %c24_285 = arith.constant 24 : index
    %c0_286 = arith.constant 0 : index
    %c0_287 = arith.constant 0 : index
    %284 = vector.load %arg4[%c24_285, %c0_286, %c0_287] : memref<25x16x16xbf16, #tpu.memory_space<vmem>>, vector<1x16x16xbf16>
    %285 = vector.shape_cast %284 : vector<1x16x16xbf16> to vector<16x16xbf16>
    %c0_288 = arith.constant 0 : index
    %c100_289 = arith.constant 100 : index
    %286 = vector.load %arg12[%c0_288, %c100_289] : memref<16x676xbf16, #tpu.memory_space<vmem>>, vector<16x576xbf16>
    %cst_290 = arith.constant dense<0.000000e+00> : vector<16x576xf32>
    %287 = tpu.matmul %285, %286, %cst_290 {dimension_numbers = #tpu.dot_dimension_numbers<[1], [0], [0], [1], [0, 0, 1, 1], [], []>} : vector<16x16xbf16>, vector<16x576xbf16>, vector<16x576xf32> -> vector<16x576xf32>
    %288 = arith.addf %283, %287 : vector<16x576xf32>
    %c0_291 = arith.constant 0 : index
    %c0_292 = arith.constant 0 : index
    %289 = vector.load %arg5[%c0_291, %c0_292] : memref<16x1xf32, #tpu.memory_space<vmem>>, vector<16x1xf32>
    %290 = vector.broadcast %289 : vector<16x1xf32> to vector<16x576xf32>
    %291 = arith.addf %288, %290 : vector<16x576xf32>
    %cst_293 = arith.constant 0.000000e+00 : f32
    %292 = vector.broadcast %cst_293 : f32 to vector<16x576xf32>
    %293 = arith.maximumf %291, %292 : vector<16x576xf32>
    %cst_294 = arith.constant 0.000000e+00 : f32
    %294 = vector.broadcast %cst_294 : f32 to vector<1x32xf32>
    %295 = vector.extract_strided_slice %293 {offsets = [0, 0], sizes = [1, 576], strides = [1, 1]} : vector<16x576xf32> to vector<1x576xf32>
    %296 = arith.truncf %295 : vector<1x576xf32> to vector<1x576xbf16>
    %c0_295 = arith.constant 0 : index
    %c0_296 = arith.constant 0 : index
    %c0_297 = arith.constant 0 : index
    %297 = vector.load %arg7[%c0_295, %c0_296, %c0_297] : memref<16x576x32xbf16, #tpu.memory_space<vmem>>, vector<1x576x32xbf16>
    %298 = vector.shape_cast %297 : vector<1x576x32xbf16> to vector<576x32xbf16>
    %cst_298 = arith.constant dense<0.000000e+00> : vector<1x32xf32>
    %299 = tpu.matmul %296, %298, %cst_298 {dimension_numbers = #tpu.dot_dimension_numbers<[1], [0], [0], [1], [0, 0, 1, 1], [], []>} : vector<1x576xbf16>, vector<576x32xbf16>, vector<1x32xf32> -> vector<1x32xf32>
    %300 = arith.addf %294, %299 : vector<1x32xf32>
    %301 = vector.extract_strided_slice %293 {offsets = [1, 0], sizes = [1, 576], strides = [1, 1]} : vector<16x576xf32> to vector<1x576xf32>
    %302 = arith.truncf %301 : vector<1x576xf32> to vector<1x576xbf16>
    %c1_299 = arith.constant 1 : index
    %c0_300 = arith.constant 0 : index
    %c0_301 = arith.constant 0 : index
    %303 = vector.load %arg7[%c1_299, %c0_300, %c0_301] : memref<16x576x32xbf16, #tpu.memory_space<vmem>>, vector<1x576x32xbf16>
    %304 = vector.shape_cast %303 : vector<1x576x32xbf16> to vector<576x32xbf16>
    %cst_302 = arith.constant dense<0.000000e+00> : vector<1x32xf32>
    %305 = tpu.matmul %302, %304, %cst_302 {dimension_numbers = #tpu.dot_dimension_numbers<[1], [0], [0], [1], [0, 0, 1, 1], [], []>} : vector<1x576xbf16>, vector<576x32xbf16>, vector<1x32xf32> -> vector<1x32xf32>
    %306 = arith.addf %300, %305 : vector<1x32xf32>
    %307 = vector.extract_strided_slice %293 {offsets = [2, 0], sizes = [1, 576], strides = [1, 1]} : vector<16x576xf32> to vector<1x576xf32>
    %308 = arith.truncf %307 : vector<1x576xf32> to vector<1x576xbf16>
    %c2_303 = arith.constant 2 : index
    %c0_304 = arith.constant 0 : index
    %c0_305 = arith.constant 0 : index
    %309 = vector.load %arg7[%c2_303, %c0_304, %c0_305] : memref<16x576x32xbf16, #tpu.memory_space<vmem>>, vector<1x576x32xbf16>
    %310 = vector.shape_cast %309 : vector<1x576x32xbf16> to vector<576x32xbf16>
    %cst_306 = arith.constant dense<0.000000e+00> : vector<1x32xf32>
    %311 = tpu.matmul %308, %310, %cst_306 {dimension_numbers = #tpu.dot_dimension_numbers<[1], [0], [0], [1], [0, 0, 1, 1], [], []>} : vector<1x576xbf16>, vector<576x32xbf16>, vector<1x32xf32> -> vector<1x32xf32>
    %312 = arith.addf %306, %311 : vector<1x32xf32>
    %313 = vector.extract_strided_slice %293 {offsets = [3, 0], sizes = [1, 576], strides = [1, 1]} : vector<16x576xf32> to vector<1x576xf32>
    %314 = arith.truncf %313 : vector<1x576xf32> to vector<1x576xbf16>
    %c3_307 = arith.constant 3 : index
    %c0_308 = arith.constant 0 : index
    %c0_309 = arith.constant 0 : index
    %315 = vector.load %arg7[%c3_307, %c0_308, %c0_309] : memref<16x576x32xbf16, #tpu.memory_space<vmem>>, vector<1x576x32xbf16>
    %316 = vector.shape_cast %315 : vector<1x576x32xbf16> to vector<576x32xbf16>
    %cst_310 = arith.constant dense<0.000000e+00> : vector<1x32xf32>
    %317 = tpu.matmul %314, %316, %cst_310 {dimension_numbers = #tpu.dot_dimension_numbers<[1], [0], [0], [1], [0, 0, 1, 1], [], []>} : vector<1x576xbf16>, vector<576x32xbf16>, vector<1x32xf32> -> vector<1x32xf32>
    %318 = arith.addf %312, %317 : vector<1x32xf32>
    %319 = vector.extract_strided_slice %293 {offsets = [4, 0], sizes = [1, 576], strides = [1, 1]} : vector<16x576xf32> to vector<1x576xf32>
    %320 = arith.truncf %319 : vector<1x576xf32> to vector<1x576xbf16>
    %c4_311 = arith.constant 4 : index
    %c0_312 = arith.constant 0 : index
    %c0_313 = arith.constant 0 : index
    %321 = vector.load %arg7[%c4_311, %c0_312, %c0_313] : memref<16x576x32xbf16, #tpu.memory_space<vmem>>, vector<1x576x32xbf16>
    %322 = vector.shape_cast %321 : vector<1x576x32xbf16> to vector<576x32xbf16>
    %cst_314 = arith.constant dense<0.000000e+00> : vector<1x32xf32>
    %323 = tpu.matmul %320, %322, %cst_314 {dimension_numbers = #tpu.dot_dimension_numbers<[1], [0], [0], [1], [0, 0, 1, 1], [], []>} : vector<1x576xbf16>, vector<576x32xbf16>, vector<1x32xf32> -> vector<1x32xf32>
    %324 = arith.addf %318, %323 : vector<1x32xf32>
    %325 = vector.extract_strided_slice %293 {offsets = [5, 0], sizes = [1, 576], strides = [1, 1]} : vector<16x576xf32> to vector<1x576xf32>
    %326 = arith.truncf %325 : vector<1x576xf32> to vector<1x576xbf16>
    %c5_315 = arith.constant 5 : index
    %c0_316 = arith.constant 0 : index
    %c0_317 = arith.constant 0 : index
    %327 = vector.load %arg7[%c5_315, %c0_316, %c0_317] : memref<16x576x32xbf16, #tpu.memory_space<vmem>>, vector<1x576x32xbf16>
    %328 = vector.shape_cast %327 : vector<1x576x32xbf16> to vector<576x32xbf16>
    %cst_318 = arith.constant dense<0.000000e+00> : vector<1x32xf32>
    %329 = tpu.matmul %326, %328, %cst_318 {dimension_numbers = #tpu.dot_dimension_numbers<[1], [0], [0], [1], [0, 0, 1, 1], [], []>} : vector<1x576xbf16>, vector<576x32xbf16>, vector<1x32xf32> -> vector<1x32xf32>
    %330 = arith.addf %324, %329 : vector<1x32xf32>
    %331 = vector.extract_strided_slice %293 {offsets = [6, 0], sizes = [1, 576], strides = [1, 1]} : vector<16x576xf32> to vector<1x576xf32>
    %332 = arith.truncf %331 : vector<1x576xf32> to vector<1x576xbf16>
    %c6_319 = arith.constant 6 : index
    %c0_320 = arith.constant 0 : index
    %c0_321 = arith.constant 0 : index
    %333 = vector.load %arg7[%c6_319, %c0_320, %c0_321] : memref<16x576x32xbf16, #tpu.memory_space<vmem>>, vector<1x576x32xbf16>
    %334 = vector.shape_cast %333 : vector<1x576x32xbf16> to vector<576x32xbf16>
    %cst_322 = arith.constant dense<0.000000e+00> : vector<1x32xf32>
    %335 = tpu.matmul %332, %334, %cst_322 {dimension_numbers = #tpu.dot_dimension_numbers<[1], [0], [0], [1], [0, 0, 1, 1], [], []>} : vector<1x576xbf16>, vector<576x32xbf16>, vector<1x32xf32> -> vector<1x32xf32>
    %336 = arith.addf %330, %335 : vector<1x32xf32>
    %337 = vector.extract_strided_slice %293 {offsets = [7, 0], sizes = [1, 576], strides = [1, 1]} : vector<16x576xf32> to vector<1x576xf32>
    %338 = arith.truncf %337 : vector<1x576xf32> to vector<1x576xbf16>
    %c7_323 = arith.constant 7 : index
    %c0_324 = arith.constant 0 : index
    %c0_325 = arith.constant 0 : index
    %339 = vector.load %arg7[%c7_323, %c0_324, %c0_325] : memref<16x576x32xbf16, #tpu.memory_space<vmem>>, vector<1x576x32xbf16>
    %340 = vector.shape_cast %339 : vector<1x576x32xbf16> to vector<576x32xbf16>
    %cst_326 = arith.constant dense<0.000000e+00> : vector<1x32xf32>
    %341 = tpu.matmul %338, %340, %cst_326 {dimension_numbers = #tpu.dot_dimension_numbers<[1], [0], [0], [1], [0, 0, 1, 1], [], []>} : vector<1x576xbf16>, vector<576x32xbf16>, vector<1x32xf32> -> vector<1x32xf32>
    %342 = arith.addf %336, %341 : vector<1x32xf32>
    %343 = vector.extract_strided_slice %293 {offsets = [8, 0], sizes = [1, 576], strides = [1, 1]} : vector<16x576xf32> to vector<1x576xf32>
    %344 = arith.truncf %343 : vector<1x576xf32> to vector<1x576xbf16>
    %c8_327 = arith.constant 8 : index
    %c0_328 = arith.constant 0 : index
    %c0_329 = arith.constant 0 : index
    %345 = vector.load %arg7[%c8_327, %c0_328, %c0_329] : memref<16x576x32xbf16, #tpu.memory_space<vmem>>, vector<1x576x32xbf16>
    %346 = vector.shape_cast %345 : vector<1x576x32xbf16> to vector<576x32xbf16>
    %cst_330 = arith.constant dense<0.000000e+00> : vector<1x32xf32>
    %347 = tpu.matmul %344, %346, %cst_330 {dimension_numbers = #tpu.dot_dimension_numbers<[1], [0], [0], [1], [0, 0, 1, 1], [], []>} : vector<1x576xbf16>, vector<576x32xbf16>, vector<1x32xf32> -> vector<1x32xf32>
    %348 = arith.addf %342, %347 : vector<1x32xf32>
    %349 = vector.extract_strided_slice %293 {offsets = [9, 0], sizes = [1, 576], strides = [1, 1]} : vector<16x576xf32> to vector<1x576xf32>
    %350 = arith.truncf %349 : vector<1x576xf32> to vector<1x576xbf16>
    %c9_331 = arith.constant 9 : index
    %c0_332 = arith.constant 0 : index
    %c0_333 = arith.constant 0 : index
    %351 = vector.load %arg7[%c9_331, %c0_332, %c0_333] : memref<16x576x32xbf16, #tpu.memory_space<vmem>>, vector<1x576x32xbf16>
    %352 = vector.shape_cast %351 : vector<1x576x32xbf16> to vector<576x32xbf16>
    %cst_334 = arith.constant dense<0.000000e+00> : vector<1x32xf32>
    %353 = tpu.matmul %350, %352, %cst_334 {dimension_numbers = #tpu.dot_dimension_numbers<[1], [0], [0], [1], [0, 0, 1, 1], [], []>} : vector<1x576xbf16>, vector<576x32xbf16>, vector<1x32xf32> -> vector<1x32xf32>
    %354 = arith.addf %348, %353 : vector<1x32xf32>
    %355 = vector.extract_strided_slice %293 {offsets = [10, 0], sizes = [1, 576], strides = [1, 1]} : vector<16x576xf32> to vector<1x576xf32>
    %356 = arith.truncf %355 : vector<1x576xf32> to vector<1x576xbf16>
    %c10_335 = arith.constant 10 : index
    %c0_336 = arith.constant 0 : index
    %c0_337 = arith.constant 0 : index
    %357 = vector.load %arg7[%c10_335, %c0_336, %c0_337] : memref<16x576x32xbf16, #tpu.memory_space<vmem>>, vector<1x576x32xbf16>
    %358 = vector.shape_cast %357 : vector<1x576x32xbf16> to vector<576x32xbf16>
    %cst_338 = arith.constant dense<0.000000e+00> : vector<1x32xf32>
    %359 = tpu.matmul %356, %358, %cst_338 {dimension_numbers = #tpu.dot_dimension_numbers<[1], [0], [0], [1], [0, 0, 1, 1], [], []>} : vector<1x576xbf16>, vector<576x32xbf16>, vector<1x32xf32> -> vector<1x32xf32>
    %360 = arith.addf %354, %359 : vector<1x32xf32>
    %361 = vector.extract_strided_slice %293 {offsets = [11, 0], sizes = [1, 576], strides = [1, 1]} : vector<16x576xf32> to vector<1x576xf32>
    %362 = arith.truncf %361 : vector<1x576xf32> to vector<1x576xbf16>
    %c11_339 = arith.constant 11 : index
    %c0_340 = arith.constant 0 : index
    %c0_341 = arith.constant 0 : index
    %363 = vector.load %arg7[%c11_339, %c0_340, %c0_341] : memref<16x576x32xbf16, #tpu.memory_space<vmem>>, vector<1x576x32xbf16>
    %364 = vector.shape_cast %363 : vector<1x576x32xbf16> to vector<576x32xbf16>
    %cst_342 = arith.constant dense<0.000000e+00> : vector<1x32xf32>
    %365 = tpu.matmul %362, %364, %cst_342 {dimension_numbers = #tpu.dot_dimension_numbers<[1], [0], [0], [1], [0, 0, 1, 1], [], []>} : vector<1x576xbf16>, vector<576x32xbf16>, vector<1x32xf32> -> vector<1x32xf32>
    %366 = arith.addf %360, %365 : vector<1x32xf32>
    %367 = vector.extract_strided_slice %293 {offsets = [12, 0], sizes = [1, 576], strides = [1, 1]} : vector<16x576xf32> to vector<1x576xf32>
    %368 = arith.truncf %367 : vector<1x576xf32> to vector<1x576xbf16>
    %c12_343 = arith.constant 12 : index
    %c0_344 = arith.constant 0 : index
    %c0_345 = arith.constant 0 : index
    %369 = vector.load %arg7[%c12_343, %c0_344, %c0_345] : memref<16x576x32xbf16, #tpu.memory_space<vmem>>, vector<1x576x32xbf16>
    %370 = vector.shape_cast %369 : vector<1x576x32xbf16> to vector<576x32xbf16>
    %cst_346 = arith.constant dense<0.000000e+00> : vector<1x32xf32>
    %371 = tpu.matmul %368, %370, %cst_346 {dimension_numbers = #tpu.dot_dimension_numbers<[1], [0], [0], [1], [0, 0, 1, 1], [], []>} : vector<1x576xbf16>, vector<576x32xbf16>, vector<1x32xf32> -> vector<1x32xf32>
    %372 = arith.addf %366, %371 : vector<1x32xf32>
    %373 = vector.extract_strided_slice %293 {offsets = [13, 0], sizes = [1, 576], strides = [1, 1]} : vector<16x576xf32> to vector<1x576xf32>
    %374 = arith.truncf %373 : vector<1x576xf32> to vector<1x576xbf16>
    %c13_347 = arith.constant 13 : index
    %c0_348 = arith.constant 0 : index
    %c0_349 = arith.constant 0 : index
    %375 = vector.load %arg7[%c13_347, %c0_348, %c0_349] : memref<16x576x32xbf16, #tpu.memory_space<vmem>>, vector<1x576x32xbf16>
    %376 = vector.shape_cast %375 : vector<1x576x32xbf16> to vector<576x32xbf16>
    %cst_350 = arith.constant dense<0.000000e+00> : vector<1x32xf32>
    %377 = tpu.matmul %374, %376, %cst_350 {dimension_numbers = #tpu.dot_dimension_numbers<[1], [0], [0], [1], [0, 0, 1, 1], [], []>} : vector<1x576xbf16>, vector<576x32xbf16>, vector<1x32xf32> -> vector<1x32xf32>
    %378 = arith.addf %372, %377 : vector<1x32xf32>
    %379 = vector.extract_strided_slice %293 {offsets = [14, 0], sizes = [1, 576], strides = [1, 1]} : vector<16x576xf32> to vector<1x576xf32>
    %380 = arith.truncf %379 : vector<1x576xf32> to vector<1x576xbf16>
    %c14_351 = arith.constant 14 : index
    %c0_352 = arith.constant 0 : index
    %c0_353 = arith.constant 0 : index
    %381 = vector.load %arg7[%c14_351, %c0_352, %c0_353] : memref<16x576x32xbf16, #tpu.memory_space<vmem>>, vector<1x576x32xbf16>
    %382 = vector.shape_cast %381 : vector<1x576x32xbf16> to vector<576x32xbf16>
    %cst_354 = arith.constant dense<0.000000e+00> : vector<1x32xf32>
    %383 = tpu.matmul %380, %382, %cst_354 {dimension_numbers = #tpu.dot_dimension_numbers<[1], [0], [0], [1], [0, 0, 1, 1], [], []>} : vector<1x576xbf16>, vector<576x32xbf16>, vector<1x32xf32> -> vector<1x32xf32>
    %384 = arith.addf %378, %383 : vector<1x32xf32>
    %385 = vector.extract_strided_slice %293 {offsets = [15, 0], sizes = [1, 576], strides = [1, 1]} : vector<16x576xf32> to vector<1x576xf32>
    %386 = arith.truncf %385 : vector<1x576xf32> to vector<1x576xbf16>
    %c15_355 = arith.constant 15 : index
    %c0_356 = arith.constant 0 : index
    %c0_357 = arith.constant 0 : index
    %387 = vector.load %arg7[%c15_355, %c0_356, %c0_357] : memref<16x576x32xbf16, #tpu.memory_space<vmem>>, vector<1x576x32xbf16>
    %388 = vector.shape_cast %387 : vector<1x576x32xbf16> to vector<576x32xbf16>
    %cst_358 = arith.constant dense<0.000000e+00> : vector<1x32xf32>
    %389 = tpu.matmul %386, %388, %cst_358 {dimension_numbers = #tpu.dot_dimension_numbers<[1], [0], [0], [1], [0, 0, 1, 1], [], []>} : vector<1x576xbf16>, vector<576x32xbf16>, vector<1x32xf32> -> vector<1x32xf32>
    %390 = arith.addf %384, %389 : vector<1x32xf32>
    %c0_359 = arith.constant 0 : index
    %c0_360 = arith.constant 0 : index
    %391 = vector.load %arg8[%c0_359, %c0_360] : memref<1x32xf32, #tpu.memory_space<vmem>>, vector<1x32xf32>
    %392 = arith.addf %390, %391 : vector<1x32xf32>
    %cst_361 = arith.constant 0.000000e+00 : f32
    %393 = vector.broadcast %cst_361 : f32 to vector<1x32xf32>
    %394 = arith.maximumf %392, %393 : vector<1x32xf32>
    %c0_362 = arith.constant 0 : index
    %c0_363 = arith.constant 0 : index
    %395 = vector.load %arg9[%c0_362, %c0_363] : memref<32x5xf32, #tpu.memory_space<vmem>>, vector<32x5xf32>
    %cst_364 = arith.constant dense<0.000000e+00> : vector<1x5xf32>
    %396 = tpu.matmul %394, %395, %cst_364 {dimension_numbers = #tpu.dot_dimension_numbers<[1], [0], [0], [1], [0, 0, 1, 1], [], []>} : vector<1x32xf32>, vector<32x5xf32>, vector<1x5xf32> -> vector<1x5xf32>
    %c0_365 = arith.constant 0 : index
    %c0_366 = arith.constant 0 : index
    %397 = vector.load %arg10[%c0_365, %c0_366] : memref<1x5xf32, #tpu.memory_space<vmem>>, vector<1x5xf32>
    %398 = arith.addf %396, %397 : vector<1x5xf32>
    %399 = vector.extract_strided_slice %398 {offsets = [0, 0], sizes = [1, 4], strides = [1, 1]} : vector<1x5xf32> to vector<1x4xf32>
    %400 = vector.extract_strided_slice %398 {offsets = [0, 4], sizes = [1, 1], strides = [1, 1]} : vector<1x5xf32> to vector<1x1xf32>
    %401 = vector.broadcast %400 : vector<1x1xf32> to vector<1x4xf32>
    %402 = arith.addf %401, %399 : vector<1x4xf32>
    %cst_367 = arith.constant dense<0.000000e+00> : vector<1xf32>
    %403 = vector.multi_reduction <add>, %399, %cst_367 [1] : vector<1x4xf32> to vector<1xf32>
    %404 = vector.shape_cast %403 : vector<1xf32> to vector<1x1xf32>
    %cst_368 = arith.constant 4.000000e+00 : f32
    %405 = vector.broadcast %cst_368 : f32 to vector<1x1xf32>
    %406 = arith.divf %404, %405 : vector<1x1xf32>
    %407 = vector.broadcast %406 : vector<1x1xf32> to vector<1x4xf32>
    %408 = arith.subf %402, %407 : vector<1x4xf32>
    %c0_369 = arith.constant 0 : index
    %c0_370 = arith.constant 0 : index
    %c0_371 = arith.constant 0 : index
    %409 = vector.load %arg11[%c0_369, %c0_370, %c0_371] : memref<1x1x4xf32, #tpu.memory_space<vmem>>, vector<1x1x4xf32>
    %410 = vector.shape_cast %409 : vector<1x1x4xf32> to vector<1x4xf32>
    %411 = vector.shape_cast %408 : vector<1x4xf32> to vector<1x1x4xf32>
    tpu.vector_store %arg11[%c0_369, %c0_370, %c0_371], %411 {strides = array<i32>} : memref<1x1x4xf32, #tpu.memory_space<vmem>>, vector<1x1x4xf32>,
    return
  }
  func.func @transform_0(%arg0: i32) -> (i32, i32, i32) {
    %c0_i32 = arith.constant 0 : i32
    %c0_i32_0 = arith.constant 0 : i32
    %c0_i32_1 = arith.constant 0 : i32
    return %arg0, %c0_i32, %c0_i32_0 : i32, i32, i32
  }
  func.func @transform_1(%arg0: i32) -> (i32, i32, i32) {
    %c0_i32 = arith.constant 0 : i32
    %c0_i32_0 = arith.constant 0 : i32
    %c0_i32_1 = arith.constant 0 : i32
    %c0_i32_2 = arith.constant 0 : i32
    return %c0_i32, %c0_i32_0, %c0_i32_1 : i32, i32, i32
  }
  func.func @transform_2(%arg0: i32) -> (i32, i32) {
    %c0_i32 = arith.constant 0 : i32
    %c0_i32_0 = arith.constant 0 : i32
    %c0_i32_1 = arith.constant 0 : i32
    return %c0_i32, %c0_i32_0 : i32, i32
  }
  func.func @transform_3(%arg0: i32) -> (i32, i32, i32) {
    %c0_i32 = arith.constant 0 : i32
    %c0_i32_0 = arith.constant 0 : i32
    %c0_i32_1 = arith.constant 0 : i32
    %c0_i32_2 = arith.constant 0 : i32
    return %c0_i32, %c0_i32_0, %c0_i32_1 : i32, i32, i32
  }
  func.func @transform_4(%arg0: i32) -> (i32, i32) {
    %c0_i32 = arith.constant 0 : i32
    %c0_i32_0 = arith.constant 0 : i32
    %c0_i32_1 = arith.constant 0 : i32
    return %c0_i32, %c0_i32_0 : i32, i32
  }
  func.func @transform_5(%arg0: i32) -> (i32, i32) {
    %c0_i32 = arith.constant 0 : i32
    %c0_i32_0 = arith.constant 0 : i32
    %c0_i32_1 = arith.constant 0 : i32
    return %c0_i32, %c0_i32_0 : i32, i32
  }
  func.func @transform_6(%arg0: i32) -> (i32, i32, i32) {
    %c0_i32 = arith.constant 0 : i32
    %c0_i32_0 = arith.constant 0 : i32
    %c0_i32_1 = arith.constant 0 : i32
    %c0_i32_2 = arith.constant 0 : i32
    return %c0_i32, %c0_i32_0, %c0_i32_1 : i32, i32, i32
  }
  func.func @transform_7(%arg0: i32) -> (i32, i32) {
    %c0_i32 = arith.constant 0 : i32
    %c0_i32_0 = arith.constant 0 : i32
    %c0_i32_1 = arith.constant 0 : i32
    return %c0_i32, %c0_i32_0 : i32, i32
  }
  func.func @transform_8(%arg0: i32) -> (i32, i32) {
    %c0_i32 = arith.constant 0 : i32
    %c0_i32_0 = arith.constant 0 : i32
    %c0_i32_1 = arith.constant 0 : i32
    return %c0_i32, %c0_i32_0 : i32, i32
  }
  func.func @transform_9(%arg0: i32) -> (i32, i32) {
    %c0_i32 = arith.constant 0 : i32
    %c0_i32_0 = arith.constant 0 : i32
    %c0_i32_1 = arith.constant 0 : i32
    return %c0_i32, %c0_i32_0 : i32, i32
  }
  func.func @transform_10(%arg0: i32) -> (i32, i32, i32) {
    %c0_i32 = arith.constant 0 : i32
    %c0_i32_0 = arith.constant 0 : i32
    %c0_i32_1 = arith.constant 0 : i32
    return %arg0, %c0_i32, %c0_i32_0 : i32, i32, i32
  }
}

</mosaic_0001>

<bundles_post_ra>
// kernel: net_forward.1
= control target key start
LH: loop header
LB: loop body
LE: loop exit
PB: predicated region body
PF: predicated region fallthrough
CT: control target
= control target key end

     0   :  { %15 = vsyncpa [#allocation4], 0  ;;  %s24563_s0 = inlined_call_operand.vmem [shape: bf16[2,16,676], index: 0, kind: input, shape index: {}]   ;;  %s24564_s1 = inlined_call_operand.vmem [shape: bf16[25,16,16], index: 1, kind: input, shape index: {}]   ;;  %s24565_s2 = inlined_call_operand.vmem [shape: f32[16,1], index: 2, kind: input, shape index: {}]   ;;  %s24566_s3 = inlined_call_operand.vmem [shape: bf16[25,16,16], index: 3, kind: input, shape index: {}]   ;;  %s24567_s4 = inlined_call_operand.vmem [shape: f32[16,1], index: 4, kind: input, shape index: {}]   ;;  %s24568_s5 = inlined_call_operand.vmem [shape: f32[1,576], index: 5, kind: input, shape index: {}]   ;;  %s24569_s6 = inlined_call_operand.vmem [shape: bf16[16,576,32], index: 6, kind: input, shape index: {}]   ;;  %s24570_s7 = inlined_call_operand.vmem [shape: f32[1,32], index: 7, kind: input, shape index: {}]   ;;  %s24571_s8 = inlined_call_operand.vmem [shape: f32[32,5], index: 8, kind: input, shape index: {}]   ;;  %s24572_s9 = inlined_call_operand.vmem [shape: f32[1,5], index: 9, kind: input, shape index: {}]   ;;  %s24573_s10 = inlined_call_operand.hbm [shape: f32[2,1,4], index: 10, kind: output, shape index: {}]  }
   0x1   :  { %17 = vsyncpa [#allocation4 + $0x1], 0  ;;  %s20484_s13 = smov 0   ;;  %s20486_s14 = smov 0  }
   0x2   :  { %s20488_s15 = smov 0   ;;  %s20490_s16 = smov 0  }
   0x3 LB: > { %s20505_s17 = sadd.s32 4294967295, %s20397_s16   ;;  %s15846_s18 = sadd.s32 4294967294, %s20397_s16   ;;  %s20397_s16 = sphi %s20490_s16, %s24706_s16   ;;  %s20393_s15 = sphi %s20488_s15, %s24705_s15   ;;  %s20389_s14 = sphi %s20486_s14, %s24704_s14   ;;  %s20385_s13 = sphi %s20484_s13, %s24703_s13  }
   0x4   : > { %s20509_s19 = sadd.s32 1, %s20397_s16   ;;  %s245_s20 = sadd.s32 1, %s20393_s15 }
   0x5   : > { %s242_s21 = ssub.s32 %s20397_s16, %s20509_s19  ;;  %p255_p0 = scmp.ne.s32.totalorder %s20393_s15, %s20389_s14 }
   0x6   : > { %p243_p1 = scmp.eq.s32.totalorder %s242_s21, 0  ;;  %p256_p2 = scmp.eq.s32.totalorder %s20505_s17, 1 }
   0x7   : > { %p261_p3 = scmp.ne.s32.totalorder %s20389_s14, %s20385_s13  ;;  %p262_p4 = scmp.eq.s32.totalorder %s15846_s18, 1 }
   0x8   : > { %s20520_s22 = scalar_select %p243_p1, %s20393_s15, %s245_s20  }
   0x9   : > { %p20522_p5 = por %p256_p2, %p255_p0  ;;  %p20526_p6 = por %p262_p4, %p261_p3 }
   0xa   : > { %p15849_p7 = scmp.ge.s32.totalorder %s20397_s16, 1  ;;  %p315_p8 = scmp.lt.s32.totalorder %s20397_s16, 3 }
   0xc   : > { %p316_p9 = pnand %p15849_p7, %p315_p8 }
   0xd   : > { %p352_p10 = scmp.lt.s32.totalorder (!%p316_p9), %s20505_s17, 1  ;;  %v20399_v0 = vmov (!%p316_p9), 0   ;;  %s20400_s30 = smov (!%p316_p9), 127   ;;  %vm405_vm0 = vcmask (!%p316_p9), 1039360   ;;  %vm415_vm1 = vcmask (!%p316_p9), 130048   ;;  %v19695_v9 = vld [vmem:[%s24564_s1 + $0x8] sm:$0xff] (!%p316_p9)  }
   0xe   : > { %319 = sbr.rel (%p316_p9) target bundleno = 2608 (0xa30), region = 60  ;;  %451 = vmatprep.mubr.bf16.mxu0 (!%p316_p9), %v20399_v0  ;;  %494 = vmatprep.mubr.bf16.mxu1 (!%p316_p9), %v20399_v0  ;;  %s20401_s11 = smov (!%p316_p9), 126   ;;  %v20413_v14 = vmov (!%p316_p9), 0.0   ;;  %vm704_vm2 = vcmask (!%p316_p9), 1031168   ;;  %vm20414_vm3 = vmmov (!%p316_p9), 0   ;;  %v19696_v23 = vld [vmem:[%s24564_s1] sm:$0xff] (!%p316_p9)  }
   0xf   : > { %19685 = vset.pattern.permute.xlu0 (!%p316_p9), %v20399_v0  ;;  %19686 = vset.pattern.permute.xlu1 (!%p316_p9), %v20399_v0  ;;  %s20402_s12 = smov (!%p316_p9), 125   ;;  %s20403_s18 = smov (!%p316_p9), 124   ;;  %vm872_vm4 = vcmask (!%p316_p9), 1022976   ;;  %v19697_v36 = vld [vmem:[%s24564_s1 + $0x10] sm:$0xff] (!%p316_p9)   ;;  %vm1040_vm5 = vcmask (!%p316_p9), 1014784   ;;  %v19698_v54 = vld [vmem:[%s24564_s1 + $0x18] sm:$0xff] (!%p316_p9)  }
  0x10   : > { %s20404_s20 = smov (!%p316_p9), 104   ;;  %s24618_s21 = smov (!%p316_p9), 103   ;;  %vm1208_vm6 = vcmask (!%p316_p9), 850944   ;;  %vm1376_vm7 = vcmask (!%p316_p9), 842752   ;;  %vm1544_vm8 = vcmask (!%p316_p9), 834560   ;;  %vm1712_vm9 = vcmask (!%p316_p9), 826368  }
  0x11   : > { %s24576_s27 = smov (!%p316_p9), 100   ;;  %s24580_s28 = smov (!%p316_p9), 80   ;;  %vm1880_vm10 = vcmask (!%p316_p9), 818176   ;;  %vm2048_vm11 = vcmask (!%p316_p9), 654336   ;;  %vm2216_vm12 = vcmask (!%p316_p9), 646144   ;;  %vm24605_vm13 = vcmask (!%p316_p9), 637952  }
  0x12   : > { %vm24604_vm14 = vcmask (!%p316_p9), 629760   ;;  %vm24606_vm15 = vcmask (!%p316_p9), 621568  }
  0x15   : > { %s353_s25 = scalar_select %p352_p10, %s20505_s17, 1 }
  0x17   : > { %s19616_s26 = smul.u32 48, %s353_s25  ;;  %s24582_s25 = smov 102  }
  0x19   : > { %s20541_s29 = scalar_lea.vmem %s24563_s0, %s19616_s26  ;;  %s24574_s26 = smov 101  }
  0x1a   : > { %v20544_v1 = vld [vmem:[%s20541_s29 + $0x4] ss:$24 sps:$4 sm:$0xff]   ;;  %v20547_v2 = vld [vmem:[%s20541_s29] ss:$24 sps:$4 sm:$0xff]   ;;  %v20562_v5 = vld [vmem:[%s20541_s29 + $0x10] ss:$24 sps:$4 sm:$0xff]  }
  0x1b   : > { %397 = vrot.lane.b32.xlu0 %v20544_v1, %s20400_s30  ;;  %v20552_v3 = vld [vmem:[%s20541_s29 + $0x8] ss:$24 sps:$4 sm:$0xff]   ;;  %395 = vrot.lane.b32.xlu1 %v20547_v2, %s20400_s30  ;;  %v20557_v4 = vld [vmem:[%s20541_s29 + $0xc] ss:$24 sps:$4 sm:$0xff]  }
  0x1c   : > { %v20721_v30 = vld [vmem:[%s20541_s29 + $0xc] ss:$24 sps:$4 sm:$0xff]   ;;  %v20325_v31 = vld [vmem:[%s20541_s29 + $0x10] ss:$24 sps:$4 sm:$0xff]   ;;  %v20753_v41 = vld [vmem:[%s20541_s29] ss:$24 sps:$4 sm:$0xff]  }
  0x1d   : > { %v20736_v34 = vld [vmem:[%s20541_s29 + $0x4] ss:$24 sps:$4 sm:$0xff]   ;;  %v20747_v38 = vld [vmem:[%s20541_s29 + $0x10] ss:$24 sps:$4 sm:$0xff]   ;;  %v20770_v46 = vld [vmem:[%s20541_s29 + $0x14] ss:$24 sps:$4 sm:$0xff]  }
  0x1e   : > { %v20759_v43 = vld [vmem:[%s20541_s29 + $0x8] ss:$24 sps:$4 sm:$0xff]  }
  0x1f   : > { %399 = vrot.lane.b32.xlu0 %v20552_v3, %s20400_s30  ;;  %401 = vrot.lane.b32.xlu1 %v20557_v4, %s20400_s30 }
  0x23   : > { %403 = vrot.lane.b32.xlu0 %v20562_v5, %s20400_s30  ;;  %696 = vrot.lane.b32.xlu1 %v20544_v1, %s20401_s11 }
  0x27   : > { %698 = vrot.lane.b32.xlu0 %v20552_v3, %s20401_s11  ;;  %694 = vrot.lane.b32.xlu1 %v20547_v2, %s20401_s11 }
  0x2b   : > { %700 = vrot.lane.b32.xlu0 %v20557_v4, %s20401_s11  ;;  %702 = vrot.lane.b32.xlu1 %v20562_v5, %s20401_s11 }
  0x2f   : > { %864 = vrot.lane.b32.xlu0 %v20544_v1, %s20402_s12  ;;  %866 = vrot.lane.b32.xlu1 %v20552_v3, %s20402_s12 }
  0x33   : > { %862 = vrot.lane.b32.xlu0 %v20547_v2, %s20402_s12  ;;  %868 = vrot.lane.b32.xlu1 %v20557_v4, %s20402_s12 }
  0x37   : > { %870 = vrot.lane.b32.xlu0 %v20562_v5, %s20402_s12  ;;  %1032 = vrot.lane.b32.xlu1 %v20544_v1, %s20403_s18 }
  0x3b   : > { %1034 = vrot.lane.b32.xlu0 %v20552_v3, %s20403_s18  ;;  %1030 = vrot.lane.b32.xlu1 %v20547_v2, %s20403_s18 }
  0x3f   : > { %1036 = vrot.lane.b32.xlu0 %v20557_v4, %s20403_s18  ;;  %1038 = vrot.lane.b32.xlu1 %v20562_v5, %s20403_s18 }
  0x43   : > { %1200 = vrot.lane.b32.xlu0 %v20544_v1, %s20404_s20  ;;  %1202 = vrot.lane.b32.xlu1 %v20552_v3, %s20404_s20 }
  0x47   : > { %1198 = vrot.lane.b32.xlu0 %v20547_v2, %s20404_s20  ;;  %1204 = vrot.lane.b32.xlu1 %v20557_v4, %s20404_s20 }
  0x4b   : > { %1206 = vrot.lane.b32.xlu0 %v20562_v5, %s20404_s20  ;;  %1368 = vrot.lane.b32.xlu1 %v20544_v1, %s24618_s21 }
  0x4f   : > { %1370 = vrot.lane.b32.xlu0 %v20552_v3, %s24618_s21  ;;  %1366 = vrot.lane.b32.xlu1 %v20547_v2, %s24618_s21 }
  0x53   : > { %1372 = vrot.lane.b32.xlu0 %v20557_v4, %s24618_s21  ;;  %1374 = vrot.lane.b32.xlu1 %v20562_v5, %s24618_s21  ;;  %s24633_s21 = smov 77  }
  0x57   : > { %1536 = vrot.lane.b32.xlu0 %v20544_v1, %s24582_s25  ;;  %1538 = vrot.lane.b32.xlu1 %v20552_v3, %s24582_s25 }
  0x5b   : > { %1534 = vrot.lane.b32.xlu0 %v20547_v2, %s24582_s25  ;;  %1540 = vrot.lane.b32.xlu1 %v20557_v4, %s24582_s25 }
  0x5f   : > { %1542 = vrot.lane.b32.xlu0 %v20562_v5, %s24582_s25  ;;  %1704 = vrot.lane.b32.xlu1 %v20544_v1, %s24574_s26  ;;  %s24586_s25 = smov 77  }
  0x63   : > { %1706 = vrot.lane.b32.xlu0 %v20552_v3, %s24574_s26  ;;  %1702 = vrot.lane.b32.xlu1 %v20547_v2, %s24574_s26 }
  0x67   : > { %1708 = vrot.lane.b32.xlu0 %v20557_v4, %s24574_s26  ;;  %1710 = vrot.lane.b32.xlu1 %v20562_v5, %s24574_s26  ;;  %s24578_s26 = smov 79  }
  0x6b   : > { %1872 = vrot.lane.b32.xlu0 %v20544_v1, %s24576_s27  ;;  %1874 = vrot.lane.b32.xlu1 %v20552_v3, %s24576_s27 }
  0x6f   : > { %1870 = vrot.lane.b32.xlu0 %v20547_v2, %s24576_s27  ;;  %1876 = vrot.lane.b32.xlu1 %v20557_v4, %s24576_s27 }
  0x73   : > { %1878 = vrot.lane.b32.xlu0 %v20562_v5, %s24576_s27  ;;  %2040 = vrot.lane.b32.xlu1 %v20544_v1, %s24580_s28  ;;  %s24584_s27 = smov 78  }
  0x77   : > { %2042 = vrot.lane.b32.xlu0 %v20552_v3, %s24580_s28  ;;  %2038 = vrot.lane.b32.xlu1 %v20547_v2, %s24580_s28 }
  0x7b   : > { %2044 = vrot.lane.b32.xlu0 %v20557_v4, %s24580_s28  ;;  %2046 = vrot.lane.b32.xlu1 %v20562_v5, %s24580_s28  ;;  %s24637_s28 = smov 54  }
  0x7f   : > { %2208 = vrot.lane.b32.xlu0 %v20544_v1, %s24578_s26  ;;  %2210 = vrot.lane.b32.xlu1 %v20552_v3, %s24578_s26 }
  0x83   : > { %2206 = vrot.lane.b32.xlu0 %v20547_v2, %s24578_s26  ;;  %2212 = vrot.lane.b32.xlu1 %v20557_v4, %s24578_s26 }
  0x87   : > { %2214 = vrot.lane.b32.xlu0 %v20562_v5, %s24578_s26  ;;  %2376 = vrot.lane.b32.xlu1 %v20544_v1, %s24584_s27  ;;  %s24588_s26 = smov 76  }
  0x8b   : > { %2378 = vrot.lane.b32.xlu0 %v20552_v3, %s24584_s27  ;;  %2374 = vrot.lane.b32.xlu1 %v20547_v2, %s24584_s27 }
  0x8d   : > { %v398_v6 = vpop.permute.xlu0 %397  ;;  %v396_v7 = vpop.permute.xlu1 %395 }
  0x8e   : > { %v406_v12 = vsel %vm405_vm0, %v396_v7, %v398_v6 }
  0x8f   : > { %2380 = vrot.lane.b32.xlu0 %v20557_v4, %s24584_s27  ;;  %2382 = vrot.lane.b32.xlu1 %v20562_v5, %s24584_s27  ;;  %s24590_s27 = smov 56  }
  0x91   : > { %v400_v8 = vpop.permute.xlu0 %399  ;;  %v402_v10 = vpop.permute.xlu1 %401 }
  0x92   : > { %v407_v11 = vsel %vm405_vm0, %v398_v6, %v400_v8  ;;  %v408_v17 = vsel %vm405_vm0, %v400_v8, %v402_v10 }
  0x93   : > { %419 = vmatprep.subr.bf16.mxu0 %v407_v11  ;;  %2544 = vrot.lane.b32.xlu0 %v20544_v1, %s24586_s25 }
  0x94   : > { %420 = vmatpush1.bf16.msra.mxu0 %v406_v12  ;;  %2546 = vrot.lane.b32.xlu1 %v20552_v3, %s24586_s25 }
  0x95   : > { %v404_v13 = vpop.permute.xlu0 %403  ;;  %18723 = vmatprep.subr.bf16.mxu0 %v20413_v14  ;;  %v697_v16 = vpop.permute.xlu1 %696 }
  0x96   : > { %v409_v15 = vsel %vm405_vm0, %v402_v10, %v404_v13 }
  0x97   : > { %15859 = vmatmul.mubr.msk.bf16.vlgmr.msra.gmra.mrb[0].mxu0 %vm415_vm1, %v19695_v9  ;;  %462 = vmatprep.subr.bf16.mxu1 %v409_v15 }
  0x98   : > { %463 = vmatpush1.bf16.msra.mxu1 %v408_v17  ;;  %18724 = vmatpush3.bf16.msra.mxu0 %v404_v13 }
  0x99   : > { %18725 = vmatprep.mubr.msk.bf16.mxu0 %vm20414_vm3, %v20413_v14  ;;  %602 = vmatprep.subr.bf16.mxu1 %v20557_v4  ;;  %v699_v18 = vpop.permute.xlu0 %698  ;;  %v695_v19 = vpop.permute.xlu1 %694 }
  0x9a   : > { %559 = vmatprep.subr.bf16.mxu0 %v20544_v1  ;;  %2542 = vrot.lane.b32.xlu0 %v20547_v2, %s24586_s25  ;;  %v706_v21 = vsel %vm704_vm2, %v697_v16, %v699_v18  ;;  %v705_v26 = vsel %vm704_vm2, %v695_v19, %v697_v16  ;;  %v19700_v16 = vld [vmem:[%s24564_s1 + $0x28] sm:$0xff]  }
  0x9b   : > { %15860 = vmatmul.mubr.msk.bf16.vlgmr.msra.gmra.mrb[0].mxu1 %vm415_vm1, %v19695_v9  ;;  %2548 = vrot.lane.b32.xlu1 %v20557_v4, %s24586_s25 }
  0x9c   : > { %603 = vmatpush1.bf16.msra.mxu1 %v20552_v3  ;;  %634 = vmatprep.mubr.bf16.mxu1 %v20399_v0 }
  0x9d   : > { %v701_v20 = vpop.permute.xlu0 %700  ;;  %18729 = vmatprep.subr.bf16.mxu1 %v20413_v14  ;;  %v703_v22 = vpop.permute.xlu1 %702 }
  0x9e   : > { %2550 = vrot.lane.b32.xlu0 %v20562_v5, %s24586_s25  ;;  %v708_v28 = vsel %vm704_vm2, %v701_v20, %v703_v22  ;;  %v707_v35 = vsel %vm704_vm2, %v699_v18, %v701_v20  ;;  %s24592_s25 = smov 55  }
  0x9f   : > { %18726 = vmatmul.mubr.msk.bf16.vlgmr.msra.gmra.mrb[4].mxu0 %vm415_vm1, %v19695_v9  ;;  %2712 = vrot.lane.b32.xlu1 %v20544_v1, %s24588_s26  ;;  %v19699_v1 = vld [vmem:[%s24564_s1 + $0x20] sm:$0xff]  }
  0xa0   : > { %560 = vmatpush1.bf16.msra.mxu0 %v20547_v2  ;;  %591 = vmatprep.mubr.bf16.mxu0 %v20399_v0 }
  0xa1   : > { %717 = vmatprep.subr.bf16.mxu0 %v706_v21  ;;  %v865_v24 = vpop.permute.xlu0 %864  ;;  %v867_v25 = vpop.permute.xlu1 %866 }
  0xa2   : > { %2714 = vrot.lane.b32.xlu0 %v20552_v3, %s24588_s26  ;;  %v874_v44 = vsel %vm872_vm4, %v865_v24, %v867_v25 }
  0xa3   : > { %2710 = vrot.lane.b32.xlu1 %v20547_v2, %s24588_s26 }
  0xa5   : > { %v863_v27 = vpop.permute.xlu0 %862  ;;  %v869_v29 = vpop.permute.xlu1 %868 }
  0xa6   : > { %2716 = vrot.lane.b32.xlu0 %v20721_v30, %s24588_s26  ;;  %v875_v47 = vsel %vm872_vm4, %v867_v25, %v869_v29  ;;  %v873_v50 = vsel %vm872_vm4, %v863_v27, %v865_v24  ;;  %v19703_v24 = vld [vmem:[%s24564_s1 + $0x30] sm:$0xff]  }
  0xa7   : > { %15863 = vmatmul.mubr.msk.bf16.vlgmr.msra.gmra.mrb[0].mxu0 %vm415_vm1, %v19696_v23  ;;  %15864 = vmatmul.mubr.msk.bf16.vlgmr.msra.gmra.mrb[0].mxu1 %vm415_vm1, %v19696_v23 }
  0xa8   : > { %718 = vmatpush1.bf16.msra.mxu0 %v705_v26  ;;  %18730 = vmatpush3.bf16.msra.mxu1 %v20325_v31 }
  0xa9   : > { %18731 = vmatprep.mubr.msk.bf16.mxu1 %vm20414_vm3, %v20413_v14  ;;  %760 = vmatprep.subr.bf16.mxu1 %v708_v28  ;;  %v20730_v32 = vpop.permute.xlu0 %870  ;;  %v1033_v33 = vpop.permute.xlu1 %1032 }
  0xaa   : > { %749 = vmatprep.mubr.bf16.mxu0 %v20399_v0  ;;  %18735 = vmatprep.subr.bf16.mxu0 %v20413_v14  ;;  %v876_v39 = vsel %vm872_vm4, %v869_v29, %v20730_v32 }
  0xab   : > { %2718 = vrot.lane.b32.xlu1 %v20325_v31, %s24588_s26  ;;  %2910 = vrot.lane.b32.xlu0 %v20736_v34, %s24590_s27  ;;  %s24594_s26 = smov 54  }
  0xad   : > { %v20744_v37 = vpop.permute.xlu0 %1034  ;;  %v1031_v40 = vpop.permute.xlu1 %1030 }
  0xae   : > { %v1042_v52 = vsel %vm1040_vm5, %v1033_v33, %v20744_v37  ;;  %v1041_v57 = vsel %vm1040_vm5, %v1031_v40, %v1033_v33 }
  0xaf   : > { %18732 = vmatmul.mubr.msk.bf16.vlgmr.msra.gmra.mrb[4].mxu1 %vm415_vm1, %v19696_v23  ;;  %2908 = vrot.lane.b32.xlu0 %v20753_v41, %s24590_s27 }
  0xb0   : > { %761 = vmatpush1.bf16.msra.mxu1 %v707_v35  ;;  %792 = vmatprep.mubr.bf16.mxu1 %v20399_v0 }
  0xb1   : > { %928 = vmatprep.subr.bf16.mxu1 %v876_v39  ;;  %v1037_v42 = vpop.permute.xlu0 %1036  ;;  %2912 = vrot.lane.b32.xlu1 %v20759_v43, %s24590_s27  ;;  %v20764_v45 = vpop.permute.xlu1 %1038  ;;  %v19705_v39 = vld [vmem:[%s24564_s1 + $0x38] sm:$0xff]  }
  0xb2   : > { %v1044_v59 = vsel %vm1040_vm5, %v1037_v42, %v20764_v45  ;;  %v1043_v63 = vsel %vm1040_vm5, %v20744_v37, %v1037_v42 }
  0xb3   : > { %15869 = vmatmul.mubr.msk.bf16.vlgmr.msra.gmra.mrb[0].mxu0 %vm415_vm1, %v19697_v36  ;;  %2916 = vrot.lane.b32.xlu0 %v20747_v38, %s24590_s27 }
  0xb4   : > { %18736 = vmatpush3.bf16.msra.mxu0 %v703_v22  ;;  %18737 = vmatprep.mubr.msk.bf16.mxu0 %vm20414_vm3, %v20413_v14 }
  0xb5   : > { %885 = vmatprep.subr.bf16.mxu0 %v874_v44  ;;  %v20775_v48 = vpop.permute.xlu0 %1200  ;;  %2914 = vrot.lane.b32.xlu1 %v20721_v30, %s24590_s27  ;;  %v1203_v49 = vpop.permute.xlu1 %1202 }
  0xb6   : > { %v1210_v6 = vsel %vm1208_vm6, %v20775_v48, %v1203_v49 }
  0xb7   : > { %15870 = vmatmul.mubr.msk.bf16.vlgmr.msra.gmra.mrb[0].mxu1 %vm415_vm1, %v19697_v36  ;;  %3081 = vrot.lane.b32.xlu0 %v20736_v34, %s24592_s25 }
  0xb8   : > { %929 = vmatpush1.bf16.msra.mxu1 %v875_v47  ;;  %960 = vmatprep.mubr.bf16.mxu1 %v20399_v0 }
  0xb9   : > { %18741 = vmatprep.subr.bf16.mxu1 %v20413_v14  ;;  %v20785_v51 = vpop.permute.xlu0 %1198  ;;  %2918 = vrot.lane.b32.xlu1 %v20770_v46, %s24590_s27  ;;  %v1205_v53 = vpop.permute.xlu1 %1204  ;;  %s24596_s27 = smov 53  }
  0xba   : > { %v1211_v8 = vsel %vm1208_vm6, %v1203_v49, %v1205_v53  ;;  %v1209_v11 = vsel %vm1208_vm6, %v20785_v51, %v20775_v48  ;;  %v19706_v51 = vld [vmem:[%s24564_s1 + $0x40] sm:$0xff]  }
  0xbb   : > { %18738 = vmatmul.mubr.msk.bf16.vlgmr.msra.gmra.mrb[8].mxu0 %vm415_vm1, %v19697_v36  ;;  %3079 = vrot.lane.b32.xlu0 %v20753_v41, %s24592_s25 }
  0xbc   : > { %886 = vmatpush1.bf16.msra.mxu0 %v873_v50  ;;  %917 = vmatprep.mubr.bf16.mxu0 %v20399_v0 }
  0xbd   : > { %1053 = vmatprep.subr.bf16.mxu0 %v1042_v52  ;;  %v20798_v55 = vpop.permute.xlu0 %1206  ;;  %3083 = vrot.lane.b32.xlu1 %v20759_v43, %s24592_s25  ;;  %v20802_v56 = vpop.permute.xlu1 %1368 }
  0xbe   : > { %v1212_v3 = vsel %vm1208_vm6, %v1205_v53, %v20798_v55 }
  0xbf   : > { %3087 = vrot.lane.b32.xlu0 %v20747_v38, %s24592_s25 }
  0xc1   : > { %v20807_v58 = vpop.permute.xlu0 %1370  ;;  %3085 = vrot.lane.b32.xlu1 %v20721_v30, %s24592_s25  ;;  %v1367_v60 = vpop.permute.xlu1 %1366 }
  0xc2   : > { %v1378_v12 = vsel %vm1376_vm7, %v20802_v56, %v20807_v58  ;;  %v1377_v18 = vsel %vm1376_vm7, %v1367_v60, %v20802_v56  ;;  %v21076_v60 = vld [vmem:[%s20541_s29 + $0x10] ss:$24 sps:$4 sm:$0xff]  }
  0xc3   : > { %15875 = vmatmul.mubr.msk.bf16.vlgmr.msra.gmra.mrb[0].mxu0 %vm415_vm1, %v19698_v54  ;;  %15876 = vmatmul.mubr.msk.bf16.vlgmr.msra.gmra.mrb[0].mxu1 %vm415_vm1, %v19698_v54 }
  0xc4   : > { %18742 = vmatpush3.bf16.msra.mxu1 %v20730_v32  ;;  %1054 = vmatpush1.bf16.msra.mxu0 %v1041_v57 }
  0xc5   : > { %18743 = vmatprep.mubr.msk.bf16.mxu1 %vm20414_vm3, %v20413_v14  ;;  %1096 = vmatprep.subr.bf16.mxu1 %v1044_v59  ;;  %v20818_v61 = vpop.permute.xlu0 %1372  ;;  %v20822_v62 = vpop.permute.xlu1 %1374 }
  0xc6   : > { %1085 = vmatprep.mubr.bf16.mxu0 %v20399_v0  ;;  %18747 = vmatprep.subr.bf16.mxu0 %v20413_v14  ;;  %v1380_v20 = vsel %vm1376_vm7, %v20818_v61, %v20822_v62  ;;  %v1379_v23 = vsel %vm1376_vm7, %v20807_v58, %v20818_v61 }
  0xc7   : > { %3252 = vrot.lane.b32.xlu0 %v20736_v34, %s24594_s26  ;;  %3089 = vrot.lane.b32.xlu1 %v20770_v46, %s24592_s25  ;;  %s24598_s25 = smov 52  }
  0xc9   : > { %v20833_v2 = vpop.permute.xlu0 %1536  ;;  %v20837_v4 = vpop.permute.xlu1 %1538 }
  0xca   : > { %v1546_v28 = vsel %vm1544_vm8, %v20833_v2, %v20837_v4 }
  0xcb   : > { %18744 = vmatmul.mubr.msk.bf16.vlgmr.msra.gmra.mrb[8].mxu1 %vm415_vm1, %v19698_v54  ;;  %3250 = vrot.lane.b32.xlu0 %v20753_v41, %s24594_s26 }
  0xcc   : > { %1097 = vmatpush1.bf16.msra.mxu1 %v1043_v63  ;;  %1128 = vmatprep.mubr.bf16.mxu1 %v20399_v0  ;;  %v21088_v63 = vld [vmem:[%s20541_s29 + $0xc] ss:$24 sps:$4 sm:$0xff]  }
  0xcd   : > { %1264 = vmatprep.subr.bf16.mxu1 %v1212_v3  ;;  %v20843_v5 = vpop.permute.xlu0 %1534  ;;  %3254 = vrot.lane.b32.xlu1 %v20759_v43, %s24594_s26  ;;  %v20849_v7 = vpop.permute.xlu1 %1540  ;;  %v20331_v3 = vld [vmem:[%s20541_s29 + $0x4] ss:$24 sps:$4 sm:$0xff]  }
  0xce   : > { %v1547_v31 = vsel %vm1544_vm8, %v20837_v4, %v20849_v7  ;;  %v1545_v35 = vsel %vm1544_vm8, %v20843_v5, %v20833_v2  ;;  %v20332_v4 = vld [vmem:[%s20541_s29 + $0x14] ss:$24 sps:$4 sm:$0xff]  }
  0xcf   : > { %15881 = vmatmul.mubr.msk.bf16.vlgmr.msra.gmra.mrb[0].mxu0 %vm415_vm1, %v19699_v1  ;;  %3258 = vrot.lane.b32.xlu0 %v20747_v38, %s24594_s26 }
  0xd0   : > { %18748 = vmatpush3.bf16.msra.mxu0 %v20764_v45  ;;  %18749 = vmatprep.mubr.msk.bf16.mxu0 %vm20414_vm3, %v20413_v14 }
  0xd1   : > { %1221 = vmatprep.subr.bf16.mxu0 %v1210_v6  ;;  %3256 = vrot.lane.b32.xlu1 %v20721_v30, %s24594_s26  ;;  %v20860_v9 = vpop.permute.xlu0 %1542  ;;  %v20862_v10 = vpop.permute.xlu1 %1704  ;;  %v19708_v6 = vld [vmem:[%s24564_s1 + $0x50] sm:$0xff]  }
  0xd2   : > { %v1548_v25 = vsel %vm1544_vm8, %v20849_v7, %v20860_v9 }
  0xd3   : > { %15882 = vmatmul.mubr.msk.bf16.vlgmr.msra.gmra.mrb[0].mxu1 %vm415_vm1, %v19699_v1  ;;  %3423 = vrot.lane.b32.xlu0 %v20736_v34, %s24596_s27 }
  0xd4   : > { %1265 = vmatpush1.bf16.msra.mxu1 %v1211_v8  ;;  %1296 = vmatprep.mubr.bf16.mxu1 %v20399_v0 }
  0xd5   : > { %18753 = vmatprep.subr.bf16.mxu1 %v20413_v14  ;;  %3260 = vrot.lane.b32.xlu1 %v20770_v46, %s24594_s26  ;;  %v20877_v13 = vpop.permute.xlu0 %1706  ;;  %v20880_v15 = vpop.permute.xlu1 %1702  ;;  %s24600_s26 = smov 32  }
  0xd6   : > { %v1714_v36 = vsel %vm1712_vm9, %v20862_v10, %v20877_v13  ;;  %v1713_v42 = vsel %vm1712_vm9, %v20880_v15, %v20862_v10 }
  0xd7   : > { %18750 = vmatmul.mubr.msk.bf16.vlgmr.msra.gmra.mrb[12].mxu0 %vm415_vm1, %v19699_v1  ;;  %3421 = vrot.lane.b32.xlu0 %v20753_v41, %s24596_s27 }
  0xd8   : > { %1222 = vmatpush1.bf16.msra.mxu0 %v1209_v11  ;;  %1253 = vmatprep.mubr.bf16.mxu0 %v20399_v0  ;;  %v20334_v11 = vld [vmem:[%s20541_s29 + $0x8] ss:$24 sps:$4 sm:$0xff]  }
  0xd9   : > { %1389 = vmatprep.subr.bf16.mxu0 %v1378_v12  ;;  %3425 = vrot.lane.b32.xlu1 %v20759_v43, %s24596_s27  ;;  %v20892_v17 = vpop.permute.xlu0 %1708  ;;  %v20896_v19 = vpop.permute.xlu1 %1710 }
  0xda   : > { %v1716_v45 = vsel %vm1712_vm9, %v20892_v17, %v20896_v19  ;;  %v1715_v50 = vsel %vm1712_vm9, %v20877_v13, %v20892_v17 }
  0xdb   : > { %3429 = vrot.lane.b32.xlu0 %v20747_v38, %s24596_s27 }
  0xdd   : > { %3427 = vrot.lane.b32.xlu1 %v20721_v30, %s24596_s27  ;;  %v20906_v21 = vpop.permute.xlu0 %1872  ;;  %v20910_v22 = vpop.permute.xlu1 %1874 }
  0xde   : > { %v1882_v54 = vsel %vm1880_vm10, %v20906_v21, %v20910_v22 }
  0xdf   : > { %15887 = vmatmul.mubr.msk.bf16.vlgmr.msra.gmra.mrb[0].mxu0 %vm415_vm1, %v19700_v16  ;;  %15888 = vmatmul.mubr.msk.bf16.vlgmr.msra.gmra.mrb[0].mxu1 %vm415_vm1, %v19700_v16 }
  0xe0   : > { %18754 = vmatpush3.bf16.msra.mxu1 %v20798_v55  ;;  %1390 = vmatpush1.bf16.msra.mxu0 %v1377_v18 }
  0xe1   : > { %18755 = vmatprep.mubr.msk.bf16.mxu1 %vm20414_vm3, %v20413_v14  ;;  %1432 = vmatprep.subr.bf16.mxu1 %v1380_v20  ;;  %v20927_v26 = vpop.permute.xlu0 %1870  ;;  %v20930_v27 = vpop.permute.xlu1 %1876 }
  0xe2   : > { %1421 = vmatprep.mubr.bf16.mxu0 %v20399_v0  ;;  %18759 = vmatprep.subr.bf16.mxu0 %v20413_v14  ;;  %v1883_v56 = vsel %vm1880_vm10, %v20910_v22, %v20930_v27 }
  0xe3   : > { %3594 = vrot.lane.b32.xlu0 %v20736_v34, %s24598_s25  ;;  %3431 = vrot.lane.b32.xlu1 %v20770_v46, %s24596_s27  ;;  %s24602_s27 = smov 31  }
  0xe5   : > { %v20946_v29 = vpop.permute.xlu0 %1878  ;;  %v20951_v32 = vpop.permute.xlu1 %2040 }
  0xe6   : > { %v1884_v52 = vsel %vm1880_vm10, %v20930_v27, %v20946_v29 }
  0xe7   : > { %18756 = vmatmul.mubr.msk.bf16.vlgmr.msra.gmra.mrb[12].mxu1 %vm415_vm1, %v19700_v16  ;;  %3592 = vrot.lane.b32.xlu0 %v20753_v41, %s24598_s25 }
  0xe8   : > { %1433 = vmatpush1.bf16.msra.mxu1 %v1379_v23  ;;  %1464 = vmatprep.mubr.bf16.mxu1 %v20399_v0 }
  0xe9   : > { %1600 = vmatprep.subr.bf16.mxu1 %v1548_v25  ;;  %3596 = vrot.lane.b32.xlu1 %v20759_v43, %s24598_s25  ;;  %v20959_v33 = vpop.permute.xlu0 %2042  ;;  %v20971_v37 = vpop.permute.xlu1 %2038 }
  0xeb   : > { %15893 = vmatmul.mubr.msk.bf16.vlgmr.msra.gmra.mrb[0].mxu0 %vm415_vm1, %v19703_v24  ;;  %3600 = vrot.lane.b32.xlu0 %v20747_v38, %s24598_s25 }
  0xec   : > { %18760 = vmatpush3.bf16.msra.mxu0 %v20822_v62  ;;  %18761 = vmatprep.mubr.msk.bf16.mxu0 %vm20414_vm3, %v20413_v14 }
  0xed   : > { %1557 = vmatprep.subr.bf16.mxu0 %v1546_v28  ;;  %3598 = vrot.lane.b32.xlu1 %v20721_v30, %s24598_s25  ;;  %v20981_v40 = vpop.permute.xlu0 %2044  ;;  %v20988_v44 = vpop.permute.xlu1 %2046 }
  0xee   : > { %v2051_v5 = vsel %vm2048_vm11, %v20959_v33, %v20981_v40 }
  0xef   : > { %15894 = vmatmul.mubr.msk.bf16.vlgmr.msra.gmra.mrb[0].mxu1 %vm415_vm1, %v19703_v24  ;;  %3765 = vrot.lane.b32.xlu0 %v20736_v34, %s24600_s26 }
  0xf0   : > { %1601 = vmatpush1.bf16.msra.mxu1 %v1547_v31  ;;  %1632 = vmatprep.mubr.bf16.mxu1 %v20399_v0 }
  0xf1   : > { %18765 = vmatprep.subr.bf16.mxu1 %v20413_v14  ;;  %3602 = vrot.lane.b32.xlu1 %v20770_v46, %s24598_s25  ;;  %v20995_v47 = vpop.permute.xlu0 %2208  ;;  %v21002_v48 = vpop.permute.xlu1 %2210  ;;  %s24616_s25 = smov 30  }
  0xf2   : > { %v2218_v12 = vsel %vm2216_vm12, %v20995_v47, %v21002_v48 }
  0xf3   : > { %18762 = vmatmul.mubr.msk.bf16.vlgmr.msra.gmra.mrb[16].mxu0 %vm415_vm1, %v19703_v24  ;;  %3763 = vrot.lane.b32.xlu0 %v20753_v41, %s24600_s26 }
  0xf4   : > { %1558 = vmatpush1.bf16.msra.mxu0 %v1545_v35  ;;  %1589 = vmatprep.mubr.bf16.mxu0 %v20399_v0 }
  0xf5   : > { %1725 = vmatprep.subr.bf16.mxu0 %v1714_v36  ;;  %3767 = vrot.lane.b32.xlu1 %v20759_v43, %s24600_s26  ;;  %v21010_v49 = vpop.permute.xlu0 %2206  ;;  %v21022_v53 = vpop.permute.xlu1 %2212 }
  0xf6   : > { %v2219_v15 = vsel %vm2216_vm12, %v21002_v48, %v21022_v53  ;;  %v2217_v17 = vsel %vm2216_vm12, %v21010_v49, %v20995_v47  ;;  %v19711_v47 = vld [vmem:[%s24564_s1 + $0x68] sm:$0xff]  }
  0xf7   : > { %3771 = vrot.lane.b32.xlu0 %v20747_v38, %s24600_s26 }
  0xf9   : > { %3769 = vrot.lane.b32.xlu1 %v20721_v30, %s24600_s26  ;;  %v21032_v55 = vpop.permute.xlu0 %2214  ;;  %v21043_v57 = vpop.permute.xlu1 %2376 }
  0xfa   : > { %v2220_v7 = vsel %vm2216_vm12, %v21022_v53, %v21032_v55 }
  0xfb   : > { %15899 = vmatmul.mubr.msk.bf16.vlgmr.msra.gmra.mrb[0].mxu0 %vm415_vm1, %v19705_v39  ;;  %15900 = vmatmul.mubr.msk.bf16.vlgmr.msra.gmra.mrb[0].mxu1 %vm415_vm1, %v19705_v39 }
  0xfc   : > { %18766 = vmatpush3.bf16.msra.mxu1 %v20860_v9  ;;  %1726 = vmatpush1.bf16.msra.mxu0 %v1713_v42  ;;  %v20333_v9 = vld [vmem:[%s20541_s29] ss:$24 sps:$4 sm:$0xff]   ;;  %s24612_s29 = smov 28  }
  0xfd   : > { %18767 = vmatprep.mubr.msk.bf16.mxu1 %vm20414_vm3, %v20413_v14  ;;  %1768 = vmatprep.subr.bf16.mxu1 %v1716_v45  ;;  %v21047_v58 = vpop.permute.xlu0 %2378 }
  0xfe   : > { %1757 = vmatprep.mubr.bf16.mxu0 %v20399_v0  ;;  %18771 = vmatprep.subr.bf16.mxu0 %v20413_v14  ;;  %v2386_v18 = vsel %vm24605_vm13, %v21043_v57, %v21047_v58 }
  0xff   : > { %3936 = vrot.lane.b32.xlu0 %v20736_v34, %s24602_s27  ;;  %3773 = vrot.lane.b32.xlu1 %v20770_v46, %s24600_s26  ;;  %s24614_s26 = smov 29  }
 0x101   : > { %v21068_v59 = vpop.permute.xlu0 %2380 }
 0x102   : > { %v2387_v28 = vsel %vm24605_vm13, %v21047_v58, %v21068_v59 }
 0x103   : > { %18768 = vmatmul.mubr.msk.bf16.vlgmr.msra.gmra.mrb[16].mxu1 %vm415_vm1, %v19705_v39  ;;  %3934 = vrot.lane.b32.xlu0 %v20753_v41, %s24602_s27 }
 0x104   : > { %1769 = vmatpush1.bf16.msra.mxu1 %v1715_v50  ;;  %1800 = vmatprep.mubr.bf16.mxu1 %v20399_v0 }
 0x105   : > { %1936 = vmatprep.subr.bf16.mxu1 %v1884_v52  ;;  %3938 = vrot.lane.b32.xlu1 %v20759_v43, %s24602_s27  ;;  %v21080_v61 = vpop.permute.xlu0 %2544 }
 0x107   : > { %15905 = vmatmul.mubr.msk.bf16.vlgmr.msra.gmra.mrb[0].mxu0 %vm415_vm1, %v19706_v51  ;;  %3942 = vrot.lane.b32.xlu0 %v20747_v38, %s24602_s27  ;;  %v1881_v38 = vsel %vm1880_vm10, %v20927_v26, %v20906_v21  ;;  %v19709_v21 = vld [vmem:[%s24564_s1 + $0x58] sm:$0xff]  }
 0x108   : > { %18772 = vmatpush3.bf16.msra.mxu0 %v20896_v19  ;;  %18773 = vmatprep.mubr.msk.bf16.mxu0 %vm20414_vm3, %v20413_v14 }
 0x109   : > { %1893 = vmatprep.subr.bf16.mxu0 %v1882_v54  ;;  %3940 = vrot.lane.b32.xlu1 %v20721_v30, %s24602_s27  ;;  %v2050_v30 = vsel %vm2048_vm11, %v20951_v32, %v20959_v33 }
 0x10b   : > { %15906 = vmatmul.mubr.msk.bf16.vlgmr.msra.gmra.mrb[0].mxu1 %vm415_vm1, %v19706_v51  ;;  %4107 = vrot.lane.b32.xlu0 %v20736_v34, %s24616_s25  ;;  %v21063_v34 = vpop.permute.xlu1 %2374 }
 0x10c   : > { %1937 = vmatpush1.bf16.msra.mxu1 %v1883_v56  ;;  %1968 = vmatprep.mubr.bf16.mxu1 %v20399_v0  ;;  %v21104_v2 = vpop.permute.xlu0 %2542  ;;  %v2385_v23 = vsel %vm24605_vm13, %v21063_v34, %v21043_v57 }
 0x10d   : > { %18777 = vmatprep.subr.bf16.mxu1 %v20413_v14  ;;  %3944 = vrot.lane.b32.xlu1 %v20770_v46, %s24602_s27  ;;  %v19707_v46 = vld [vmem:[%s24564_s1 + $0x48] sm:$0xff]   ;;  %s24641_s27 = smov 31  }
 0x10f   : > { %18774 = vmatmul.mubr.msk.bf16.vlgmr.msra.gmra.mrb[20].mxu0 %vm415_vm1, %v19706_v51  ;;  %4105 = vrot.lane.b32.xlu0 %v20753_v41, %s24616_s25  ;;  %v2049_v41 = vsel %vm2048_vm11, %v20971_v37, %v20951_v32  ;;  %v21085_v62 = vpop.permute.xlu1 %2382 }
 0x110   : > { %1894 = vmatpush1.bf16.msra.mxu0 %v1881_v38  ;;  %1925 = vmatprep.mubr.bf16.mxu0 %v20399_v0  ;;  %v21125_v10 = vpop.permute.xlu0 %2550  ;;  %v2388_v25 = vsel %vm24605_vm13, %v21068_v59, %v21085_v62  ;;  %vm24608_vm13 = vcmask 449536  }
 0x111   : > { %2061 = vmatprep.subr.bf16.mxu0 %v2050_v30  ;;  %4109 = vrot.lane.b32.xlu1 %v20759_v43, %s24616_s25  ;;  %v2052_v43 = vsel %vm2048_vm11, %v20981_v40, %v20988_v44  ;;  %v2553_v40 = vsel %vm24604_vm14, %v21104_v2, %v21080_v61 }
 0x113   : > { %4113 = vrot.lane.b32.xlu0 %v21076_v60, %s24616_s25  ;;  %v21100_v1 = vpop.permute.xlu1 %2546 }
 0x114   : > { %v21138_v13 = vpop.permute.xlu0 %2714  ;;  %v2554_v35 = vsel %vm24604_vm14, %v21080_v61, %v21100_v1 }
 0x115   : > { %4111 = vrot.lane.b32.xlu1 %v21088_v63, %s24616_s25 }
 0x117   : > { %15911 = vmatmul.mubr.msk.bf16.vlgmr.msra.gmra.mrb[0].mxu0 %vm415_vm1, %v19707_v46  ;;  %15912 = vmatmul.mubr.msk.bf16.vlgmr.msra.gmra.mrb[0].mxu1 %vm415_vm1, %v19707_v46  ;;  %v21120_v8 = vpop.permute.xlu1 %2548 }
 0x118   : > { %18778 = vmatpush3.bf16.msra.mxu1 %v20946_v29  ;;  %2062 = vmatpush1.bf16.msra.mxu0 %v2049_v41  ;;  %v21158_v19 = vpop.permute.xlu0 %2716  ;;  %v19710_v29 = vld [vmem:[%s24564_s1 + $0x60] sm:$0xff]   ;;  %v2556_v31 = vsel %vm24604_vm14, %v21120_v8, %v21125_v10  ;;  %v2555_v37 = vsel %vm24604_vm14, %v21100_v1, %v21120_v8  ;;  %vm24607_vm14 = vcmask 457728  }
 0x119   : > { %18779 = vmatprep.mubr.msk.bf16.mxu1 %vm20414_vm3, %v20413_v14  ;;  %2104 = vmatprep.subr.bf16.mxu1 %v2052_v43  ;;  %v2723_v54 = vsel %vm24606_vm15, %v21138_v13, %v21158_v19 }
 0x11a   : > { %2093 = vmatprep.mubr.bf16.mxu0 %v20399_v0  ;;  %18783 = vmatprep.subr.bf16.mxu0 %v20413_v14 }
 0x11b   : > { %4278 = vrot.lane.b32.xlu0 %v20331_v3, %s24614_s26  ;;  %4115 = vrot.lane.b32.xlu1 %v20332_v4, %s24616_s25  ;;  %v21143_v16 = vpop.permute.xlu1 %2712  ;;  %s24634_s25 = smov 76  }
 0x11c   : > { %v2722_v42 = vsel %vm24606_vm15, %v21143_v16, %v21138_v13 }
 0x11d   : > { %v21167_v22 = vpop.permute.xlu0 %2910 }
 0x11f   : > { %18780 = vmatmul.mubr.msk.bf16.vlgmr.msra.gmra.mrb[20].mxu1 %vm415_vm1, %v19707_v46  ;;  %4276 = vrot.lane.b32.xlu0 %v20333_v9, %s24614_s26  ;;  %v2711_v20 = vpop.permute.xlu1 %2710 }
 0x120   : > { %2105 = vmatpush1.bf16.msra.mxu1 %v2051_v5  ;;  %2136 = vmatprep.mubr.bf16.mxu1 %v20399_v0  ;;  %v2721_v49 = vsel %vm24606_vm15, %v2711_v20, %v21143_v16 }
 0x121   : > { %2272 = vmatprep.subr.bf16.mxu1 %v2220_v7  ;;  %4280 = vrot.lane.b32.xlu1 %v20334_v11, %s24614_s26  ;;  %v21184_v26 = vpop.permute.xlu0 %2908 }
 0x122   : > { %v2921_v46 = vsel %vm24607_vm14, %v21184_v26, %v21167_v22 }
 0x123   : > { %15917 = vmatmul.mubr.msk.bf16.vlgmr.msra.gmra.mrb[0].mxu0 %vm415_vm1, %v19708_v6  ;;  %4284 = vrot.lane.b32.xlu0 %v21076_v60, %s24614_s26  ;;  %v21174_v24 = vpop.permute.xlu1 %2718 }
 0x124   : > { %18784 = vmatpush3.bf16.msra.mxu0 %v20988_v44  ;;  %18785 = vmatprep.mubr.msk.bf16.mxu0 %vm20414_vm3, %v20413_v14  ;;  %v2724_v51 = vsel %vm24606_vm15, %v21158_v19, %v21174_v24  ;;  %vm24609_vm15 = vcmask 441344  }
 0x125   : > { %2229 = vmatprep.subr.bf16.mxu0 %v2218_v12  ;;  %4282 = vrot.lane.b32.xlu1 %v21088_v63, %s24614_s26  ;;  %v21202_v32 = vpop.permute.xlu0 %2916 }
 0x127   : > { %15918 = vmatmul.mubr.msk.bf16.vlgmr.msra.gmra.mrb[0].mxu1 %vm415_vm1, %v19708_v6  ;;  %4449 = vrot.lane.b32.xlu0 %v20331_v3, %s24612_s29  ;;  %v21188_v27 = vpop.permute.xlu1 %2912 }
 0x128   : > { %2273 = vmatpush1.bf16.msra.mxu1 %v2219_v15  ;;  %2304 = vmatprep.mubr.bf16.mxu1 %v20399_v0  ;;  %v2922_v38 = vsel %vm24607_vm14, %v21167_v22, %v21188_v27 }
 0x129   : > { %18789 = vmatprep.subr.bf16.mxu1 %v20413_v14  ;;  %4286 = vrot.lane.b32.xlu1 %v20332_v4, %s24614_s26  ;;  %v21213_v36 = vpop.permute.xlu0 %3081  ;;  %s24631_s26 = smov 79  }
 0x12b   : > { %18786 = vmatmul.mubr.msk.bf16.vlgmr.msra.gmra.mrb[24].mxu0 %vm415_vm1, %v19708_v6  ;;  %4447 = vrot.lane.b32.xlu0 %v20333_v9, %s24612_s29  ;;  %v2915_v33 = vpop.permute.xlu1 %2914 }
 0x12c   : > { %2230 = vmatpush1.bf16.msra.mxu0 %v2217_v17  ;;  %2261 = vmatprep.mubr.bf16.mxu0 %v20399_v0  ;;  %v2924_v56 = vsel %vm24607_vm14, %v2915_v33, %v21202_v32  ;;  %v2923_v34 = vsel %vm24607_vm14, %v21188_v27, %v2915_v33 }
 0x12d   : > { %2397 = vmatprep.subr.bf16.mxu0 %v2386_v18  ;;  %4451 = vrot.lane.b32.xlu1 %v20334_v11, %s24612_s29  ;;  %v3080_v44 = vpop.permute.xlu0 %3079  ;;  %v19714_v11 = vld [vmem:[%s24564_s1 + $0x80] sm:$0xff]  }
 0x12e   : > { %v3092_v1 = vsel %vm24608_vm13, %v3080_v44, %v21213_v36 }
 0x12f   : > { %4455 = vrot.lane.b32.xlu0 %v21076_v60, %s24612_s29  ;;  %v2919_v39 = vpop.permute.xlu1 %2918 }
 0x130   : > { %v2925_v43 = vsel %vm24607_vm14, %v21202_v32, %v2919_v39  ;;  %vm24610_vm14 = vcmask 433152  }
 0x131   : > { %4453 = vrot.lane.b32.xlu1 %v21088_v63, %s24612_s29  ;;  %v21234_v48 = vpop.permute.xlu0 %3087 }
 0x133   : > { %15923 = vmatmul.mubr.msk.bf16.vlgmr.msra.gmra.mrb[0].mxu0 %vm415_vm1, %v19709_v21  ;;  %15924 = vmatmul.mubr.msk.bf16.vlgmr.msra.gmra.mrb[0].mxu1 %vm415_vm1, %v19709_v21  ;;  %v21228_v45 = vpop.permute.xlu1 %3083 }
 0x134   : > { %18790 = vmatpush3.bf16.msra.mxu1 %v21032_v55  ;;  %2398 = vmatpush1.bf16.msra.mxu0 %v2385_v23  ;;  %v19712_v55 = vld [vmem:[%s24564_s1 + $0x70] sm:$0xff]   ;;  %v3093_v60 = vsel %vm24608_vm13, %v21213_v36, %v21228_v45 }
 0x135   : > { %18791 = vmatprep.mubr.msk.bf16.mxu1 %vm20414_vm3, %v20413_v14  ;;  %2440 = vmatprep.subr.bf16.mxu1 %v2388_v25 }
 0x136   : > { %2429 = vmatprep.mubr.bf16.mxu0 %v20399_v0  ;;  %18795 = vmatprep.subr.bf16.mxu0 %v20413_v14 }
 0x137   : > { %4457 = vrot.lane.b32.xlu1 %v20332_v4, %s24612_s29  ;;  %v3086_v50 = vpop.permute.xlu1 %3085  ;;  %s24632_s29 = smov 78  }
 0x138   : > { %v3095_v3 = vsel %vm24608_vm13, %v3086_v50, %v21234_v48  ;;  %v3094_v6 = vsel %vm24608_vm13, %v21228_v45, %v3086_v50  ;;  %v19716_v50 = vld [vmem:[%s24564_s1 + $0x90] sm:$0xff]  }
 0x139   : > { %v21244_v52 = vpop.permute.xlu0 %3252 }
 0x13b   : > { %18792 = vmatmul.mubr.msk.bf16.vlgmr.msra.gmra.mrb[24].mxu1 %vm415_vm1, %v19709_v21  ;;  %v3090_v53 = vpop.permute.xlu1 %3089 }
 0x13c   : > { %2441 = vmatpush1.bf16.msra.mxu1 %v2387_v28  ;;  %2472 = vmatprep.mubr.bf16.mxu1 %v20399_v0  ;;  %v3096_v15 = vsel %vm24608_vm13, %v21234_v48, %v3090_v53  ;;  %v19715_v28 = vld [vmem:[%s24564_s1 + $0x88] sm:$0xff]   ;;  %vm24611_vm13 = vcmask 424960  }
 0x13d   : > { %2608 = vmatprep.subr.bf16.mxu1 %v2556_v31  ;;  %v21258_v57 = vpop.permute.xlu0 %3250 }
 0x13e   : > { %v3263_v21 = vsel %vm24609_vm15, %v21258_v57, %v21244_v52 }
 0x13f   : > { %15929 = vmatmul.mubr.msk.bf16.vlgmr.msra.gmra.mrb[0].mxu0 %vm415_vm1, %v19710_v29  ;;  %v21261_v58 = vpop.permute.xlu1 %3254 }
 0x140   : > { %18796 = vmatpush3.bf16.msra.mxu0 %v21085_v62  ;;  %18797 = vmatprep.mubr.msk.bf16.mxu0 %vm20414_vm3, %v20413_v14  ;;  %v19713_v62 = vld [vmem:[%s24564_s1 + $0x78] sm:$0xff]   ;;  %v3264_v17 = vsel %vm24609_vm15, %v21244_v52, %v21261_v58 }
 0x141   : > { %2565 = vmatprep.subr.bf16.mxu0 %v2554_v35  ;;  %v21271_v30 = vpop.permute.xlu0 %3258 }
 0x143   : > { %15930 = vmatmul.mubr.msk.bf16.vlgmr.msra.gmra.mrb[0].mxu1 %vm415_vm1, %v19710_v29  ;;  %v3257_v59 = vpop.permute.xlu1 %3256 }
 0x144   : > { %2609 = vmatpush1.bf16.msra.mxu1 %v2555_v37  ;;  %2640 = vmatprep.mubr.bf16.mxu1 %v20399_v0  ;;  %v3266_v8 = vsel %vm24609_vm15, %v3257_v59, %v21271_v30  ;;  %v3265_v19 = vsel %vm24609_vm15, %v21261_v58, %v3257_v59 }
 0x145   : > { %18801 = vmatprep.subr.bf16.mxu1 %v20413_v14  ;;  %v21284_v61 = vpop.permute.xlu0 %3423 }
 0x147   : > { %18798 = vmatmul.mubr.msk.bf16.vlgmr.msra.gmra.mrb[28].mxu0 %vm415_vm1, %v19710_v29  ;;  %v21287_v41 = vpop.permute.xlu1 %3260 }
 0x148   : > { %2566 = vmatpush1.bf16.msra.mxu0 %v2553_v40  ;;  %2597 = vmatprep.mubr.bf16.mxu0 %v20399_v0  ;;  %v3267_v32 = vsel %vm24609_vm15, %v21271_v30, %v21287_v41  ;;  %vm24620_vm15 = vcmask 261120  }
 0x149   : > { %2733 = vmatprep.subr.bf16.mxu0 %v2722_v42  ;;  %v3422_v63 = vpop.permute.xlu0 %3421 }
 0x14a   : > { %v3434_v35 = vsel %vm24610_vm14, %v3422_v63, %v21284_v61  ;;  %v19717_v63 = vld [vmem:[%s24564_s1 + $0x98] sm:$0xff]  }
 0x14b   : > { %v21297_v2 = vpop.permute.xlu1 %3425 }
 0x14c   : > { %v3435_v22 = vsel %vm24610_vm14, %v21284_v61, %v21297_v2 }
 0x14d   : > { %v21307_v4 = vpop.permute.xlu0 %3429 }
 0x14f   : > { %15935 = vmatmul.mubr.msk.bf16.vlgmr.msra.gmra.mrb[0].mxu0 %vm415_vm1, %v19711_v47  ;;  %15936 = vmatmul.mubr.msk.bf16.vlgmr.msra.gmra.mrb[0].mxu1 %vm415_vm1, %v19711_v47  ;;  %v3428_v5 = vpop.permute.xlu1 %3427 }
 0x150   : > { %18802 = vmatpush3.bf16.msra.mxu1 %v21125_v10  ;;  %2734 = vmatpush1.bf16.msra.mxu0 %v2721_v49  ;;  %v3437_v39 = vsel %vm24610_vm14, %v3428_v5, %v21307_v4  ;;  %v3436_v44 = vsel %vm24610_vm14, %v21297_v2, %v3428_v5 }
 0x151   : > { %18803 = vmatprep.mubr.msk.bf16.mxu1 %vm20414_vm3, %v20413_v14  ;;  %2776 = vmatprep.subr.bf16.mxu1 %v2724_v51 }
 0x152   : > { %2765 = vmatprep.mubr.bf16.mxu0 %v20399_v0  ;;  %18807 = vmatprep.subr.bf16.mxu0 %v20413_v14 }
 0x155   : > { %v21313_v9 = vpop.permute.xlu0 %3594  ;;  %v21319_v12 = vpop.permute.xlu1 %3431 }
 0x156   : > { %v3438_v53 = vsel %vm24610_vm14, %v21307_v4, %v21319_v12  ;;  %vm24621_vm14 = vcmask 252928  }
 0x157   : > { %18804 = vmatmul.mubr.msk.bf16.vlgmr.msra.gmra.mrb[28].mxu1 %vm415_vm1, %v19711_v47 }
 0x158   : > { %2777 = vmatpush1.bf16.msra.mxu1 %v2723_v54  ;;  %2808 = vmatprep.mubr.bf16.mxu1 %v20399_v0 }
 0x159   : > { %2977 = vmatprep.subr.bf16.mxu1 %v2924_v56  ;;  %v21330_v18 = vpop.permute.xlu0 %3592 }
 0x15b   : > { %15941 = vmatmul.mubr.msk.bf16.vlgmr.msra.gmra.mrb[0].mxu0 %vm415_vm1, %v19712_v55  ;;  %v3597_v20 = vpop.permute.xlu1 %3596 }
 0x15c   : > { %18808 = vmatpush3.bf16.msra.mxu0 %v21174_v24  ;;  %18809 = vmatprep.mubr.msk.bf16.mxu0 %vm20414_vm3, %v20413_v14  ;;  %v3606_v57 = vsel %vm24611_vm13, %v21313_v9, %v3597_v20 }
 0x15d   : > { %2934 = vmatprep.subr.bf16.mxu0 %v2922_v38  ;;  %v21343_v23 = vpop.permute.xlu0 %3600 }
 0x15f   : > { %15942 = vmatmul.mubr.msk.bf16.vlgmr.msra.gmra.mrb[0].mxu1 %vm415_vm1, %v19712_v55  ;;  %v3599_v24 = vpop.permute.xlu1 %3598 }
 0x160   : > { %2978 = vmatpush1.bf16.msra.mxu1 %v2923_v34  ;;  %3009 = vmatprep.mubr.bf16.mxu1 %v20399_v0  ;;  %v3608_v47 = vsel %vm24611_vm13, %v3599_v24, %v21343_v23  ;;  %v3607_v38 = vsel %vm24611_vm13, %v3597_v20, %v3599_v24  ;;  %v3605_v34 = vsel %vm24611_vm13, %v21330_v18, %v21313_v9 }
 0x161   : > { %18813 = vmatprep.subr.bf16.mxu1 %v20413_v14  ;;  %v21350_v31 = vpop.permute.xlu0 %3765 }
 0x163   : > { %18810 = vmatmul.mubr.msk.bf16.vlgmr.msra.gmra.mrb[32].mxu0 %vm415_vm1, %v19712_v55  ;;  %v3603_v37 = vpop.permute.xlu1 %3602 }
 0x164   : > { %2935 = vmatpush1.bf16.msra.mxu0 %v2921_v46  ;;  %2966 = vmatprep.mubr.bf16.mxu0 %v20399_v0  ;;  %v3609_v2 = vsel %vm24611_vm13, %v21343_v23, %v3603_v37  ;;  %vm4117_vm13 = vcmask 244736  }
 0x165   : > { %3105 = vmatprep.subr.bf16.mxu0 %v3093_v60  ;;  %v3764_v40 = vpop.permute.xlu0 %3763 }
 0x166   : > { %v3776_v4 = vsel %vm24620_vm15, %v3764_v40, %v21350_v31 }
 0x167   : > { %v3768_v42 = vpop.permute.xlu1 %3767 }
 0x168   : > { %v3777_v59 = vsel %vm24620_vm15, %v21350_v31, %v3768_v42 }
 0x169   : > { %v3772_v52 = vpop.permute.xlu0 %3771 }
 0x16b   : > { %15953 = vmatmul.mubr.msk.bf16.vlgmr.msra.gmra.mrb[0].mxu0 %vm415_vm1, %v19713_v62  ;;  %15954 = vmatmul.mubr.msk.bf16.vlgmr.msra.gmra.mrb[0].mxu1 %vm415_vm1, %v19713_v62  ;;  %v3770_v56 = vpop.permute.xlu1 %3769 }
 0x16c   : > { %18814 = vmatpush3.bf16.msra.mxu1 %v2925_v43  ;;  %3106 = vmatpush1.bf16.msra.mxu0 %v3092_v1 }
 0x16d   : > { %18815 = vmatprep.mubr.msk.bf16.mxu1 %vm20414_vm3, %v20413_v14  ;;  %3148 = vmatprep.subr.bf16.mxu1 %v3095_v3 }
 0x16e   : > { %3137 = vmatprep.mubr.bf16.mxu0 %v20399_v0  ;;  %18819 = vmatprep.subr.bf16.mxu0 %v20413_v14 }
 0x171   : > { %v21382_v58 = vpop.permute.xlu0 %3936  ;;  %v3774_v30 = vpop.permute.xlu1 %3773 }
 0x172   : > { %v539_v7 = vpop.f32.mrb[4].mxu0 }
 0x173   : > { %v18727_v10 = vpop.f32.mrb[5].mxu0  ;;  %18816 = vmatmul.mubr.msk.bf16.vlgmr.msra.gmra.mrb[32].mxu1 %vm415_vm1, %v19713_v62 }
 0x174   : > { %3149 = vmatpush1.bf16.msra.mxu1 %v3094_v6  ;;  %v542_v13 = vpop.f32.mrb[6].mxu0  ;;  %3180 = vmatprep.mubr.bf16.mxu1 %v20399_v0  ;;  %v3778_v10 = vsel %vm24620_vm15, %v3768_v42, %v3770_v56 }
 0x175   : > { %v18728_v16 = vpop.f32.mrb[7].mxu0  ;;  %3319 = vmatprep.subr.bf16.mxu1 %v3266_v8  ;;  %v3935_v46 = vpop.permute.xlu0 %3934 }
 0x176   : > { %v19718_v16 = vld [vmem:[%s24564_s1 + $0xa0] sm:$0xff]  }
 0x177   : > { %15959 = vmatmul.mubr.msk.bf16.vlgmr.msra.gmra.mrb[0].mxu0 %vm415_vm1, %v19714_v11  ;;  %v3939_v60 = vpop.permute.xlu1 %3938 }
 0x178   : > { %18820 = vmatpush3.bf16.msra.mxu0 %v3096_v15  ;;  %18821 = vmatprep.mubr.msk.bf16.mxu0 %vm20414_vm3, %v20413_v14  ;;  %v3948_v23 = vsel %vm24621_vm14, %v21382_v58, %v3939_v60 }
 0x179   : > { %3276 = vmatprep.subr.bf16.mxu0 %v3264_v17  ;;  %v21398_v1 = vpop.permute.xlu0 %3942 }
 0x17b   : > { %15960 = vmatmul.mubr.msk.bf16.vlgmr.msra.gmra.mrb[0].mxu1 %vm415_vm1, %v19714_v11  ;;  %v3941_v6 = vpop.permute.xlu1 %3940 }
 0x17c   : > { %3320 = vmatpush1.bf16.msra.mxu1 %v3265_v19  ;;  %3351 = vmatprep.mubr.bf16.mxu1 %v20399_v0  ;;  %v3950_v12 = vsel %vm24621_vm14, %v3941_v6, %v21398_v1  ;;  %v3780_v19 = vsel %vm24620_vm15, %v3772_v52, %v3774_v30  ;;  %v3949_v24 = vsel %vm24621_vm14, %v3939_v60, %v3941_v6  ;;  %v19721_v6 = vld [vmem:[%s24564_s1 + $0xb8] sm:$0xff]  }
 0x17d   : > { %18825 = vmatprep.subr.bf16.mxu1 %v20413_v14  ;;  %v4108_v8 = vpop.permute.xlu0 %4107 }
 0x17f   : > { %18822 = vmatmul.mubr.msk.bf16.vlgmr.msra.gmra.mrb[36].mxu0 %vm415_vm1, %v19714_v11  ;;  %v3945_v9 = vpop.permute.xlu1 %3944 }
 0x180   : > { %3277 = vmatpush1.bf16.msra.mxu0 %v3263_v21  ;;  %3308 = vmatprep.mubr.bf16.mxu0 %v20399_v0 }
 0x181   : > { %3447 = vmatprep.subr.bf16.mxu0 %v3435_v22  ;;  %v4106_v18 = vpop.permute.xlu0 %4105 }
 0x182   : > { %v679_v25 = vpop.f32.mrb[4].mxu1 }
 0x183   : > { %v680_v26 = vadd.f32 %v679_v25, %v539_v7  ;;  %v18733_v27 = vpop.f32.mrb[5].mxu1  ;;  %v3779_v7 = vsel %vm24620_vm15, %v3770_v56, %v3772_v52  ;;  %v4110_v22 = vpop.permute.xlu1 %4109  ;;  %vm24623_vm15 = vcmask 236544  }
 0x184   : > { %v682_v29 = vpop.f32.mrb[6].mxu1  ;;  %v3947_v27 = vsel %vm24621_vm14, %v3935_v46, %v21382_v58  ;;  %v19720_v58 = vld [vmem:[%s24564_s1 + $0xb0] sm:$0xff]  }
 0x185   : > { %v683_v33 = vadd.f32 %v682_v29, %v542_v13  ;;  %v18734_v36 = vpop.f32.mrb[7].mxu1  ;;  %v4114_v25 = vpop.permute.xlu0 %4113 }
 0x187   : > { %15965 = vmatmul.mubr.msk.bf16.vlgmr.msra.gmra.mrb[0].mxu0 %vm415_vm1, %v19715_v28  ;;  %15966 = vmatmul.mubr.msk.bf16.vlgmr.msra.gmra.mrb[0].mxu1 %vm415_vm1, %v19715_v28 }
 0x188   : > { %18826 = vmatpush3.bf16.msra.mxu1 %v3267_v32  ;;  %3448 = vmatpush1.bf16.msra.mxu0 %v3434_v35  ;;  %v4610_v32 = vld [vmem:[%s24565_s2] sm:$0xff] }
 0x189   : > { %18827 = vmatprep.mubr.msk.bf16.mxu1 %vm20414_vm3, %v20413_v14  ;;  %3490 = vmatprep.subr.bf16.mxu1 %v3437_v39  ;;  %v19719_v39 = vld [vmem:[%s24564_s1 + $0xa8] sm:$0xff]  }
 0x18a   : > { %3479 = vmatprep.mubr.bf16.mxu0 %v20399_v0  ;;  %18831 = vmatprep.subr.bf16.mxu0 %v20413_v14 }
 0x18b   : > { %4614 = vperm.xlu0 %19685, %v4610_v32  }
 0x18d   : > { %v4279_v29 = vpop.permute.xlu0 %4278 }
 0x18e   : > { %v837_v45 = vpop.f32.mrb[8].mxu0 }
 0x18f   : > { %v848_v48 = vadd.f32 %v837_v45, %v680_v26  ;;  %v18739_v49 = vpop.f32.mrb[9].mxu0  ;;  %18828 = vmatmul.mubr.msk.bf16.vlgmr.msra.gmra.mrb[36].mxu1 %vm415_vm1, %v19715_v28  ;;  %v4112_v26 = vpop.permute.xlu1 %4111  ;;  %v4119_v28 = vsel %vm4117_vm13, %v4108_v8, %v4110_v22 }
 0x190   : > { %3491 = vmatpush1.bf16.msra.mxu1 %v3436_v44  ;;  %v840_v51 = vpop.f32.mrb[10].mxu0  ;;  %3522 = vmatprep.mubr.bf16.mxu1 %v20399_v0  ;;  %v3951_v44 = vsel %vm24621_vm14, %v21398_v1, %v3945_v9  ;;  %vm24622_vm14 = vcmask 228352  }
 0x191   : > { %v853_v54 = vadd.f32 %v840_v51, %v683_v33  ;;  %v18740_v55 = vpop.f32.mrb[11].mxu0  ;;  %3661 = vmatprep.subr.bf16.mxu1 %v3608_v47  ;;  %v4611_v33 = vld [vmem:[%s24565_s2 + $0x8] sm:$0xff]  ;;  %v4277_v42 = vpop.permute.xlu0 %4276  ;;  %v4118_v47 = vsel %vm4117_vm13, %v4106_v18, %v4108_v8 }
 0x192   : > { %4619 = vperm.xlu1 %19686, %v4611_v33  }
 0x193   : > { %15971 = vmatmul.mubr.msk.bf16.vlgmr.msra.gmra.mrb[0].mxu0 %vm415_vm1, %v19716_v50  ;;  %v4116_v31 = vpop.permute.xlu1 %4115 }
 0x194   : > { %18832 = vmatpush3.bf16.msra.mxu0 %v3438_v53  ;;  %18833 = vmatprep.mubr.msk.bf16.mxu0 %vm20414_vm3, %v20413_v14  ;;  %v4120_v53 = vsel %vm4117_vm13, %v4110_v22, %v4112_v26  ;;  %v4122_v30 = vsel %vm4117_vm13, %v4114_v25, %v4116_v31 }
 0x195   : > { %3618 = vmatprep.subr.bf16.mxu0 %v3606_v57  ;;  %v4285_v51 = vpop.permute.xlu0 %4284 }
 0x197   : > { %15972 = vmatmul.mubr.msk.bf16.vlgmr.msra.gmra.mrb[0].mxu1 %vm415_vm1, %v19716_v50  ;;  %v4281_v49 = vpop.permute.xlu1 %4280 }
 0x198   : > { %3662 = vmatpush1.bf16.msra.mxu1 %v3607_v38  ;;  %3693 = vmatprep.mubr.bf16.mxu1 %v20399_v0  ;;  %v4290_v60 = vsel %vm24623_vm15, %v4279_v29, %v4281_v49 }
 0x199   : > { %18837 = vmatprep.subr.bf16.mxu1 %v20413_v14 }
 0x19b   : > { %18834 = vmatmul.mubr.msk.bf16.vlgmr.msra.gmra.mrb[40].mxu0 %vm415_vm1, %v19716_v50  ;;  %v4121_v50 = vsel %vm4117_vm13, %v4112_v26, %v4114_v25  ;;  %v4283_v52 = vpop.permute.xlu1 %4282 }
 0x19c   : > { %3619 = vmatpush1.bf16.msra.mxu0 %v3605_v34  ;;  %3650 = vmatprep.mubr.bf16.mxu0 %v20399_v0  ;;  %v4292_v55 = vsel %vm24623_vm15, %v4283_v52, %v4285_v51 }
 0x19d   : > { %3789 = vmatprep.subr.bf16.mxu0 %v3777_v59 }
 0x19e   : > { %v1005_v61 = vpop.f32.mrb[8].mxu1 }
 0x19f   : > { %v1016_v41 = vadd.f32 %v1005_v61, %v848_v48  ;;  %v18745_v62 = vpop.f32.mrb[9].mxu1  ;;  %v4287_v46 = vpop.permute.xlu1 %4286 }
 0x1a0   : > { %v1008_v43 = vpop.f32.mrb[10].mxu1  ;;  %v4450_v61 = vpop.permute.xlu0 %4449  ;;  %v4293_v9 = vsel %vm24623_vm15, %v4285_v51, %v4287_v46 }
 0x1a1   : > { %v1021_v3 = vadd.f32 %v1008_v43, %v853_v54  ;;  %v18746_v5 = vpop.f32.mrb[11].mxu1  ;;  %v4289_v43 = vsel %vm24623_vm15, %v4277_v42, %v4279_v29 }
 0x1a3   : > { %15977 = vmatmul.mubr.msk.bf16.vlgmr.msra.gmra.mrb[0].mxu0 %vm415_vm1, %v19717_v63  ;;  %15978 = vmatmul.mubr.msk.bf16.vlgmr.msra.gmra.mrb[0].mxu1 %vm415_vm1, %v19717_v63  ;;  %v4452_v62 = vpop.permute.xlu1 %4451 }
 0x1a4   : > { %18838 = vmatpush3.bf16.msra.mxu1 %v3609_v2  ;;  %3790 = vmatpush1.bf16.msra.mxu0 %v3776_v4  ;;  %v4461_v1 = vsel %vm24622_vm14, %v4450_v61, %v4452_v62 }
 0x1a5   : > { %18839 = vmatprep.mubr.msk.bf16.mxu1 %vm20414_vm3, %v20413_v14  ;;  %3832 = vmatprep.subr.bf16.mxu1 %v3779_v7 }
 0x1a6   : > { %3821 = vmatprep.mubr.bf16.mxu0 %v20399_v0  ;;  %18843 = vmatprep.subr.bf16.mxu0 %v20413_v14 }
 0x1a7   : > { %v4454_v7 = vpop.permute.xlu1 %4453 }
 0x1aa   : > { %v1173_v11 = vpop.f32.mrb[12].mxu0 }
 0x1ab   : > { %v1184_v13 = vadd.f32 %v1173_v11, %v1016_v41  ;;  %v18751_v15 = vpop.f32.mrb[13].mxu0  ;;  %18840 = vmatmul.mubr.msk.bf16.vlgmr.msra.gmra.mrb[40].mxu1 %vm415_vm1, %v19717_v63  ;;  %v4291_v41 = vsel %vm24623_vm15, %v4281_v49, %v4283_v52  ;;  %v4448_v63 = vpop.permute.xlu0 %4447  ;;  %vm4681_vm15 = vcmask 293888  }
 0x1ac   : > { %3833 = vmatpush1.bf16.msra.mxu1 %v3778_v10  ;;  %v1176_v17 = vpop.f32.mrb[14].mxu0  ;;  %3864 = vmatprep.mubr.bf16.mxu1 %v20399_v0  ;;  %v4462_v15 = vsel %vm24622_vm14, %v4452_v62, %v4454_v7  ;;  %4682 = vst.msk [vmem:[#allocation2 + $0x28] sm:$0xff] %vm4681_vm15, %v20399_v0  ;;  %vm24656_vm15 = vcmask 457728  }
 0x1ad   : > { %v1189_v20 = vadd.f32 %v1176_v17, %v1021_v3  ;;  %v18752_v21 = vpop.f32.mrb[15].mxu0  ;;  %4003 = vmatprep.subr.bf16.mxu1 %v3950_v12  ;;  %v4460_v12 = vsel %vm24622_vm14, %v4448_v63, %v4450_v61  ;;  %v4458_v17 = vpop.permute.xlu1 %4457 }
 0x1af   : > { %15983 = vmatmul.mubr.msk.bf16.vlgmr.msra.gmra.mrb[0].mxu0 %vm415_vm1, %v19718_v16  ;;  %v4456_v3 = vpop.permute.xlu0 %4455 }
 0x1b0   : > { %18844 = vmatpush3.bf16.msra.mxu0 %v3780_v19  ;;  %18845 = vmatprep.mubr.msk.bf16.mxu0 %vm20414_vm3, %v20413_v14 }
 0x1b1   : > { %3960 = vmatprep.subr.bf16.mxu0 %v3948_v23 }
 0x1b3   : > { %15984 = vmatmul.mubr.msk.bf16.vlgmr.msra.gmra.mrb[0].mxu1 %vm415_vm1, %v19718_v16 }
 0x1b4   : > { %4004 = vmatpush1.bf16.msra.mxu1 %v3949_v24  ;;  %4035 = vmatprep.mubr.bf16.mxu1 %v20399_v0  ;;  %v4464_v24 = vsel %vm24622_vm14, %v4456_v3, %v4458_v17 }
 0x1b5   : > { %18849 = vmatprep.subr.bf16.mxu1 %v20413_v14 }
 0x1b7   : > { %18846 = vmatmul.mubr.msk.bf16.vlgmr.msra.gmra.mrb[44].mxu0 %vm415_vm1, %v19718_v16 }
 0x1b8   : > { %3961 = vmatpush1.bf16.msra.mxu0 %v3947_v27  ;;  %3992 = vmatprep.mubr.bf16.mxu0 %v20399_v0 }
 0x1b9   : > { %4131 = vmatprep.subr.bf16.mxu0 %v4119_v28 }
 0x1ba   : > { %v1341_v35 = vpop.f32.mrb[12].mxu1 }
 0x1bb   : > { %v1352_v36 = vadd.f32 %v1341_v35, %v1184_v13  ;;  %v18757_v37 = vpop.f32.mrb[13].mxu1  ;;  %v4463_v13 = vsel %vm24622_vm14, %v4454_v7, %v4456_v3  ;;  %vm4679_vm14 = vcmask 1048064  }
 0x1bc   : > { %v1344_v40 = vpop.f32.mrb[14].mxu1  ;;  %4680 = vst.msk [vmem:[#allocation2 + $0x20] sm:$0xff] %vm4679_vm14, %v20399_v0  ;;  %vm4692_vm14 = vcmask 523264  }
 0x1bd   : > { %v1357_v45 = vadd.f32 %v1344_v40, %v1189_v20  ;;  %v18758_v48 = vpop.f32.mrb[15].mxu1  ;;  %v19722_v20 = vld [vmem:[%s24564_s1 + $0xc0] sm:$0xff]  }
 0x1bf   : > { %15989 = vmatmul.mubr.msk.bf16.vlgmr.msra.gmra.mrb[0].mxu0 %vm415_vm1, %v19719_v39  ;;  %15990 = vmatmul.mubr.msk.bf16.vlgmr.msra.gmra.mrb[0].mxu1 %vm415_vm1, %v19719_v39 }
 0x1c0   : > { %18850 = vmatpush3.bf16.msra.mxu1 %v3951_v44  ;;  %4132 = vmatpush1.bf16.msra.mxu0 %v4118_v47 }
 0x1c1   : > { %18851 = vmatprep.mubr.msk.bf16.mxu1 %vm20414_vm3, %v20413_v14  ;;  %4174 = vmatprep.subr.bf16.mxu1 %v4121_v50 }
 0x1c2   : > { %4163 = vmatprep.mubr.bf16.mxu0 %v20399_v0  ;;  %18855 = vmatprep.subr.bf16.mxu0 %v20413_v14 }
 0x1c6   : > { %v1509_v54 = vpop.f32.mrb[16].mxu0 }
 0x1c7   : > { %v1520_v56 = vadd.f32 %v1509_v54, %v1352_v36  ;;  %v18763_v57 = vpop.f32.mrb[17].mxu0  ;;  %18852 = vmatmul.mubr.msk.bf16.vlgmr.msra.gmra.mrb[44].mxu1 %vm415_vm1, %v19719_v39 }
 0x1c8   : > { %4175 = vmatpush1.bf16.msra.mxu1 %v4120_v53  ;;  %v1512_v38 = vpop.f32.mrb[18].mxu0  ;;  %4206 = vmatprep.mubr.bf16.mxu1 %v20399_v0 }
 0x1c9   : > { %v1525_v34 = vadd.f32 %v1512_v38, %v1357_v45  ;;  %v18764_v59 = vpop.f32.mrb[19].mxu0  ;;  %4345 = vmatprep.subr.bf16.mxu1 %v4292_v55 }
 0x1cb   : > { %15995 = vmatmul.mubr.msk.bf16.vlgmr.msra.gmra.mrb[0].mxu0 %vm415_vm1, %v19720_v58 }
 0x1cc   : > { %18856 = vmatpush3.bf16.msra.mxu0 %v4122_v30  ;;  %18857 = vmatprep.mubr.msk.bf16.mxu0 %vm20414_vm3, %v20413_v14 }
 0x1cd   : > { %4302 = vmatprep.subr.bf16.mxu0 %v4290_v60 }
 0x1cf   : > { %15996 = vmatmul.mubr.msk.bf16.vlgmr.msra.gmra.mrb[0].mxu1 %vm415_vm1, %v19720_v58 }
 0x1d0   : > { %4346 = vmatpush1.bf16.msra.mxu1 %v4291_v41  ;;  %4377 = vmatprep.mubr.bf16.mxu1 %v20399_v0 }
 0x1d1   : > { %18861 = vmatprep.subr.bf16.mxu1 %v20413_v14 }
 0x1d3   : > { %18858 = vmatmul.mubr.msk.bf16.vlgmr.msra.gmra.mrb[48].mxu0 %vm415_vm1, %v19720_v58 }
 0x1d4   : > { %4303 = vmatpush1.bf16.msra.mxu0 %v4289_v43  ;;  %4334 = vmatprep.mubr.bf16.mxu0 %v20399_v0 }
 0x1d5   : > { %4473 = vmatprep.subr.bf16.mxu0 %v4461_v1 }
 0x1d6   : > { %v1677_v2 = vpop.f32.mrb[16].mxu1 }
 0x1d7   : > { %v1688_v4 = vadd.f32 %v1677_v2, %v1520_v56  ;;  %v18769_v5 = vpop.f32.mrb[17].mxu1 }
 0x1d8   : > { %v1680_v8 = vpop.f32.mrb[18].mxu1 }
 0x1d9   : > { %v1693_v10 = vadd.f32 %v1680_v8, %v1525_v34  ;;  %v18770_v11 = vpop.f32.mrb[19].mxu1 }
 0x1db   : > { %16001 = vmatmul.mubr.msk.bf16.vlgmr.msra.gmra.mrb[0].mxu0 %vm415_vm1, %v19721_v6  ;;  %16002 = vmatmul.mubr.msk.bf16.vlgmr.msra.gmra.mrb[0].mxu1 %vm415_vm1, %v19721_v6 }
 0x1dc   : > { %18862 = vmatpush3.bf16.msra.mxu1 %v4293_v9  ;;  %4474 = vmatpush1.bf16.msra.mxu0 %v4460_v12 }
 0x1dd   : > { %18863 = vmatprep.mubr.msk.bf16.mxu1 %vm20414_vm3, %v20413_v14  ;;  %4516 = vmatprep.subr.bf16.mxu1 %v4463_v13 }
 0x1de   : > { %4505 = vmatprep.mubr.bf16.mxu0 %v20399_v0  ;;  %18867 = vmatprep.subr.bf16.mxu0 %v20413_v14 }
 0x1e2   : > { %v1845_v16 = vpop.f32.mrb[20].mxu0 }
 0x1e3   : > { %v1856_v18 = vadd.f32 %v1845_v16, %v1688_v4  ;;  %v18775_v19 = vpop.f32.mrb[21].mxu0  ;;  %18864 = vmatmul.mubr.msk.bf16.vlgmr.msra.gmra.mrb[48].mxu1 %vm415_vm1, %v19721_v6 }
 0x1e4   : > { %4517 = vmatpush1.bf16.msra.mxu1 %v4462_v15  ;;  %v1848_v21 = vpop.f32.mrb[22].mxu0  ;;  %4548 = vmatprep.mubr.bf16.mxu1 %v20399_v0 }
 0x1e5   : > { %v1861_v22 = vadd.f32 %v1848_v21, %v1693_v10  ;;  %v18776_v23 = vpop.f32.mrb[23].mxu0 }
 0x1e7   : > { %16007 = vmatmul.mubr.msk.bf16.vlgmr.msra.gmra.mrb[0].mxu0 %vm415_vm1, %v19722_v20 }
 0x1e8   : > { %18868 = vmatpush3.bf16.msra.mxu0 %v4464_v24  ;;  %18869 = vmatprep.mubr.msk.bf16.mxu0 %vm20414_vm3, %v20413_v14 }
 0x1eb   : > { %16008 = vmatmul.mubr.msk.bf16.vlgmr.msra.gmra.mrb[0].mxu1 %vm415_vm1, %v19722_v20 }
 0x1ec   : > { %4768 = vmatprep.mubr.bf16.mxu1 %v20399_v0 }
 0x1ef   : > { %18870 = vmatmul.mubr.msk.bf16.vlgmr.msra.gmra.mrb[52].mxu0 %vm415_vm1, %v19722_v20 }
 0x1f0   : > { %4811 = vmatprep.mubr.bf16.mxu0 %v20399_v0 }
 0x1f2   : > { %v2013_v25 = vpop.f32.mrb[20].mxu1 }
 0x1f3   : > { %v2024_v26 = vadd.f32 %v2013_v25, %v1856_v18  ;;  %v18781_v27 = vpop.f32.mrb[21].mxu1 }
 0x1f4   : > { %v2016_v28 = vpop.f32.mrb[22].mxu1 }
 0x1f5   : > { %v2029_v29 = vadd.f32 %v2016_v28, %v1861_v22  ;;  %v18782_v31 = vpop.f32.mrb[23].mxu1 }
 0x1fe   : > { %v2181_v32 = vpop.f32.mrb[24].mxu0 }
 0x1ff   : > { %v2192_v33 = vadd.f32 %v2181_v32, %v2024_v26  ;;  %v18787_v35 = vpop.f32.mrb[25].mxu0 }
 0x200   : > { %v2184_v36 = vpop.f32.mrb[26].mxu0 }
 0x201   : > { %v2197_v37 = vadd.f32 %v2184_v36, %v2029_v29  ;;  %v18788_v39 = vpop.f32.mrb[27].mxu0 }
 0x20e   : > { %v2349_v40 = vpop.f32.mrb[24].mxu1 }
 0x20f   : > { %v2360_v42 = vadd.f32 %v2349_v40, %v2192_v33  ;;  %v18793_v44 = vpop.f32.mrb[25].mxu1 }
 0x210   : > { %v2352_v45 = vpop.f32.mrb[26].mxu1 }
 0x211   : > { %v2365_v47 = vadd.f32 %v2352_v45, %v2197_v37  ;;  %v18794_v48 = vpop.f32.mrb[27].mxu1 }
 0x21a   : > { %v2517_v49 = vpop.f32.mrb[28].mxu0 }
 0x21b   : > { %v2528_v50 = vadd.f32 %v2517_v49, %v2360_v42  ;;  %v18799_v51 = vpop.f32.mrb[29].mxu0 }
 0x21c   : > { %v2520_v52 = vpop.f32.mrb[30].mxu0 }
 0x21d   : > { %v2533_v53 = vadd.f32 %v2520_v52, %v2365_v47  ;;  %v18800_v54 = vpop.f32.mrb[31].mxu0 }
 0x22a   : > { %v2685_v55 = vpop.f32.mrb[28].mxu1 }
 0x22b   : > { %v2696_v56 = vadd.f32 %v2685_v55, %v2528_v50  ;;  %v18805_v57 = vpop.f32.mrb[29].mxu1 }
 0x22c   : > { %v2688_v58 = vpop.f32.mrb[30].mxu1 }
 0x22d   : > { %v2701_v38 = vadd.f32 %v2688_v58, %v2533_v53  ;;  %v18806_v30 = vpop.f32.mrb[31].mxu1  ;;  %v4644_v53 = vlaneseq }
 0x22f   : > { %v21500_v54 = vshrl.u32 %v4644_v53, 7 }
 0x236   : > { %v2853_v34 = vpop.f32.mrb[32].mxu0 }
 0x237   : > { %v2864_v59 = vadd.f32 %v2853_v34, %v2696_v56  ;;  %v18811_v46 = vpop.f32.mrb[33].mxu0 }
 0x238   : > { %v2856_v60 = vpop.f32.mrb[34].mxu0 }
 0x239   : > { %v2869_v61 = vadd.f32 %v2856_v60, %v2701_v38  ;;  %v18812_v41 = vpop.f32.mrb[35].mxu0  ;;  %v4615_v38 = vpop.permute.xlu0 %4614  ;;  %v4642_v60 = vld [vmem:[%s24568_s5] sm:$0x1f] }
 0x23a   : > { %v4620_v41 = vpop.permute.xlu1 %4619 }
 0x246   : > { %v3054_v62 = vpop.f32.mrb[32].mxu1 }
 0x247   : > { %v3065_v63 = vadd.f32 %v3054_v62, %v2864_v59  ;;  %v18817_v43 = vpop.f32.mrb[33].mxu1  ;;  %v4646_v59 = vsub.s32 0, %v21500_v54 }
 0x248   : > { %v3057_v1 = vpop.f32.mrb[34].mxu1 }
 0x249   : > { %v3070_v2 = vadd.f32 %v3057_v1, %v2869_v61  ;;  %v18818_v3 = vpop.f32.mrb[35].mxu1  ;;  %v4650_v61 = vsub.s32 1, %v21500_v54 }
 0x24a   : > { %v4658_v3 = vsub.s32 3, %v21500_v54 }
 0x252   : > { %v3225_v4 = vpop.f32.mrb[36].mxu0 }
 0x253   : > { %v3236_v5 = vadd.f32 %v3225_v4, %v3065_v63  ;;  %v18823_v6 = vpop.f32.mrb[37].mxu0 }
 0x254   : > { %v3228_v7 = vpop.f32.mrb[38].mxu0 }
 0x255   : > { %v3241_v8 = vadd.f32 %v3228_v7, %v3070_v2  ;;  %v18824_v9 = vpop.f32.mrb[39].mxu0  ;;  %v4654_v2 = vsub.s32 2, %v21500_v54 }
 0x256   : > { %v4651_v9 = vrot.slane %v4642_v60, %v4650_v61 }
 0x262   : > { %v3396_v10 = vpop.f32.mrb[36].mxu1 }
 0x263   : > { %v3407_v11 = vadd.f32 %v3396_v10, %v3236_v5  ;;  %v18829_v12 = vpop.f32.mrb[37].mxu1  ;;  %v4647_v5 = vrot.slane %v4642_v60, %v4646_v59 }
 0x264   : > { %v3399_v13 = vpop.f32.mrb[38].mxu1 }
 0x265   : > { %v3412_v15 = vadd.f32 %v3399_v13, %v3241_v8  ;;  %v18830_v16 = vpop.f32.mrb[39].mxu1 }
 0x26e   : > { %v3567_v17 = vpop.f32.mrb[40].mxu0 }
 0x26f   : > { %v3578_v18 = vadd.f32 %v3567_v17, %v3407_v11  ;;  %v18835_v19 = vpop.f32.mrb[41].mxu0  ;;  %v4655_v17 = vrot.slane %v4642_v60, %v4654_v2 }
 0x270   : > { %v3570_v20 = vpop.f32.mrb[42].mxu0  ;;  %v4659_v19 = vrot.slane %v4642_v60, %v4658_v3 }
 0x271   : > { %v3583_v21 = vadd.f32 %v3570_v20, %v3412_v15  ;;  %v18836_v22 = vpop.f32.mrb[43].mxu0 }
 0x27e   : > { %v3738_v23 = vpop.f32.mrb[40].mxu1 }
 0x27f   : > { %v3749_v24 = vadd.f32 %v3738_v23, %v3578_v18  ;;  %v18841_v25 = vpop.f32.mrb[41].mxu1 }
 0x280   : > { %v3741_v26 = vpop.f32.mrb[42].mxu1 }
 0x281   : > { %v3754_v27 = vadd.f32 %v3741_v26, %v3583_v21  ;;  %v18842_v28 = vpop.f32.mrb[43].mxu1 }
 0x28a   : > { %v3909_v29 = vpop.f32.mrb[44].mxu0 }
 0x28b   : > { %v3920_v31 = vadd.f32 %v3909_v29, %v3749_v24  ;;  %v18847_v32 = vpop.f32.mrb[45].mxu0 }
 0x28c   : > { %v3912_v33 = vpop.f32.mrb[46].mxu0 }
 0x28d   : > { %v3925_v35 = vadd.f32 %v3912_v33, %v3754_v27  ;;  %v18848_v36 = vpop.f32.mrb[47].mxu0 }
 0x28e   : > { %v4662_v36 = vsub.s32 4, %v21500_v54 }
 0x29a   : > { %v4080_v37 = vpop.f32.mrb[44].mxu1 }
 0x29b   : > { %v4091_v39 = vadd.f32 %v4080_v37, %v3920_v31  ;;  %v18853_v40 = vpop.f32.mrb[45].mxu1 }
 0x29c   : > { %v4083_v42 = vpop.f32.mrb[46].mxu1 }
 0x29d   : > { %v4096_v44 = vadd.f32 %v4083_v42, %v3925_v35  ;;  %v18854_v45 = vpop.f32.mrb[47].mxu1 }
 0x2a6   : > { %v4251_v47 = vpop.f32.mrb[48].mxu0 }
 0x2a7   : > { %v4262_v48 = vadd.f32 %v4251_v47, %v4091_v39  ;;  %v18859_v49 = vpop.f32.mrb[49].mxu0 }
 0x2a8   : > { %v4254_v50 = vpop.f32.mrb[50].mxu0 }
 0x2a9   : > { %v4267_v51 = vadd.f32 %v4254_v50, %v4096_v44  ;;  %v18860_v52 = vpop.f32.mrb[51].mxu0 }
 0x2b6   : > { %v4422_v55 = vpop.f32.mrb[48].mxu1 }
 0x2b7   : > { %v4433_v56 = vadd.f32 %v4422_v55, %v4262_v48  ;;  %v18865_v57 = vpop.f32.mrb[49].mxu1  ;;  %v4663_v55 = vrot.slane %v4642_v60, %v4662_v36 }
 0x2b8   : > { %v4425_v58 = vpop.f32.mrb[50].mxu1 }
 0x2b9   : > { %v4438_v30 = vadd.f32 %v4425_v58, %v4267_v51  ;;  %v18866_v34 = vpop.f32.mrb[51].mxu1 }
 0x2ba   : > { %v4507_v46 = vpop.f32.mrb[0].mxu0 }
 0x2bb   : > { %v4622_v62 = vadd.f32 %v4615_v38, %v4507_v46  ;;  %v4509_v63 = vpop.f32.mrb[1].mxu0 }
 0x2bc   : > { %v4623_v43 = vadd.f32 %v4615_v38, %v4509_v63  ;;  %v4511_v1 = vpop.f32.mrb[2].mxu0 }
 0x2bd   : > { %v4632_v4 = vmax.f32 %v4622_v62, 0.0  ;;  %v4627_v6 = vadd.f32 %v4620_v41, %v4511_v1  ;;  %v4513_v7 = vpop.f32.mrb[3].mxu0  ;;  %v19723_v62 = vld [vmem:[%s24566_s3 + $0x8] sm:$0xff]  }
 0x2be   : > { %v4633_v8 = vmax.f32 %v4623_v43, 0.0  ;;  %v4628_v10 = vadd.f32 %v4620_v41, %v4513_v7  ;;  %v4550_v11 = vpop.f32.mrb[0].mxu1 }
 0x2bf   : > { %v4637_v12 = vmax.f32 %v4627_v6, 0.0  ;;  %v4624_v13 = vadd.f32 %v4615_v38, %v4550_v11  ;;  %v4552_v15 = vpop.f32.mrb[1].mxu1  ;;  %v4669_v21 = vmul.f32 %v4647_v5, %v4632_v4 }
 0x2c0   : > { %v4638_v16 = vmax.f32 %v4628_v10, 0.0  ;;  %v4625_v18 = vadd.f32 %v4615_v38, %v4552_v15  ;;  %v4554_v20 = vpop.f32.mrb[2].mxu1  ;;  %v4670_v26 = vmul.f32 %v4651_v9, %v4633_v8  ;;  %v19724_v10 = vld [vmem:[%s24566_s3] sm:$0xff]  }
 0x2c1   : > { %v4674_v22 = vmul.f32 %v4647_v5, %v4637_v12  ;;  %v4634_v23 = vmax.f32 %v4624_v13, 0.0  ;;  %v4629_v24 = vadd.f32 %v4620_v41, %v4554_v20  ;;  %v4556_v25 = vpop.f32.mrb[3].mxu1 }
 0x2c2   : > { %v4675_v27 = vmul.f32 %v4651_v9, %v4638_v16  ;;  %v4635_v28 = vmax.f32 %v4625_v18, 0.0  ;;  %v4630_v29 = vadd.f32 %v4620_v41, %v4556_v25  ;;  %v4593_v31 = vpop.f32.mrb[52].mxu0  ;;  %v21697_v18 = vld [vmem:[#allocation2 + $0x28] sm:$0xff] }
 0x2c3   : > { %v21509_v32 = vpack.c.bf16 %v4674_v22, %v4669_v21  ;;  %v4639_v33 = vmax.f32 %v4629_v24, 0.0  ;;  %v4604_v35 = vadd.f32 %v4593_v31, %v4433_v56  ;;  %v18871_v37 = vpop.f32.mrb[53].mxu0  ;;  %v4671_v44 = vmul.f32 %v4655_v17, %v4634_v23  ;;  %v19725_v21 = vld [vmem:[%s24566_s3 + $0x10] sm:$0xff]  }
 0x2c4   : > { %v21512_v39 = vpack.c.bf16 %v4675_v27, %v4670_v26  ;;  %v4640_v40 = vmax.f32 %v4630_v29, 0.0  ;;  %v4596_v42 = vpop.f32.mrb[54].mxu0  ;;  %v4672_v50 = vmul.f32 %v4659_v19, %v4635_v28 }
 0x2c5   : > { %v4676_v45 = vmul.f32 %v4655_v17, %v4639_v33  ;;  %v4626_v47 = vadd.f32 %v4615_v38, %v4604_v35  ;;  %v4609_v48 = vadd.f32 %v4596_v42, %v4438_v30  ;;  %v18872_v49 = vpop.f32.mrb[55].mxu0  ;;  %v19726_v42 = vld [vmem:[%s24566_s3 + $0x18] sm:$0xff]  }
 0x2c6   : > { %v4677_v51 = vmul.f32 %v4659_v19, %v4640_v40  ;;  %4716 = vrot.lane.b32.xlu1 %v21512_v39, %s20400_s30 }
 0x2c7   : > { %v21516_v52 = vpack.c.bf16 %v4676_v45, %v4671_v44  ;;  %v4636_v53 = vmax.f32 %v4626_v47, 0.0  ;;  %v4631_v54 = vadd.f32 %v4620_v41, %v4609_v48 }
 0x2c8   : > { %v21518_v56 = vpack.c.bf16 %v4677_v51, %v4672_v50 }
 0x2c9   : > { %v4641_v57 = vmax.f32 %v4631_v54, 0.0  ;;  %4718 = vrot.lane.b32.xlu0 %v21516_v52, %s20400_s30  ;;  %v4673_v58 = vmul.f32 %v4663_v55, %v4636_v53 }
 0x2ca   : > { %4714 = vrot.lane.b32.xlu1 %v21509_v32, %s20400_s30 }
 0x2cb   : > { %v4678_v38 = vmul.f32 %v4663_v55, %v4641_v57  ;;  %v19727_v55 = vld [vmem:[%s24566_s3 + $0x20] sm:$0xff]  }
 0x2cd   : > { %v4687_v30 = vpack.c.bf16 %v4678_v38, %v4673_v58  ;;  %4720 = vrot.lane.b32.xlu0 %v21518_v56, %s20400_s30 }
 0x2cf   : > { %4693 = vst.msk [vmem:[#allocation2 + $0x20] sm:$0xff] %vm4692_vm14, %v4687_v30 }
 0x2d1   : > { %5008 = vrot.lane.b32.xlu0 %v21512_v39, %s20401_s11 }
 0x2d5   : > { %5006 = vrot.lane.b32.xlu0 %v21509_v32, %s20401_s11 }
 0x2d6   : > { %v21531_v34 = vld [vmem:[#allocation2 + $0x20] sm:$0xff] }
 0x2d7   : > { %4722 = vrot.lane.b32.xlu1 %v21531_v34, %s20400_s30  ;;  %s24626_s30 = smov 103  }
 0x2d9   : > { %5014 = vrot.lane.b32.xlu0 %v21531_v34, %s20401_s11 }
 0x2db   : > { %5010 = vrot.lane.b32.xlu1 %v21516_v52, %s20401_s11 }
 0x2dd   : > { %5177 = vrot.lane.b32.xlu0 %v21516_v52, %s20402_s12 }
 0x2df   : > { %5012 = vrot.lane.b32.xlu1 %v21518_v56, %s20401_s11  ;;  %s24627_s11 = smov 102  }
 0x2e1   : > { %5179 = vrot.lane.b32.xlu0 %v21518_v56, %s20402_s12 }
 0x2e3   : > { %5175 = vrot.lane.b32.xlu1 %v21512_v39, %s20402_s12 }
 0x2e5   : > { %5342 = vrot.lane.b32.xlu0 %v21512_v39, %s20403_s18 }
 0x2e7   : > { %5173 = vrot.lane.b32.xlu1 %v21509_v32, %s20402_s12 }
 0x2e9   : > { %5340 = vrot.lane.b32.xlu0 %v21509_v32, %s20403_s18 }
 0x2eb   : > { %5181 = vrot.lane.b32.xlu1 %v21531_v34, %s20402_s12  ;;  %s24628_s12 = smov 101  }
 0x2ed   : > { %5348 = vrot.lane.b32.xlu0 %v21531_v34, %s20403_s18 }
 0x2ef   : > { %5344 = vrot.lane.b32.xlu1 %v21516_v52, %s20403_s18 }
 0x2f1   : > { %5511 = vrot.lane.b32.xlu0 %v21516_v52, %s20404_s20 }
 0x2f3   : > { %5346 = vrot.lane.b32.xlu1 %v21518_v56, %s20403_s18  ;;  %s24629_s18 = smov 100  }
 0x2f5   : > { %5513 = vrot.lane.b32.xlu0 %v21518_v56, %s20404_s20 }
 0x2f7   : > { %5509 = vrot.lane.b32.xlu1 %v21512_v39, %s20404_s20 }
 0x2f9   : > { %5676 = vrot.lane.b32.xlu0 %v21512_v39, %s24626_s30 }
 0x2fb   : > { %5507 = vrot.lane.b32.xlu1 %v21509_v32, %s20404_s20 }
 0x2fd   : > { %5674 = vrot.lane.b32.xlu0 %v21509_v32, %s24626_s30 }
 0x2ff   : > { %5515 = vrot.lane.b32.xlu1 %v21531_v34, %s20404_s20  ;;  %s24630_s20 = smov 80  }
 0x301   : > { %5682 = vrot.lane.b32.xlu0 %v21531_v34, %s24626_s30 }
 0x303   : > { %5678 = vrot.lane.b32.xlu1 %v21516_v52, %s24626_s30 }
 0x305   : > { %5845 = vrot.lane.b32.xlu0 %v21516_v52, %s24627_s11 }
 0x307   : > { %5680 = vrot.lane.b32.xlu1 %v21518_v56, %s24626_s30  ;;  %s24638_s30 = smov 53  }
 0x309   : > { %5847 = vrot.lane.b32.xlu0 %v21518_v56, %s24627_s11 }
 0x30b   : > { %5843 = vrot.lane.b32.xlu1 %v21512_v39, %s24627_s11 }
 0x30d   : > { %6010 = vrot.lane.b32.xlu0 %v21512_v39, %s24628_s12 }
 0x30f   : > { %5841 = vrot.lane.b32.xlu1 %v21509_v32, %s24627_s11 }
 0x311   : > { %6008 = vrot.lane.b32.xlu0 %v21509_v32, %s24628_s12 }
 0x313   : > { %5849 = vrot.lane.b32.xlu1 %v21531_v34, %s24627_s11  ;;  %s24639_s11 = smov 52  }
 0x315   : > { %6016 = vrot.lane.b32.xlu0 %v21531_v34, %s24628_s12 }
 0x317   : > { %6012 = vrot.lane.b32.xlu1 %v21516_v52, %s24628_s12 }
 0x319   : > { %6179 = vrot.lane.b32.xlu0 %v21516_v52, %s24629_s18 }
 0x31b   : > { %6014 = vrot.lane.b32.xlu1 %v21518_v56, %s24628_s12  ;;  %s24635_s12 = smov 56  }
 0x31d   : > { %6181 = vrot.lane.b32.xlu0 %v21518_v56, %s24629_s18 }
 0x31f   : > { %6177 = vrot.lane.b32.xlu1 %v21512_v39, %s24629_s18 }
 0x321   : > { %6344 = vrot.lane.b32.xlu0 %v21512_v39, %s24630_s20 }
 0x323   : > { %6175 = vrot.lane.b32.xlu1 %v21509_v32, %s24629_s18 }
 0x325   : > { %6342 = vrot.lane.b32.xlu0 %v21509_v32, %s24630_s20 }
 0x327   : > { %6183 = vrot.lane.b32.xlu1 %v21531_v34, %s24629_s18 }
 0x329   : > { %6350 = vrot.lane.b32.xlu0 %v21531_v34, %s24630_s20 }
 0x32b   : > { %6346 = vrot.lane.b32.xlu1 %v21516_v52, %s24630_s20 }
 0x32d   : > { %6513 = vrot.lane.b32.xlu0 %v21516_v52, %s24631_s26 }
 0x32f   : > { %6348 = vrot.lane.b32.xlu1 %v21518_v56, %s24630_s20  ;;  %s24640_s20 = smov 32  }
 0x331   : > { %6515 = vrot.lane.b32.xlu0 %v21518_v56, %s24631_s26 }
 0x333   : > { %6511 = vrot.lane.b32.xlu1 %v21512_v39, %s24631_s26 }
 0x335   : > { %6678 = vrot.lane.b32.xlu0 %v21512_v39, %s24632_s29 }
 0x337   : > { %6509 = vrot.lane.b32.xlu1 %v21509_v32, %s24631_s26 }
 0x338   : > { %v4717_v59 = vpop.permute.xlu1 %4716 }
 0x339   : > { %6676 = vrot.lane.b32.xlu0 %v21509_v32, %s24632_s29 }
 0x33b   : > { %6517 = vrot.lane.b32.xlu1 %v21531_v34, %s24631_s26  ;;  %v4719_v46 = vpop.permute.xlu0 %4718  ;;  %s24636_s26 = smov 55  }
 0x33c   : > { %v4715_v60 = vpop.permute.xlu1 %4714  ;;  %v4725_v61 = vsel %vm405_vm0, %v4717_v59, %v4719_v46 }
 0x33d   : > { %v4724_v41 = vsel %vm405_vm0, %v4715_v60, %v4717_v59  ;;  %4736 = vmatprep.subr.bf16.mxu1 %v4725_v61  ;;  %6684 = vrot.lane.b32.xlu0 %v21531_v34, %s24632_s29 }
 0x33e   : > { %4737 = vmatpush1.bf16.msra.mxu1 %v4724_v41 }
 0x33f   : > { %6680 = vrot.lane.b32.xlu1 %v21516_v52, %s24632_s29  ;;  %v4721_v63 = vpop.permute.xlu0 %4720  ;;  %18873 = vmatprep.subr.bf16.mxu1 %v20413_v14 }
 0x340   : > { %v4726_v4 = vsel %vm405_vm0, %v4719_v46, %v4721_v63 }
 0x341   : > { %6847 = vrot.lane.b32.xlu0 %v21516_v52, %s24633_s21  ;;  %16013 = vmatmul.mubr.msk.bf16.vlgmr.msra.gmra.mrb[52].mxu1 %vm415_vm1, %v19723_v62 }
 0x342   : > { %18875 = vmatprep.mubr.msk.bf16.mxu1 %vm20414_vm3, %v20413_v14 }
 0x343   : > { %6682 = vrot.lane.b32.xlu1 %v21518_v56, %s24632_s29  ;;  %v5009_v43 = vpop.permute.xlu0 %5008  ;;  %s17831_s29 = sshll.u32 %s20505_s17, 4  ;;  %s20428_s17 = smov [#allocation3]  }
 0x344   : > { %s20339_s18 = sshll.u32 %s20428_s17, 4  ;;  %s20340_s18 = int_to_ptr.vmem [resolvable:$false] %s20339_s18 }
 0x345   : > { %6849 = vrot.lane.b32.xlu0 %v21518_v56, %s24633_s21 }
 0x347   : > { %6845 = vrot.lane.b32.xlu1 %v21512_v39, %s24633_s21  ;;  %v5007_v1 = vpop.permute.xlu0 %5006 }
 0x348   : > { %v5016_v12 = vsel %vm704_vm2, %v5007_v1, %v5009_v43 }
 0x349   : > { %v4723_v2 = vpop.permute.xlu1 %4722  ;;  %7012 = vrot.lane.b32.xlu0 %v21512_v39, %s24634_s25 }
 0x34a   : > { %18874 = vmatpush3.bf16.msra.mxu1 %v4723_v2  ;;  %v4727_v3 = vsel %vm405_vm0, %v4721_v63, %v4723_v2  ;;  %v19728_v2 = vld [vmem:[%s24566_s3 + $0x28] sm:$0xff]   ;;  %vm24645_vm0 = vcmask 637952  }
 0x34b   : > { %6843 = vrot.lane.b32.xlu1 %v21509_v32, %s24633_s21  ;;  %4779 = vmatprep.subr.bf16.mxu0 %v4727_v3  ;;  %v5015_v5 = vpop.permute.xlu0 %5014 }
 0x34c   : > { %4871 = vmatprep.subr.bf16.mxu1 %v21512_v39  ;;  %4780 = vmatpush1.bf16.msra.mxu0 %v4726_v4 }
 0x34d   : > { %4914 = vmatprep.subr.bf16.mxu0 %v21518_v56  ;;  %v5011_v6 = vpop.permute.xlu1 %5010  ;;  %18876 = vmatmul.mubr.msk.bf16.vlgmr.msra.gmra.mrb[56].mxu1 %vm415_vm1, %v19723_v62 }
 0x34e   : > { %4872 = vmatpush1.bf16.msra.mxu1 %v21509_v32  ;;  %v5017_v7 = vsel %vm704_vm2, %v5009_v43, %v5011_v6  ;;  %7010 = vrot.lane.b32.xlu0 %v21509_v32, %s24634_s25 }
 0x34f   : > { %6851 = vrot.lane.b32.xlu1 %v21531_v34, %s24633_s21  ;;  %16014 = vmatmul.mubr.msk.bf16.vlgmr.msra.gmra.mrb[56].mxu0 %vm415_vm1, %v19723_v62  ;;  %v5178_v8 = vpop.permute.xlu0 %5177 }
 0x350   : > { %4915 = vmatpush1.bf16.msra.mxu0 %v21516_v52  ;;  %5028 = vmatprep.subr.bf16.mxu1 %v5017_v7 }
 0x351   : > { %v5013_v9 = vpop.permute.xlu1 %5012  ;;  %4903 = vmatprep.mubr.bf16.mxu1 %v20399_v0  ;;  %4946 = vmatprep.mubr.bf16.mxu0 %v20399_v0 }
 0x352   : > { %7018 = vrot.lane.b32.xlu0 %v21531_v34, %s24634_s25  ;;  %18879 = vmatprep.subr.bf16.mxu0 %v20413_v14  ;;  %v5019_v19 = vsel %vm704_vm2, %v5013_v9, %v5015_v5  ;;  %v5018_v24 = vsel %vm704_vm2, %v5011_v6, %v5013_v9  ;;  %vm24646_vm2 = vmmov %vm24645_vm0 }
 0x353   : > { %7014 = vrot.lane.b32.xlu1 %v21516_v52, %s24634_s25  ;;  %v5180_v11 = vpop.permute.xlu0 %5179 }
 0x354   : > { %v5185_v35 = vsel %vm872_vm4, %v5178_v8, %v5180_v11 }
 0x355   : > { %v5176_v13 = vpop.permute.xlu1 %5175  ;;  %16017 = vmatmul.mubr.msk.bf16.vlgmr.msra.gmra.mrb[52].mxu1 %vm415_vm1, %v19724_v10 }
 0x356   : > { %5029 = vmatpush1.bf16.msra.mxu1 %v5016_v12  ;;  %7193 = vrot.lane.b32.xlu0 %v21516_v52, %s24635_s12  ;;  %v5184_v25 = vsel %vm872_vm4, %v5176_v13, %v5178_v8 }
 0x357   : > { %7016 = vrot.lane.b32.xlu1 %v21518_v56, %s24634_s25  ;;  %v5343_v15 = vpop.permute.xlu0 %5342  ;;  %5060 = vmatprep.mubr.bf16.mxu1 %v20399_v0  ;;  %s24642_s25 = smov 30  }
 0x358   : > { %18885 = vmatprep.subr.bf16.mxu1 %v20413_v14 }
 0x359   : > { %v5174_v16 = vpop.permute.xlu1 %5173 }
 0x35a   : > { %7195 = vrot.lane.b32.xlu0 %v21518_v56, %s24635_s12  ;;  %v5183_v31 = vsel %vm872_vm4, %v5174_v16, %v5176_v13 }
 0x35b   : > { %7191 = vrot.lane.b32.xlu1 %v21512_v39, %s24635_s12  ;;  %16018 = vmatmul.mubr.msk.bf16.vlgmr.msra.gmra.mrb[56].mxu0 %vm415_vm1, %v19724_v10  ;;  %v5341_v17 = vpop.permute.xlu0 %5340 }
 0x35c   : > { %18880 = vmatpush3.bf16.msra.mxu0 %v21531_v34  ;;  %18881 = vmatprep.mubr.msk.bf16.mxu0 %vm20414_vm3, %v20413_v14  ;;  %v5350_v45 = vsel %vm1040_vm5, %v5341_v17, %v5343_v15 }
 0x35d   : > { %5071 = vmatprep.subr.bf16.mxu0 %v5019_v19  ;;  %v5182_v20 = vpop.permute.xlu1 %5181 }
 0x35e   : > { %7199 = vrot.lane.b32.xlu0 %v21697_v18, %s24635_s12  ;;  %v5186_v27 = vsel %vm872_vm4, %v5180_v11, %v5182_v20  ;;  %v19729_v11 = vld [vmem:[%s24566_s3 + $0x30] sm:$0xff]   ;;  %vm24647_vm4 = vmmov %vm24645_vm0 }
 0x35f   : > { %7189 = vrot.lane.b32.xlu1 %v21509_v32, %s24635_s12  ;;  %v21710_v22 = vpop.permute.xlu0 %5348 }
 0x361   : > { %v21712_v23 = vpop.permute.xlu1 %5344  ;;  %16023 = vmatmul.mubr.msk.bf16.vlgmr.msra.gmra.mrb[52].mxu1 %vm415_vm1, %v19725_v21 }
 0x362   : > { %18886 = vmatpush3.bf16.msra.mxu1 %v5015_v5  ;;  %7363 = vrot.lane.b32.xlu0 %v21516_v52, %s24636_s26  ;;  %v5351_v36 = vsel %vm1040_vm5, %v5343_v15, %v21712_v23 }
 0x363   : > { %7197 = vrot.lane.b32.xlu1 %v21531_v34, %s24635_s12  ;;  %18882 = vmatmul.mubr.msk.bf16.vlgmr.msra.gmra.mrb[60].mxu0 %vm415_vm1, %v19724_v10  ;;  %v21722_v26 = vpop.permute.xlu0 %5511  ;;  %s24643_s12 = smov 29  }
 0x364   : > { %5072 = vmatpush1.bf16.msra.mxu0 %v5018_v24  ;;  %5195 = vmatprep.subr.bf16.mxu1 %v5184_v25 }
 0x365   : > { %5238 = vmatprep.subr.bf16.mxu0 %v5186_v27  ;;  %v5347_v28 = vpop.permute.xlu1 %5346  ;;  %5103 = vmatprep.mubr.bf16.mxu0 %v20399_v0  ;;  %v19730_v27 = vld [vmem:[%s24566_s3 + $0x38] sm:$0xff]  }
 0x366   : > { %18887 = vmatprep.mubr.msk.bf16.mxu1 %vm20414_vm3, %v20413_v14  ;;  %7365 = vrot.lane.b32.xlu0 %v21518_v56, %s24636_s26  ;;  %v5353_v51 = vsel %vm1040_vm5, %v5347_v28, %v21710_v22  ;;  %v5352_v58 = vsel %vm1040_vm5, %v21712_v23, %v5347_v28  ;;  %vm24648_vm5 = vcmask 629760  }
 0x367   : > { %7361 = vrot.lane.b32.xlu1 %v21512_v39, %s24636_s26  ;;  %v21732_v29 = vpop.permute.xlu0 %5513 }
 0x368   : > { %v5519_v62 = vsel %vm1208_vm6, %v21722_v26, %v21732_v29 }
 0x369   : > { %v5510_v33 = vpop.permute.xlu1 %5509  ;;  %18888 = vmatmul.mubr.msk.bf16.vlgmr.msra.gmra.mrb[60].mxu1 %vm415_vm1, %v19725_v21 }
 0x36a   : > { %5196 = vmatpush1.bf16.msra.mxu1 %v5183_v31  ;;  %7369 = vrot.lane.b32.xlu0 %v21697_v18, %s24636_s26  ;;  %v5518_v38 = vsel %vm1208_vm6, %v5510_v33, %v21722_v26 }
 0x36b   : > { %7359 = vrot.lane.b32.xlu1 %v21509_v32, %s24636_s26  ;;  %16024 = vmatmul.mubr.msk.bf16.vlgmr.msra.gmra.mrb[56].mxu0 %vm415_vm1, %v19725_v21  ;;  %v21744_v37 = vpop.permute.xlu0 %5676 }
 0x36c   : > { %5239 = vmatpush1.bf16.msra.mxu0 %v5185_v35  ;;  %5362 = vmatprep.subr.bf16.mxu1 %v5351_v36 }
 0x36d   : > { %v5508_v40 = vpop.permute.xlu1 %5507  ;;  %5227 = vmatprep.mubr.bf16.mxu1 %v20399_v0  ;;  %5270 = vmatprep.mubr.bf16.mxu0 %v20399_v0 }
 0x36e   : > { %7533 = vrot.lane.b32.xlu0 %v21516_v52, %s24637_s28  ;;  %18891 = vmatprep.subr.bf16.mxu0 %v20413_v14  ;;  %v5517_v61 = vsel %vm1208_vm6, %v5508_v40, %v5510_v33 }
 0x36f   : > { %7367 = vrot.lane.b32.xlu1 %v21531_v34, %s24636_s26  ;;  %v21756_v44 = vpop.permute.xlu0 %5674  ;;  %s24644_s26 = smov 28  }
 0x370   : > { %v5684_v4 = vsel %vm1376_vm7, %v21756_v44, %v21744_v37 }
 0x371   : > { %v21759_v47 = vpop.permute.xlu1 %5515  ;;  %16029 = vmatmul.mubr.msk.bf16.vlgmr.msra.gmra.mrb[52].mxu1 %vm415_vm1, %v19726_v42 }
 0x372   : > { %5363 = vmatpush1.bf16.msra.mxu1 %v5350_v45  ;;  %7535 = vrot.lane.b32.xlu0 %v21518_v56, %s24637_s28  ;;  %v5520_v59 = vsel %vm1208_vm6, %v21732_v29, %v21759_v47  ;;  %vm24649_vm6 = vmmov %vm24645_vm0 }
 0x373   : > { %7531 = vrot.lane.b32.xlu1 %v21512_v39, %s24637_s28  ;;  %v21766_v48 = vpop.permute.xlu0 %5682  ;;  %5394 = vmatprep.mubr.bf16.mxu1 %v20399_v0 }
 0x374   : > { %18897 = vmatprep.subr.bf16.mxu1 %v20413_v14 }
 0x375   : > { %v21770_v49 = vpop.permute.xlu1 %5678 }
 0x376   : > { %7539 = vrot.lane.b32.xlu0 %v21697_v18, %s24637_s28  ;;  %v5685_v63 = vsel %vm1376_vm7, %v21744_v37, %v21770_v49  ;;  %v19731_v37 = vld [vmem:[%s24566_s3 + $0x40] sm:$0xff]  }
 0x377   : > { %7529 = vrot.lane.b32.xlu1 %v21509_v32, %s24637_s28  ;;  %16030 = vmatmul.mubr.msk.bf16.vlgmr.msra.gmra.mrb[56].mxu0 %vm415_vm1, %v19726_v42  ;;  %v21777_v50 = vpop.permute.xlu0 %5845 }
 0x378   : > { %18892 = vmatpush3.bf16.msra.mxu0 %v5182_v20  ;;  %18893 = vmatprep.mubr.msk.bf16.mxu0 %vm20414_vm3, %v20413_v14 }
 0x379   : > { %5405 = vmatprep.subr.bf16.mxu0 %v5353_v51  ;;  %v21783_v53 = vpop.permute.xlu1 %5680 }
 0x37a   : > { %7703 = vrot.lane.b32.xlu0 %v21516_v52, %s24638_s30  ;;  %v5687_v9 = vsel %vm1376_vm7, %v21783_v53, %v21766_v48  ;;  %v5686_v15 = vsel %vm1376_vm7, %v21770_v49, %v21783_v53  ;;  %vm24650_vm7 = vmmov %vm24648_vm5 }
 0x37b   : > { %7537 = vrot.lane.b32.xlu1 %v21531_v34, %s24637_s28  ;;  %v21792_v54 = vpop.permute.xlu0 %5847 }
 0x37c   : > { %v5853_v23 = vsel %vm1544_vm8, %v21777_v50, %v21792_v54 }
 0x37d   : > { %v21794_v57 = vpop.permute.xlu1 %5843  ;;  %16035 = vmatmul.mubr.msk.bf16.vlgmr.msra.gmra.mrb[52].mxu1 %vm415_vm1, %v19727_v55 }
 0x37e   : > { %18898 = vmatpush3.bf16.msra.mxu1 %v21710_v22  ;;  %7705 = vrot.lane.b32.xlu0 %v21518_v56, %s24638_s30  ;;  %v5852_v16 = vsel %vm1544_vm8, %v21794_v57, %v21777_v50 }
 0x37f   : > { %7701 = vrot.lane.b32.xlu1 %v21512_v39, %s24638_s30  ;;  %18894 = vmatmul.mubr.msk.bf16.vlgmr.msra.gmra.mrb[64].mxu0 %vm415_vm1, %v19726_v42  ;;  %v21807_v30 = vpop.permute.xlu0 %6010 }
 0x380   : > { %5406 = vmatpush1.bf16.msra.mxu0 %v5352_v58  ;;  %5529 = vmatprep.subr.bf16.mxu1 %v5518_v38 }
 0x381   : > { %5572 = vmatprep.subr.bf16.mxu0 %v5520_v59  ;;  %v21812_v46 = vpop.permute.xlu1 %5841  ;;  %5437 = vmatprep.mubr.bf16.mxu0 %v20399_v0  ;;  %v8881_v59 = vld [vmem:[%s24567_s4] sm:$0xff] }
 0x382   : > { %18899 = vmatprep.mubr.msk.bf16.mxu1 %vm20414_vm3, %v20413_v14  ;;  %7709 = vrot.lane.b32.xlu0 %v21697_v18, %s24638_s30  ;;  %v5851_v21 = vsel %vm1544_vm8, %v21812_v46, %v21794_v57  ;;  %v19732_v57 = vld [vmem:[%s24566_s3 + $0x48] sm:$0xff]  }
 0x383   : > { %7699 = vrot.lane.b32.xlu1 %v21509_v32, %s24638_s30  ;;  %v21821_v60 = vpop.permute.xlu0 %6008 }
 0x384   : > { %v6018_v28 = vsel %vm1712_vm9, %v21821_v60, %v21807_v30 }
 0x385   : > { %v21824_v41 = vpop.permute.xlu1 %5849  ;;  %18900 = vmatmul.mubr.msk.bf16.vlgmr.msra.gmra.mrb[64].mxu1 %vm415_vm1, %v19727_v55 }
 0x386   : > { %5530 = vmatpush1.bf16.msra.mxu1 %v5517_v61  ;;  %7873 = vrot.lane.b32.xlu0 %v21516_v52, %s24639_s11  ;;  %v5854_v17 = vsel %vm1544_vm8, %v21792_v54, %v21824_v41  ;;  %vm24651_vm8 = vmmov %vm24648_vm5 }
 0x387   : > { %7707 = vrot.lane.b32.xlu1 %v21531_v34, %s24638_s30  ;;  %16036 = vmatmul.mubr.msk.bf16.vlgmr.msra.gmra.mrb[56].mxu0 %vm415_vm1, %v19727_v55  ;;  %v21838_v43 = vpop.permute.xlu0 %6016  ;;  %s24520_s30 = scalar_lea.hbm %s24573_s10, %s17831_s29 }
 0x388   : > { %5573 = vmatpush1.bf16.msra.mxu0 %v5519_v62  ;;  %5696 = vmatprep.subr.bf16.mxu1 %v5685_v63 }
 0x389   : > { %v21840_v1 = vpop.permute.xlu1 %6012  ;;  %5561 = vmatprep.mubr.bf16.mxu1 %v20399_v0  ;;  %5604 = vmatprep.mubr.bf16.mxu0 %v20399_v0 }
 0x38a   : > { %7875 = vrot.lane.b32.xlu0 %v21518_v56, %s24639_s11  ;;  %18903 = vmatprep.subr.bf16.mxu0 %v20413_v14  ;;  %v6019_v24 = vsel %vm1712_vm9, %v21807_v30, %v21840_v1 }
 0x38b   : > { %7871 = vrot.lane.b32.xlu1 %v21512_v39, %s24639_s11  ;;  %v21852_v3 = vpop.permute.xlu0 %6179 }
 0x38d   : > { %v21857_v5 = vpop.permute.xlu1 %6014  ;;  %16041 = vmatmul.mubr.msk.bf16.vlgmr.msra.gmra.mrb[52].mxu1 %vm415_vm1, %v19728_v2 }
 0x38e   : > { %5697 = vmatpush1.bf16.msra.mxu1 %v5684_v4  ;;  %7879 = vrot.lane.b32.xlu0 %v21697_v18, %s24639_s11  ;;  %v6021_v36 = vsel %vm1712_vm9, %v21857_v5, %v21838_v43  ;;  %v6020_v44 = vsel %vm1712_vm9, %v21840_v1, %v21857_v5  ;;  %v19734_v4 = vld [vmem:[%s24566_s3 + $0x58] sm:$0xff]   ;;  %vm24652_vm9 = vcmask 621568  }
 0x38f   : > { %7869 = vrot.lane.b32.xlu1 %v21509_v32, %s24639_s11  ;;  %v21864_v6 = vpop.permute.xlu0 %6181  ;;  %5728 = vmatprep.mubr.bf16.mxu1 %v20399_v0 }
 0x390   : > { %18909 = vmatprep.subr.bf16.mxu1 %v20413_v14  ;;  %v6187_v51 = vsel %vm1880_vm10, %v21852_v3, %v21864_v6 }
 0x391   : > { %v21868_v7 = vpop.permute.xlu1 %6177 }
 0x392   : > { %8043 = vrot.lane.b32.xlu0 %v21516_v52, %s24640_s20  ;;  %v6186_v45 = vsel %vm1880_vm10, %v21868_v7, %v21852_v3 }
 0x393   : > { %7877 = vrot.lane.b32.xlu1 %v21531_v34, %s24639_s11  ;;  %16042 = vmatmul.mubr.msk.bf16.vlgmr.msra.gmra.mrb[56].mxu0 %vm415_vm1, %v19728_v2  ;;  %v21875_v8 = vpop.permute.xlu0 %6344 }
 0x394   : > { %18904 = vmatpush3.bf16.msra.mxu0 %v21759_v47  ;;  %18905 = vmatprep.mubr.msk.bf16.mxu0 %vm20414_vm3, %v20413_v14 }
 0x395   : > { %5739 = vmatprep.subr.bf16.mxu0 %v5687_v9  ;;  %v21883_v10 = vpop.permute.xlu1 %6175 }
 0x396   : > { %8045 = vrot.lane.b32.xlu0 %v21518_v56, %s24640_s20  ;;  %v6185_v50 = vsel %vm1880_vm10, %v21883_v10, %v21868_v7 }
 0x397   : > { %8041 = vrot.lane.b32.xlu1 %v21512_v39, %s24640_s20  ;;  %v21892_v12 = vpop.permute.xlu0 %6342 }
 0x398   : > { %v6352_v58 = vsel %vm2048_vm11, %v21892_v12, %v21875_v8 }
 0x399   : > { %v21894_v13 = vpop.permute.xlu1 %6183  ;;  %16047 = vmatmul.mubr.msk.bf16.vlgmr.msra.gmra.mrb[52].mxu1 %vm415_vm1, %v19729_v11 }
 0x39a   : > { %18910 = vmatpush3.bf16.msra.mxu1 %v21766_v48  ;;  %8049 = vrot.lane.b32.xlu0 %v21697_v18, %s24640_s20  ;;  %v6188_v47 = vsel %vm1880_vm10, %v21864_v6, %v21894_v13  ;;  %vm24653_vm10 = vmmov %vm24648_vm5 }
 0x39b   : > { %8039 = vrot.lane.b32.xlu1 %v21509_v32, %s24640_s20  ;;  %18906 = vmatmul.mubr.msk.bf16.vlgmr.msra.gmra.mrb[68].mxu0 %vm415_vm1, %v19728_v2  ;;  %v21915_v20 = vpop.permute.xlu0 %6350 }
 0x39c   : > { %5740 = vmatpush1.bf16.msra.mxu0 %v5686_v15  ;;  %5863 = vmatprep.subr.bf16.mxu1 %v5852_v16 }
 0x39d   : > { %5906 = vmatprep.subr.bf16.mxu0 %v5854_v17  ;;  %v21912_v19 = vpop.permute.xlu1 %6346  ;;  %5771 = vmatprep.mubr.bf16.mxu0 %v20399_v0 }
 0x39e   : > { %18911 = vmatprep.mubr.msk.bf16.mxu1 %vm20414_vm3, %v20413_v14  ;;  %8213 = vrot.lane.b32.xlu0 %v21516_v52, %s24641_s27  ;;  %v6353_v55 = vsel %vm2048_vm11, %v21875_v8, %v21912_v19 }
 0x39f   : > { %8047 = vrot.lane.b32.xlu1 %v21531_v34, %s24640_s20  ;;  %v21940_v25 = vpop.permute.xlu0 %6513  ;;  %s20341_s20 = scalar_lea.vmem %s20340_s18, 32 }
 0x3a1   : > { %v21926_v22 = vpop.permute.xlu1 %6348  ;;  %18912 = vmatmul.mubr.msk.bf16.vlgmr.msra.gmra.mrb[68].mxu1 %vm415_vm1, %v19729_v11 }
 0x3a2   : > { %5864 = vmatpush1.bf16.msra.mxu1 %v5851_v21  ;;  %8215 = vrot.lane.b32.xlu0 %v21518_v56, %s24641_s27  ;;  %v6354_v60 = vsel %vm2048_vm11, %v21912_v19, %v21926_v22 }
 0x3a3   : > { %8211 = vrot.lane.b32.xlu1 %v21512_v39, %s24641_s27  ;;  %16048 = vmatmul.mubr.msk.bf16.vlgmr.msra.gmra.mrb[56].mxu0 %vm415_vm1, %v19729_v11  ;;  %v21959_v31 = vpop.permute.xlu0 %6515  ;;  %v19735_v11 = vld [vmem:[%s24566_s3 + $0x60] sm:$0xff]  }
 0x3a4   : > { %5907 = vmatpush1.bf16.msra.mxu0 %v5853_v23  ;;  %6030 = vmatprep.subr.bf16.mxu1 %v6019_v24  ;;  %v6521_v2 = vsel %vm2216_vm12, %v21940_v25, %v21959_v31 }
 0x3a5   : > { %v21942_v26 = vpop.permute.xlu1 %6511  ;;  %5895 = vmatprep.mubr.bf16.mxu1 %v20399_v0  ;;  %5938 = vmatprep.mubr.bf16.mxu0 %v20399_v0 }
 0x3a6   : > { %8219 = vrot.lane.b32.xlu0 %v21697_v18, %s24641_s27  ;;  %18915 = vmatprep.subr.bf16.mxu0 %v20413_v14 }
 0x3a7   : > { %8209 = vrot.lane.b32.xlu1 %v21509_v32, %s24641_s27  ;;  %v21972_v35 = vpop.permute.xlu0 %6678 }
 0x3a9   : > { %v21957_v29 = vpop.permute.xlu1 %6509  ;;  %16053 = vmatmul.mubr.msk.bf16.vlgmr.msra.gmra.mrb[52].mxu1 %vm415_vm1, %v19730_v27 }
 0x3aa   : > { %6031 = vmatpush1.bf16.msra.mxu1 %v6018_v28  ;;  %8383 = vrot.lane.b32.xlu0 %v21516_v52, %s24642_s25  ;;  %v6519_v63 = vsel %vm2216_vm12, %v21957_v29, %v21942_v26 }
 0x3ab   : > { %8217 = vrot.lane.b32.xlu1 %v21531_v34, %s24641_s27  ;;  %6062 = vmatprep.mubr.bf16.mxu1 %v20399_v0  ;;  %v21992_v42 = vpop.permute.xlu0 %6676 }
 0x3ac   : > { %18921 = vmatprep.subr.bf16.mxu1 %v20413_v14  ;;  %v6686_v6 = vsel %vm24646_vm2, %v21992_v42, %v21972_v35  ;;  %vm24658_vm2 = vmmov %vm24656_vm15 }
 0x3ad   : > { %v21968_v33 = vpop.permute.xlu1 %6517 }
 0x3ae   : > { %8385 = vrot.lane.b32.xlu0 %v21518_v56, %s24642_s25 }
 0x3af   : > { %8381 = vrot.lane.b32.xlu1 %v21512_v39, %s24642_s25  ;;  %16054 = vmatmul.mubr.msk.bf16.vlgmr.msra.gmra.mrb[56].mxu0 %vm415_vm1, %v19730_v27  ;;  %v22017_v49 = vpop.permute.xlu0 %6684 }
 0x3b0   : > { %18916 = vmatpush3.bf16.msra.mxu0 %v21824_v41  ;;  %18917 = vmatprep.mubr.msk.bf16.mxu0 %vm20414_vm3, %v20413_v14  ;;  %v6522_v41 = vsel %vm2216_vm12, %v21959_v31, %v21968_v33 }
 0x3b1   : > { %6073 = vmatprep.subr.bf16.mxu0 %v6021_v36  ;;  %v21988_v40 = vpop.permute.xlu1 %6680 }
 0x3b2   : > { %8389 = vrot.lane.b32.xlu0 %v21697_v18, %s24642_s25  ;;  %v6687_v1 = vsel %vm24645_vm0, %v21972_v35, %v21988_v40  ;;  %v19737_v35 = vld [vmem:[%s24566_s3 + $0x70] sm:$0xff]   ;;  %vm24657_vm0 = vmmov %vm24652_vm9 }
 0x3b3   : > { %8379 = vrot.lane.b32.xlu1 %v21509_v32, %s24642_s25  ;;  %v22038_v54 = vpop.permute.xlu0 %6847 }
 0x3b5   : > { %16059 = vmatmul.mubr.msk.bf16.vlgmr.msra.gmra.mrb[52].mxu1 %vm415_vm1, %v19731_v37  ;;  %v22010_v48 = vpop.permute.xlu1 %6682 }
 0x3b6   : > { %18922 = vmatpush3.bf16.msra.mxu1 %v21838_v43  ;;  %8553 = vrot.lane.b32.xlu0 %v21516_v52, %s24643_s12  ;;  %v6689_v9 = vsel %vm24647_vm4, %v22010_v48, %v22017_v49  ;;  %v6688_v15 = vsel %vm24649_vm6, %v21988_v40, %v22010_v48  ;;  %vm24659_vm4 = vmmov %vm24658_vm2 }
 0x3b7   : > { %8387 = vrot.lane.b32.xlu1 %v21531_v34, %s24642_s25  ;;  %18918 = vmatmul.mubr.msk.bf16.vlgmr.msra.gmra.mrb[72].mxu0 %vm415_vm1, %v19730_v27  ;;  %v22058_v30 = vpop.permute.xlu0 %6849  ;;  %vm24661_vm6 = vmmov %vm24658_vm2 }
 0x3b8   : > { %6074 = vmatpush1.bf16.msra.mxu0 %v6020_v44  ;;  %6197 = vmatprep.subr.bf16.mxu1 %v6186_v45  ;;  %v6855_v23 = vsel %vm24653_vm10, %v22038_v54, %v22058_v30 }
 0x3b9   : > { %6240 = vmatprep.subr.bf16.mxu0 %v6188_v47  ;;  %6105 = vmatprep.mubr.bf16.mxu0 %v20399_v0  ;;  %v22030_v53 = vpop.permute.xlu1 %6845 }
 0x3ba   : > { %18923 = vmatprep.mubr.msk.bf16.mxu1 %vm20414_vm3, %v20413_v14  ;;  %8555 = vrot.lane.b32.xlu0 %v21518_v56, %s24643_s12 }
 0x3bb   : > { %8551 = vrot.lane.b32.xlu1 %v21512_v39, %s24643_s12 }
 0x3bd   : > { %18924 = vmatmul.mubr.msk.bf16.vlgmr.msra.gmra.mrb[72].mxu1 %vm415_vm1, %v19731_v37  ;;  %v22053_v38 = vpop.permute.xlu1 %6843 }
 0x3be   : > { %6198 = vmatpush1.bf16.msra.mxu1 %v6185_v50  ;;  %8559 = vrot.lane.b32.xlu0 %v21697_v18, %s24643_s12 }
 0x3bf   : > { %8549 = vrot.lane.b32.xlu1 %v21509_v32, %s24643_s12  ;;  %16060 = vmatmul.mubr.msk.bf16.vlgmr.msra.gmra.mrb[56].mxu0 %vm415_vm1, %v19731_v37 }
 0x3c0   : > { %6241 = vmatpush1.bf16.msra.mxu0 %v6187_v51  ;;  %6364 = vmatprep.subr.bf16.mxu1 %v6353_v55  ;;  %v19738_v55 = vld [vmem:[%s24566_s3 + $0x78] sm:$0xff]  }
 0x3c1   : > { %6229 = vmatprep.mubr.bf16.mxu1 %v20399_v0  ;;  %6272 = vmatprep.mubr.bf16.mxu0 %v20399_v0 }
 0x3c2   : > { %8723 = vrot.lane.b32.xlu0 %v21516_v52, %s24644_s26  ;;  %18927 = vmatprep.subr.bf16.mxu0 %v20413_v14  ;;  %v22066_v52 = vpop.permute.xlu1 %6851 }
 0x3c3   : > { %8557 = vrot.lane.b32.xlu1 %v21531_v34, %s24643_s12  ;;  %v6856_v17 = vsel %vm24650_vm7, %v22058_v30, %v22066_v52 }
 0x3c5   : > { %16065 = vmatmul.mubr.msk.bf16.vlgmr.msra.gmra.mrb[52].mxu1 %vm415_vm1, %v19732_v57 }
 0x3c6   : > { %6365 = vmatpush1.bf16.msra.mxu1 %v6352_v58  ;;  %8725 = vrot.lane.b32.xlu0 %v21518_v56, %s24644_s26  ;;  %v8882_v56 = vld [vmem:[%s24567_s4 + $0x8] sm:$0xff]  ;;  %v22090_v46 = vpop.permute.xlu1 %7014 }
 0x3c7   : > { %8721 = vrot.lane.b32.xlu1 %v21512_v39, %s24644_s26  ;;  %6396 = vmatprep.mubr.bf16.mxu1 %v20399_v0  ;;  %v6355_v39 = vsel %vm2048_vm11, %v21926_v22, %v21915_v20  ;;  %vm24654_vm11 = vmmov %vm24652_vm9 }
 0x3c8   : > { %18933 = vmatprep.subr.bf16.mxu1 %v20413_v14 }
 0x3ca   : > { %8729 = vrot.lane.b32.xlu0 %v21697_v18, %s24644_s26  ;;  %v22080_v18 = vpop.permute.xlu0 %7012  ;;  %v22109_v62 = vpop.permute.xlu1 %7016 }
 0x3cb   : > { %8719 = vrot.lane.b32.xlu1 %v21509_v32, %s24644_s26  ;;  %16066 = vmatmul.mubr.msk.bf16.vlgmr.msra.gmra.mrb[56].mxu0 %vm415_vm1, %v19732_v57  ;;  %v19733_v32 = vld [vmem:[%s24566_s3 + $0x50] sm:$0xff]   ;;  %v7021_v22 = vsel %vm24652_vm9, %v22080_v18, %v22090_v46  ;;  %v7022_v42 = vsel %vm24657_vm0, %v22090_v46, %v22109_v62 }
 0x3cc   : > { %18928 = vmatpush3.bf16.msra.mxu0 %v21894_v13  ;;  %18929 = vmatprep.mubr.msk.bf16.mxu0 %vm20414_vm3, %v20413_v14  ;;  %v6854_v13 = vsel %vm24648_vm5, %v22030_v53, %v22038_v54  ;;  %vm24660_vm5 = vcmask 449536  }
 0x3cd   : > { %6407 = vmatprep.subr.bf16.mxu0 %v6355_v39  ;;  %vm24662_vm7 = vmmov %vm24660_vm5 }
 0x3ce   : > { %8890 = vperm.xlu0 %19685, %v8882_v56   ;;  %v22099_v61 = vpop.permute.xlu0 %7010  ;;  %v22126_v3 = vpop.permute.xlu1 %7191  ;;  %vm24665_vm10 = vmmov %vm24660_vm5 }
 0x3cf   : > { %8727 = vrot.lane.b32.xlu1 %v21531_v34, %s24644_s26  ;;  %v6520_v34 = vsel %vm2216_vm12, %v21942_v26, %v21940_v25  ;;  %v19736_v25 = vld [vmem:[%s24566_s3 + $0x68] sm:$0xff]   ;;  %v7020_v27 = vsel %vm24654_vm11, %v22099_v61, %v22080_v18  ;;  %vm24655_vm12 = vmmov %vm24652_vm9  ;;  %vm24666_vm11 = vcmask 441344   ;;  %s350_s26 = sand.u32 1, %s20389_s14  }
 0x3d0   : > { %vm24664_vm9 = vmmov %vm24660_vm5  ;;  %s351_s27 = scalar_lea.vmem [#allocation3], %s350_s26  ;;  %s15779_s11 = scalar_lea.sflag [#allocation4], %s350_s26 }
 0x3d1   : > { %16071 = vmatmul.mubr.msk.bf16.vlgmr.msra.gmra.mrb[52].mxu1 %vm415_vm1, %v19733_v32  ;;  %vm24669_vm0 = vmmov %vm24666_vm11  ;;  %s15791_s28 = sshll.u32 %s351_s27, 4  ;;  %s24522_s28 = int_to_ptr.vmem [resolvable:$true] %s15791_s28 }
 0x3d2   : > { %18934 = vmatpush3.bf16.msra.mxu1 %v21915_v20  ;;  %18935 = vmatprep.mubr.msk.bf16.mxu1 %vm20414_vm3, %v20413_v14  ;;  %v22114_v43 = vpop.permute.xlu0 %7018  ;;  %v22139_v7 = vpop.permute.xlu1 %7189  ;;  %v6853_v20 = vsel %vm24651_vm8, %v22053_v38, %v22030_v53  ;;  %vm24663_vm8 = vmmov %vm24658_vm2  ;;  %s20335_s12 = scalar_lea.vmem %s24522_s28, 16  ;;  %p20342_p0 = scmp.lt.s32.totalorder %s24522_s28, %s20340_s18 }
 0x3d3   : > { %8885 = vperm.xlu1 %19686, %v8881_v59   ;;  %18930 = vmatmul.mubr.msk.bf16.vlgmr.msra.gmra.mrb[76].mxu0 %vm415_vm1, %v19732_v57  ;;  %v7201_v48 = vsel %vm24659_vm4, %v22139_v7, %v22126_v3  ;;  %vm24671_vm4 = vmmov %vm24669_vm0  ;;  %p20336_p11 = scmp.ne.s32.totalorder %s24522_s28, %s20335_s12  ;;  %p20343_p1 = scmp.lt.s32.totalorder %s20341_s20, %s20335_s12 }
 0x3d4   : > { %6408 = vmatpush1.bf16.msra.mxu0 %v6354_v60  ;;  %6531 = vmatprep.subr.bf16.mxu1 %v6520_v34 }
 0x3d5   : > { %6574 = vmatprep.subr.bf16.mxu0 %v6522_v41  ;;  %6439 = vmatprep.mubr.bf16.mxu0 %v20399_v0  ;;  %p20337_p12 = pnand %p20336_p11, %p20522_p5  ;;  %p20344_p2 = por %p20343_p1, %p20342_p0 }
 0x3d6   : > { %v22132_v5 = vpop.permute.xlu0 %7193  ;;  %v22151_v10 = vpop.permute.xlu1 %7197 }
 0x3d7   : > { %v7202_v40 = vsel %vm24656_vm15, %v22126_v3, %v22132_v5  ;;  %vm24668_vm15 = vmmov %vm24666_vm11  ;;  %p20338_p13 = pneg %p20337_p12 }
 0x3d9   : > { %18936 = vmatmul.mubr.msk.bf16.vlgmr.msra.gmra.mrb[76].mxu1 %vm415_vm1, %v19733_v32  ;;  %p20345_p3 = pnand %p20344_p2, %p20338_p13 }
 0x3da   : > { %6532 = vmatpush1.bf16.msra.mxu1 %v6519_v63  ;;  %6563 = vmatprep.mubr.bf16.mxu1 %v20399_v0  ;;  %v22142_v8 = vpop.permute.xlu0 %7195  ;;  %v22168_v16 = vpop.permute.xlu1 %7361 }
 0x3db   : > { %16072 = vmatmul.mubr.msk.bf16.vlgmr.msra.gmra.mrb[56].mxu0 %vm415_vm1, %v19733_v32  ;;  %6698 = vmatprep.subr.bf16.mxu1 %v6687_v1  ;;  %v7204_v44 = vsel %vm24658_vm2, %v22142_v8, %v22151_v10  ;;  %v7203_v50 = vsel %vm24661_vm6, %v22132_v5, %v22142_v8  ;;  %v19739_v32 = vld [vmem:[%s24566_s3 + $0x80] sm:$0xff]   ;;  %vm24670_vm2 = vcmask 433152   ;;  %vm24673_vm6 = vmmov %vm24669_vm0 }
 0x3dc   : > { %6575 = vmatpush1.bf16.msra.mxu0 %v6521_v2  ;;  %6606 = vmatprep.mubr.bf16.mxu0 %v20399_v0 }
 0x3dd   : > { %18939 = vmatprep.subr.bf16.mxu0 %v20413_v14 }
 0x3de   : > { %v22156_v12 = vpop.permute.xlu0 %7199  ;;  %v7360_v21 = vpop.permute.xlu1 %7359 }
 0x3df   : > { %v7371_v54 = vsel %vm24662_vm7, %v7360_v21, %v22168_v16  ;;  %v7205_v38 = vsel %vm24663_vm8, %v22151_v10, %v22156_v12  ;;  %vm24674_vm7 = vmmov %vm24670_vm2 }
 0x3e0   : > { %vm24675_vm8 = vmmov %vm24670_vm2 }
 0x3e1   : > { %16077 = vmatmul.mubr.msk.bf16.vlgmr.msra.gmra.mrb[52].mxu1 %vm415_vm1, %v19734_v4 }
 0x3e2   : > { %6699 = vmatpush1.bf16.msra.mxu1 %v6686_v6  ;;  %6730 = vmatprep.mubr.bf16.mxu1 %v20399_v0  ;;  %v22175_v19 = vpop.permute.xlu0 %7363  ;;  %v22196_v26 = vpop.permute.xlu1 %7367  ;;  %v19740_v6 = vld [vmem:[%s24566_s3 + $0x88] sm:$0xff]  }
 0x3e3   : > { %18945 = vmatprep.subr.bf16.mxu1 %v20413_v14 }
 0x3e6   : > { %v22188_v24 = vpop.permute.xlu0 %7365  ;;  %v22206_v29 = vpop.permute.xlu1 %7531 }
 0x3e7   : > { %16078 = vmatmul.mubr.msk.bf16.vlgmr.msra.gmra.mrb[56].mxu0 %vm415_vm1, %v19734_v4 }
 0x3e8   : > { %18940 = vmatpush3.bf16.msra.mxu0 %v21968_v33  ;;  %18941 = vmatprep.mubr.msk.bf16.mxu0 %vm20414_vm3, %v20413_v14  ;;  %v7023_v33 = vsel %vm24655_vm12, %v22109_v62, %v22114_v43  ;;  %vm24667_vm12 = vmmov %vm24660_vm5 }
 0x3e9   : > { %6741 = vmatprep.subr.bf16.mxu0 %v6689_v9  ;;  %v7373_v41 = vsel %vm24667_vm12, %v22175_v19, %v22188_v24 }
 0x3ea   : > { %v22201_v28 = vpop.permute.xlu0 %7369  ;;  %v22220_v36 = vpop.permute.xlu1 %7529 }
 0x3eb   : > { %v7375_v60 = vsel %vm24665_vm10, %v22196_v26, %v22201_v28  ;;  %v7541_v1 = vsel %vm24669_vm0, %v22220_v36, %v22206_v29  ;;  %vm24677_vm10 = vmmov %vm24670_vm2 }
 0x3ed   : > { %16083 = vmatmul.mubr.msk.bf16.vlgmr.msra.gmra.mrb[52].mxu1 %vm415_vm1, %v19735_v11 }
 0x3ee   : > { %18946 = vmatpush3.bf16.msra.mxu1 %v22017_v49  ;;  %18947 = vmatprep.mubr.msk.bf16.mxu1 %vm20414_vm3, %v20413_v14  ;;  %v22208_v31 = vpop.permute.xlu0 %7533  ;;  %v22239_v45 = vpop.permute.xlu1 %7537  ;;  %v7372_v49 = vsel %vm24660_vm5, %v22168_v16, %v22175_v19  ;;  %vm24672_vm5 = vmmov %vm24670_vm2 }
 0x3ef   : > { %18942 = vmatmul.mubr.msk.bf16.vlgmr.msra.gmra.mrb[80].mxu0 %vm415_vm1, %v19734_v4  ;;  %6865 = vmatprep.subr.bf16.mxu1 %v6854_v13  ;;  %v7542_v34 = vsel %vm24666_vm11, %v22206_v29, %v22208_v31 }
 0x3f0   : > { %6742 = vmatpush1.bf16.msra.mxu0 %v6688_v15  ;;  %6773 = vmatprep.mubr.bf16.mxu0 %v20399_v0 }
 0x3f1   : > { %6908 = vmatprep.subr.bf16.mxu0 %v6856_v17 }
 0x3f2   : > { %v22222_v37 = vpop.permute.xlu0 %7535  ;;  %v7702_v51 = vpop.permute.xlu1 %7701 }
 0x3f3   : > { %v7544_v63 = vsel %vm24668_vm15, %v22222_v37, %v22239_v45  ;;  %v7543_v4 = vsel %vm24671_vm4, %v22208_v31, %v22222_v37  ;;  %vm24680_vm15 = vcmask 261120  }
 0x3f5   : > { %18948 = vmatmul.mubr.msk.bf16.vlgmr.msra.gmra.mrb[80].mxu1 %vm415_vm1, %v19735_v11 }
 0x3f6   : > { %6866 = vmatpush1.bf16.msra.mxu1 %v6853_v20  ;;  %6897 = vmatprep.mubr.bf16.mxu1 %v20399_v0  ;;  %v22241_v47 = vpop.permute.xlu0 %7539  ;;  %v7700_v57 = vpop.permute.xlu1 %7699 }
 0x3f7   : > { %16084 = vmatmul.mubr.msk.bf16.vlgmr.msra.gmra.mrb[56].mxu0 %vm415_vm1, %v19735_v11  ;;  %7032 = vmatprep.subr.bf16.mxu1 %v7021_v22  ;;  %v7711_v8 = vsel %vm24672_vm5, %v7700_v57, %v7702_v51  ;;  %v7545_v19 = vsel %vm24673_vm6, %v22239_v45, %v22241_v47 }
 0x3f8   : > { %6909 = vmatpush1.bf16.msra.mxu0 %v6855_v23  ;;  %6940 = vmatprep.mubr.bf16.mxu0 %v20399_v0 }
 0x3f9   : > { %18951 = vmatprep.subr.bf16.mxu0 %v20413_v14 }
 0x3fa   : > { %v22256_v53 = vpop.permute.xlu0 %7703  ;;  %v22272_v30 = vpop.permute.xlu1 %7707 }
 0x3fb   : > { %v7712_v3 = vsel %vm24670_vm2, %v7702_v51, %v22256_v53  ;;  %vm24682_vm2 = vmmov %vm24680_vm15 }
 0x3fc   : > { %vm24684_vm5 = vmmov %vm24682_vm2 }
 0x3fd   : > { %16089 = vmatmul.mubr.msk.bf16.vlgmr.msra.gmra.mrb[52].mxu1 %vm415_vm1, %v19736_v25  ;;  %vm24685_vm6 = vmmov %vm24682_vm2 }
 0x3fe   : > { %7033 = vmatpush1.bf16.msra.mxu1 %v7020_v27  ;;  %7064 = vmatprep.mubr.bf16.mxu1 %v20399_v0  ;;  %v22266_v58 = vpop.permute.xlu0 %7705  ;;  %v22288_v61 = vpop.permute.xlu1 %7871 }
 0x3ff   : > { %18957 = vmatprep.subr.bf16.mxu1 %v20413_v14  ;;  %v7714_v20 = vsel %vm24674_vm7, %v22266_v58, %v22272_v30  ;;  %vm24686_vm7 = vcmask 252928  }
 0x402   : > { %v22280_v39 = vpop.permute.xlu0 %7709 }
 0x403   : > { %16090 = vmatmul.mubr.msk.bf16.vlgmr.msra.gmra.mrb[56].mxu0 %vm415_vm1, %v19736_v25  ;;  %v7715_v31 = vsel %vm24675_vm8, %v22272_v30, %v22280_v39  ;;  %vm24687_vm8 = vmmov %vm24682_vm2 }
 0x404   : > { %18952 = vmatpush3.bf16.msra.mxu0 %v22066_v52  ;;  %18953 = vmatprep.mubr.msk.bf16.mxu0 %vm20414_vm3, %v20413_v14  ;;  %v7374_v52 = vsel %vm24664_vm9, %v22188_v24, %v22196_v26  ;;  %vm24676_vm9 = vcmask 424960  }
 0x405   : > { %7075 = vmatprep.subr.bf16.mxu0 %v7023_v33  ;;  %vm24678_vm11 = vmmov %vm24676_vm9 }
 0x406   : > { %v22299_v62 = vpop.permute.xlu0 %7873  ;;  %vm24679_vm12 = vmmov %vm24676_vm9 }
 0x407   : > { %v7882_v33 = vsel %vm24676_vm9, %v22288_v61, %v22299_v62  ;;  %vm24681_vm0 = vmmov %vm24676_vm9 }
 0x408   : > { %vm24683_vm4 = vmmov %vm24681_vm0 }
 0x409   : > { %16095 = vmatmul.mubr.msk.bf16.vlgmr.msra.gmra.mrb[52].mxu1 %vm415_vm1, %v19737_v35  ;;  %vm24688_vm9 = vmmov %vm24686_vm7 }
 0x40a   : > { %18958 = vmatpush3.bf16.msra.mxu1 %v22114_v43  ;;  %18959 = vmatprep.mubr.msk.bf16.mxu1 %vm20414_vm3, %v20413_v14  ;;  %v7870_v43 = vpop.permute.xlu1 %7869  ;;  %v22309_v2 = vpop.permute.xlu0 %7875 }
 0x40b   : > { %18954 = vmatmul.mubr.msk.bf16.vlgmr.msra.gmra.mrb[84].mxu0 %vm415_vm1, %v19736_v25  ;;  %7214 = vmatprep.subr.bf16.mxu1 %v7202_v40  ;;  %v19741_v25 = vld [vmem:[%s24566_s3 + $0x90] sm:$0xff]   ;;  %v7883_v47 = vsel %vm24681_vm0, %v22299_v62, %v22309_v2 }
 0x40c   : > { %7076 = vmatpush1.bf16.msra.mxu0 %v7022_v42  ;;  %7107 = vmatprep.mubr.bf16.mxu0 %v20399_v0  ;;  %v7881_v42 = vsel %vm24679_vm12, %v7870_v43, %v22288_v61  ;;  %vm24691_vm12 = vmmov %vm24686_vm7 }
 0x40d   : > { %7257 = vmatprep.subr.bf16.mxu0 %v7204_v44 }
 0x40e   : > { %v22320_v5 = vpop.permute.xlu1 %7877  ;;  %v22326_v7 = vpop.permute.xlu0 %7879 }
 0x40f   : > { %v7884_v37 = vsel %vm24678_vm11, %v22309_v2, %v22320_v5  ;;  %vm24690_vm11 = vmmov %vm24686_vm7 }
 0x411   : > { %18960 = vmatmul.mubr.msk.bf16.vlgmr.msra.gmra.mrb[84].mxu1 %vm415_vm1, %v19737_v35 }
 0x412   : > { %7215 = vmatpush1.bf16.msra.mxu1 %v7201_v48  ;;  %7246 = vmatprep.mubr.bf16.mxu1 %v20399_v0  ;;  %v8042_v10 = vpop.permute.xlu1 %8041  ;;  %v22332_v15 = vpop.permute.xlu0 %8043 }
 0x413   : > { %16096 = vmatmul.mubr.msk.bf16.vlgmr.msra.gmra.mrb[56].mxu0 %vm415_vm1, %v19737_v35  ;;  %7384 = vmatprep.subr.bf16.mxu1 %v7372_v49  ;;  %v7713_v35 = vsel %vm24677_vm10, %v22256_v53, %v22266_v58  ;;  %v8052_v45 = vsel %vm24680_vm15, %v8042_v10, %v22332_v15  ;;  %v19742_v49 = vld [vmem:[%s24566_s3 + $0x98] sm:$0xff]   ;;  %vm24689_vm10 = vmmov %vm24686_vm7  ;;  %vm24692_vm15 = vcmask 236544  }
 0x414   : > { %7258 = vmatpush1.bf16.msra.mxu0 %v7203_v50  ;;  %7289 = vmatprep.mubr.bf16.mxu0 %v20399_v0  ;;  %vm24693_vm0 = vmmov %vm24692_vm15 }
 0x415   : > { %18963 = vmatprep.subr.bf16.mxu0 %v20413_v14 }
 0x416   : > { %v8040_v22 = vpop.permute.xlu1 %8039  ;;  %v22346_v27 = vpop.permute.xlu0 %8045 }
 0x417   : > { %v8051_v51 = vsel %vm24682_vm2, %v8040_v22, %v8042_v10  ;;  %v8053_v2 = vsel %vm24687_vm8, %v22332_v15, %v22346_v27  ;;  %vm24694_vm2 = vmmov %vm24693_vm0 }
 0x419   : > { %16101 = vmatmul.mubr.msk.bf16.vlgmr.msra.gmra.mrb[52].mxu1 %vm415_vm1, %v19738_v55 }
 0x41a   : > { %7385 = vmatpush1.bf16.msra.mxu1 %v7371_v54  ;;  %7416 = vmatprep.mubr.bf16.mxu1 %v20399_v0  ;;  %v8048_v36 = vpop.permute.xlu1 %8047  ;;  %v8050_v40 = vpop.permute.xlu0 %8049 }
 0x41b   : > { %18969 = vmatprep.subr.bf16.mxu1 %v20413_v14 }
 0x41e   : > { %v8212_v44 = vpop.permute.xlu1 %8211  ;;  %v8214_v48 = vpop.permute.xlu0 %8213 }
 0x41f   : > { %16102 = vmatmul.mubr.msk.bf16.vlgmr.msra.gmra.mrb[56].mxu0 %vm415_vm1, %v19738_v55 }
 0x420   : > { %18964 = vmatpush3.bf16.msra.mxu0 %v7205_v38  ;;  %18965 = vmatprep.mubr.msk.bf16.mxu0 %vm20414_vm3, %v20413_v14  ;;  %v4856_v56 = vpop.f32.mrb[56].mxu1 }
 0x421   : > { %7427 = vmatprep.subr.bf16.mxu0 %v7374_v52  ;;  %v18877_v18 = vpop.f32.mrb[57].mxu1 }
 0x422   : > { %v4859_v59 = vpop.f32.mrb[58].mxu1  ;;  %v8210_v50 = vpop.permute.xlu1 %8209  ;;  %v8054_v18 = vsel %vm24684_vm5, %v22346_v27, %v8048_v36 }
 0x423   : > { %v18878_v46 = vpop.f32.mrb[59].mxu1  ;;  %v8216_v53 = vpop.permute.xlu0 %8215 }
 0x425   : > { %16107 = vmatmul.mubr.msk.bf16.vlgmr.msra.gmra.mrb[52].mxu1 %vm415_vm1, %v19739_v32 }
 0x426   : > { %18970 = vmatpush3.bf16.msra.mxu1 %v7375_v60  ;;  %18971 = vmatprep.mubr.msk.bf16.mxu1 %vm20414_vm3, %v20413_v14  ;;  %v8218_v38 = vpop.permute.xlu1 %8217  ;;  %v19743_v60 = vld [vmem:[%s24566_s3 + $0xa0] sm:$0xff]  }
 0x427   : > { %18966 = vmatmul.mubr.msk.bf16.vlgmr.msra.gmra.mrb[88].mxu0 %vm415_vm1, %v19738_v55  ;;  %7554 = vmatprep.subr.bf16.mxu1 %v7542_v34  ;;  %v8220_v39 = vpop.permute.xlu0 %8219 }
 0x428   : > { %7428 = vmatpush1.bf16.msra.mxu0 %v7373_v41  ;;  %7459 = vmatprep.mubr.bf16.mxu0 %v20399_v0 }
 0x429   : > { %7597 = vmatprep.subr.bf16.mxu0 %v7544_v63  ;;  %v8055_v63 = vsel %vm24685_vm6, %v8048_v36, %v8050_v40  ;;  %vm24698_vm6 = vmmov %vm24693_vm0 }
 0x42a   : > { %v8382_v34 = vpop.permute.xlu1 %8381 }
 0x42b   : > { %v22396_v43 = vpop.permute.xlu0 %8383 }
 0x42d   : > { %18972 = vmatmul.mubr.msk.bf16.vlgmr.msra.gmra.mrb[88].mxu1 %vm415_vm1, %v19739_v32 }
 0x42e   : > { %7555 = vmatpush1.bf16.msra.mxu1 %v7541_v1  ;;  %7586 = vmatprep.mubr.bf16.mxu1 %v20399_v0  ;;  %v8222_v1 = vsel %vm24686_vm7, %v8212_v44, %v8214_v48 }
 0x42f   : > { %16108 = vmatmul.mubr.msk.bf16.vlgmr.msra.gmra.mrb[56].mxu0 %vm415_vm1, %v19739_v32  ;;  %7724 = vmatprep.subr.bf16.mxu1 %v7712_v3  ;;  %v8224_v3 = vsel %vm24688_vm9, %v8216_v53, %v8218_v38 }
 0x430   : > { %7598 = vmatpush1.bf16.msra.mxu0 %v7543_v4  ;;  %7629 = vmatprep.mubr.bf16.mxu0 %v20399_v0  ;;  %v8380_v4 = vpop.permute.xlu1 %8379 }
 0x431   : > { %18975 = vmatprep.subr.bf16.mxu0 %v20413_v14 }
 0x435   : > { %16113 = vmatmul.mubr.msk.bf16.vlgmr.msra.gmra.mrb[52].mxu1 %vm415_vm1, %v19740_v6 }
 0x436   : > { %v4991_v9 = vpop.f32.mrb[60].mxu0  ;;  %7725 = vmatpush1.bf16.msra.mxu1 %v7711_v8  ;;  %7756 = vmatprep.mubr.bf16.mxu1 %v20399_v0  ;;  %v8223_v8 = vsel %vm24690_vm11, %v8214_v48, %v8216_v53 }
 0x437   : > { %v4992_v11 = vadd.f32 %v4991_v9, %v4856_v56  ;;  %v18883_v12 = vpop.f32.mrb[61].mxu0  ;;  %18981 = vmatprep.subr.bf16.mxu1 %v20413_v14  ;;  %v7885_v56 = vsel %vm24683_vm4, %v22320_v5, %v22326_v7  ;;  %v8386_v5 = vpop.permute.xlu0 %8385  ;;  %v8392_v7 = vsel %vm4117_vm13, %v8382_v34, %v22396_v43  ;;  %vm24695_vm4 = vcmask 228352  }
 0x438   : > { %v4994_v13 = vpop.f32.mrb[62].mxu0  ;;  %v8388_v9 = vpop.permute.xlu1 %8387  ;;  %v8391_v12 = vsel %vm4117_vm13, %v8380_v4, %v8382_v34  ;;  %vm24697_vm5 = vmmov %vm24695_vm4 }
 0x439   : > { %v4995_v16 = vadd.f32 %v4994_v13, %v4859_v59  ;;  %v18884_v17 = vpop.f32.mrb[63].mxu0  ;;  %vm24699_vm7 = vmmov %vm24695_vm4 }
 0x43a   : > { %vm24700_vm8 = vmmov %vm24695_vm4 }
 0x43b   : > { %16114 = vmatmul.mubr.msk.bf16.vlgmr.msra.gmra.mrb[56].mxu0 %vm415_vm1, %v19740_v6  ;;  %v8390_v10 = vpop.permute.xlu0 %8389  ;;  %vm24701_vm9 = vmmov %vm24695_vm4 }
 0x43c   : > { %18976 = vmatpush3.bf16.msra.mxu0 %v7545_v19  ;;  %v5148_v21 = vpop.f32.mrb[60].mxu1  ;;  %18977 = vmatprep.mubr.msk.bf16.mxu0 %vm20414_vm3, %v20413_v14  ;;  %v8552_v13 = vpop.permute.xlu1 %8551 }
 0x43d   : > { %7767 = vmatprep.subr.bf16.mxu0 %v7714_v20  ;;  %v5159_v23 = vadd.f32 %v5148_v21, %v4992_v11  ;;  %v18889_v24 = vpop.f32.mrb[61].mxu1  ;;  %v19744_v11 = vld [vmem:[%s24566_s3 + $0xa8] sm:$0xff]  }
 0x43e   : > { %v5151_v26 = vpop.f32.mrb[62].mxu1 }
 0x43f   : > { %v5164_v28 = vadd.f32 %v5151_v26, %v4995_v16  ;;  %v18890_v29 = vpop.f32.mrb[63].mxu1  ;;  %v8554_v16 = vpop.permute.xlu0 %8553 }
 0x440   : > { %v8550_v24 = vpop.permute.xlu1 %8549 }
 0x441   : > { %16119 = vmatmul.mubr.msk.bf16.vlgmr.msra.gmra.mrb[52].mxu1 %vm415_vm1, %v19741_v25 }
 0x442   : > { %18982 = vmatpush3.bf16.msra.mxu1 %v7715_v31  ;;  %18983 = vmatprep.mubr.msk.bf16.mxu1 %vm20414_vm3, %v20413_v14  ;;  %v19745_v31 = vld [vmem:[%s24566_s3 + $0xb0] sm:$0xff]  }
 0x443   : > { %18978 = vmatmul.mubr.msk.bf16.vlgmr.msra.gmra.mrb[92].mxu0 %vm415_vm1, %v19740_v6  ;;  %7894 = vmatprep.subr.bf16.mxu1 %v7882_v33  ;;  %v8221_v6 = vsel %vm24689_vm10, %v8210_v50, %v8212_v44  ;;  %v8556_v27 = vpop.permute.xlu0 %8555  ;;  %v8393_v44 = vsel %vm4117_vm13, %v22396_v43, %v8386_v5 }
 0x444   : > { %7768 = vmatpush1.bf16.msra.mxu0 %v7713_v35  ;;  %7799 = vmatprep.mubr.bf16.mxu0 %v20399_v0  ;;  %v8558_v40 = vpop.permute.xlu1 %8557 }
 0x445   : > { %7937 = vmatprep.subr.bf16.mxu0 %v7884_v37  ;;  %v8395_v37 = vsel %vm4117_vm13, %v8388_v9, %v8390_v10 }
 0x448   : > { %v8722_v48 = vpop.permute.xlu1 %8721 }
 0x449   : > { %18984 = vmatmul.mubr.msk.bf16.vlgmr.msra.gmra.mrb[92].mxu1 %vm415_vm1, %v19741_v25 }
 0x44a   : > { %7895 = vmatpush1.bf16.msra.mxu1 %v7881_v42  ;;  %7926 = vmatprep.mubr.bf16.mxu1 %v20399_v0  ;;  %v8562_v42 = vsel %vm24692_vm15, %v8552_v13, %v8554_v16 }
 0x44b   : > { %16120 = vmatmul.mubr.msk.bf16.vlgmr.msra.gmra.mrb[56].mxu0 %vm415_vm1, %v19741_v25  ;;  %8064 = vmatprep.subr.bf16.mxu1 %v8052_v45  ;;  %v8394_v25 = vsel %vm4117_vm13, %v8386_v5, %v8388_v9  ;;  %v8560_v45 = vpop.permute.xlu0 %8559  ;;  %vm24696_vm13 = vmmov %vm24693_vm0 }
 0x44c   : > { %7938 = vmatpush1.bf16.msra.mxu0 %v7883_v47  ;;  %7969 = vmatprep.mubr.bf16.mxu0 %v20399_v0  ;;  %v8564_v47 = vsel %vm24693_vm0, %v8556_v27, %v8558_v40  ;;  %v8563_v53 = vsel %vm24696_vm13, %v8554_v16, %v8556_v27 }
 0x44d   : > { %18987 = vmatprep.subr.bf16.mxu0 %v20413_v14 }
 0x44f   : > { %v8724_v50 = vpop.permute.xlu0 %8723 }
 0x451   : > { %16125 = vmatmul.mubr.msk.bf16.vlgmr.msra.gmra.mrb[52].mxu1 %vm415_vm1, %v19742_v49 }
 0x452   : > { %v5315_v55 = vpop.f32.mrb[64].mxu0  ;;  %8065 = vmatpush1.bf16.msra.mxu1 %v8051_v51  ;;  %8096 = vmatprep.mubr.bf16.mxu1 %v20399_v0  ;;  %v8732_v51 = vsel %vm24695_vm4, %v8722_v48, %v8724_v50 }
 0x453   : > { %v5326_v54 = vadd.f32 %v5315_v55, %v5159_v23  ;;  %v18895_v57 = vpop.f32.mrb[65].mxu0  ;;  %18993 = vmatprep.subr.bf16.mxu1 %v20413_v14  ;;  %v8225_v23 = vsel %vm24691_vm12, %v8218_v38, %v8220_v39  ;;  %v19746_v55 = vld [vmem:[%s24566_s3 + $0xb8] sm:$0xff]  }
 0x454   : > { %v5318_v58 = vpop.f32.mrb[66].mxu0 }
 0x455   : > { %v5331_v30 = vadd.f32 %v5318_v58, %v5164_v28  ;;  %v18896_v52 = vpop.f32.mrb[67].mxu0 }
 0x457   : > { %16126 = vmatmul.mubr.msk.bf16.vlgmr.msra.gmra.mrb[56].mxu0 %vm415_vm1, %v19742_v49 }
 0x458   : > { %18988 = vmatpush3.bf16.msra.mxu0 %v7885_v56  ;;  %v5482_v32 = vpop.f32.mrb[64].mxu1  ;;  %18989 = vmatprep.mubr.msk.bf16.mxu0 %vm20414_vm3, %v20413_v14 }
 0x459   : > { %8107 = vmatprep.subr.bf16.mxu0 %v8054_v18  ;;  %v5493_v59 = vadd.f32 %v5482_v32, %v5326_v54  ;;  %v18901_v46 = vpop.f32.mrb[65].mxu1  ;;  %v8720_v54 = vpop.permute.xlu1 %8719 }
 0x45a   : > { %v5485_v61 = vpop.f32.mrb[66].mxu1  ;;  %v8731_v57 = vsel %vm24697_vm5, %v8720_v54, %v8722_v48  ;;  %v8726_v32 = vpop.permute.xlu0 %8725  ;;  %v19760_v48 = vld [vmem:[%s24569_s6 + $0x1f0] sm:$0xff]  }
 0x45b   : > { %v5498_v41 = vadd.f32 %v5485_v61, %v5331_v30  ;;  %v18902_v62 = vpop.f32.mrb[67].mxu1 }
 0x45d   : > { %16131 = vmatmul.mubr.msk.bf16.vlgmr.msra.gmra.mrb[52].mxu1 %vm415_vm1, %v19743_v60  ;;  %v8728_v56 = vpop.permute.xlu1 %8727 }
 0x45e   : > { %18994 = vmatpush3.bf16.msra.mxu1 %v8055_v63  ;;  %18995 = vmatprep.mubr.msk.bf16.mxu1 %vm20414_vm3, %v20413_v14  ;;  %v8734_v46 = vsel %vm24699_vm7, %v8726_v32, %v8728_v56  ;;  %v8730_v62 = vpop.permute.xlu0 %8729 }
 0x45f   : > { %18990 = vmatmul.mubr.msk.bf16.vlgmr.msra.gmra.mrb[96].mxu0 %vm415_vm1, %v19742_v49  ;;  %8234 = vmatprep.subr.bf16.mxu1 %v8222_v1  ;;  %v8561_v49 = vsel %vm24694_vm2, %v8550_v24, %v8552_v13 }
 0x460   : > { %8108 = vmatpush1.bf16.msra.mxu0 %v8053_v2  ;;  %8139 = vmatprep.mubr.bf16.mxu0 %v20399_v0  ;;  %v8735_v2 = vsel %vm24700_vm8, %v8728_v56, %v8730_v62  ;;  %v19765_v56 = vld [vmem:[%s24569_s6 + $0x1b8] sm:$0xff]   ;;  %v19771_v62 = vld [vmem:[%s24569_s6 + $0x150] sm:$0xff]  }
 0x461   : > { %8277 = vmatprep.subr.bf16.mxu0 %v8224_v3  ;;  %v8733_v3 = vsel %vm24701_vm9, %v8724_v50, %v8726_v32 }
 0x465   : > { %18996 = vmatmul.mubr.msk.bf16.vlgmr.msra.gmra.mrb[96].mxu1 %vm415_vm1, %v19743_v60 }
 0x466   : > { %8235 = vmatpush1.bf16.msra.mxu1 %v8221_v6  ;;  %8266 = vmatprep.mubr.bf16.mxu1 %v20399_v0 }
 0x467   : > { %16132 = vmatmul.mubr.msk.bf16.vlgmr.msra.gmra.mrb[56].mxu0 %vm415_vm1, %v19743_v60  ;;  %8404 = vmatprep.subr.bf16.mxu1 %v8392_v7 }
 0x468   : > { %8278 = vmatpush1.bf16.msra.mxu0 %v8223_v8  ;;  %8309 = vmatprep.mubr.bf16.mxu0 %v20399_v0 }
 0x469   : > { %18999 = vmatprep.subr.bf16.mxu0 %v20413_v14 }
 0x46d   : > { %16137 = vmatmul.mubr.msk.bf16.vlgmr.msra.gmra.mrb[52].mxu1 %vm415_vm1, %v19744_v11 }
 0x46e   : > { %v5649_v15 = vpop.f32.mrb[68].mxu0  ;;  %8405 = vmatpush1.bf16.msra.mxu1 %v8391_v12  ;;  %8436 = vmatprep.mubr.bf16.mxu1 %v20399_v0 }
 0x46f   : > { %v5660_v17 = vadd.f32 %v5649_v15, %v5493_v59  ;;  %v18907_v19 = vpop.f32.mrb[69].mxu0  ;;  %19005 = vmatprep.subr.bf16.mxu1 %v20413_v14  ;;  %v8565_v59 = vsel %vm24698_vm6, %v8558_v40, %v8560_v45  ;;  %v19754_v40 = vld [vmem:[%s24569_s6 + $0x170] sm:$0xff]   ;;  %v19757_v45 = vld [vmem:[%s24569_s6 + $0x1a8] sm:$0xff]  }
 0x470   : > { %v5652_v20 = vpop.f32.mrb[70].mxu0 }
 0x471   : > { %v5665_v21 = vadd.f32 %v5652_v20, %v5498_v41  ;;  %v18908_v22 = vpop.f32.mrb[71].mxu0  ;;  %v19747_v41 = vld [vmem:[%s24566_s3 + $0xc0] sm:$0xff]  }
 0x473   : > { %16138 = vmatmul.mubr.msk.bf16.vlgmr.msra.gmra.mrb[56].mxu0 %vm415_vm1, %v19744_v11 }
 0x474   : > { %19000 = vmatpush3.bf16.msra.mxu0 %v8225_v23  ;;  %v5816_v26 = vpop.f32.mrb[68].mxu1  ;;  %19001 = vmatprep.mubr.msk.bf16.mxu0 %vm20414_vm3, %v20413_v14 }
 0x475   : > { %8447 = vmatprep.subr.bf16.mxu0 %v8394_v25  ;;  %v5827_v28 = vadd.f32 %v5816_v26, %v5660_v17  ;;  %v18913_v29 = vpop.f32.mrb[69].mxu1 }
 0x476   : > { %v5819_v33 = vpop.f32.mrb[70].mxu1  ;;  %v19748_v29 = vld [vmem:[%s24569_s6 + $0x160] sm:$0xff]  }
 0x477   : > { %v5832_v35 = vadd.f32 %v5819_v33, %v5665_v21  ;;  %v18914_v36 = vpop.f32.mrb[71].mxu1  ;;  %v19750_v33 = vld [vmem:[%s24569_s6 + $0x168] sm:$0xff]  }
 0x478   : > { %v19752_v36 = vld [vmem:[%s24569_s6 + $0x1e0] sm:$0xff]  }
 0x479   : > { %16143 = vmatmul.mubr.msk.bf16.vlgmr.msra.gmra.mrb[52].mxu1 %vm415_vm1, %v19745_v31 }
 0x47a   : > { %19006 = vmatpush3.bf16.msra.mxu1 %v8395_v37  ;;  %19007 = vmatprep.mubr.msk.bf16.mxu1 %vm20414_vm3, %v20413_v14  ;;  %v19753_v37 = vld [vmem:[%s24569_s6 + $0x1a0] sm:$0xff]  }
 0x47b   : > { %19002 = vmatmul.mubr.msk.bf16.vlgmr.msra.gmra.mrb[100].mxu0 %vm415_vm1, %v19744_v11  ;;  %8574 = vmatprep.subr.bf16.mxu1 %v8562_v42  ;;  %v19756_v42 = vld [vmem:[%s24569_s6 + $0x1e8] sm:$0xff]  }
 0x47c   : > { %8448 = vmatpush1.bf16.msra.mxu0 %v8393_v44  ;;  %8479 = vmatprep.mubr.bf16.mxu0 %v20399_v0  ;;  %v19755_v44 = vld [vmem:[%s24569_s6 + $0x130] sm:$0xff]  }
 0x47d   : > { %8617 = vmatprep.subr.bf16.mxu0 %v8564_v47  ;;  %v19758_v47 = vld [vmem:[%s24569_s6 + $0x178] sm:$0xff]  }
 0x481   : > { %19008 = vmatmul.mubr.msk.bf16.vlgmr.msra.gmra.mrb[100].mxu1 %vm415_vm1, %v19745_v31 }
 0x482   : > { %8575 = vmatpush1.bf16.msra.mxu1 %v8561_v49  ;;  %8606 = vmatprep.mubr.bf16.mxu1 %v20399_v0  ;;  %v19759_v49 = vld [vmem:[%s24569_s6 + $0x138] sm:$0xff]  }
 0x483   : > { %16144 = vmatmul.mubr.msk.bf16.vlgmr.msra.gmra.mrb[56].mxu0 %vm415_vm1, %v19745_v31  ;;  %8744 = vmatprep.subr.bf16.mxu1 %v8732_v51  ;;  %v19749_v31 = vld [vmem:[%s24569_s6 + $0x120] sm:$0xff]   ;;  %v19761_v51 = vld [vmem:[%s24569_s6 + $0x1b0] sm:$0xff]  }
 0x484   : > { %8618 = vmatpush1.bf16.msra.mxu0 %v8563_v53  ;;  %8649 = vmatprep.mubr.bf16.mxu0 %v20399_v0  ;;  %v19762_v53 = vld [vmem:[%s24569_s6 + $0x180] sm:$0xff]  }
 0x485   : > { %19011 = vmatprep.subr.bf16.mxu0 %v20413_v14 }
 0x489   : > { %16149 = vmatmul.mubr.msk.bf16.vlgmr.msra.gmra.mrb[52].mxu1 %vm415_vm1, %v19746_v55 }
 0x48a   : > { %v5983_v58 = vpop.f32.mrb[72].mxu0  ;;  %8745 = vmatpush1.bf16.msra.mxu1 %v8731_v57  ;;  %8776 = vmatprep.mubr.bf16.mxu1 %v20399_v0  ;;  %v19764_v57 = vld [vmem:[%s24569_s6 + $0x1f8] sm:$0xff]  }
 0x48b   : > { %v5994_v38 = vadd.f32 %v5983_v58, %v5827_v28  ;;  %v18919_v30 = vpop.f32.mrb[73].mxu0  ;;  %19017 = vmatprep.subr.bf16.mxu1 %v20413_v14 }
 0x48c   : > { %v5986_v52 = vpop.f32.mrb[74].mxu0 }
 0x48d   : > { %v5999_v39 = vadd.f32 %v5986_v52, %v5832_v35  ;;  %v18920_v18 = vpop.f32.mrb[75].mxu0  ;;  %v19751_v35 = vld [vmem:[%s24569_s6 + $0x128] sm:$0xff]   ;;  %v19763_v52 = vld [vmem:[%s24569_s6 + $0x140] sm:$0xff]  }
 0x48f   : > { %16150 = vmatmul.mubr.msk.bf16.vlgmr.msra.gmra.mrb[56].mxu0 %vm415_vm1, %v19746_v55 }
 0x490   : > { %19012 = vmatpush3.bf16.msra.mxu0 %v8565_v59  ;;  %v6150_v60 = vpop.f32.mrb[72].mxu1  ;;  %19013 = vmatprep.mubr.msk.bf16.mxu0 %vm20414_vm3, %v20413_v14 }
 0x491   : > { %8787 = vmatprep.subr.bf16.mxu0 %v8734_v46  ;;  %v6161_v61 = vadd.f32 %v6150_v60, %v5994_v38  ;;  %v18925_v34 = vpop.f32.mrb[73].mxu1  ;;  %v19766_v46 = vld [vmem:[%s24569_s6 + $0x188] sm:$0xff]  }
 0x492   : > { %v6153_v63 = vpop.f32.mrb[74].mxu1  ;;  %v19767_v34 = vld [vmem:[%s24569_s6 + $0x148] sm:$0xff]  }
 0x493   : > { %v6166_v43 = vadd.f32 %v6153_v63, %v5999_v39  ;;  %v18926_v1 = vpop.f32.mrb[75].mxu1  ;;  %v19768_v63 = vld [vmem:[%s24569_s6 + $0x200] sm:$0xff]  }
 0x494   : > { %v19774_v1 = vld [vmem:[%s24569_s6 + $0x198] sm:$0xff]  }
 0x495   : > { %16155 = vmatmul.mubr.msk.bf16.vlgmr.msra.gmra.mrb[52].mxu1 %vm415_vm1, %v19747_v41 }
 0x496   : > { %19018 = vmatpush3.bf16.msra.mxu1 %v8735_v2  ;;  %19019 = vmatprep.mubr.msk.bf16.mxu1 %vm20414_vm3, %v20413_v14  ;;  %v19775_v2 = vld [vmem:[%s24569_s6 + $0x158] sm:$0xff]  }
 0x497   : > { %19014 = vmatmul.mubr.msk.bf16.vlgmr.msra.gmra.mrb[104].mxu0 %vm415_vm1, %v19746_v55  ;;  %17956 = vmatprep.subr.bf16.mxu1 %v19752_v36 }
 0x498   : > { %8788 = vmatpush1.bf16.msra.mxu0 %v8733_v3  ;;  %8819 = vmatprep.mubr.bf16.mxu0 %v20399_v0  ;;  %v19772_v3 = vld [vmem:[%s24569_s6 + $0x208] sm:$0xff]  }
 0x499   : > { %17934 = vmatprep.subr.bf16.mxu0 %v19748_v29 }
 0x49d   : > { %19020 = vmatmul.mubr.msk.bf16.vlgmr.msra.gmra.mrb[104].mxu1 %vm415_vm1, %v19747_v41 }
 0x49e   : > { %17957 = vmatpush3.bf16.msra.mxu1 %v19753_v37 }
 0x49f   : > { %16156 = vmatmul.mubr.msk.bf16.vlgmr.msra.gmra.mrb[56].mxu0 %vm415_vm1, %v19747_v41  ;;  %17958 = vmatprep.subr.bf16.mxu1 %v19756_v42  ;;  %v19770_v41 = vld [vmem:[%s24569_s6 + $0x190] sm:$0xff]   ;;  %vm24702_vm1 = vcmask 261120  }
 0x4a0   : > { %17935 = vmatpush3.bf16.msra.mxu0 %v19749_v31 }
 0x4a1   : > { %17936 = vmatprep.subr.bf16.mxu0 %v19750_v33 }
 0x4a2   : > { %17959 = vmatpush3.bf16.msra.mxu1 %v19757_v45 }
 0x4a3   : > { %17960 = vmatprep.subr.bf16.mxu1 %v19760_v48 }
 0x4a4   : > { %17937 = vmatpush3.bf16.msra.mxu0 %v19751_v35 }
 0x4a5   : > { %17938 = vmatprep.subr.bf16.mxu0 %v19754_v40 }
 0x4a6   : > { %v6317_v4 = vpop.f32.mrb[76].mxu0  ;;  %17961 = vmatpush3.bf16.msra.mxu1 %v19761_v51 }
 0x4a7   : > { %v6328_v5 = vadd.f32 %v6317_v4, %v6161_v61  ;;  %v18931_v6 = vpop.f32.mrb[77].mxu0  ;;  %17962 = vmatprep.subr.bf16.mxu1 %v19764_v57  ;;  %v19773_v4 = vld [vmem:[%s24569_s6 + $0x1c8] sm:$0xff]  }
 0x4a8   : > { %v6320_v7 = vpop.f32.mrb[78].mxu0  ;;  %17939 = vmatpush3.bf16.msra.mxu0 %v19755_v44  ;;  %v19777_v6 = vld [vmem:[%s24569_s6 + $0x1d0] sm:$0xff]  }
 0x4a9   : > { %v6333_v8 = vadd.f32 %v6320_v7, %v6166_v43  ;;  %v18932_v9 = vpop.f32.mrb[79].mxu0  ;;  %17940 = vmatprep.subr.bf16.mxu0 %v19758_v47  ;;  %v19769_v43 = vld [vmem:[%s24569_s6 + $0x1c0] sm:$0xff]   ;;  %v19779_v7 = vld [vmem:[%s24569_s6 + $0x218] sm:$0xff]  }
 0x4aa   : > { %17963 = vmatpush3.bf16.msra.mxu1 %v19765_v56 }
 0x4ab   : > { %17964 = vmatprep.subr.bf16.mxu1 %v19768_v63 }
 0x4ac   : > { %v6484_v10 = vpop.f32.mrb[76].mxu1  ;;  %17941 = vmatpush3.bf16.msra.mxu0 %v19759_v49 }
 0x4ad   : > { %v6495_v11 = vadd.f32 %v6484_v10, %v6328_v5  ;;  %v18937_v12 = vpop.f32.mrb[77].mxu1  ;;  %17942 = vmatprep.subr.bf16.mxu0 %v19762_v53  ;;  %v19776_v5 = vld [vmem:[%s24569_s6 + $0x210] sm:$0xff]  }
 0x4ae   : > { %v6487_v13 = vpop.f32.mrb[78].mxu1  ;;  %17965 = vmatpush3.bf16.msra.mxu1 %v19769_v43 }
 0x4af   : > { %v6500_v15 = vadd.f32 %v6487_v13, %v6333_v8  ;;  %v18938_v16 = vpop.f32.mrb[79].mxu1  ;;  %17966 = vmatprep.subr.bf16.mxu1 %v19772_v3  ;;  %v19780_v8 = vld [vmem:[%s24569_s6 + $0x1d8] sm:$0xff]   ;;  %v19782_v13 = vld [vmem:[%s24569_s6 + $0x40] sm:$0xff]  }
 0x4b0   : > { %17943 = vmatpush3.bf16.msra.mxu0 %v19763_v52 }
 0x4b1   : > { %17944 = vmatprep.subr.bf16.mxu0 %v19766_v46 }
 0x4b2   : > { %17967 = vmatpush3.bf16.msra.mxu1 %v19773_v4 }
 0x4b3   : > { %17968 = vmatprep.subr.bf16.mxu1 %v19776_v5 }
 0x4b4   : > { %17945 = vmatpush3.bf16.msra.mxu0 %v19767_v34 }
 0x4b5   : > { %17946 = vmatprep.subr.bf16.mxu0 %v19770_v41 }
 0x4b6   : > { %17969 = vmatpush3.bf16.msra.mxu1 %v19777_v6 }
 0x4b7   : > { %17970 = vmatprep.subr.bf16.mxu1 %v19779_v7 }
 0x4b8   : > { %17947 = vmatpush3.bf16.msra.mxu0 %v19771_v62 }
 0x4b9   : > { %17948 = vmatprep.subr.bf16.mxu0 %v19774_v1 }
 0x4ba   : > { %17971 = vmatpush3.bf16.msra.mxu1 %v19780_v8 }
 0x4bb   : > { %17983 = vmatprep.subr.bf16.mxu1 %v19782_v13 }
 0x4bc   : > { %17949 = vmatpush3.bf16.msra.mxu0 %v19775_v2 }
 0x4bd   : > { %19023 = vmatprep.subr.bf16.mxu0 %v20413_v14 }
 0x4c2   : > { %v6651_v17 = vpop.f32.mrb[80].mxu0 }
 0x4c3   : > { %v6662_v19 = vadd.f32 %v6651_v17, %v6495_v11  ;;  %v18943_v20 = vpop.f32.mrb[81].mxu0 }
 0x4c4   : > { %v6654_v0 = vpop.f32.mrb[82].mxu0 }
 0x4c5   : > { %v6667_v21 = vadd.f32 %v6654_v0, %v6500_v15  ;;  %v18944_v22 = vpop.f32.mrb[83].mxu0 }
 0x4c8   : > { %v6818_v23 = vpop.f32.mrb[80].mxu1 }
 0x4c9   : > { %v6829_v24 = vadd.f32 %v6818_v23, %v6662_v19  ;;  %v18949_v25 = vpop.f32.mrb[81].mxu1 }
 0x4ca   : > { %v6821_v26 = vpop.f32.mrb[82].mxu1 }
 0x4cb   : > { %v6834_v27 = vadd.f32 %v6821_v26, %v6667_v21  ;;  %v18950_v28 = vpop.f32.mrb[83].mxu1 }
 0x4de   : > { %v6985_v50 = vpop.f32.mrb[84].mxu0 }
 0x4df   : > { %v6996_v55 = vadd.f32 %v6985_v50, %v6829_v24  ;;  %v18955_v54 = vpop.f32.mrb[85].mxu0 }
 0x4e0   : > { %v6988_v58 = vpop.f32.mrb[86].mxu0 }
 0x4e1   : > { %v7001_v38 = vadd.f32 %v6988_v58, %v6834_v27  ;;  %v18956_v30 = vpop.f32.mrb[87].mxu0 }
 0x4e4   : > { %v7152_v39 = vpop.f32.mrb[84].mxu1 }
 0x4e5   : > { %v7163_v18 = vadd.f32 %v7152_v39, %v6996_v55  ;;  %v18961_v32 = vpop.f32.mrb[85].mxu1 }
 0x4e6   : > { %v7155_v59 = vpop.f32.mrb[86].mxu1 }
 0x4e7   : > { %v7168_v60 = vadd.f32 %v7155_v59, %v7001_v38  ;;  %v18962_v61 = vpop.f32.mrb[87].mxu1 }
 0x4e8   : > { %v8886_v61 = vpop.permute.xlu1 %8885 }
 0x4fa   : > { %v7334_v9 = vpop.f32.mrb[88].mxu0 }
 0x4fb   : > { %v7345_v10 = vadd.f32 %v7334_v9, %v7163_v18  ;;  %v18967_v11 = vpop.f32.mrb[89].mxu0 }
 0x4fc   : > { %v7337_v12 = vpop.f32.mrb[90].mxu0 }
 0x4fd   : > { %v7350_v15 = vadd.f32 %v7337_v12, %v7168_v60  ;;  %v18968_v16 = vpop.f32.mrb[91].mxu0 }
 0x500   : > { %v7504_v17 = vpop.f32.mrb[88].mxu1 }
 0x501   : > { %v7515_v19 = vadd.f32 %v7504_v17, %v7345_v10  ;;  %v18973_v20 = vpop.f32.mrb[89].mxu1 }
 0x502   : > { %v7507_v0 = vpop.f32.mrb[90].mxu1 }
 0x503   : > { %v7520_v21 = vadd.f32 %v7507_v0, %v7350_v15  ;;  %v18974_v22 = vpop.f32.mrb[91].mxu1  ;;  %v19778_v15 = vld [vmem:[%s24569_s6 + $0x220] sm:$0xff]  }
 0x516   : > { %v7674_v23 = vpop.f32.mrb[92].mxu0 }
 0x517   : > { %v7685_v24 = vadd.f32 %v7674_v23, %v7515_v19  ;;  %v18979_v25 = vpop.f32.mrb[93].mxu0 }
 0x518   : > { %v7677_v26 = vpop.f32.mrb[94].mxu0 }
 0x519   : > { %v7690_v27 = vadd.f32 %v7677_v26, %v7520_v21  ;;  %v18980_v28 = vpop.f32.mrb[95].mxu0 }
 0x51c   : > { %v7844_v29 = vpop.f32.mrb[92].mxu1 }
 0x51d   : > { %v7855_v31 = vadd.f32 %v7844_v29, %v7685_v24  ;;  %v18985_v33 = vpop.f32.mrb[93].mxu1 }
 0x51e   : > { %v7847_v35 = vpop.f32.mrb[94].mxu1 }
 0x51f   : > { %v7860_v36 = vadd.f32 %v7847_v35, %v7690_v27  ;;  %v18986_v37 = vpop.f32.mrb[95].mxu1  ;;  %v19781_v27 = vld [vmem:[%s24569_s6 + $0x228] sm:$0xff]  }
 0x520   : > { %v19784_v37 = vld [vmem:[%s24569_s6 + $0x230] sm:$0xff]  }
 0x532   : > { %v8014_v40 = vpop.f32.mrb[96].mxu0 }
 0x533   : > { %v8025_v42 = vadd.f32 %v8014_v40, %v7855_v31  ;;  %v18991_v44 = vpop.f32.mrb[97].mxu0 }
 0x534   : > { %v8017_v45 = vpop.f32.mrb[98].mxu0  ;;  %v19783_v44 = vld [vmem:[%s24569_s6] sm:$0xff]  }
 0x535   : > { %v8030_v47 = vadd.f32 %v8017_v45, %v7860_v36  ;;  %v18992_v48 = vpop.f32.mrb[99].mxu0 }
 0x536   : > { %v19787_v48 = vld [vmem:[%s24569_s6 + $0x238] sm:$0xff]  }
 0x538   : > { %v8184_v49 = vpop.f32.mrb[96].mxu1 }
 0x539   : > { %v8195_v50 = vadd.f32 %v8184_v49, %v8025_v42  ;;  %v18997_v51 = vpop.f32.mrb[97].mxu1 }
 0x53a   : > { %v8187_v53 = vpop.f32.mrb[98].mxu1  ;;  %v19786_v51 = vld [vmem:[%s24569_s6 + $0x8] sm:$0xff]  }
 0x53b   : > { %v8200_v55 = vadd.f32 %v8187_v53, %v8030_v47  ;;  %v18998_v54 = vpop.f32.mrb[99].mxu1  ;;  %v19785_v47 = vld [vmem:[%s24569_s6 + $0x48] sm:$0xff]   ;;  %v19788_v53 = vld [vmem:[%s24569_s6 + $0x50] sm:$0xff]  }
 0x54e   : > { %v8354_v57 = vpop.f32.mrb[100].mxu0 }
 0x54f   : > { %v8365_v58 = vadd.f32 %v8354_v57, %v8195_v50  ;;  %v19003_v38 = vpop.f32.mrb[101].mxu0  ;;  %v19790_v50 = vld [vmem:[%s24569_s6 + $0xc0] sm:$0xff]   ;;  %v19794_v57 = vld [vmem:[%s24569_s6 + $0xc8] sm:$0xff]  }
 0x550   : > { %v8357_v30 = vpop.f32.mrb[102].mxu0  ;;  %v19792_v38 = vld [vmem:[%s24569_s6 + $0x58] sm:$0xff]  }
 0x551   : > { %v8370_v52 = vadd.f32 %v8357_v30, %v8200_v55  ;;  %v19004_v56 = vpop.f32.mrb[103].mxu0  ;;  %v19791_v55 = vld [vmem:[%s24569_s6 + $0x80] sm:$0xff]   ;;  %v19795_v30 = vld [vmem:[%s24569_s6 + $0x88] sm:$0xff]  }
 0x552   : > { %v19793_v56 = vld [vmem:[%s24569_s6 + $0x18] sm:$0xff]  }
 0x554   : > { %v8524_v39 = vpop.f32.mrb[100].mxu1 }
 0x555   : > { %v8535_v18 = vadd.f32 %v8524_v39, %v8365_v58  ;;  %v19009_v32 = vpop.f32.mrb[101].mxu1  ;;  %v19789_v58 = vld [vmem:[%s24569_s6 + $0x10] sm:$0xff]   ;;  %v19796_v39 = vld [vmem:[%s24569_s6 + $0x60] sm:$0xff]  }
 0x556   : > { %v8527_v59 = vpop.f32.mrb[102].mxu1  ;;  %v19802_v32 = vld [vmem:[%s24569_s6 + $0xd8] sm:$0xff]  }
 0x557   : > { %v8540_v46 = vadd.f32 %v8527_v59, %v8370_v52  ;;  %v19010_v60 = vpop.f32.mrb[103].mxu1  ;;  %v19798_v52 = vld [vmem:[%s24569_s6 + $0xd0] sm:$0xff]   ;;  %v19797_v59 = vld [vmem:[%s24569_s6 + $0x20] sm:$0xff]  }
 0x558   : > { %v19803_v60 = vld [vmem:[%s24569_s6 + $0x98] sm:$0xff]  }
 0x568   : > { %v8778_v34 = vpop.f32.mrb[52].mxu1 }
 0x569   : > { %v8893_v41 = vadd.f32 %v8886_v61, %v8778_v34  ;;  %v8780_v62 = vpop.f32.mrb[53].mxu1  ;;  %v19801_v34 = vld [vmem:[%s24569_s6 + $0x28] sm:$0xff]  }
 0x56a   : > { %v8694_v63 = vpop.f32.mrb[104].mxu0  ;;  %v8894_v43 = vadd.f32 %v8886_v61, %v8780_v62  ;;  %v22574_v1 = vpop.f32.mrb[54].mxu1  ;;  %v19807_v62 = vld [vmem:[%s24569_s6 + $0xa0] sm:$0xff]  }
 0x56b   : > { %v8705_v2 = vadd.f32 %v8694_v63, %v8535_v18  ;;  %v19015_v3 = vpop.f32.mrb[105].mxu0  ;;  %v8903_v4 = vmax.f32 %v8893_v41, 0.0  ;;  %v22576_v5 = vpop.f32.mrb[55].mxu1  ;;  %v19799_v18 = vld [vmem:[%s24569_s6 + $0x90] sm:$0xff]   ;;  %v19810_v63 = vld [vmem:[%s24569_s6 + $0xe8] sm:$0xff]  }
 0x56c   : > { %v8697_v6 = vpop.f32.mrb[106].mxu0  ;;  %v8904_v7 = vmax.f32 %v8894_v43, 0.0  ;;  %v19804_v41 = vld [vmem:[%s24569_s6 + $0x70] sm:$0xff]   ;;  %v19811_v3 = vld [vmem:[%s24569_s6 + $0xa8] sm:$0xff]  }
 0x56d   : > { %v8710_v8 = vadd.f32 %v8697_v6, %v8540_v46  ;;  %v22578_v9 = vpack.c.bf16 %v8903_v4, %v8903_v4  ;;  %v19016_v10 = vpop.f32.mrb[107].mxu0  ;;  %v19800_v46 = vld [vmem:[%s24569_s6 + $0x68] sm:$0xff]   ;;  %v19805_v43 = vld [vmem:[%s24569_s6 + $0x30] sm:$0xff]   ;;  %v19809_v6 = vld [vmem:[%s24569_s6 + $0x38] sm:$0xff]  }
 0x56e   : > { %v22580_v11 = vpack.c.bf16 %v8904_v7, %v8904_v7  ;;  %v19813_v4 = vld [vmem:[%s24569_s6 + $0xf0] sm:$0xff]   ;;  %v19812_v10 = vld [vmem:[%s24569_s6 + $0x100] sm:$0xff]  }
 0x56f   : > { %v22589_v19 = vshrl.u32 %v22578_v9, 16  ;;  %v19814_v7 = vld [vmem:[%s24569_s6 + $0xb0] sm:$0xff]  }
 0x570   : > { %v8864_v12 = vpop.f32.mrb[104].mxu1  ;;  %v22583_v13 = vshrl.u32 %v22580_v11, 16 }
 0x571   : > { %v8875_v16 = vadd.f32 %v8864_v12, %v8705_v2  ;;  %v19021_v17 = vpop.f32.mrb[105].mxu1  ;;  %v19808_v2 = vld [vmem:[%s24569_s6 + $0x78] sm:$0xff]  }
 0x572   : > { %v8821_v20 = vpop.f32.mrb[56].mxu0  ;;  %v8867_v0 = vpop.f32.mrb[106].mxu1  ;;  %9333 = vmatprep.mubr.bf16.mxu0 %v22583_v13  ;;  %v19817_v12 = vld [vmem:[%s24569_s6 + $0xb8] sm:$0xff]   ;;  %v19820_v17 = vld [vmem:[%s24569_s6 + $0x240] sm:$0xff]  }
 0x573   : > { %v8895_v21 = vadd.f32 %v8886_v61, %v8821_v20  ;;  %v8823_v22 = vpop.f32.mrb[57].mxu0  ;;  %v22592_v23 = vadd.f32 %v8867_v0, %v8710_v8  ;;  %9334 = vmatmul.mubr.bf16.vlgmr.msra.gmra.mrb[108].mxu0 %v22589_v19  ;;  %v19022_v24 = vpop.f32.mrb[107].mxu1  ;;  %v8897_v29 = vadd.f32 %v8886_v61, %v8875_v16  ;;  %v19816_v8 = vld [vmem:[%s24569_s6 + $0xf8] sm:$0xff]   ;;  %v19815_v16 = vld [vmem:[%s24569_s6 + $0x108] sm:$0xff]   ;;  %v19818_v0 = vld [vmem:[%s24569_s6 + $0x110] sm:$0xff]  }
 0x574   : > { %v8896_v25 = vadd.f32 %v8886_v61, %v8823_v22  ;;  %v22595_v26 = vpop.f32.mrb[58].mxu0  ;;  %19024 = vmatpush3.bf16.msra.mxu0 %v19778_v15  ;;  %19031 = vmatprep.mubr.msk.bf16.mxu0 %vm20414_vm3, %v20413_v14  ;;  %v19806_v61 = vld [vmem:[%s24569_s6 + $0xe0] sm:$0xff]   ;;  %v19822_v20 = vld [vmem:[%s24569_s6 + $0x288] sm:$0xff]   ;;  %v19826_v24 = vld [vmem:[%s24569_s6 + $0x290] sm:$0xff]  }
 0x575   : > { %v8905_v28 = vmax.f32 %v8895_v21, 0.0  ;;  %v22602_v31 = vpop.f32.mrb[59].mxu0  ;;  %19025 = vmatprep.subr.bf16.mxu0 %v20413_v14  ;;  %v8907_v40 = vmax.f32 %v8897_v29, 0.0  ;;  %v19819_v15 = vld [vmem:[%s24569_s6 + $0x280] sm:$0xff]   ;;  %v9838_v21 = vrot.slane %v22580_v11, 1  ;;  %v19823_v22 = vld [vmem:[%s24569_s6 + $0x248] sm:$0xff]  }
 0x576   : > { %v8906_v33 = vmax.f32 %v8896_v25, 0.0  ;;  %v19821_v25 = vld [vmem:[%s24569_s6 + $0x118] sm:$0xff]  }
 0x577   : > { %v22605_v35 = vpack.c.bf16 %v8905_v28, %v8905_v28  ;;  %v22629_v49 = vpack.c.bf16 %v8907_v40, %v8907_v40  ;;  %v19827_v28 = vld [vmem:[%s24569_s6 + $0x250] sm:$0xff]   ;;  %v19830_v29 = vld [vmem:[%s24569_s6 + $0x298] sm:$0xff]  }
 0x578   : > { %v22607_v36 = vpack.c.bf16 %v8906_v33, %v8906_v33  ;;  %19026 = vmatpush3.bf16.msra.mxu0 %v19781_v27  ;;  %v19824_v27 = vld [vmem:[%s24569_s6 + $0x300] sm:$0xff]  }
 0x579   : > { %19027 = vmatprep.subr.bf16.mxu0 %v20413_v14  ;;  %v22620_v45 = vshrl.u32 %v22605_v35, 16  ;;  %v22647_v54 = vshrl.u32 %v22629_v49, 16  ;;  %v19825_v33 = vld [vmem:[%s24569_s6 + $0x2c0] sm:$0xff]  }
 0x57a   : > { %v22614_v42 = vshrl.u32 %v22607_v36, 16  ;;  %v9840_v40 = vrot.slane %v22607_v36, 1 }
 0x57c   : > { %9373 = vmatprep.mubr.bf16.mxu1 %v22614_v42  ;;  %19028 = vmatpush3.bf16.msra.mxu0 %v19784_v37  ;;  %v19828_v37 = vld [vmem:[%s24569_s6 + $0x308] sm:$0xff]  }
 0x57d   : > { %9374 = vmatmul.mubr.bf16.vlgmr.msra.gmra.mrb[108].mxu1 %v22620_v45  ;;  %19029 = vmatprep.subr.bf16.mxu0 %v20413_v14 }
 0x57e   : > { %17984 = vmatpush3.bf16.msra.mxu1 %v19783_v44  ;;  %9671 = vmatprep.mubr.bf16.mxu1 %v22580_v11  ;;  %v19831_v44 = vld [vmem:[%s24569_s6 + $0x258] sm:$0xff]  }
 0x57f   : > { %17985 = vmatprep.subr.bf16.mxu1 %v19785_v47  ;;  %v19834_v47 = vld [vmem:[%s24569_s6 + $0x2a0] sm:$0xff]  }
 0x580   : > { %19030 = vmatpush3.bf16.msra.mxu0 %v19787_v48  ;;  %v19829_v48 = vld [vmem:[%s24569_s6 + $0x2c8] sm:$0xff]  }
 0x581   : > { %18005 = vmatprep.subr.bf16.mxu0 %v19790_v50  ;;  %v19832_v50 = vld [vmem:[%s24569_s6 + $0x310] sm:$0xff]  }
 0x582   : > { %17986 = vmatpush3.bf16.msra.mxu1 %v19786_v51  ;;  %v19835_v51 = vld [vmem:[%s24569_s6 + $0x260] sm:$0xff]  }
 0x583   : > { %17987 = vmatprep.subr.bf16.mxu1 %v19788_v53  ;;  %19032 = vmatmul.mubr.msk.bf16.vlgmr.msra.gmra.mrb[112].mxu0 %vm4692_vm14, %v22647_v54  ;;  %v19838_v53 = vld [vmem:[%s24569_s6 + $0x2a8] sm:$0xff]  }
 0x584   : > { %18006 = vmatpush3.bf16.msra.mxu0 %v19791_v55  ;;  %9711 = vmatprep.mubr.bf16.mxu0 %v22607_v36  ;;  %v19833_v55 = vld [vmem:[%s24569_s6 + $0x2d0] sm:$0xff]  }
 0x585   : > { %18007 = vmatprep.subr.bf16.mxu0 %v19794_v57  ;;  %v19836_v57 = vld [vmem:[%s24569_s6 + $0x318] sm:$0xff]  }
 0x586   : > { %17988 = vmatpush3.bf16.msra.mxu1 %v19789_v58  ;;  %v19839_v58 = vld [vmem:[%s24569_s6 + $0x268] sm:$0xff]  }
 0x587   : > { %17989 = vmatprep.subr.bf16.mxu1 %v19792_v38  ;;  %v19842_v38 = vld [vmem:[%s24569_s6 + $0x2b0] sm:$0xff]  }
 0x588   : > { %18008 = vmatpush3.bf16.msra.mxu0 %v19795_v30  ;;  %v19837_v30 = vld [vmem:[%s24569_s6 + $0x2d8] sm:$0xff]  }
 0x589   : > { %18009 = vmatprep.subr.bf16.mxu0 %v19798_v52  ;;  %v19840_v52 = vld [vmem:[%s24569_s6 + $0x320] sm:$0xff]  }
 0x58a   : > { %17990 = vmatpush3.bf16.msra.mxu1 %v19793_v56  ;;  %v19843_v56 = vld [vmem:[%s24569_s6 + $0x270] sm:$0xff]  }
 0x58b   : > { %17991 = vmatprep.subr.bf16.mxu1 %v19796_v39  ;;  %v19846_v39 = vld [vmem:[%s24569_s6 + $0x2b8] sm:$0xff]  }
 0x58c   : > { %18010 = vmatpush3.bf16.msra.mxu0 %v19799_v18  ;;  %v19841_v18 = vld [vmem:[%s24569_s6 + $0x2e0] sm:$0xff]  }
 0x58d   : > { %18011 = vmatprep.subr.bf16.mxu0 %v19802_v32  ;;  %v19844_v32 = vld [vmem:[%s24569_s6 + $0x328] sm:$0xff]  }
 0x58e   : > { %17992 = vmatpush3.bf16.msra.mxu1 %v19797_v59  ;;  %v19847_v59 = vld [vmem:[%s24569_s6 + $0x278] sm:$0xff]  }
 0x58f   : > { %17993 = vmatprep.subr.bf16.mxu1 %v19800_v46  ;;  %v19845_v46 = vld [vmem:[%s24569_s6 + $0x2e8] sm:$0xff]  }
 0x590   : > { %18012 = vmatpush3.bf16.msra.mxu0 %v19803_v60  ;;  %v19848_v60 = vld [vmem:[%s24569_s6 + $0x330] sm:$0xff]  }
 0x591   : > { %18013 = vmatprep.subr.bf16.mxu0 %v19806_v61  ;;  %v19850_v61 = vld [vmem:[%s24569_s6 + $0x340] sm:$0xff]  }
 0x592   : > { %17994 = vmatpush3.bf16.msra.mxu1 %v19801_v34  ;;  %v9837_v34 = vrot.slane %v22578_v9, 1 }
 0x593   : > { %17995 = vmatprep.subr.bf16.mxu1 %v19804_v41  ;;  %v19849_v41 = vld [vmem:[%s24569_s6 + $0x2f0] sm:$0xff]  }
 0x594   : > { %18014 = vmatpush3.bf16.msra.mxu0 %v19807_v62  ;;  %v19851_v62 = vld [vmem:[%s24569_s6 + $0x338] sm:$0xff]  }
 0x595   : > { %18015 = vmatprep.subr.bf16.mxu0 %v19810_v63  ;;  %v19853_v63 = vld [vmem:[%s24569_s6 + $0x348] sm:$0xff]  }
 0x596   : > { %17996 = vmatpush3.bf16.msra.mxu1 %v19805_v43  ;;  %v19852_v43 = vld [vmem:[%s24569_s6 + $0x2f8] sm:$0xff]  }
 0x597   : > { %17997 = vmatprep.subr.bf16.mxu1 %v19808_v2  ;;  %v19854_v2 = vld [vmem:[%s24569_s6 + $0x3a0] sm:$0xff]  }
 0x598   : > { %18016 = vmatpush3.bf16.msra.mxu0 %v19811_v3  ;;  %v19856_v3 = vld [vmem:[%s24569_s6 + $0x350] sm:$0xff]  }
 0x599   : > { %18017 = vmatprep.subr.bf16.mxu0 %v19813_v4  ;;  %v19855_v4 = vld [vmem:[%s24569_s6 + $0x360] sm:$0xff]  }
 0x59a   : > { %17998 = vmatpush3.bf16.msra.mxu1 %v19809_v6  ;;  %v9839_v6 = vrot.slane %v22605_v35, 1 }
 0x59b   : > { %19035 = vmatprep.subr.bf16.mxu1 %v20413_v14 }
 0x59c   : > { %18018 = vmatpush3.bf16.msra.mxu0 %v19814_v7  ;;  %v19857_v7 = vld [vmem:[%s24569_s6 + $0x3a8] sm:$0xff]  }
 0x59d   : > { %9672 = vmatmul.mubr.bf16.vlgmr.msra.gmra.mrb[112].mxu1 %v22578_v9  ;;  %18019 = vmatprep.subr.bf16.mxu0 %v19816_v8  ;;  %v10260_v8 = vrot.slane %v22583_v13, 1 }
 0x59e   : > { %19036 = vmatpush3.bf16.msra.mxu1 %v19812_v10  ;;  %19043 = vmatprep.mubr.msk.bf16.mxu1 %vm20414_vm3, %v20413_v14  ;;  %v19859_v10 = vld [vmem:[%s24569_s6 + $0x358] sm:$0xff]  }
 0x59f   : > { %19037 = vmatprep.subr.bf16.mxu1 %v20413_v14 }
 0x5a0   : > { %18020 = vmatpush3.bf16.msra.mxu0 %v19817_v12  ;;  %v19862_v12 = vld [vmem:[%s24569_s6 + $0x420] sm:$0xff]  }
 0x5a1   : > { %18032 = vmatprep.subr.bf16.mxu0 %v19819_v15  ;;  %v19858_v15 = vld [vmem:[%s24569_s6 + $0x368] sm:$0xff]  }
 0x5a2   : > { %19038 = vmatpush3.bf16.msra.mxu1 %v19815_v16  ;;  %v19860_v16 = vld [vmem:[%s24569_s6 + $0x3b0] sm:$0xff]  }
 0x5a3   : > { %19039 = vmatprep.subr.bf16.mxu1 %v20413_v14  ;;  %9712 = vmatmul.mubr.bf16.vlgmr.msra.gmra.mrb[116].mxu0 %v22605_v35 }
 0x5a4   : > { %18033 = vmatpush3.bf16.msra.mxu0 %v19820_v17  ;;  %10097 = vmatprep.mubr.bf16.mxu0 %v9838_v21  ;;  %v19863_v17 = vld [vmem:[%s24569_s6 + $0x3e0] sm:$0xff]   ;;  %v19861_v21 = vld [vmem:[%s24569_s6 + $0x370] sm:$0xff]  }
 0x5a5   : > { %18034 = vmatprep.subr.bf16.mxu0 %v19822_v20  ;;  %v9841_v20 = vrot.slane %v22629_v49, 1 }
 0x5a6   : > { %19040 = vmatpush3.bf16.msra.mxu1 %v19818_v0  ;;  %v19866_v0 = vld [vmem:[%s24569_s6 + $0x428] sm:$0xff]  }
 0x5a7   : > { %19041 = vmatprep.subr.bf16.mxu1 %v20413_v14 }
 0x5a8   : > { %18035 = vmatpush3.bf16.msra.mxu0 %v19823_v22  ;;  %v10262_v22 = vrot.slane %v22614_v42, 1 }
 0x5a9   : > { %18036 = vmatprep.subr.bf16.mxu0 %v19826_v24  ;;  %v19864_v24 = vld [vmem:[%s24569_s6 + $0x3b8] sm:$0xff]  }
 0x5aa   : > { %19042 = vmatpush3.bf16.msra.mxu1 %v19821_v25  ;;  %v19867_v25 = vld [vmem:[%s24569_s6 + $0x3e8] sm:$0xff]  }
 0x5ab   : > { %18054 = vmatprep.subr.bf16.mxu1 %v19824_v27  ;;  %v19870_v27 = vld [vmem:[%s24569_s6 + $0x430] sm:$0xff]  }
 0x5ac   : > { %18037 = vmatpush3.bf16.msra.mxu0 %v19827_v28  ;;  %v19865_v28 = vld [vmem:[%s24569_s6 + $0x378] sm:$0xff]  }
 0x5ad   : > { %19044 = vmatmul.mubr.msk.bf16.vlgmr.msra.gmra.mrb[116].mxu1 %vm4692_vm14, %v22629_v49  ;;  %18038 = vmatprep.subr.bf16.mxu0 %v19830_v29  ;;  %v19868_v29 = vld [vmem:[%s24569_s6 + $0x3c0] sm:$0xff]  }
 0x5ae   : > { %18055 = vmatpush3.bf16.msra.mxu1 %v19825_v33  ;;  %10137 = vmatprep.mubr.bf16.mxu1 %v9840_v40  ;;  %v19871_v33 = vld [vmem:[%s24569_s6 + $0x3f0] sm:$0xff]   ;;  %v19869_v40 = vld [vmem:[%s24569_s6 + $0x380] sm:$0xff]  }
 0x5af   : > { %18056 = vmatprep.subr.bf16.mxu1 %v19828_v37  ;;  %v19874_v37 = vld [vmem:[%s24569_s6 + $0x438] sm:$0xff]  }
 0x5b0   : > { %18039 = vmatpush3.bf16.msra.mxu0 %v19831_v44  ;;  %v19872_v44 = vld [vmem:[%s24569_s6 + $0x3c8] sm:$0xff]  }
 0x5b1   : > { %18040 = vmatprep.subr.bf16.mxu0 %v19834_v47  ;;  %v19875_v47 = vld [vmem:[%s24569_s6 + $0x3f8] sm:$0xff]  }
 0x5b2   : > { %18057 = vmatpush3.bf16.msra.mxu1 %v19829_v48  ;;  %v19878_v48 = vld [vmem:[%s24569_s6 + $0x440] sm:$0xff]  }
 0x5b3   : > { %18058 = vmatprep.subr.bf16.mxu1 %v19832_v50  ;;  %v19873_v50 = vld [vmem:[%s24569_s6 + $0x388] sm:$0xff]  }
 0x5b4   : > { %18041 = vmatpush3.bf16.msra.mxu0 %v19835_v51  ;;  %v19876_v51 = vld [vmem:[%s24569_s6 + $0x3d0] sm:$0xff]  }
 0x5b5   : > { %18042 = vmatprep.subr.bf16.mxu0 %v19838_v53  ;;  %v19879_v53 = vld [vmem:[%s24569_s6 + $0x400] sm:$0xff]  }
 0x5b6   : > { %18059 = vmatpush3.bf16.msra.mxu1 %v19833_v55  ;;  %v19882_v55 = vld [vmem:[%s24569_s6 + $0x448] sm:$0xff]  }
 0x5b7   : > { %18060 = vmatprep.subr.bf16.mxu1 %v19836_v57  ;;  %v19877_v57 = vld [vmem:[%s24569_s6 + $0x390] sm:$0xff]  }
 0x5b8   : > { %18043 = vmatpush3.bf16.msra.mxu0 %v19839_v58  ;;  %v19880_v58 = vld [vmem:[%s24569_s6 + $0x3d8] sm:$0xff]  }
 0x5b9   : > { %18044 = vmatprep.subr.bf16.mxu0 %v19842_v38  ;;  %v19883_v38 = vld [vmem:[%s24569_s6 + $0x408] sm:$0xff]  }
 0x5ba   : > { %18061 = vmatpush3.bf16.msra.mxu1 %v19837_v30  ;;  %v19885_v30 = vld [vmem:[%s24569_s6 + $0x450] sm:$0xff]  }
 0x5bb   : > { %18062 = vmatprep.subr.bf16.mxu1 %v19840_v52  ;;  %v19881_v52 = vld [vmem:[%s24569_s6 + $0x398] sm:$0xff]  }
 0x5bc   : > { %18045 = vmatpush3.bf16.msra.mxu0 %v19843_v56  ;;  %v19886_v56 = vld [vmem:[%s24569_s6 + $0x410] sm:$0xff]  }
 0x5bd   : > { %18046 = vmatprep.subr.bf16.mxu0 %v19846_v39  ;;  %v19888_v39 = vld [vmem:[%s24569_s6 + $0x458] sm:$0xff]  }
 0x5be   : > { %18063 = vmatpush3.bf16.msra.mxu1 %v19841_v18  ;;  %v19884_v18 = vld [vmem:[%s24569_s6 + $0x460] sm:$0xff]  }
 0x5bf   : > { %18064 = vmatprep.subr.bf16.mxu1 %v19844_v32  ;;  %v10259_v32 = vrot.slane %v22589_v19, 1 }
 0x5c0   : > { %18047 = vmatpush3.bf16.msra.mxu0 %v19847_v59  ;;  %v19889_v59 = vld [vmem:[%s24569_s6 + $0x418] sm:$0xff]  }
 0x5c1   : > { %19047 = vmatprep.subr.bf16.mxu0 %v20413_v14 }
 0x5c2   : > { %18065 = vmatpush3.bf16.msra.mxu1 %v19845_v46  ;;  %v19891_v46 = vld [vmem:[%s24569_s6 + $0x4c0] sm:$0xff]  }
 0x5c3   : > { %18066 = vmatprep.subr.bf16.mxu1 %v19848_v60  ;;  %10098 = vmatmul.mubr.bf16.vlgmr.msra.gmra.mrb[120].mxu0 %v9837_v34  ;;  %v19887_v60 = vld [vmem:[%s24569_s6 + $0x468] sm:$0xff]   ;;  %v10261_v34 = vrot.slane %v22620_v45, 1 }
 0x5c4   : > { %19048 = vmatpush3.bf16.msra.mxu0 %v19850_v61  ;;  %19055 = vmatprep.mubr.msk.bf16.mxu0 %vm20414_vm3, %v20413_v14  ;;  %v19892_v61 = vld [vmem:[%s24569_s6 + $0x480] sm:$0xff]  }
 0x5c5   : > { %19049 = vmatprep.subr.bf16.mxu0 %v20413_v14 }
 0x5c6   : > { %18067 = vmatpush3.bf16.msra.mxu1 %v19849_v41  ;;  %v19894_v41 = vld [vmem:[%s24569_s6 + $0x4c8] sm:$0xff]  }
 0x5c7   : > { %18068 = vmatprep.subr.bf16.mxu1 %v19851_v62  ;;  %v19890_v62 = vld [vmem:[%s24569_s6 + $0x470] sm:$0xff]  }
 0x5c8   : > { %19050 = vmatpush3.bf16.msra.mxu0 %v19853_v63  ;;  %v10682_v63 = vrot.slane %v22580_v11, 2 }
 0x5c9   : > { %19051 = vmatprep.subr.bf16.mxu0 %v20413_v14 }
 0x5ca   : > { %18069 = vmatpush3.bf16.msra.mxu1 %v19852_v43  ;;  %v19895_v43 = vld [vmem:[%s24569_s6 + $0x488] sm:$0xff]  }
 0x5cb   : > { %18081 = vmatprep.subr.bf16.mxu1 %v19854_v2  ;;  %v19898_v2 = vld [vmem:[%s24569_s6 + $0x4d0] sm:$0xff]  }
 0x5cc   : > { %19052 = vmatpush3.bf16.msra.mxu0 %v19856_v3  ;;  %v19893_v3 = vld [vmem:[%s24569_s6 + $0x478] sm:$0xff]  }
 0x5cd   : > { %10138 = vmatmul.mubr.bf16.vlgmr.msra.gmra.mrb[120].mxu1 %v9839_v6  ;;  %19053 = vmatprep.subr.bf16.mxu0 %v20413_v14  ;;  %v19899_v6 = vld [vmem:[%s24569_s6 + $0x490] sm:$0xff]  }
 0x5ce   : > { %18082 = vmatpush3.bf16.msra.mxu1 %v19855_v4  ;;  %10519 = vmatprep.mubr.bf16.mxu1 %v10260_v8  ;;  %v19896_v4 = vld [vmem:[%s24569_s6 + $0x540] sm:$0xff]  }
 0x5cf   : > { %18083 = vmatprep.subr.bf16.mxu1 %v19857_v7  ;;  %v19902_v7 = vld [vmem:[%s24569_s6 + $0x4d8] sm:$0xff]   ;;  %v19897_v8 = vld [vmem:[%s24569_s6 + $0x500] sm:$0xff]  }
 0x5d0   : > { %19054 = vmatpush3.bf16.msra.mxu0 %v19859_v10  ;;  %v10263_v10 = vrot.slane %v22647_v54, 1 }
 0x5d1   : > { %18103 = vmatprep.subr.bf16.mxu0 %v19862_v12  ;;  %v19900_v12 = vld [vmem:[%s24569_s6 + $0x548] sm:$0xff]  }
 0x5d2   : > { %18084 = vmatpush3.bf16.msra.mxu1 %v19858_v15  ;;  %v10684_v15 = vrot.slane %v22607_v36, 2 }
 0x5d3   : > { %18085 = vmatprep.subr.bf16.mxu1 %v19860_v16  ;;  %19056 = vmatmul.mubr.msk.bf16.vlgmr.msra.gmra.mrb[124].mxu0 %vm4692_vm14, %v9841_v20  ;;  %v19903_v16 = vld [vmem:[%s24569_s6 + $0x498] sm:$0xff]   ;;  %v19901_v20 = vld [vmem:[%s24569_s6 + $0x508] sm:$0xff]  }
 0x5d4   : > { %18104 = vmatpush3.bf16.msra.mxu0 %v19863_v17  ;;  %10559 = vmatprep.mubr.bf16.mxu0 %v10262_v22  ;;  %v19906_v17 = vld [vmem:[%s24569_s6 + $0x4e0] sm:$0xff]   ;;  %v19910_v22 = vld [vmem:[%s24569_s6 + $0x4e8] sm:$0xff]  }
 0x5d5   : > { %18105 = vmatprep.subr.bf16.mxu0 %v19866_v0  ;;  %v19904_v0 = vld [vmem:[%s24569_s6 + $0x550] sm:$0xff]  }
 0x5d6   : > { %18086 = vmatpush3.bf16.msra.mxu1 %v19861_v21  ;;  %v19907_v21 = vld [vmem:[%s24569_s6 + $0x4a0] sm:$0xff]  }
 0x5d7   : > { %18087 = vmatprep.subr.bf16.mxu1 %v19864_v24  ;;  %v19905_v24 = vld [vmem:[%s24569_s6 + $0x510] sm:$0xff]  }
 0x5d8   : > { %18106 = vmatpush3.bf16.msra.mxu0 %v19867_v25  ;;  %v19908_v25 = vld [vmem:[%s24569_s6 + $0x558] sm:$0xff]  }
 0x5d9   : > { %18107 = vmatprep.subr.bf16.mxu0 %v19870_v27  ;;  %v19911_v27 = vld [vmem:[%s24569_s6 + $0x4a8] sm:$0xff]  }
 0x5da   : > { %18088 = vmatpush3.bf16.msra.mxu1 %v19865_v28  ;;  %v19914_v28 = vld [vmem:[%s24569_s6 + $0x4f0] sm:$0xff]  }
 0x5db   : > { %18089 = vmatprep.subr.bf16.mxu1 %v19868_v29  ;;  %v19909_v29 = vld [vmem:[%s24569_s6 + $0x518] sm:$0xff]  }
 0x5dc   : > { %18108 = vmatpush3.bf16.msra.mxu0 %v19871_v33  ;;  %v19912_v33 = vld [vmem:[%s24569_s6 + $0x560] sm:$0xff]  }
 0x5dd   : > { %18109 = vmatprep.subr.bf16.mxu0 %v19874_v37  ;;  %v19915_v37 = vld [vmem:[%s24569_s6 + $0x4b0] sm:$0xff]  }
 0x5de   : > { %18090 = vmatpush3.bf16.msra.mxu1 %v19869_v40  ;;  %v19918_v40 = vld [vmem:[%s24569_s6 + $0x4f8] sm:$0xff]  }
 0x5df   : > { %18091 = vmatprep.subr.bf16.mxu1 %v19872_v44  ;;  %v19913_v44 = vld [vmem:[%s24569_s6 + $0x520] sm:$0xff]  }
 0x5e0   : > { %18110 = vmatpush3.bf16.msra.mxu0 %v19875_v47  ;;  %v19916_v47 = vld [vmem:[%s24569_s6 + $0x568] sm:$0xff]  }
 0x5e1   : > { %18111 = vmatprep.subr.bf16.mxu0 %v19878_v48  ;;  %v19919_v48 = vld [vmem:[%s24569_s6 + $0x4b8] sm:$0xff]  }
 0x5e2   : > { %18092 = vmatpush3.bf16.msra.mxu1 %v19873_v50  ;;  %v19917_v50 = vld [vmem:[%s24569_s6 + $0x528] sm:$0xff]  }
 0x5e3   : > { %18093 = vmatprep.subr.bf16.mxu1 %v19876_v51  ;;  %v19920_v51 = vld [vmem:[%s24569_s6 + $0x570] sm:$0xff]  }
 0x5e4   : > { %18112 = vmatpush3.bf16.msra.mxu0 %v19879_v53  ;;  %v19922_v53 = vld [vmem:[%s24569_s6 + $0x580] sm:$0xff]  }
 0x5e5   : > { %18113 = vmatprep.subr.bf16.mxu0 %v19882_v55  ;;  %v10681_v55 = vrot.slane %v22578_v9, 2 }
 0x5e6   : > { %18094 = vmatpush3.bf16.msra.mxu1 %v19877_v57  ;;  %v19921_v57 = vld [vmem:[%s24569_s6 + $0x530] sm:$0xff]  }
 0x5e7   : > { %18095 = vmatprep.subr.bf16.mxu1 %v19880_v58  ;;  %v19923_v58 = vld [vmem:[%s24569_s6 + $0x578] sm:$0xff]  }
 0x5e8   : > { %18114 = vmatpush3.bf16.msra.mxu0 %v19883_v38  ;;  %v19925_v38 = vld [vmem:[%s24569_s6 + $0x588] sm:$0xff]  }
 0x5e9   : > { %18115 = vmatprep.subr.bf16.mxu0 %v19885_v30  ;;  %v19924_v30 = vld [vmem:[%s24569_s6 + $0x538] sm:$0xff]  }
 0x5ea   : > { %18096 = vmatpush3.bf16.msra.mxu1 %v19881_v52  ;;  %v19926_v52 = vld [vmem:[%s24569_s6 + $0x5e0] sm:$0xff]  }
 0x5eb   : > { %19059 = vmatprep.subr.bf16.mxu1 %v20413_v14 }
 0x5ec   : > { %18116 = vmatpush3.bf16.msra.mxu0 %v19886_v56  ;;  %v19928_v56 = vld [vmem:[%s24569_s6 + $0x590] sm:$0xff]  }
 0x5ed   : > { %10520 = vmatmul.mubr.bf16.vlgmr.msra.gmra.mrb[124].mxu1 %v10259_v32  ;;  %18117 = vmatprep.subr.bf16.mxu0 %v19888_v39  ;;  %v19927_v39 = vld [vmem:[%s24569_s6 + $0x5a0] sm:$0xff]   ;;  %v19929_v32 = vld [vmem:[%s24569_s6 + $0x5e8] sm:$0xff]  }
 0x5ee   : > { %19060 = vmatpush3.bf16.msra.mxu1 %v19884_v18  ;;  %19067 = vmatprep.mubr.msk.bf16.mxu1 %vm20414_vm3, %v20413_v14  ;;  %v10683_v18 = vrot.slane %v22605_v35, 2 }
 0x5ef   : > { %19061 = vmatprep.subr.bf16.mxu1 %v20413_v14 }
 0x5f0   : > { %18118 = vmatpush3.bf16.msra.mxu0 %v19889_v59  ;;  %v11104_v59 = vrot.slane %v22583_v13, 2 }
 0x5f1   : > { %18130 = vmatprep.subr.bf16.mxu0 %v19891_v46  ;;  %v19931_v46 = vld [vmem:[%s24569_s6 + $0x598] sm:$0xff]  }
 0x5f2   : > { %19062 = vmatpush3.bf16.msra.mxu1 %v19887_v60  ;;  %v19934_v60 = vld [vmem:[%s24569_s6 + $0x660] sm:$0xff]  }
 0x5f3   : > { %19063 = vmatprep.subr.bf16.mxu1 %v20413_v14  ;;  %10560 = vmatmul.mubr.bf16.vlgmr.msra.gmra.mrb[128].mxu0 %v10261_v34  ;;  %v19932_v34 = vld [vmem:[%s24569_s6 + $0x5f0] sm:$0xff]  }
 0x5f4   : > { %18131 = vmatpush3.bf16.msra.mxu0 %v19892_v61  ;;  %10941 = vmatprep.mubr.bf16.mxu0 %v10682_v63  ;;  %v19930_v61 = vld [vmem:[%s24569_s6 + $0x5a8] sm:$0xff]  }
 0x5f5   : > { %18132 = vmatprep.subr.bf16.mxu0 %v19894_v41  ;;  %v19935_v41 = vld [vmem:[%s24569_s6 + $0x620] sm:$0xff]   ;;  %v19938_v63 = vld [vmem:[%s24569_s6 + $0x668] sm:$0xff]  }
 0x5f6   : > { %19064 = vmatpush3.bf16.msra.mxu1 %v19890_v62  ;;  %v10685_v62 = vrot.slane %v22629_v49, 2 }
 0x5f7   : > { %19065 = vmatprep.subr.bf16.mxu1 %v20413_v14 }
 0x5f8   : > { %18133 = vmatpush3.bf16.msra.mxu0 %v19895_v43  ;;  %v19933_v43 = vld [vmem:[%s24569_s6 + $0x5b0] sm:$0xff]  }
 0x5f9   : > { %18134 = vmatprep.subr.bf16.mxu0 %v19898_v2  ;;  %v11106_v2 = vrot.slane %v22614_v42, 2 }
 0x5fa   : > { %19066 = vmatpush3.bf16.msra.mxu1 %v19893_v3  ;;  %v19936_v3 = vld [vmem:[%s24569_s6 + $0x5f8] sm:$0xff]  }
 0x5fb   : > { %18152 = vmatprep.subr.bf16.mxu1 %v19896_v4  ;;  %v19939_v4 = vld [vmem:[%s24569_s6 + $0x628] sm:$0xff]  }
 0x5fc   : > { %18135 = vmatpush3.bf16.msra.mxu0 %v19899_v6  ;;  %v19942_v6 = vld [vmem:[%s24569_s6 + $0x670] sm:$0xff]  }
 0x5fd   : > { %19068 = vmatmul.mubr.msk.bf16.vlgmr.msra.gmra.mrb[128].mxu1 %vm4692_vm14, %v10263_v10  ;;  %18136 = vmatprep.subr.bf16.mxu0 %v19902_v7  ;;  %v19937_v7 = vld [vmem:[%s24569_s6 + $0x5b8] sm:$0xff]   ;;  %v19943_v10 = vld [vmem:[%s24569_s6 + $0x630] sm:$0xff]  }
 0x5fe   : > { %18153 = vmatpush3.bf16.msra.mxu1 %v19897_v8  ;;  %10981 = vmatprep.mubr.bf16.mxu1 %v10684_v15  ;;  %v19940_v8 = vld [vmem:[%s24569_s6 + $0x600] sm:$0xff]  }
 0x5ff   : > { %18154 = vmatprep.subr.bf16.mxu1 %v19900_v12  ;;  %v19946_v12 = vld [vmem:[%s24569_s6 + $0x678] sm:$0xff]   ;;  %v19941_v15 = vld [vmem:[%s24569_s6 + $0x5c0] sm:$0xff]  }
 0x600   : > { %18137 = vmatpush3.bf16.msra.mxu0 %v19903_v16  ;;  %v19944_v16 = vld [vmem:[%s24569_s6 + $0x608] sm:$0xff]  }
 0x601   : > { %18138 = vmatprep.subr.bf16.mxu0 %v19906_v17  ;;  %v19947_v17 = vld [vmem:[%s24569_s6 + $0x638] sm:$0xff]  }
 0x602   : > { %18155 = vmatpush3.bf16.msra.mxu1 %v19901_v20  ;;  %v19950_v20 = vld [vmem:[%s24569_s6 + $0x680] sm:$0xff]  }
 0x603   : > { %18156 = vmatprep.subr.bf16.mxu1 %v19904_v0  ;;  %v19945_v0 = vld [vmem:[%s24569_s6 + $0x5c8] sm:$0xff]  }
 0x604   : > { %18139 = vmatpush3.bf16.msra.mxu0 %v19907_v21  ;;  %v19948_v21 = vld [vmem:[%s24569_s6 + $0x610] sm:$0xff]  }
 0x605   : > { %18140 = vmatprep.subr.bf16.mxu0 %v19910_v22  ;;  %v19951_v22 = vld [vmem:[%s24569_s6 + $0x640] sm:$0xff]  }
 0x606   : > { %18157 = vmatpush3.bf16.msra.mxu1 %v19905_v24  ;;  %v19954_v24 = vld [vmem:[%s24569_s6 + $0x688] sm:$0xff]  }
 0x607   : > { %18158 = vmatprep.subr.bf16.mxu1 %v19908_v25  ;;  %v19949_v25 = vld [vmem:[%s24569_s6 + $0x5d0] sm:$0xff]  }
 0x608   : > { %18141 = vmatpush3.bf16.msra.mxu0 %v19911_v27  ;;  %v19952_v27 = vld [vmem:[%s24569_s6 + $0x618] sm:$0xff]  }
 0x609   : > { %18142 = vmatprep.subr.bf16.mxu0 %v19914_v28  ;;  %v19955_v28 = vld [vmem:[%s24569_s6 + $0x648] sm:$0xff]  }
 0x60a   : > { %18159 = vmatpush3.bf16.msra.mxu1 %v19909_v29  ;;  %v19957_v29 = vld [vmem:[%s24569_s6 + $0x690] sm:$0xff]  }
 0x60b   : > { %18160 = vmatprep.subr.bf16.mxu1 %v19912_v33  ;;  %v19953_v33 = vld [vmem:[%s24569_s6 + $0x5d8] sm:$0xff]  }
 0x60c   : > { %18143 = vmatpush3.bf16.msra.mxu0 %v19915_v37  ;;  %v19958_v37 = vld [vmem:[%s24569_s6 + $0x650] sm:$0xff]  }
 0x60d   : > { %18144 = vmatprep.subr.bf16.mxu0 %v19918_v40  ;;  %v19960_v40 = vld [vmem:[%s24569_s6 + $0x698] sm:$0xff]  }
 0x60e   : > { %18161 = vmatpush3.bf16.msra.mxu1 %v19913_v44  ;;  %v19956_v44 = vld [vmem:[%s24569_s6 + $0x6a0] sm:$0xff]  }
 0x60f   : > { %18162 = vmatprep.subr.bf16.mxu1 %v19916_v47  ;;  %v11103_v47 = vrot.slane %v22589_v19, 2 }
 0x610   : > { %18145 = vmatpush3.bf16.msra.mxu0 %v19919_v48  ;;  %v19961_v48 = vld [vmem:[%s24569_s6 + $0x658] sm:$0xff]  }
 0x611   : > { %19071 = vmatprep.subr.bf16.mxu0 %v20413_v14 }
 0x612   : > { %18163 = vmatpush3.bf16.msra.mxu1 %v19917_v50  ;;  %v19963_v50 = vld [vmem:[%s24569_s6 + $0x700] sm:$0xff]  }
 0x613   : > { %18164 = vmatprep.subr.bf16.mxu1 %v19920_v51  ;;  %10942 = vmatmul.mubr.bf16.vlgmr.msra.gmra.mrb[132].mxu0 %v10681_v55  ;;  %v19959_v51 = vld [vmem:[%s24569_s6 + $0x6a8] sm:$0xff]   ;;  %v11105_v55 = vrot.slane %v22620_v45, 2 }
 0x614   : > { %19072 = vmatpush3.bf16.msra.mxu0 %v19922_v53  ;;  %19079 = vmatprep.mubr.msk.bf16.mxu0 %vm20414_vm3, %v20413_v14  ;;  %v19964_v53 = vld [vmem:[%s24569_s6 + $0x6c0] sm:$0xff]  }
 0x615   : > { %19073 = vmatprep.subr.bf16.mxu0 %v20413_v14 }
 0x616   : > { %18165 = vmatpush3.bf16.msra.mxu1 %v19921_v57  ;;  %v19966_v57 = vld [vmem:[%s24569_s6 + $0x708] sm:$0xff]  }
 0x617   : > { %18166 = vmatprep.subr.bf16.mxu1 %v19923_v58  ;;  %v19962_v58 = vld [vmem:[%s24569_s6 + $0x6b0] sm:$0xff]  }
 0x618   : > { %19074 = vmatpush3.bf16.msra.mxu0 %v19925_v38  ;;  %v11526_v38 = vrot.slane %v22580_v11, 3 }
 0x619   : > { %19075 = vmatprep.subr.bf16.mxu0 %v20413_v14 }
 0x61a   : > { %18167 = vmatpush3.bf16.msra.mxu1 %v19924_v30  ;;  %v19967_v30 = vld [vmem:[%s24569_s6 + $0x6c8] sm:$0xff]  }
 0x61b   : > { %18179 = vmatprep.subr.bf16.mxu1 %v19926_v52  ;;  %v19970_v52 = vld [vmem:[%s24569_s6 + $0x710] sm:$0xff]  }
 0x61c   : > { %19076 = vmatpush3.bf16.msra.mxu0 %v19928_v56  ;;  %v19965_v56 = vld [vmem:[%s24569_s6 + $0x6b8] sm:$0xff]  }
 0x61d   : > { %10982 = vmatmul.mubr.bf16.vlgmr.msra.gmra.mrb[132].mxu1 %v10683_v18  ;;  %19077 = vmatprep.subr.bf16.mxu0 %v20413_v14  ;;  %v19968_v18 = vld [vmem:[%s24569_s6 + $0x780] sm:$0xff]  }
 0x61e   : > { %18180 = vmatpush3.bf16.msra.mxu1 %v19927_v39  ;;  %11363 = vmatprep.mubr.bf16.mxu1 %v11104_v59 }
 0x61f   : > { %18181 = vmatprep.subr.bf16.mxu1 %v19929_v32 }
 0x620   : > { %19078 = vmatpush3.bf16.msra.mxu0 %v19931_v46  ;;  %v19971_v46 = vld [vmem:[%s24569_s6 + $0x6d0] sm:$0xff]  }
 0x621   : > { %18201 = vmatprep.subr.bf16.mxu0 %v19934_v60 }
 0x622   : > { %18182 = vmatpush3.bf16.msra.mxu1 %v19930_v61  ;;  %v19974_v61 = vld [vmem:[%s24569_s6 + $0x718] sm:$0xff]  }
 0x623   : > { %18183 = vmatprep.subr.bf16.mxu1 %v19932_v34  ;;  %19080 = vmatmul.mubr.msk.bf16.vlgmr.msra.gmra.mrb[136].mxu0 %vm4692_vm14, %v10685_v62  ;;  %v19969_v34 = vld [vmem:[%s24569_s6 + $0x740] sm:$0xff]   ;;  %v19972_v62 = vld [vmem:[%s24569_s6 + $0x788] sm:$0xff]  }
 0x624   : > { %18202 = vmatpush3.bf16.msra.mxu0 %v19935_v41  ;;  %11403 = vmatprep.mubr.bf16.mxu0 %v11106_v2  ;;  %v11107_v41 = vrot.slane %v22647_v54, 2  ;;  %v19978_v2 = vld [vmem:[%s24569_s6 + $0x720] sm:$0xff]  }
 0x625   : > { %18203 = vmatprep.subr.bf16.mxu0 %v19938_v63  ;;  %v11528_v63 = vrot.slane %v22607_v36, 3  ;;  %v19976_v36 = vld [vmem:[%s24569_s6 + $0x790] sm:$0xff]  }
 0x626   : > { %18184 = vmatpush3.bf16.msra.mxu1 %v19933_v43  ;;  %v19975_v43 = vld [vmem:[%s24569_s6 + $0x6d8] sm:$0xff]  }
 0x627   : > { %18185 = vmatprep.subr.bf16.mxu1 %v19936_v3  ;;  %v19973_v3 = vld [vmem:[%s24569_s6 + $0x748] sm:$0xff]  }
 0x628   : > { %18204 = vmatpush3.bf16.msra.mxu0 %v19939_v4 }
 0x629   : > { %18205 = vmatprep.subr.bf16.mxu0 %v19942_v6  ;;  %v19979_v6 = vld [vmem:[%s24569_s6 + $0x6e0] sm:$0xff]  }
 0x62a   : > { %18186 = vmatpush3.bf16.msra.mxu1 %v19937_v7 }
 0x62b   : > { %18187 = vmatprep.subr.bf16.mxu1 %v19940_v8  ;;  %v19982_v8 = vld [vmem:[%s24569_s6 + $0x728] sm:$0xff]  }
 0x62c   : > { %18206 = vmatpush3.bf16.msra.mxu0 %v19943_v10 }
 0x62d   : > { %18207 = vmatprep.subr.bf16.mxu0 %v19946_v12 }
 0x62e   : > { %18188 = vmatpush3.bf16.msra.mxu1 %v19941_v15  ;;  %v19977_v15 = vld [vmem:[%s24569_s6 + $0x750] sm:$0xff]  }
 0x62f   : > { %18189 = vmatprep.subr.bf16.mxu1 %v19944_v16 }
 0x630   : > { %18208 = vmatpush3.bf16.msra.mxu0 %v19947_v17  ;;  %v19980_v17 = vld [vmem:[%s24569_s6 + $0x798] sm:$0xff]  }
 0x631   : > { %18209 = vmatprep.subr.bf16.mxu0 %v19950_v20 }
 0x632   : > { %18190 = vmatpush3.bf16.msra.mxu1 %v19945_v0  ;;  %v19983_v0 = vld [vmem:[%s24569_s6 + $0x6e8] sm:$0xff]  }
 0x633   : > { %18191 = vmatprep.subr.bf16.mxu1 %v19948_v21  ;;  %v19986_v21 = vld [vmem:[%s24569_s6 + $0x730] sm:$0xff]  }
 0x634   : > { %18210 = vmatpush3.bf16.msra.mxu0 %v19951_v22 }
 0x635   : > { %18211 = vmatprep.subr.bf16.mxu0 %v19954_v24  ;;  %v19981_v24 = vld [vmem:[%s24569_s6 + $0x758] sm:$0xff]  }
 0x636   : > { %18192 = vmatpush3.bf16.msra.mxu1 %v19949_v25 }
 0x637   : > { %18193 = vmatprep.subr.bf16.mxu1 %v19952_v27 }
 0x638   : > { %18212 = vmatpush3.bf16.msra.mxu0 %v19955_v28  ;;  %v19984_v28 = vld [vmem:[%s24569_s6 + $0x7a0] sm:$0xff]  }
 0x639   : > { %18213 = vmatprep.subr.bf16.mxu0 %v19957_v29 }
 0x63a   : > { %18194 = vmatpush3.bf16.msra.mxu1 %v19953_v33  ;;  %v19987_v33 = vld [vmem:[%s24569_s6 + $0x6f0] sm:$0xff]  }
 0x63b   : > { %19083 = vmatprep.subr.bf16.mxu1 %v20413_v14 }
 0x63c   : > { %18214 = vmatpush3.bf16.msra.mxu0 %v19958_v37 }
 0x63d   : > { %11364 = vmatmul.mubr.bf16.vlgmr.msra.gmra.mrb[136].mxu1 %v11103_v47  ;;  %18215 = vmatprep.subr.bf16.mxu0 %v19960_v40  ;;  %v19990_v40 = vld [vmem:[%s24569_s6 + $0x738] sm:$0xff]   ;;  %v19988_v47 = vld [vmem:[%s24569_s6 + $0x7a8] sm:$0xff]  }
 0x63e   : > { %19084 = vmatpush3.bf16.msra.mxu1 %v19956_v44  ;;  %19091 = vmatprep.mubr.msk.bf16.mxu1 %vm20414_vm3, %v20413_v14  ;;  %v19985_v44 = vld [vmem:[%s24569_s6 + $0x760] sm:$0xff]  }
 0x63f   : > { %19085 = vmatprep.subr.bf16.mxu1 %v20413_v14 }
 0x640   : > { %18216 = vmatpush3.bf16.msra.mxu0 %v19961_v48  ;;  %v19991_v48 = vld [vmem:[%s24569_s6 + $0x6f8] sm:$0xff]  }
 0x641   : > { %18228 = vmatprep.subr.bf16.mxu0 %v19963_v50  ;;  %v19989_v50 = vld [vmem:[%s24569_s6 + $0x768] sm:$0xff]  }
 0x642   : > { %19086 = vmatpush3.bf16.msra.mxu1 %v19959_v51  ;;  %v19992_v51 = vld [vmem:[%s24569_s6 + $0x7b0] sm:$0xff]  }
 0x643   : > { %19087 = vmatprep.subr.bf16.mxu1 %v20413_v14  ;;  %11404 = vmatmul.mubr.bf16.vlgmr.msra.gmra.mrb[140].mxu0 %v11105_v55  ;;  %v11525_v55 = vrot.slane %v22578_v9, 3  ;;  %v19996_v9 = vld [vmem:[%s24569_s6 + $0x778] sm:$0xff]  }
 0x644   : > { %18229 = vmatpush3.bf16.msra.mxu0 %v19964_v53  ;;  %11785 = vmatprep.mubr.bf16.mxu0 %v11526_v38  ;;  %v19994_v53 = vld [vmem:[%s24569_s6 + $0x7c0] sm:$0xff]   ;;  %v19997_v38 = vld [vmem:[%s24569_s6 + $0x7c8] sm:$0xff]  }
 0x645   : > { %18230 = vmatprep.subr.bf16.mxu0 %v19966_v57  ;;  %v19993_v57 = vld [vmem:[%s24569_s6 + $0x770] sm:$0xff]  }
 0x646   : > { %19088 = vmatpush3.bf16.msra.mxu1 %v19962_v58  ;;  %v17950_v11 = vpop.f32.mrb[108].mxu0  ;;  %v19995_v58 = vld [vmem:[%s24569_s6 + $0x7b8] sm:$0xff]  }
 0x647   : > { %19089 = vmatprep.subr.bf16.mxu1 %v20413_v14  ;;  %v17951_v39 = vpop.f32.mrb[109].mxu0 }
 0x648   : > { %v17952_v32 = vadd.f32 %v17951_v39, %v17950_v11  ;;  %18231 = vmatpush3.bf16.msra.mxu0 %v19967_v30  ;;  %v17953_v59 = vpop.f32.mrb[110].mxu0  ;;  %v19998_v30 = vld [vmem:[%s24569_s6 + $0x820] sm:$0xff]   ;;  %v11527_v11 = vrot.slane %v22605_v35, 3  ;;  %v20001_v39 = vld [vmem:[%s24569_s6 + $0x828] sm:$0xff]  }
 0x649   : > { %v17954_v60 = vpop.f32.mrb[111].mxu0  ;;  %18232 = vmatprep.subr.bf16.mxu0 %v19970_v52  ;;  %v20000_v52 = vld [vmem:[%s24569_s6 + $0x7d0] sm:$0xff]   ;;  %v20006_v59 = vld [vmem:[%s24569_s6 + $0x8a0] sm:$0xff]   ;;  %v20002_v35 = vld [vmem:[%s24569_s6 + $0x7e8] sm:$0xff]  }
 0x64a   : > { %19090 = vmatpush3.bf16.msra.mxu1 %v19965_v56  ;;  %v19999_v56 = vld [vmem:[%s24569_s6 + $0x7e0] sm:$0xff]  }
 0x64b   : > { %18250 = vmatprep.subr.bf16.mxu1 %v19968_v18  ;;  %v11948_v18 = vrot.slane %v22583_v13, 3  ;;  %v20004_v13 = vld [vmem:[%s24569_s6 + $0x830] sm:$0xff]   ;;  %v20007_v60 = vld [vmem:[%s24569_s6 + $0x860] sm:$0xff]  }
 0x64c   : > { %18233 = vmatpush3.bf16.msra.mxu0 %v19971_v46 }
 0x64d   : > { %19092 = vmatmul.mubr.msk.bf16.vlgmr.msra.gmra.mrb[140].mxu1 %vm4692_vm14, %v11107_v41  ;;  %18234 = vmatprep.subr.bf16.mxu0 %v19974_v61  ;;  %v20010_v41 = vld [vmem:[%s24569_s6 + $0x8a8] sm:$0xff]  }
 0x64e   : > { %18251 = vmatpush3.bf16.msra.mxu1 %v19969_v34  ;;  %11825 = vmatprep.mubr.bf16.mxu1 %v11528_v63  ;;  %v11529_v34 = vrot.slane %v22629_v49, 3  ;;  %v20008_v49 = vld [vmem:[%s24569_s6 + $0x838] sm:$0xff]  }
 0x64f   : > { %18252 = vmatprep.subr.bf16.mxu1 %v19972_v62 }
 0x650   : > { %v17972_v4 = vpop.f32.mrb[108].mxu1  ;;  %18235 = vmatpush3.bf16.msra.mxu0 %v19975_v43  ;;  %v20005_v43 = vld [vmem:[%s24569_s6 + $0x7f0] sm:$0xff]  }
 0x651   : > { %v17973_v7 = vpop.f32.mrb[109].mxu1  ;;  %18236 = vmatprep.subr.bf16.mxu0 %v19978_v2  ;;  %v11950_v2 = vrot.slane %v22614_v42, 3  ;;  %v20014_v42 = vld [vmem:[%s24569_s6 + $0x8b0] sm:$0xff]  }
 0x652   : > { %v17974_v10 = vadd.f32 %v17973_v7, %v17972_v4  ;;  %18253 = vmatpush3.bf16.msra.mxu1 %v19973_v3  ;;  %v17975_v12 = vpop.f32.mrb[110].mxu1  ;;  %v20011_v4 = vld [vmem:[%s24569_s6 + $0x868] sm:$0xff]   ;;  %v20009_v7 = vld [vmem:[%s24569_s6 + $0x7f8] sm:$0xff]  }
 0x653   : > { %v17976_v16 = vpop.f32.mrb[111].mxu1  ;;  %18254 = vmatprep.subr.bf16.mxu1 %v19976_v36 }
 0x654   : > { %18237 = vmatpush3.bf16.msra.mxu0 %v19979_v6  ;;  %v9376_v20 = vadd.f32 %v17974_v10, %v17952_v32  ;;  %v20003_v32 = vld [vmem:[%s24569_s6 + $0x7d8] sm:$0xff]   ;;  %v20012_v10 = vld [vmem:[%s24569_s6 + $0x840] sm:$0xff]   ;;  %v20015_v16 = vld [vmem:[%s24569_s6 + $0x870] sm:$0xff]  }
 0x655   : > { %18238 = vmatprep.subr.bf16.mxu0 %v19982_v8 }
 0x656   : > { %18255 = vmatpush3.bf16.msra.mxu1 %v19977_v15  ;;  %v9415_v22 = vpop.f32.mrb[112].mxu0 }
 0x657   : > { %18256 = vmatprep.subr.bf16.mxu1 %v19980_v17  ;;  %v23294_v25 = vadd.f32 %v9415_v22, %v9376_v20  ;;  %v19033_v27 = vpop.f32.mrb[113].mxu0  ;;  %v20018_v20 = vld [vmem:[%s24569_s6 + $0x8b8] sm:$0xff]   ;;  %v20016_v22 = vld [vmem:[%s24569_s6 + $0x848] sm:$0xff]  }
 0x658   : > { %v9418_v29 = vpop.f32.mrb[114].mxu0  ;;  %18239 = vmatpush3.bf16.msra.mxu0 %v19983_v0  ;;  %v20013_v0 = vld [vmem:[%s24569_s6 + $0x800] sm:$0xff]   ;;  %v20017_v27 = vld [vmem:[%s24569_s6 + $0x808] sm:$0xff]  }
 0x659   : > { %v19034_v37 = vpop.f32.mrb[115].mxu0  ;;  %18240 = vmatprep.subr.bf16.mxu0 %v19986_v21 }
 0x65a   : > { %18257 = vmatpush3.bf16.msra.mxu1 %v19981_v24  ;;  %v20019_v24 = vld [vmem:[%s24569_s6 + $0x878] sm:$0xff]  }
 0x65b   : > { %18258 = vmatprep.subr.bf16.mxu1 %v19984_v28  ;;  %v20020_v28 = vld [vmem:[%s24569_s6 + $0x850] sm:$0xff]  }
 0x65c   : > { %18241 = vmatpush3.bf16.msra.mxu0 %v19987_v33  ;;  %v20023_v33 = vld [vmem:[%s24569_s6 + $0x880] sm:$0xff]  }
 0x65d   : > { %18242 = vmatprep.subr.bf16.mxu0 %v19990_v40 }
 0x65e   : > { %18259 = vmatpush3.bf16.msra.mxu1 %v19985_v44  ;;  %v20026_v44 = vld [vmem:[%s24569_s6 + $0x8c8] sm:$0xff]  }
 0x65f   : > { %18260 = vmatprep.subr.bf16.mxu1 %v19988_v47 }
 0x660   : > { %18243 = vmatpush3.bf16.msra.mxu0 %v19991_v48  ;;  %v20021_v48 = vld [vmem:[%s24569_s6 + $0x810] sm:$0xff]  }
 0x661   : > { %19095 = vmatprep.subr.bf16.mxu0 %v20413_v14 }
 0x662   : > { %18261 = vmatpush3.bf16.msra.mxu1 %v19989_v50 }
 0x663   : > { %18262 = vmatprep.subr.bf16.mxu1 %v19992_v51  ;;  %11786 = vmatmul.mubr.bf16.vlgmr.msra.gmra.mrb[144].mxu0 %v11525_v55  ;;  %v20024_v51 = vld [vmem:[%s24569_s6 + $0x858] sm:$0xff]   ;;  %v20029_v55 = vld [vmem:[%s24569_s6 + $0x8d0] sm:$0xff]  }
 0x664   : > { %19096 = vmatpush3.bf16.msra.mxu0 %v19994_v53  ;;  %19103 = vmatprep.mubr.msk.bf16.mxu0 %vm20414_vm3, %v20413_v14  ;;  %v20027_v53 = vld [vmem:[%s24569_s6 + $0x888] sm:$0xff]  }
 0x665   : > { %19097 = vmatprep.subr.bf16.mxu0 %v20413_v14 }
 0x666   : > { %18263 = vmatpush3.bf16.msra.mxu1 %v19993_v57  ;;  %v20025_v57 = vld [vmem:[%s24569_s6 + $0x818] sm:$0xff]  }
 0x667   : > { %18264 = vmatprep.subr.bf16.mxu1 %v19995_v58  ;;  %v20030_v58 = vld [vmem:[%s24569_s6 + $0x890] sm:$0xff]  }
 0x668   : > { %19098 = vmatpush3.bf16.msra.mxu0 %v19997_v38  ;;  %v23446_v38 = vpop.permute.xlu0 %8890 }
 0x669   : > { %19099 = vmatprep.subr.bf16.mxu0 %v20413_v14 }
 0x66a   : > { %18265 = vmatpush3.bf16.msra.mxu1 %v19996_v9  ;;  %v20032_v9 = vld [vmem:[%s24569_s6 + $0x8d8] sm:$0xff]  }
 0x66b   : > { %18277 = vmatprep.subr.bf16.mxu1 %v19998_v30  ;;  %v8899_v30 = vadd.f32 %v23446_v38, %v22576_v5  ;;  %v20035_v5 = vld [vmem:[%s24569_s6 + $0x940] sm:$0xff]  }
 0x66c   : > { %19100 = vmatpush3.bf16.msra.mxu0 %v20000_v52  ;;  %v20028_v52 = vld [vmem:[%s24569_s6 + $0x8e0] sm:$0xff]  }
 0x66d   : > { %11826 = vmatmul.mubr.bf16.vlgmr.msra.gmra.mrb[144].mxu1 %v11527_v11  ;;  %19101 = vmatprep.subr.bf16.mxu0 %v20413_v14  ;;  %v20033_v11 = vld [vmem:[%s24569_s6 + $0x898] sm:$0xff]  }
 0x66e   : > { %18278 = vmatpush3.bf16.msra.mxu1 %v19999_v56  ;;  %12207 = vmatprep.mubr.bf16.mxu1 %v11948_v18  ;;  %v11947_v56 = vrot.slane %v22589_v19, 3  ;;  %v20031_v18 = vld [vmem:[%s24569_s6 + $0x8e8] sm:$0xff]   ;;  %v20036_v19 = vld [vmem:[%s24569_s6 + $0x900] sm:$0xff]  }
 0x66f   : > { %18279 = vmatprep.subr.bf16.mxu1 %v20001_v39  ;;  %v8909_v39 = vmax.f32 %v8899_v30, 0.0  ;;  %v20061_v30 = vld [vmem:[%s24569_s6 + $0x9a8] sm:$0xff]  }
 0x670   : > { %v17999_v46 = vpop.f32.mrb[112].mxu1  ;;  %19102 = vmatpush3.bf16.msra.mxu0 %v20003_v32  ;;  %v11949_v32 = vrot.slane %v22620_v45, 3  ;;  %v20039_v45 = vld [vmem:[%s24569_s6 + $0x908] sm:$0xff]  }
 0x671   : > { %v18000_v61 = vpop.f32.mrb[113].mxu1  ;;  %18299 = vmatprep.subr.bf16.mxu0 %v20006_v59  ;;  %v20038_v59 = vld [vmem:[%s24569_s6 + $0x948] sm:$0xff]  }
 0x672   : > { %v18001_v62 = vadd.f32 %v18000_v61, %v17999_v46  ;;  %v18002_v63 = vpop.f32.mrb[114].mxu1  ;;  %18280 = vmatpush3.bf16.msra.mxu1 %v20002_v35  ;;  %v23477_v35 = vpack.c.bf16 %v8909_v39, %v8909_v39  ;;  %v8901_v46 = vadd.f32 %v23446_v38, %v22602_v31  ;;  %v8900_v39 = vadd.f32 %v23446_v38, %v22595_v26  ;;  %v20068_v26 = vld [vmem:[%s24569_s6 + $0x9b8] sm:$0xff]  }
 0x673   : > { %v18003_v3 = vpop.f32.mrb[115].mxu1  ;;  %18281 = vmatprep.subr.bf16.mxu1 %v20004_v13  ;;  %19104 = vmatmul.mubr.msk.bf16.vlgmr.msra.gmra.mrb[148].mxu0 %vm4692_vm14, %v11529_v34  ;;  %v20034_v13 = vld [vmem:[%s24569_s6 + $0x8f0] sm:$0xff]   ;;  %v20037_v34 = vld [vmem:[%s24569_s6 + $0x8f8] sm:$0xff]  }
 0x674   : > { %v9674_v36 = vadd.f32 %v18001_v62, %v23294_v25  ;;  %18300 = vmatpush3.bf16.msra.mxu0 %v20007_v60  ;;  %12247 = vmatprep.mubr.bf16.mxu0 %v11950_v2  ;;  %v20022_v25 = vld [vmem:[%s24569_s6 + $0x8c0] sm:$0xff]   ;;  %v20042_v60 = vld [vmem:[%s24569_s6 + $0x950] sm:$0xff]   ;;  %v8911_v62 = vmax.f32 %v8901_v46, 0.0  ;;  %v8902_v46 = vadd.f32 %v23446_v38, %v22592_v23  ;;  %v20075_v23 = vld [vmem:[%s24569_s6 + $0xa18] sm:$0xff]  }
 0x675   : > { %18301 = vmatprep.subr.bf16.mxu0 %v20010_v41  ;;  %v20040_v41 = vld [vmem:[%s24569_s6 + $0x9c0] sm:$0xff]   ;;  %v20043_v2 = vld [vmem:[%s24569_s6 + $0x910] sm:$0xff]  }
 0x676   : > { %18282 = vmatpush3.bf16.msra.mxu1 %v20005_v43  ;;  %v18021_v6 = vpop.f32.mrb[116].mxu0 }
 0x677   : > { %18283 = vmatprep.subr.bf16.mxu1 %v20008_v49  ;;  %v18022_v8 = vpop.f32.mrb[117].mxu0  ;;  %v20046_v49 = vld [vmem:[%s24569_s6 + $0x958] sm:$0xff]  }
 0x678   : > { %v18023_v12 = vadd.f32 %v18022_v8, %v18021_v6  ;;  %v18024_v15 = vpop.f32.mrb[118].mxu0  ;;  %18302 = vmatpush3.bf16.msra.mxu0 %v20011_v4  ;;  %v11951_v4 = vrot.slane %v22647_v54, 3  ;;  %v23512_v6 = vpack.c.bf16 %v8911_v62, %v8911_v62  ;;  %v20050_v8 = vld [vmem:[%s24569_s6 + $0x960] sm:$0xff]   ;;  %v20045_v54 = vld [vmem:[%s24569_s6 + $0x988] sm:$0xff]   ;;  %v20076_v62 = vld [vmem:[%s24569_s6 + $0xa70] sm:$0xff]  }
 0x679   : > { %v18025_v17 = vpop.f32.mrb[119].mxu0  ;;  %18303 = vmatprep.subr.bf16.mxu0 %v20014_v42  ;;  %v20044_v42 = vld [vmem:[%s24569_s6 + $0x9c8] sm:$0xff]   ;;  %v20051_v15 = vld [vmem:[%s24569_s6 + $0x920] sm:$0xff]  }
 0x67a   : > { %18284 = vmatpush3.bf16.msra.mxu1 %v20009_v7  ;;  %v9714_v21 = vadd.f32 %v18023_v12, %v9674_v36  ;;  %v20041_v36 = vld [vmem:[%s24569_s6 + $0x980] sm:$0xff]   ;;  %v20047_v7 = vld [vmem:[%s24569_s6 + $0x918] sm:$0xff]   ;;  %v20054_v17 = vld [vmem:[%s24569_s6 + $0x968] sm:$0xff]  }
 0x67b   : > { %18285 = vmatprep.subr.bf16.mxu1 %v20012_v10  ;;  %v20048_v10 = vld [vmem:[%s24569_s6 + $0x9d0] sm:$0xff]  }
 0x67c   : > { %18304 = vmatpush3.bf16.msra.mxu0 %v20015_v16 }
 0x67d   : > { %18305 = vmatprep.subr.bf16.mxu0 %v20018_v20 }
 0x67e   : > { %18286 = vmatpush3.bf16.msra.mxu1 %v20013_v0 }
 0x67f   : > { %18287 = vmatprep.subr.bf16.mxu1 %v20016_v22 }
 0x680   : > { %v9753_v29 = vpop.f32.mrb[116].mxu1  ;;  %18306 = vmatpush3.bf16.msra.mxu0 %v20019_v24  ;;  %v20052_v24 = vld [vmem:[%s24569_s6 + $0x9d8] sm:$0xff]  }
 0x681   : > { %v23423_v37 = vadd.f32 %v9753_v29, %v9714_v21  ;;  %v19045_v40 = vpop.f32.mrb[117].mxu1  ;;  %18307 = vmatprep.subr.bf16.mxu0 %v20022_v25  ;;  %v20049_v21 = vld [vmem:[%s24569_s6 + $0x990] sm:$0xff]  }
 0x682   : > { %v9756_v47 = vpop.f32.mrb[118].mxu1  ;;  %18288 = vmatpush3.bf16.msra.mxu1 %v20017_v27  ;;  %v20055_v27 = vld [vmem:[%s24569_s6 + $0x928] sm:$0xff]  }
 0x683   : > { %v19046_v50 = vpop.f32.mrb[119].mxu1  ;;  %18289 = vmatprep.subr.bf16.mxu1 %v20020_v28  ;;  %v20058_v28 = vld [vmem:[%s24569_s6 + $0x970] sm:$0xff]   ;;  %v20056_v47 = vld [vmem:[%s24569_s6 + $0x9e0] sm:$0xff]  }
 0x684   : > { %18308 = vmatpush3.bf16.msra.mxu0 %v20023_v33  ;;  %v20053_v33 = vld [vmem:[%s24569_s6 + $0x998] sm:$0xff]   ;;  %v20059_v50 = vld [vmem:[%s24569_s6 + $0x930] sm:$0xff]  }
 0x685   : > { %18309 = vmatprep.subr.bf16.mxu0 %v20026_v44 }
 0x686   : > { %18290 = vmatpush3.bf16.msra.mxu1 %v20021_v48 }
 0x687   : > { %18291 = vmatprep.subr.bf16.mxu1 %v20024_v51  ;;  %v8898_v51 = vadd.f32 %v23446_v38, %v22574_v1  ;;  %v20063_v1 = vld [vmem:[%s24569_s6 + $0x938] sm:$0xff]   ;;  %v8912_v38 = vmax.f32 %v8902_v46, 0.0 }
 0x688   : > { %18310 = vmatpush3.bf16.msra.mxu0 %v20027_v53 }
 0x689   : > { %18311 = vmatprep.subr.bf16.mxu0 %v20029_v55 }
 0x68a   : > { %18292 = vmatpush3.bf16.msra.mxu1 %v20025_v57  ;;  %v20062_v57 = vld [vmem:[%s24569_s6 + $0x978] sm:$0xff]  }
 0x68b   : > { %19107 = vmatprep.subr.bf16.mxu1 %v20413_v14 }
 0x68c   : > { %18312 = vmatpush3.bf16.msra.mxu0 %v20030_v58  ;;  %v20057_v58 = vld [vmem:[%s24569_s6 + $0x9a0] sm:$0xff]  }
 0x68d   : > { %12208 = vmatmul.mubr.bf16.vlgmr.msra.gmra.mrb[148].mxu1 %v11947_v56  ;;  %18313 = vmatprep.subr.bf16.mxu0 %v20032_v9  ;;  %v20060_v9 = vld [vmem:[%s24569_s6 + $0x9e8] sm:$0xff]   ;;  %v20066_v56 = vld [vmem:[%s24569_s6 + $0xa00] sm:$0xff]  }
 0x68e   : > { %19108 = vmatpush3.bf16.msra.mxu1 %v20028_v52  ;;  %19115 = vmatprep.mubr.msk.bf16.mxu1 %vm20414_vm3, %v20413_v14  ;;  %v20064_v52 = vld [vmem:[%s24569_s6 + $0x9f0] sm:$0xff]  }
 0x68f   : > { %19109 = vmatprep.subr.bf16.mxu1 %v20413_v14 }
 0x690   : > { %18314 = vmatpush3.bf16.msra.mxu0 %v20033_v11 }
 0x691   : > { %18326 = vmatprep.subr.bf16.mxu0 %v20035_v5  ;;  %v20065_v5 = vld [vmem:[%s24569_s6 + $0x9b0] sm:$0xff]  }
 0x692   : > { %19110 = vmatpush3.bf16.msra.mxu1 %v20031_v18  ;;  %v20067_v18 = vld [vmem:[%s24569_s6 + $0x9f8] sm:$0xff]  }
 0x693   : > { %19111 = vmatprep.subr.bf16.mxu1 %v20413_v14  ;;  %12248 = vmatmul.mubr.bf16.vlgmr.msra.gmra.mrb[152].mxu0 %v11949_v32  ;;  %v8910_v32 = vmax.f32 %v8900_v39, 0.0  ;;  %v20104_v39 = vld [vmem:[%s24569_s6 + $0xb18] sm:$0xff]  }
 0x694   : > { %18327 = vmatpush3.bf16.msra.mxu0 %v20036_v19  ;;  %12625 = vmatprep.mubr.bf16.mxu0 %v23477_v35  ;;  %v20069_v19 = vld [vmem:[%s24569_s6 + $0xa08] sm:$0xff]  }
 0x695   : > { %18328 = vmatprep.subr.bf16.mxu0 %v20038_v59  ;;  %v20070_v59 = vld [vmem:[%s24569_s6 + $0xa60] sm:$0xff]  }
 0x696   : > { %19112 = vmatpush3.bf16.msra.mxu1 %v20034_v13  ;;  %v18048_v61 = vpop.f32.mrb[120].mxu0  ;;  %v20072_v13 = vld [vmem:[%s24569_s6 + $0xa10] sm:$0xff]  }
 0x697   : > { %19113 = vmatprep.subr.bf16.mxu1 %v20413_v14  ;;  %v18049_v31 = vpop.f32.mrb[121].mxu0 }
 0x698   : > { %v18050_v63 = vadd.f32 %v18049_v31, %v18048_v61  ;;  %v18051_v43 = vpop.f32.mrb[122].mxu0  ;;  %18329 = vmatpush3.bf16.msra.mxu0 %v20039_v45  ;;  %v20071_v45 = vld [vmem:[%s24569_s6 + $0xa20] sm:$0xff]   ;;  %v20073_v61 = vld [vmem:[%s24569_s6 + $0xa68] sm:$0xff]  }
 0x699   : > { %v18052_v3 = vpop.f32.mrb[123].mxu0  ;;  %18330 = vmatprep.subr.bf16.mxu0 %v20042_v60  ;;  %v23614_v60 = vpack.c.bf16 %v8910_v32, %v8910_v32  ;;  %v20078_v31 = vld [vmem:[%s24569_s6 + $0xae0] sm:$0xff]  }
 0x69a   : > { %19114 = vmatpush3.bf16.msra.mxu1 %v20037_v34  ;;  %v23620_v34 = vshrl.u32 %v23477_v35, 16  ;;  %v20079_v43 = vld [vmem:[%s24569_s6 + $0xaa0] sm:$0xff]  }
 0x69b   : > { %18348 = vmatprep.subr.bf16.mxu1 %v20040_v41  ;;  %v20074_v41 = vld [vmem:[%s24569_s6 + $0xa28] sm:$0xff]   ;;  %v20107_v32 = vld [vmem:[%s24569_s6 + $0xb80] sm:$0xff]   ;;  %v23747_v46 = vshrl.u32 %v23614_v60, 16 }
 0x69c   : > { %18331 = vmatpush3.bf16.msra.mxu0 %v20043_v2  ;;  %v23640_v2 = vpack.c.bf16 %v8912_v38, %v8912_v38  ;;  %v20111_v38 = vld [vmem:[%s24569_s6 + $0xb48] sm:$0xff]  }
 0x69d   : > { %19116 = vmatmul.mubr.msk.bf16.vlgmr.msra.gmra.mrb[152].mxu1 %vm4692_vm14, %v11951_v4  ;;  %18332 = vmatprep.subr.bf16.mxu0 %v20046_v49  ;;  %v20082_v49 = vld [vmem:[%s24569_s6 + $0xae8] sm:$0xff]  }
 0x69e   : > { %18349 = vmatpush3.bf16.msra.mxu1 %v20041_v36  ;;  %12665 = vmatprep.mubr.bf16.mxu1 %v23512_v6 }
 0x69f   : > { %18350 = vmatprep.subr.bf16.mxu1 %v20044_v42  ;;  %v20077_v42 = vld [vmem:[%s24569_s6 + $0xa30] sm:$0xff]  }
 0x6a0   : > { %v18070_v12 = vpop.f32.mrb[120].mxu1  ;;  %18333 = vmatpush3.bf16.msra.mxu0 %v20047_v7  ;;  %v23649_v7 = vshrl.u32 %v23512_v6, 16 }
 0x6a1   : > { %v18071_v16 = vpop.f32.mrb[121].mxu1  ;;  %18334 = vmatprep.subr.bf16.mxu0 %v20050_v8 }
 0x6a2   : > { %v18072_v20 = vadd.f32 %v18071_v16, %v18070_v12  ;;  %v18073_v0 = vpop.f32.mrb[122].mxu1  ;;  %18351 = vmatpush3.bf16.msra.mxu1 %v20045_v54  ;;  %v20080_v54 = vld [vmem:[%s24569_s6 + $0xa78] sm:$0xff]   ;;  %v20086_v12 = vld [vmem:[%s24569_s6 + $0xaf0] sm:$0xff]  }
 0x6a3   : > { %v18074_v22 = vpop.f32.mrb[123].mxu1  ;;  %18352 = vmatprep.subr.bf16.mxu1 %v20048_v10  ;;  %v20083_v10 = vld [vmem:[%s24569_s6 + $0xaa8] sm:$0xff]   ;;  %v20081_v16 = vld [vmem:[%s24569_s6 + $0xa38] sm:$0xff]  }
 0x6a4   : > { %18335 = vmatpush3.bf16.msra.mxu0 %v20051_v15  ;;  %v10140_v25 = vadd.f32 %v18072_v20, %v18050_v63  ;;  %v20084_v20 = vld [vmem:[%s24569_s6 + $0xa80] sm:$0xff]   ;;  %v20087_v22 = vld [vmem:[%s24569_s6 + $0xab0] sm:$0xff]  }
 0x6a5   : > { %18336 = vmatprep.subr.bf16.mxu0 %v20054_v17 }
 0x6a6   : > { %18353 = vmatpush3.bf16.msra.mxu1 %v20049_v21  ;;  %v10179_v29 = vpop.f32.mrb[124].mxu0 }
 0x6a7   : > { %18354 = vmatprep.subr.bf16.mxu1 %v20052_v24  ;;  %v10180_v40 = vadd.f32 %v10179_v29, %v10140_v25  ;;  %v19057_v44 = vpop.f32.mrb[125].mxu0  ;;  %v20090_v25 = vld [vmem:[%s24569_s6 + $0xaf8] sm:$0xff]   ;;  %v20088_v29 = vld [vmem:[%s24569_s6 + $0xa88] sm:$0xff]  }
 0x6a8   : > { %v10182_v48 = vpop.f32.mrb[126].mxu0  ;;  %18337 = vmatpush3.bf16.msra.mxu0 %v20055_v27  ;;  %v20085_v27 = vld [vmem:[%s24569_s6 + $0xa40] sm:$0xff]   ;;  %v20089_v44 = vld [vmem:[%s24569_s6 + $0xa48] sm:$0xff]  }
 0x6a9   : > { %v23558_v53 = vadd.f32 %v10180_v40, %v23423_v37  ;;  %v19058_v55 = vpop.f32.mrb[127].mxu0  ;;  %18338 = vmatprep.subr.bf16.mxu0 %v20058_v28  ;;  %v8908_v37 = vmax.f32 %v8898_v51, 0.0  ;;  %v20094_v40 = vld [vmem:[%s24569_s6 + $0xb00] sm:$0xff]  }
 0x6aa   : > { %18355 = vmatpush3.bf16.msra.mxu1 %v20053_v33  ;;  %v20091_v33 = vld [vmem:[%s24569_s6 + $0xab8] sm:$0xff]  }
 0x6ab   : > { %18356 = vmatprep.subr.bf16.mxu1 %v20056_v47  ;;  %v23581_v11 = vpack.c.bf16 %v8908_v37, %v8908_v37  ;;  %v20092_v47 = vld [vmem:[%s24569_s6 + $0xa90] sm:$0xff]  }
 0x6ac   : > { %18339 = vmatpush3.bf16.msra.mxu0 %v20059_v50  ;;  %v20095_v50 = vld [vmem:[%s24569_s6 + $0xac0] sm:$0xff]  }
 0x6ad   : > { %18340 = vmatprep.subr.bf16.mxu0 %v20062_v57  ;;  %v20098_v57 = vld [vmem:[%s24569_s6 + $0xb08] sm:$0xff]  }
 0x6ae   : > { %18357 = vmatpush3.bf16.msra.mxu1 %v20057_v58 }
 0x6af   : > { %18358 = vmatprep.subr.bf16.mxu1 %v20060_v9  ;;  %v20093_v9 = vld [vmem:[%s24569_s6 + $0xa50] sm:$0xff]  }
 0x6b0   : > { %18341 = vmatpush3.bf16.msra.mxu0 %v20063_v1 }
 0x6b1   : > { %19119 = vmatprep.subr.bf16.mxu0 %v20413_v14 }
 0x6b2   : > { %18359 = vmatpush3.bf16.msra.mxu1 %v20061_v30  ;;  %v20096_v30 = vld [vmem:[%s24569_s6 + $0xa98] sm:$0xff]  }
 0x6b3   : > { %18360 = vmatprep.subr.bf16.mxu1 %v20064_v52  ;;  %12626 = vmatmul.mubr.bf16.vlgmr.msra.gmra.mrb[156].mxu0 %v23581_v11  ;;  %v20099_v52 = vld [vmem:[%s24569_s6 + $0xac8] sm:$0xff]  }
 0x6b4   : > { %19120 = vmatpush3.bf16.msra.mxu0 %v20066_v56  ;;  %19127 = vmatprep.mubr.msk.bf16.mxu0 %vm20414_vm3, %v20413_v14  ;;  %v20101_v56 = vld [vmem:[%s24569_s6 + $0xb10] sm:$0xff]  }
 0x6b5   : > { %19121 = vmatprep.subr.bf16.mxu0 %v20413_v14 }
 0x6b6   : > { %18361 = vmatpush3.bf16.msra.mxu1 %v20065_v5  ;;  %v20102_v5 = vld [vmem:[%s24569_s6 + $0xad0] sm:$0xff]  }
 0x6b7   : > { %18362 = vmatprep.subr.bf16.mxu1 %v20067_v18  ;;  %v20100_v18 = vld [vmem:[%s24569_s6 + $0xb20] sm:$0xff]  }
 0x6b8   : > { %19122 = vmatpush3.bf16.msra.mxu0 %v20069_v19  ;;  %v23727_v19 = vshrl.u32 %v23581_v11, 16 }
 0x6b9   : > { %19123 = vmatprep.subr.bf16.mxu0 %v20413_v14 }
 0x6ba   : > { %18363 = vmatpush3.bf16.msra.mxu1 %v20068_v26  ;;  %v20105_v26 = vld [vmem:[%s24569_s6 + $0xad8] sm:$0xff]  }
 0x6bb   : > { %18375 = vmatprep.subr.bf16.mxu1 %v20070_v59  ;;  %v20103_v59 = vld [vmem:[%s24569_s6 + $0xb28] sm:$0xff]  }
 0x6bc   : > { %19124 = vmatpush3.bf16.msra.mxu0 %v20072_v13  ;;  %v20108_v13 = vld [vmem:[%s24569_s6 + $0xb40] sm:$0xff]  }
 0x6bd   : > { %12666 = vmatmul.mubr.bf16.vlgmr.msra.gmra.mrb[156].mxu1 %v23614_v60  ;;  %19125 = vmatprep.subr.bf16.mxu0 %v20413_v14 }
 0x6be   : > { %18376 = vmatpush3.bf16.msra.mxu1 %v20071_v45  ;;  %13056 = vmatprep.mubr.bf16.mxu1 %v23620_v34  ;;  %v20110_v45 = vld [vmem:[%s24569_s6 + $0xb88] sm:$0xff]  }
 0x6bf   : > { %18377 = vmatprep.subr.bf16.mxu1 %v20073_v61  ;;  %v20106_v61 = vld [vmem:[%s24569_s6 + $0xb30] sm:$0xff]  }
 0x6c0   : > { %v18097_v63 = vpop.f32.mrb[124].mxu1  ;;  %19126 = vmatpush3.bf16.msra.mxu0 %v20075_v23  ;;  %v13224_v23 = vrot.slane %v23477_v35, 1 }
 0x6c1   : > { %v18098_v3 = vpop.f32.mrb[125].mxu1  ;;  %18397 = vmatprep.subr.bf16.mxu0 %v20078_v31  ;;  %v20114_v31 = vld [vmem:[%s24569_s6 + $0xb90] sm:$0xff]  }
 0x6c2   : > { %v18099_v36 = vadd.f32 %v18098_v3, %v18097_v63  ;;  %v18100_v4 = vpop.f32.mrb[126].mxu1  ;;  %18378 = vmatpush3.bf16.msra.mxu1 %v20074_v41 }
 0x6c3   : > { %v18101_v8 = vpop.f32.mrb[127].mxu1  ;;  %18379 = vmatprep.subr.bf16.mxu1 %v20076_v62  ;;  %19128 = vmatmul.mubr.msk.bf16.vlgmr.msra.gmra.mrb[160].mxu0 %vm4692_vm14, %v23640_v2  ;;  %v20109_v62 = vld [vmem:[%s24569_s6 + $0xb38] sm:$0xff]  }
 0x6c4   : > { %18398 = vmatpush3.bf16.msra.mxu0 %v20079_v43  ;;  %13096 = vmatprep.mubr.bf16.mxu0 %v23649_v7  ;;  %v20112_v43 = vld [vmem:[%s24569_s6 + $0xc00] sm:$0xff]  }
 0x6c5   : > { %18399 = vmatprep.subr.bf16.mxu0 %v20082_v49  ;;  %v20113_v8 = vld [vmem:[%s24569_s6 + $0xbc0] sm:$0xff]  }
 0x6c6   : > { %18380 = vmatpush3.bf16.msra.mxu1 %v20077_v42  ;;  %v18119_v15 = vpop.f32.mrb[128].mxu0  ;;  %v20118_v42 = vld [vmem:[%s24569_s6 + $0xb98] sm:$0xff]  }
 0x6c7   : > { %18381 = vmatprep.subr.bf16.mxu1 %v20080_v54  ;;  %v18120_v17 = vpop.f32.mrb[129].mxu0  ;;  %v23781_v54 = vshrl.u32 %v23640_v2, 16 }
 0x6c8   : > { %v18121_v0 = vadd.f32 %v18120_v17, %v18119_v15  ;;  %v18122_v21 = vpop.f32.mrb[130].mxu0  ;;  %18400 = vmatpush3.bf16.msra.mxu0 %v20083_v10  ;;  %v20116_v10 = vld [vmem:[%s24569_s6 + $0xc08] sm:$0xff]   ;;  %v20119_v15 = vld [vmem:[%s24569_s6 + $0xb58] sm:$0xff]  }
 0x6c9   : > { %v18123_v24 = vpop.f32.mrb[131].mxu0  ;;  %18401 = vmatprep.subr.bf16.mxu0 %v20086_v12  ;;  %v13226_v12 = vrot.slane %v23512_v6, 1  ;;  %v20117_v17 = vld [vmem:[%s24569_s6 + $0xbc8] sm:$0xff]   ;;  %v20123_v21 = vld [vmem:[%s24569_s6 + $0xb60] sm:$0xff]  }
 0x6ca   : > { %18382 = vmatpush3.bf16.msra.mxu1 %v20081_v16  ;;  %v10562_v28 = vadd.f32 %v18121_v0, %v18099_v36  ;;  %v20115_v36 = vld [vmem:[%s24569_s6 + $0xb50] sm:$0xff]   ;;  %v20122_v16 = vld [vmem:[%s24569_s6 + $0xba0] sm:$0xff]   ;;  %v20126_v24 = vld [vmem:[%s24569_s6 + $0xba8] sm:$0xff]  }
 0x6cb   : > { %18383 = vmatprep.subr.bf16.mxu1 %v20084_v20  ;;  %v20120_v20 = vld [vmem:[%s24569_s6 + $0xc10] sm:$0xff]  }
 0x6cc   : > { %18402 = vmatpush3.bf16.msra.mxu0 %v20087_v22 }
 0x6cd   : > { %18403 = vmatprep.subr.bf16.mxu0 %v20090_v25 }
 0x6ce   : > { %18384 = vmatpush3.bf16.msra.mxu1 %v20085_v27 }
 0x6cf   : > { %18385 = vmatprep.subr.bf16.mxu1 %v20088_v29 }
 0x6d0   : > { %v10601_v48 = vpop.f32.mrb[128].mxu1  ;;  %18404 = vmatpush3.bf16.msra.mxu0 %v20091_v33  ;;  %v20124_v33 = vld [vmem:[%s24569_s6 + $0xc18] sm:$0xff]  }
 0x6d1   : > { %v10602_v51 = vadd.f32 %v10601_v48, %v10562_v28  ;;  %v19069_v55 = vpop.f32.mrb[129].mxu1  ;;  %18405 = vmatprep.subr.bf16.mxu0 %v20094_v40  ;;  %v20121_v28 = vld [vmem:[%s24569_s6 + $0xbd0] sm:$0xff]  }
 0x6d2   : > { %v10604_v58 = vpop.f32.mrb[130].mxu1  ;;  %18386 = vmatpush3.bf16.msra.mxu1 %v20089_v44  ;;  %v20127_v44 = vld [vmem:[%s24569_s6 + $0xb68] sm:$0xff]  }
 0x6d3   : > { %v23703_v1 = vadd.f32 %v10602_v51, %v23558_v53  ;;  %v19070_v37 = vpop.f32.mrb[131].mxu1  ;;  %18387 = vmatprep.subr.bf16.mxu1 %v20092_v47  ;;  %v20097_v53 = vld [vmem:[%s24569_s6 + $0xa58] sm:$0xff]   ;;  %v20130_v47 = vld [vmem:[%s24569_s6 + $0xbb0] sm:$0xff]  }
 0x6d4   : > { %18406 = vmatpush3.bf16.msra.mxu0 %v20095_v50  ;;  %v20125_v50 = vld [vmem:[%s24569_s6 + $0xbd8] sm:$0xff]  }
 0x6d5   : > { %18407 = vmatprep.subr.bf16.mxu0 %v20098_v57  ;;  %v20128_v57 = vld [vmem:[%s24569_s6 + $0xc20] sm:$0xff]  }
 0x6d6   : > { %18388 = vmatpush3.bf16.msra.mxu1 %v20093_v9  ;;  %v20131_v9 = vld [vmem:[%s24569_s6 + $0xb70] sm:$0xff]  }
 0x6d7   : > { %18389 = vmatprep.subr.bf16.mxu1 %v20096_v30 }
 0x6d8   : > { %18408 = vmatpush3.bf16.msra.mxu0 %v20099_v52  ;;  %v20134_v52 = vld [vmem:[%s24569_s6 + $0xbb8] sm:$0xff]  }
 0x6d9   : > { %18409 = vmatprep.subr.bf16.mxu0 %v20101_v56  ;;  %v20129_v56 = vld [vmem:[%s24569_s6 + $0xbe0] sm:$0xff]  }
 0x6da   : > { %18390 = vmatpush3.bf16.msra.mxu1 %v20097_v53  ;;  %v20132_v53 = vld [vmem:[%s24569_s6 + $0xc28] sm:$0xff]  }
 0x6db   : > { %19131 = vmatprep.subr.bf16.mxu1 %v20413_v14 }
 0x6dc   : > { %18410 = vmatpush3.bf16.msra.mxu0 %v20102_v5  ;;  %v20133_v5 = vld [vmem:[%s24569_s6 + $0xbe8] sm:$0xff]  }
 0x6dd   : > { %13057 = vmatmul.mubr.bf16.vlgmr.msra.gmra.mrb[160].mxu1 %v23727_v19  ;;  %18411 = vmatprep.subr.bf16.mxu0 %v20104_v39  ;;  %v20136_v39 = vld [vmem:[%s24569_s6 + $0xc30] sm:$0xff]  }
 0x6de   : > { %19132 = vmatpush3.bf16.msra.mxu1 %v20100_v18  ;;  %19139 = vmatprep.mubr.msk.bf16.mxu1 %vm20414_vm3, %v20413_v14  ;;  %v20138_v18 = vld [vmem:[%s24569_s6 + $0xc40] sm:$0xff]  }
 0x6df   : > { %19133 = vmatprep.subr.bf16.mxu1 %v20413_v14 }
 0x6e0   : > { %18412 = vmatpush3.bf16.msra.mxu0 %v20105_v26  ;;  %v13223_v26 = vrot.slane %v23581_v11, 1 }
 0x6e1   : > { %18424 = vmatprep.subr.bf16.mxu0 %v20107_v32  ;;  %v20137_v32 = vld [vmem:[%s24569_s6 + $0xbf0] sm:$0xff]  }
 0x6e2   : > { %19134 = vmatpush3.bf16.msra.mxu1 %v20103_v59  ;;  %v20139_v59 = vld [vmem:[%s24569_s6 + $0xc38] sm:$0xff]  }
 0x6e3   : > { %19135 = vmatprep.subr.bf16.mxu1 %v20413_v14  ;;  %13097 = vmatmul.mubr.bf16.vlgmr.msra.gmra.mrb[164].mxu0 %v23747_v46 }
 0x6e4   : > { %18425 = vmatpush3.bf16.msra.mxu0 %v20108_v13  ;;  %13483 = vmatprep.mubr.bf16.mxu0 %v13224_v23  ;;  %v20141_v13 = vld [vmem:[%s24569_s6 + $0xc48] sm:$0xff]   ;;  %v20144_v23 = vld [vmem:[%s24569_s6 + $0xc50] sm:$0xff]  }
 0x6e5   : > { %18426 = vmatprep.subr.bf16.mxu0 %v20110_v45  ;;  %v20140_v45 = vld [vmem:[%s24569_s6 + $0xbf8] sm:$0xff]  }
 0x6e6   : > { %19136 = vmatpush3.bf16.msra.mxu1 %v20106_v61  ;;  %v18146_v41 = vpop.f32.mrb[132].mxu0  ;;  %v20142_v61 = vld [vmem:[%s24569_s6 + $0xca0] sm:$0xff]  }
 0x6e7   : > { %19137 = vmatprep.subr.bf16.mxu1 %v20413_v14  ;;  %v18147_v63 = vpop.f32.mrb[133].mxu0 }
 0x6e8   : > { %v18148_v3 = vadd.f32 %v18147_v63, %v18146_v41  ;;  %v18149_v49 = vpop.f32.mrb[134].mxu0  ;;  %18427 = vmatpush3.bf16.msra.mxu0 %v20111_v38  ;;  %v20143_v38 = vld [vmem:[%s24569_s6 + $0xc60] sm:$0xff]   ;;  %v20145_v41 = vld [vmem:[%s24569_s6 + $0xca8] sm:$0xff]   ;;  %v20147_v63 = vld [vmem:[%s24569_s6 + $0xc58] sm:$0xff]  }
 0x6e9   : > { %v18150_v4 = vpop.f32.mrb[135].mxu0  ;;  %18428 = vmatprep.subr.bf16.mxu0 %v20114_v31  ;;  %v13225_v31 = vrot.slane %v23614_v60, 1  ;;  %v20148_v49 = vld [vmem:[%s24569_s6 + $0xcb0] sm:$0xff]  }
 0x6ea   : > { %19138 = vmatpush3.bf16.msra.mxu1 %v20109_v62  ;;  %v13646_v62 = vrot.slane %v23620_v34, 1  ;;  %v20151_v4 = vld [vmem:[%s24569_s6 + $0xce0] sm:$0xff]  }
 0x6eb   : > { %18446 = vmatprep.subr.bf16.mxu1 %v20112_v43  ;;  %v20150_v43 = vld [vmem:[%s24569_s6 + $0xd20] sm:$0xff]  }
 0x6ec   : > { %18429 = vmatpush3.bf16.msra.mxu0 %v20115_v36 }
 0x6ed   : > { %19140 = vmatmul.mubr.msk.bf16.vlgmr.msra.gmra.mrb[164].mxu1 %vm4692_vm14, %v23781_v54  ;;  %18430 = vmatprep.subr.bf16.mxu0 %v20118_v42 }
 0x6ee   : > { %18447 = vmatpush3.bf16.msra.mxu1 %v20113_v8  ;;  %13523 = vmatprep.mubr.bf16.mxu1 %v13226_v12  ;;  %v13227_v8 = vrot.slane %v23640_v2, 1 }
 0x6ef   : > { %18448 = vmatprep.subr.bf16.mxu1 %v20116_v10  ;;  %v20154_v10 = vld [vmem:[%s24569_s6 + $0xd28] sm:$0xff]  }
 0x6f0   : > { %v18168_v0 = vpop.f32.mrb[132].mxu1  ;;  %18431 = vmatpush3.bf16.msra.mxu0 %v20119_v15 }
 0x6f1   : > { %v18169_v22 = vpop.f32.mrb[133].mxu1  ;;  %18432 = vmatprep.subr.bf16.mxu0 %v20122_v16  ;;  %v20149_v16 = vld [vmem:[%s24569_s6 + $0xc70] sm:$0xff]  }
 0x6f2   : > { %v18170_v25 = vadd.f32 %v18169_v22, %v18168_v0  ;;  %v18171_v27 = vpop.f32.mrb[134].mxu1  ;;  %18449 = vmatpush3.bf16.msra.mxu1 %v20117_v17  ;;  %v13648_v17 = vrot.slane %v23649_v7, 1  ;;  %v20152_v0 = vld [vmem:[%s24569_s6 + $0xcb8] sm:$0xff]   ;;  %v20158_v22 = vld [vmem:[%s24569_s6 + $0xd30] sm:$0xff]  }
 0x6f3   : > { %v18172_v29 = vpop.f32.mrb[135].mxu1  ;;  %18450 = vmatprep.subr.bf16.mxu1 %v20120_v20 }
 0x6f4   : > { %18433 = vmatpush3.bf16.msra.mxu0 %v20123_v21  ;;  %v10984_v40 = vadd.f32 %v18170_v25, %v18148_v3  ;;  %v20146_v3 = vld [vmem:[%s24569_s6 + $0xc68] sm:$0xff]   ;;  %v20153_v25 = vld [vmem:[%s24569_s6 + $0xc78] sm:$0xff]  }
 0x6f5   : > { %18434 = vmatprep.subr.bf16.mxu0 %v20126_v24  ;;  %v20155_v21 = vld [vmem:[%s24569_s6 + $0xce8] sm:$0xff]  }
 0x6f6   : > { %18451 = vmatpush3.bf16.msra.mxu1 %v20121_v28  ;;  %v11023_v48 = vpop.f32.mrb[136].mxu0  ;;  %v20156_v28 = vld [vmem:[%s24569_s6 + $0xcc0] sm:$0xff]  }
 0x6f7   : > { %18452 = vmatprep.subr.bf16.mxu1 %v20124_v33  ;;  %v11024_v51 = vadd.f32 %v11023_v48, %v10984_v40  ;;  %v19081_v55 = vpop.f32.mrb[137].mxu0  ;;  %v20159_v40 = vld [vmem:[%s24569_s6 + $0xcf0] sm:$0xff]   ;;  %v20157_v48 = vld [vmem:[%s24569_s6 + $0xc80] sm:$0xff]  }
 0x6f8   : > { %v11026_v58 = vpop.f32.mrb[138].mxu0  ;;  %18435 = vmatpush3.bf16.msra.mxu0 %v20127_v44  ;;  %v20163_v55 = vld [vmem:[%s24569_s6 + $0xcf8] sm:$0xff]  }
 0x6f9   : > { %v23829_v37 = vadd.f32 %v11024_v51, %v23703_v1  ;;  %v19082_v30 = vpop.f32.mrb[139].mxu0  ;;  %18436 = vmatprep.subr.bf16.mxu0 %v20130_v47  ;;  %v20135_v1 = vld [vmem:[%s24569_s6 + $0xb78] sm:$0xff]   ;;  %v20160_v51 = vld [vmem:[%s24569_s6 + $0xcc8] sm:$0xff]  }
 0x6fa   : > { %18453 = vmatpush3.bf16.msra.mxu1 %v20125_v50  ;;  %v20162_v47 = vld [vmem:[%s24569_s6 + $0xd38] sm:$0xff]   ;;  %v20161_v58 = vld [vmem:[%s24569_s6 + $0xc88] sm:$0xff]  }
 0x6fb   : > { %18454 = vmatprep.subr.bf16.mxu1 %v20128_v57  ;;  %v20166_v57 = vld [vmem:[%s24569_s6 + $0xd40] sm:$0xff]  }
 0x6fc   : > { %18437 = vmatpush3.bf16.msra.mxu0 %v20131_v9  ;;  %v20164_v9 = vld [vmem:[%s24569_s6 + $0xcd0] sm:$0xff]  }
 0x6fd   : > { %18438 = vmatprep.subr.bf16.mxu0 %v20134_v52  ;;  %v20167_v52 = vld [vmem:[%s24569_s6 + $0xd00] sm:$0xff]  }
 0x6fe   : > { %18455 = vmatpush3.bf16.msra.mxu1 %v20129_v56 }
 0x6ff   : > { %18456 = vmatprep.subr.bf16.mxu1 %v20132_v53 }
 0x700   : > { %18439 = vmatpush3.bf16.msra.mxu0 %v20135_v1  ;;  %v20170_v1 = vld [vmem:[%s24569_s6 + $0xd48] sm:$0xff]  }
 0x701   : > { %19143 = vmatprep.subr.bf16.mxu0 %v20413_v14 }
 0x702   : > { %18457 = vmatpush3.bf16.msra.mxu1 %v20133_v5 }
 0x703   : > { %18458 = vmatprep.subr.bf16.mxu1 %v20136_v39  ;;  %13484 = vmatmul.mubr.bf16.vlgmr.msra.gmra.mrb[168].mxu0 %v13223_v26  ;;  %v20165_v39 = vld [vmem:[%s24569_s6 + $0xc90] sm:$0xff]  }
 0x704   : > { %19144 = vmatpush3.bf16.msra.mxu0 %v20138_v18  ;;  %19151 = vmatprep.mubr.msk.bf16.mxu0 %vm20414_vm3, %v20413_v14 }
 0x705   : > { %19145 = vmatprep.subr.bf16.mxu0 %v20413_v14 }
 0x706   : > { %18459 = vmatpush3.bf16.msra.mxu1 %v20137_v32  ;;  %v20168_v32 = vld [vmem:[%s24569_s6 + $0xcd8] sm:$0xff]  }
 0x707   : > { %18460 = vmatprep.subr.bf16.mxu1 %v20139_v59  ;;  %v20171_v59 = vld [vmem:[%s24569_s6 + $0xd08] sm:$0xff]  }
 0x708   : > { %19146 = vmatpush3.bf16.msra.mxu0 %v20141_v13  ;;  %v20173_v13 = vld [vmem:[%s24569_s6 + $0xd50] sm:$0xff]  }
 0x709   : > { %19147 = vmatprep.subr.bf16.mxu0 %v20413_v14 }
 0x70a   : > { %18461 = vmatpush3.bf16.msra.mxu1 %v20140_v45  ;;  %v20174_v45 = vld [vmem:[%s24569_s6 + $0xd10] sm:$0xff]  }
 0x70b   : > { %18473 = vmatprep.subr.bf16.mxu1 %v20142_v61  ;;  %v20176_v61 = vld [vmem:[%s24569_s6 + $0xd58] sm:$0xff]  }
 0x70c   : > { %19148 = vmatpush3.bf16.msra.mxu0 %v20144_v23  ;;  %v20172_v23 = vld [vmem:[%s24569_s6 + $0xd60] sm:$0xff]  }
 0x70d   : > { %13524 = vmatmul.mubr.bf16.vlgmr.msra.gmra.mrb[168].mxu1 %v13225_v31  ;;  %19149 = vmatprep.subr.bf16.mxu0 %v20413_v14  ;;  %v20177_v31 = vld [vmem:[%s24569_s6 + $0xd18] sm:$0xff]  }
 0x70e   : > { %18474 = vmatpush3.bf16.msra.mxu1 %v20143_v38  ;;  %13905 = vmatprep.mubr.bf16.mxu1 %v13646_v62  ;;  %v13645_v38 = vrot.slane %v23727_v19, 1  ;;  %v20175_v62 = vld [vmem:[%s24569_s6 + $0xd68] sm:$0xff]  }
 0x70f   : > { %18475 = vmatprep.subr.bf16.mxu1 %v20145_v41  ;;  %v20179_v41 = vld [vmem:[%s24569_s6 + $0xdc0] sm:$0xff]  }
 0x710   : > { %v18195_v36 = vpop.f32.mrb[136].mxu1  ;;  %19150 = vmatpush3.bf16.msra.mxu0 %v20147_v63  ;;  %v20180_v63 = vld [vmem:[%s24569_s6 + $0xd80] sm:$0xff]  }
 0x711   : > { %v18196_v42 = vpop.f32.mrb[137].mxu1  ;;  %18495 = vmatprep.subr.bf16.mxu0 %v20150_v43  ;;  %v13647_v43 = vrot.slane %v23747_v46, 1 }
 0x712   : > { %v18197_v12 = vadd.f32 %v18196_v42, %v18195_v36  ;;  %v18198_v15 = vpop.f32.mrb[138].mxu1  ;;  %18476 = vmatpush3.bf16.msra.mxu1 %v20146_v3  ;;  %v20182_v3 = vld [vmem:[%s24569_s6 + $0xdc8] sm:$0xff]   ;;  %v14068_v36 = vrot.slane %v23477_v35, 2  ;;  %v20186_v42 = vld [vmem:[%s24569_s6 + $0xdd0] sm:$0xff]  }
 0x713   : > { %v18199_v20 = vpop.f32.mrb[139].mxu1  ;;  %18477 = vmatprep.subr.bf16.mxu1 %v20148_v49  ;;  %19152 = vmatmul.mubr.msk.bf16.vlgmr.msra.gmra.mrb[172].mxu0 %vm4692_vm14, %v13227_v8  ;;  %v20178_v49 = vld [vmem:[%s24569_s6 + $0xd70] sm:$0xff]   ;;  %v20184_v15 = vld [vmem:[%s24569_s6 + $0xe40] sm:$0xff]  }
 0x714   : > { %18496 = vmatpush3.bf16.msra.mxu0 %v20151_v4  ;;  %13945 = vmatprep.mubr.bf16.mxu0 %v13648_v17  ;;  %v20183_v4 = vld [vmem:[%s24569_s6 + $0xd88] sm:$0xff]   ;;  %v20187_v20 = vld [vmem:[%s24569_s6 + $0xd90] sm:$0xff]  }
 0x715   : > { %18497 = vmatprep.subr.bf16.mxu0 %v20154_v10  ;;  %v20181_v10 = vld [vmem:[%s24569_s6 + $0xd78] sm:$0xff]  }
 0x716   : > { %18478 = vmatpush3.bf16.msra.mxu1 %v20149_v16  ;;  %v18217_v24 = vpop.f32.mrb[140].mxu0 }
 0x717   : > { %18479 = vmatprep.subr.bf16.mxu1 %v20152_v0  ;;  %v18218_v27 = vpop.f32.mrb[141].mxu0 }
 0x718   : > { %v18219_v29 = vadd.f32 %v18218_v27, %v18217_v24  ;;  %v18220_v33 = vpop.f32.mrb[142].mxu0  ;;  %18498 = vmatpush3.bf16.msra.mxu0 %v20155_v21  ;;  %v20190_v21 = vld [vmem:[%s24569_s6 + $0xdd8] sm:$0xff]   ;;  %v13649_v24 = vrot.slane %v23781_v54, 1  ;;  %v14070_v27 = vrot.slane %v23512_v6, 2 }
 0x719   : > { %v18221_v44 = vpop.f32.mrb[143].mxu0  ;;  %18499 = vmatprep.subr.bf16.mxu0 %v20158_v22  ;;  %v20185_v22 = vld [vmem:[%s24569_s6 + $0xe00] sm:$0xff]   ;;  %v20189_v33 = vld [vmem:[%s24569_s6 + $0xe08] sm:$0xff]  }
 0x71a   : > { %18480 = vmatpush3.bf16.msra.mxu1 %v20153_v25  ;;  %v11406_v50 = vadd.f32 %v18219_v29, %v18197_v12  ;;  %v20188_v25 = vld [vmem:[%s24569_s6 + $0xe48] sm:$0xff]   ;;  %v20194_v29 = vld [vmem:[%s24569_s6 + $0xde0] sm:$0xff]  }
 0x71b   : > { %18481 = vmatprep.subr.bf16.mxu1 %v20156_v28  ;;  %v20191_v28 = vld [vmem:[%s24569_s6 + $0xd98] sm:$0xff]  }
 0x71c   : > { %18500 = vmatpush3.bf16.msra.mxu0 %v20159_v40  ;;  %v20192_v40 = vld [vmem:[%s24569_s6 + $0xe50] sm:$0xff]  }
 0x71d   : > { %18501 = vmatprep.subr.bf16.mxu0 %v20162_v47  ;;  %v20195_v47 = vld [vmem:[%s24569_s6 + $0xda0] sm:$0xff]  }
 0x71e   : > { %18482 = vmatpush3.bf16.msra.mxu1 %v20157_v48 }
 0x71f   : > { %18483 = vmatprep.subr.bf16.mxu1 %v20160_v51 }
 0x720   : > { %v11445_v30 = vpop.f32.mrb[140].mxu1  ;;  %18502 = vmatpush3.bf16.msra.mxu0 %v20163_v55 }
 0x721   : > { %v11446_v56 = vadd.f32 %v11445_v30, %v11406_v50  ;;  %v19093_v53 = vpop.f32.mrb[141].mxu1  ;;  %18503 = vmatprep.subr.bf16.mxu0 %v20166_v57  ;;  %v20198_v50 = vld [vmem:[%s24569_s6 + $0xde8] sm:$0xff]   ;;  %v20193_v57 = vld [vmem:[%s24569_s6 + $0xe10] sm:$0xff]  }
 0x722   : > { %v11448_v5 = vpop.f32.mrb[142].mxu1  ;;  %18484 = vmatpush3.bf16.msra.mxu1 %v20161_v58 }
 0x723   : > { %v23958_v18 = vadd.f32 %v11446_v56, %v23829_v37  ;;  %v19094_v26 = vpop.f32.mrb[143].mxu1  ;;  %18485 = vmatprep.subr.bf16.mxu1 %v20164_v9  ;;  %v20169_v37 = vld [vmem:[%s24569_s6 + $0xc98] sm:$0xff]   ;;  %v20202_v56 = vld [vmem:[%s24569_s6 + $0xdf0] sm:$0xff]  }
 0x724   : > { %18504 = vmatpush3.bf16.msra.mxu0 %v20167_v52  ;;  %v20196_v9 = vld [vmem:[%s24569_s6 + $0xe58] sm:$0xff]   ;;  %v20199_v52 = vld [vmem:[%s24569_s6 + $0xda8] sm:$0xff]   ;;  %v20200_v26 = vld [vmem:[%s24569_s6 + $0xe60] sm:$0xff]  }
 0x725   : > { %18505 = vmatprep.subr.bf16.mxu0 %v20170_v1  ;;  %v20197_v1 = vld [vmem:[%s24569_s6 + $0xe18] sm:$0xff]  }
 0x726   : > { %18486 = vmatpush3.bf16.msra.mxu1 %v20165_v39 }
 0x727   : > { %18487 = vmatprep.subr.bf16.mxu1 %v20168_v32 }
 0x728   : > { %18506 = vmatpush3.bf16.msra.mxu0 %v20171_v59  ;;  %v20203_v59 = vld [vmem:[%s24569_s6 + $0xdb0] sm:$0xff]  }
 0x729   : > { %18507 = vmatprep.subr.bf16.mxu0 %v20173_v13 }
 0x72a   : > { %18488 = vmatpush3.bf16.msra.mxu1 %v20169_v37 }
 0x72b   : > { %19155 = vmatprep.subr.bf16.mxu1 %v20413_v14 }
 0x72c   : > { %18508 = vmatpush3.bf16.msra.mxu0 %v20174_v45  ;;  %v20206_v45 = vld [vmem:[%s24569_s6 + $0xdf8] sm:$0xff]  }
 0x72d   : > { %13906 = vmatmul.mubr.bf16.vlgmr.msra.gmra.mrb[172].mxu1 %v13645_v38  ;;  %18509 = vmatprep.subr.bf16.mxu0 %v20176_v61  ;;  %v20201_v61 = vld [vmem:[%s24569_s6 + $0xe20] sm:$0xff]   ;;  %v20205_v38 = vld [vmem:[%s24569_s6 + $0xe28] sm:$0xff]  }
 0x72e   : > { %19156 = vmatpush3.bf16.msra.mxu1 %v20172_v23  ;;  %19163 = vmatprep.mubr.msk.bf16.mxu1 %vm20414_vm3, %v20413_v14  ;;  %v20204_v23 = vld [vmem:[%s24569_s6 + $0xe68] sm:$0xff]  }
 0x72f   : > { %19157 = vmatprep.subr.bf16.mxu1 %v20413_v14 }
 0x730   : > { %18510 = vmatpush3.bf16.msra.mxu0 %v20177_v31  ;;  %v20208_v31 = vld [vmem:[%s24569_s6 + $0xe70] sm:$0xff]  }
 0x731   : > { %18522 = vmatprep.subr.bf16.mxu0 %v20179_v41  ;;  %v20210_v41 = vld [vmem:[%s24569_s6 + $0xe80] sm:$0xff]  }
 0x732   : > { %19158 = vmatpush3.bf16.msra.mxu1 %v20175_v62  ;;  %v14067_v62 = vrot.slane %v23581_v11, 2 }
 0x733   : > { %19159 = vmatprep.subr.bf16.mxu1 %v20413_v14  ;;  %13946 = vmatmul.mubr.bf16.vlgmr.msra.gmra.mrb[176].mxu0 %v13647_v43  ;;  %v20211_v43 = vld [vmem:[%s24569_s6 + $0xe78] sm:$0xff]  }
 0x734   : > { %18523 = vmatpush3.bf16.msra.mxu0 %v20180_v63  ;;  %14327 = vmatprep.mubr.bf16.mxu0 %v14068_v36  ;;  %v20209_v63 = vld [vmem:[%s24569_s6 + $0xe30] sm:$0xff]   ;;  %v20214_v36 = vld [vmem:[%s24569_s6 + $0xee0] sm:$0xff]  }
 0x735   : > { %18524 = vmatprep.subr.bf16.mxu0 %v20182_v3  ;;  %v20213_v3 = vld [vmem:[%s24569_s6 + $0xe88] sm:$0xff]  }
 0x736   : > { %19160 = vmatpush3.bf16.msra.mxu1 %v20178_v49  ;;  %v18244_v8 = vpop.f32.mrb[144].mxu0  ;;  %v20212_v49 = vld [vmem:[%s24569_s6 + $0xe38] sm:$0xff]  }
 0x737   : > { %19161 = vmatprep.subr.bf16.mxu1 %v20413_v14  ;;  %v18245_v12 = vpop.f32.mrb[145].mxu0 }
 0x738   : > { %v18246_v16 = vadd.f32 %v18245_v12, %v18244_v8  ;;  %v18247_v17 = vpop.f32.mrb[146].mxu0  ;;  %18525 = vmatpush3.bf16.msra.mxu0 %v20183_v4  ;;  %v20216_v4 = vld [vmem:[%s24569_s6 + $0xe90] sm:$0xff]   ;;  %v14069_v8 = vrot.slane %v23614_v60, 2  ;;  %v14490_v12 = vrot.slane %v23620_v34, 2 }
 0x739   : > { %v18248_v0 = vpop.f32.mrb[147].mxu0  ;;  %18526 = vmatprep.subr.bf16.mxu0 %v20186_v42  ;;  %v20215_v42 = vld [vmem:[%s24569_s6 + $0xea0] sm:$0xff]   ;;  %v20218_v17 = vld [vmem:[%s24569_s6 + $0xea8] sm:$0xff]  }
 0x73a   : > { %19162 = vmatpush3.bf16.msra.mxu1 %v20181_v10  ;;  %v20217_v10 = vld [vmem:[%s24569_s6 + $0xee8] sm:$0xff]  }
 0x73b   : > { %18544 = vmatprep.subr.bf16.mxu1 %v20184_v15  ;;  %v20219_v15 = vld [vmem:[%s24569_s6 + $0xe98] sm:$0xff]  }
 0x73c   : > { %18527 = vmatpush3.bf16.msra.mxu0 %v20187_v20  ;;  %v20220_v20 = vld [vmem:[%s24569_s6 + $0xef0] sm:$0xff]  }
 0x73d   : > { %19164 = vmatmul.mubr.msk.bf16.vlgmr.msra.gmra.mrb[176].mxu1 %vm4692_vm14, %v13649_v24  ;;  %18528 = vmatprep.subr.bf16.mxu0 %v20190_v21  ;;  %v20223_v21 = vld [vmem:[%s24569_s6 + $0xf20] sm:$0xff]   ;;  %v14071_v24 = vrot.slane %v23640_v2, 2 }
 0x73e   : > { %18545 = vmatpush3.bf16.msra.mxu1 %v20185_v22  ;;  %14367 = vmatprep.mubr.bf16.mxu1 %v14070_v27 }
 0x73f   : > { %18546 = vmatprep.subr.bf16.mxu1 %v20188_v25  ;;  %v20226_v25 = vld [vmem:[%s24569_s6 + $0xf68] sm:$0xff]  }
 0x740   : > { %v18266_v44 = vpop.f32.mrb[144].mxu1  ;;  %18529 = vmatpush3.bf16.msra.mxu0 %v20191_v28 }
 0x741   : > { %v18267_v48 = vpop.f32.mrb[145].mxu1  ;;  %18530 = vmatprep.subr.bf16.mxu0 %v20194_v29  ;;  %v20221_v29 = vld [vmem:[%s24569_s6 + $0xeb0] sm:$0xff]  }
 0x742   : > { %v18268_v51 = vadd.f32 %v18267_v48, %v18266_v44  ;;  %v18269_v55 = vpop.f32.mrb[146].mxu1  ;;  %18547 = vmatpush3.bf16.msra.mxu1 %v20189_v33  ;;  %v14492_v33 = vrot.slane %v23649_v7, 2  ;;  %v20224_v44 = vld [vmem:[%s24569_s6 + $0xef8] sm:$0xff]   ;;  %v20230_v48 = vld [vmem:[%s24569_s6 + $0xf70] sm:$0xff]  }
 0x743   : > { %v18270_v58 = vpop.f32.mrb[147].mxu1  ;;  %18548 = vmatprep.subr.bf16.mxu1 %v20192_v40 }
 0x744   : > { %18531 = vmatpush3.bf16.msra.mxu0 %v20195_v47  ;;  %v11828_v30 = vadd.f32 %v18268_v51, %v18246_v16  ;;  %v20222_v16 = vld [vmem:[%s24569_s6 + $0xf60] sm:$0xff]   ;;  %v20227_v47 = vld [vmem:[%s24569_s6 + $0xf28] sm:$0xff]   ;;  %v20225_v51 = vld [vmem:[%s24569_s6 + $0xeb8] sm:$0xff]  }
 0x745   : > { %18532 = vmatprep.subr.bf16.mxu0 %v20198_v50 }
 0x746   : > { %18549 = vmatpush3.bf16.msra.mxu1 %v20193_v57  ;;  %v11867_v53 = vpop.f32.mrb[148].mxu0  ;;  %v20228_v57 = vld [vmem:[%s24569_s6 + $0xf00] sm:$0xff]  }
 0x747   : > { %18550 = vmatprep.subr.bf16.mxu1 %v20196_v9  ;;  %v11868_v5 = vadd.f32 %v11867_v53, %v11828_v30  ;;  %v19105_v39 = vpop.f32.mrb[149].mxu0  ;;  %v20231_v30 = vld [vmem:[%s24569_s6 + $0xf30] sm:$0xff]   ;;  %v20229_v53 = vld [vmem:[%s24569_s6 + $0xec0] sm:$0xff]  }
 0x748   : > { %v11870_v32 = vpop.f32.mrb[150].mxu0  ;;  %18533 = vmatpush3.bf16.msra.mxu0 %v20199_v52  ;;  %v20235_v39 = vld [vmem:[%s24569_s6 + $0xf38] sm:$0xff]  }
 0x749   : > { %v24075_v13 = vadd.f32 %v11868_v5, %v23958_v18  ;;  %v19106_v37 = vpop.f32.mrb[151].mxu0  ;;  %18534 = vmatprep.subr.bf16.mxu0 %v20202_v56  ;;  %v20207_v18 = vld [vmem:[%s24569_s6 + $0xdb8] sm:$0xff]   ;;  %v20232_v5 = vld [vmem:[%s24569_s6 + $0xf08] sm:$0xff]  }
 0x74a   : > { %18551 = vmatpush3.bf16.msra.mxu1 %v20197_v1  ;;  %v20234_v56 = vld [vmem:[%s24569_s6 + $0xf78] sm:$0xff]   ;;  %v20233_v32 = vld [vmem:[%s24569_s6 + $0xec8] sm:$0xff]  }
 0x74b   : > { %18552 = vmatprep.subr.bf16.mxu1 %v20200_v26  ;;  %v20238_v26 = vld [vmem:[%s24569_s6 + $0xf80] sm:$0xff]  }
 0x74c   : > { %18535 = vmatpush3.bf16.msra.mxu0 %v20203_v59  ;;  %v20236_v59 = vld [vmem:[%s24569_s6 + $0xf10] sm:$0xff]  }
 0x74d   : > { %18536 = vmatprep.subr.bf16.mxu0 %v20206_v45  ;;  %v20239_v45 = vld [vmem:[%s24569_s6 + $0xf40] sm:$0xff]  }
 0x74e   : > { %18553 = vmatpush3.bf16.msra.mxu1 %v20201_v61 }
 0x74f   : > { %18554 = vmatprep.subr.bf16.mxu1 %v20204_v23 }
 0x750   : > { %18537 = vmatpush3.bf16.msra.mxu0 %v20207_v18  ;;  %v20242_v18 = vld [vmem:[%s24569_s6 + $0xf88] sm:$0xff]  }
 0x751   : > { %19167 = vmatprep.subr.bf16.mxu0 %v20413_v14 }
 0x752   : > { %18555 = vmatpush3.bf16.msra.mxu1 %v20205_v38 }
 0x753   : > { %18556 = vmatprep.subr.bf16.mxu1 %v20208_v31  ;;  %14328 = vmatmul.mubr.bf16.vlgmr.msra.gmra.mrb[180].mxu0 %v14067_v62  ;;  %v20237_v31 = vld [vmem:[%s24569_s6 + $0xed0] sm:$0xff]  }
 0x754   : > { %19168 = vmatpush3.bf16.msra.mxu0 %v20210_v41  ;;  %19175 = vmatprep.mubr.msk.bf16.mxu0 %vm20414_vm3, %v20413_v14 }
 0x755   : > { %19169 = vmatprep.subr.bf16.mxu0 %v20413_v14 }
 0x756   : > { %18557 = vmatpush3.bf16.msra.mxu1 %v20209_v63  ;;  %v20240_v63 = vld [vmem:[%s24569_s6 + $0xf18] sm:$0xff]  }
 0x757   : > { %18558 = vmatprep.subr.bf16.mxu1 %v20211_v43  ;;  %v20243_v43 = vld [vmem:[%s24569_s6 + $0xf48] sm:$0xff]  }
 0x758   : > { %19170 = vmatpush3.bf16.msra.mxu0 %v20213_v3  ;;  %v20245_v3 = vld [vmem:[%s24569_s6 + $0xf90] sm:$0xff]  }
 0x759   : > { %19171 = vmatprep.subr.bf16.mxu0 %v20413_v14 }
 0x75a   : > { %18559 = vmatpush3.bf16.msra.mxu1 %v20212_v49  ;;  %v20246_v49 = vld [vmem:[%s24569_s6 + $0xf50] sm:$0xff]  }
 0x75b   : > { %18571 = vmatprep.subr.bf16.mxu1 %v20214_v36  ;;  %v20248_v36 = vld [vmem:[%s24569_s6 + $0xf98] sm:$0xff]  }
 0x75c   : > { %19172 = vmatpush3.bf16.msra.mxu0 %v20216_v4  ;;  %v20244_v4 = vld [vmem:[%s24569_s6 + $0xfa0] sm:$0xff]  }
 0x75d   : > { %14368 = vmatmul.mubr.bf16.vlgmr.msra.gmra.mrb[180].mxu1 %v14069_v8  ;;  %19173 = vmatprep.subr.bf16.mxu0 %v20413_v14  ;;  %v20249_v8 = vld [vmem:[%s24569_s6 + $0xf58] sm:$0xff]  }
 0x75e   : > { %18572 = vmatpush3.bf16.msra.mxu1 %v20215_v42  ;;  %14749 = vmatprep.mubr.bf16.mxu1 %v14490_v12  ;;  %v14489_v42 = vrot.slane %v23727_v19, 2  ;;  %v20247_v12 = vld [vmem:[%s24569_s6 + $0xfa8] sm:$0xff]  }
 0x75f   : > { %18573 = vmatprep.subr.bf16.mxu1 %v20217_v10  ;;  %v20251_v10 = vld [vmem:[%s24569_s6 + $0x1000] sm:$0xff]  }
 0x760   : > { %v18293_v0 = vpop.f32.mrb[148].mxu1  ;;  %19174 = vmatpush3.bf16.msra.mxu0 %v20219_v15  ;;  %v20252_v15 = vld [vmem:[%s24569_s6 + $0xfc0] sm:$0xff]  }
 0x761   : > { %v18294_v22 = vpop.f32.mrb[149].mxu1  ;;  %18593 = vmatprep.subr.bf16.mxu0 %v20222_v16  ;;  %v14491_v16 = vrot.slane %v23747_v46, 2 }
 0x762   : > { %v18295_v27 = vadd.f32 %v18294_v22, %v18293_v0  ;;  %v18296_v28 = vpop.f32.mrb[150].mxu1  ;;  %18574 = vmatpush3.bf16.msra.mxu1 %v20218_v17  ;;  %v20254_v17 = vld [vmem:[%s24569_s6 + $0x1008] sm:$0xff]   ;;  %v14912_v0 = vrot.slane %v23477_v35, 3  ;;  %v20258_v22 = vld [vmem:[%s24569_s6 + $0x1010] sm:$0xff]   ;;  %v20253_v35 = vld [vmem:[%s24569_s6 + $0xfb8] sm:$0xff]  }
 0x763   : > { %v18297_v40 = vpop.f32.mrb[151].mxu1  ;;  %18575 = vmatprep.subr.bf16.mxu1 %v20220_v20  ;;  %19176 = vmatmul.mubr.msk.bf16.vlgmr.msra.gmra.mrb[184].mxu0 %vm4692_vm14, %v14071_v24  ;;  %v20250_v20 = vld [vmem:[%s24569_s6 + $0xfb0] sm:$0xff]  }
 0x764   : > { %18594 = vmatpush3.bf16.msra.mxu0 %v20223_v21  ;;  %14789 = vmatprep.mubr.bf16.mxu0 %v14492_v33  ;;  %v20255_v21 = vld [vmem:[%s24569_s6 + $0xfc8] sm:$0xff]   ;;  %v20259_v33 = vld [vmem:[%s24569_s6 + $0xfd0] sm:$0xff]  }
 0x765   : > { %18595 = vmatprep.subr.bf16.mxu0 %v20226_v25 }
 0x766   : > { %18576 = vmatpush3.bf16.msra.mxu1 %v20221_v29  ;;  %v18315_v50 = vpop.f32.mrb[152].mxu0 }
 0x767   : > { %18577 = vmatprep.subr.bf16.mxu1 %v20224_v44  ;;  %v18316_v55 = vpop.f32.mrb[153].mxu0  ;;  %v20262_v44 = vld [vmem:[%s24569_s6 + $0x1018] sm:$0xff]  }
 0x768   : > { %v18317_v58 = vadd.f32 %v18316_v55, %v18315_v50  ;;  %v18318_v9 = vpop.f32.mrb[154].mxu0  ;;  %18596 = vmatpush3.bf16.msra.mxu0 %v20227_v47  ;;  %v20257_v47 = vld [vmem:[%s24569_s6 + $0x1040] sm:$0xff]   ;;  %v20260_v50 = vld [vmem:[%s24569_s6 + $0x1088] sm:$0xff]   ;;  %v20263_v55 = vld [vmem:[%s24569_s6 + $0xfd8] sm:$0xff]  }
 0x769   : > { %v18319_v52 = vpop.f32.mrb[155].mxu0  ;;  %18597 = vmatprep.subr.bf16.mxu0 %v20230_v48  ;;  %v14493_v48 = vrot.slane %v23781_v54, 2 }
 0x76a   : > { %18578 = vmatpush3.bf16.msra.mxu1 %v20225_v51  ;;  %v12250_v1 = vadd.f32 %v18317_v58, %v18295_v27  ;;  %v20256_v27 = vld [vmem:[%s24569_s6 + $0x1080] sm:$0xff]   ;;  %v14914_v51 = vrot.slane %v23512_v6, 3  ;;  %v20261_v58 = vld [vmem:[%s24569_s6 + $0x1048] sm:$0xff]   ;;  %v20264_v6 = vld [vmem:[%s24569_s6 + $0x1090] sm:$0xff]  }
 0x76b   : > { %18579 = vmatprep.subr.bf16.mxu1 %v20228_v57  ;;  %v20266_v57 = vld [vmem:[%s24569_s6 + $0x1020] sm:$0xff]  }
 0x76c   : > { %18598 = vmatpush3.bf16.msra.mxu0 %v20231_v30  ;;  %v20267_v30 = vld [vmem:[%s24569_s6 + $0xfe0] sm:$0xff]  }
 0x76d   : > { %18599 = vmatprep.subr.bf16.mxu0 %v20234_v56  ;;  %v20270_v56 = vld [vmem:[%s24569_s6 + $0x1028] sm:$0xff]  }
 0x76e   : > { %18580 = vmatpush3.bf16.msra.mxu1 %v20229_v53 }
 0x76f   : > { %18581 = vmatprep.subr.bf16.mxu1 %v20232_v5  ;;  %v20265_v5 = vld [vmem:[%s24569_s6 + $0x1050] sm:$0xff]  }
 0x770   : > { %v12289_v37 = vpop.f32.mrb[152].mxu1  ;;  %18600 = vmatpush3.bf16.msra.mxu0 %v20235_v39 }
 0x771   : > { %v12290_v61 = vadd.f32 %v12289_v37, %v12250_v1  ;;  %v19117_v23 = vpop.f32.mrb[153].mxu1  ;;  %18601 = vmatprep.subr.bf16.mxu0 %v20238_v26  ;;  %v20268_v26 = vld [vmem:[%s24569_s6 + $0x1098] sm:$0xff]   ;;  %v20274_v37 = vld [vmem:[%s24569_s6 + $0x1030] sm:$0xff]  }
 0x772   : > { %v12292_v38 = vpop.f32.mrb[154].mxu1  ;;  %18582 = vmatpush3.bf16.msra.mxu1 %v20233_v32 }
 0x773   : > { %v24204_v41 = vadd.f32 %v12290_v61, %v24075_v13  ;;  %v19118_v62 = vpop.f32.mrb[155].mxu1  ;;  %18583 = vmatprep.subr.bf16.mxu1 %v20236_v59  ;;  %v20241_v13 = vld [vmem:[%s24569_s6 + $0xed8] sm:$0xff]   ;;  %v20271_v59 = vld [vmem:[%s24569_s6 + $0xfe8] sm:$0xff]   ;;  %v20272_v38 = vld [vmem:[%s24569_s6 + $0x10a0] sm:$0xff]  }
 0x774   : > { %18602 = vmatpush3.bf16.msra.mxu0 %v20239_v45  ;;  %v20269_v61 = vld [vmem:[%s24569_s6 + $0x1058] sm:$0xff]   ;;  %v20275_v62 = vld [vmem:[%s24569_s6 + $0xff0] sm:$0xff]  }
 0x775   : > { %18603 = vmatprep.subr.bf16.mxu0 %v20242_v18 }
 0x776   : > { %18584 = vmatpush3.bf16.msra.mxu1 %v20237_v31 }
 0x777   : > { %18585 = vmatprep.subr.bf16.mxu1 %v20240_v63 }
 0x778   : > { %18604 = vmatpush3.bf16.msra.mxu0 %v20243_v43 }
 0x779   : > { %18605 = vmatprep.subr.bf16.mxu0 %v20245_v3  ;;  %v20278_v3 = vld [vmem:[%s24569_s6 + $0x1038] sm:$0xff]  }
 0x77a   : > { %18586 = vmatpush3.bf16.msra.mxu1 %v20241_v13  ;;  %v20273_v13 = vld [vmem:[%s24569_s6 + $0x1060] sm:$0xff]  }
 0x77b   : > { %19179 = vmatprep.subr.bf16.mxu1 %v20413_v14 }
 0x77c   : > { %18606 = vmatpush3.bf16.msra.mxu0 %v20246_v49  ;;  %v20276_v49 = vld [vmem:[%s24569_s6 + $0x10a8] sm:$0xff]  }
 0x77d   : > { %14750 = vmatmul.mubr.bf16.vlgmr.msra.gmra.mrb[184].mxu1 %v14489_v42  ;;  %18607 = vmatprep.subr.bf16.mxu0 %v20248_v36  ;;  %v20277_v36 = vld [vmem:[%s24569_s6 + $0x1068] sm:$0xff]   ;;  %v20282_v42 = vld [vmem:[%s24569_s6 + $0x10c0] sm:$0xff]  }
 0x77e   : > { %19180 = vmatpush3.bf16.msra.mxu1 %v20244_v4  ;;  %19187 = vmatprep.mubr.msk.bf16.mxu1 %vm20414_vm3, %v20413_v14  ;;  %v20280_v4 = vld [vmem:[%s24569_s6 + $0x10b0] sm:$0xff]  }
 0x77f   : > { %19181 = vmatprep.subr.bf16.mxu1 %v20413_v14 }
 0x780   : > { %18608 = vmatpush3.bf16.msra.mxu0 %v20249_v8  ;;  %v14911_v8 = vrot.slane %v23581_v11, 3  ;;  %v20284_v11 = vld [vmem:[%s24569_s6 + $0x1078] sm:$0xff]  }
 0x781   : > { %18620 = vmatprep.subr.bf16.mxu0 %v20251_v10  ;;  %v20281_v10 = vld [vmem:[%s24569_s6 + $0x1070] sm:$0xff]  }
 0x782   : > { %19182 = vmatpush3.bf16.msra.mxu1 %v20247_v12  ;;  %v20283_v12 = vld [vmem:[%s24569_s6 + $0x10b8] sm:$0xff]  }
 0x783   : > { %19183 = vmatprep.subr.bf16.mxu1 %v20413_v14  ;;  %14790 = vmatmul.mubr.bf16.vlgmr.msra.gmra.mrb[188].mxu0 %v14491_v16  ;;  %v20286_v16 = vld [vmem:[%s24569_s6 + $0x1120] sm:$0xff]  }
 0x784   : > { %18621 = vmatpush3.bf16.msra.mxu0 %v20252_v15  ;;  %15171 = vmatprep.mubr.bf16.mxu0 %v14912_v0  ;;  %v20285_v15 = vld [vmem:[%s24569_s6 + $0x10c8] sm:$0xff]   ;;  %v14913_v0 = vrot.slane %v23614_v60, 3 }
 0x785   : > { %18622 = vmatprep.subr.bf16.mxu0 %v20254_v17  ;;  %v20288_v17 = vld [vmem:[%s24569_s6 + $0x10d0] sm:$0xff]   ;;  %v20290_v60 = vld [vmem:[%s24569_s6 + $0x10e8] sm:$0xff]  }
 0x786   : > { %19184 = vmatpush3.bf16.msra.mxu1 %v20250_v20  ;;  %v18342_v24 = vpop.f32.mrb[156].mxu0  ;;  %v20287_v20 = vld [vmem:[%s24569_s6 + $0x10e0] sm:$0xff]  }
 0x787   : > { %19185 = vmatprep.subr.bf16.mxu1 %v20413_v14  ;;  %v18343_v25 = vpop.f32.mrb[157].mxu0 }
 0x788   : > { %v18344_v28 = vadd.f32 %v18343_v25, %v18342_v24  ;;  %v18345_v29 = vpop.f32.mrb[158].mxu0  ;;  %18623 = vmatpush3.bf16.msra.mxu0 %v20255_v21  ;;  %v20289_v21 = vld [vmem:[%s24569_s6 + $0x1128] sm:$0xff]   ;;  %v20291_v24 = vld [vmem:[%s24569_s6 + $0x10d8] sm:$0xff]  }
 0x789   : > { %v18346_v40 = vpop.f32.mrb[159].mxu0  ;;  %18624 = vmatprep.subr.bf16.mxu0 %v20258_v22  ;;  %v15334_v22 = vrot.slane %v23620_v34, 3  ;;  %v20292_v34 = vld [vmem:[%s24569_s6 + $0x1130] sm:$0xff]   ;;  %v14915_v29 = vrot.slane %v23640_v2, 3  ;;  %v20296_v2 = vld [vmem:[%s24569_s6 + $0x1138] sm:$0xff]  }
 0x78a   : > { %19186 = vmatpush3.bf16.msra.mxu1 %v20253_v35  ;;  %v20294_v35 = vld [vmem:[%s24569_s6 + $0x11a0] sm:$0xff]  }
 0x78b   : > { %18642 = vmatprep.subr.bf16.mxu1 %v20256_v27  ;;  %v20295_v27 = vld [vmem:[%s24569_s6 + $0x1160] sm:$0xff]  }
 0x78c   : > { %18625 = vmatpush3.bf16.msra.mxu0 %v20259_v33  ;;  %v20298_v33 = vld [vmem:[%s24569_s6 + $0x11a8] sm:$0xff]  }
 0x78d   : > { %19188 = vmatmul.mubr.msk.bf16.vlgmr.msra.gmra.mrb[188].mxu1 %vm4692_vm14, %v14493_v48  ;;  %18626 = vmatprep.subr.bf16.mxu0 %v20262_v44  ;;  %v15336_v48 = vrot.slane %v23649_v7, 3 }
 0x78e   : > { %18643 = vmatpush3.bf16.msra.mxu1 %v20257_v47  ;;  %15211 = vmatprep.mubr.bf16.mxu1 %v14914_v51  ;;  %v20293_v47 = vld [vmem:[%s24569_s6 + $0x10f0] sm:$0xff]   ;;  %v20299_v51 = vld [vmem:[%s24569_s6 + $0x1168] sm:$0xff]  }
 0x78f   : > { %18644 = vmatprep.subr.bf16.mxu1 %v20260_v50 }
 0x790   : > { %v18364_v9 = vpop.f32.mrb[156].mxu1  ;;  %18627 = vmatpush3.bf16.msra.mxu0 %v20263_v55  ;;  %v20302_v55 = vld [vmem:[%s24569_s6 + $0x11b0] sm:$0xff]  }
 0x791   : > { %v18365_v52 = vpop.f32.mrb[157].mxu1  ;;  %18628 = vmatprep.subr.bf16.mxu0 %v20266_v57  ;;  %v20297_v57 = vld [vmem:[%s24569_s6 + $0x10f8] sm:$0xff]  }
 0x792   : > { %v18366_v53 = vadd.f32 %v18365_v52, %v18364_v9  ;;  %v18367_v1 = vpop.f32.mrb[158].mxu1  ;;  %18645 = vmatpush3.bf16.msra.mxu1 %v20261_v58  ;;  %v20303_v52 = vld [vmem:[%s24569_s6 + $0x1170] sm:$0xff]  }
 0x793   : > { %v18368_v39 = vpop.f32.mrb[159].mxu1  ;;  %18646 = vmatprep.subr.bf16.mxu1 %v20264_v6  ;;  %v20300_v6 = vld [vmem:[%s24569_s6 + $0x1140] sm:$0xff]  }
 0x794   : > { %18629 = vmatpush3.bf16.msra.mxu0 %v20267_v30  ;;  %v12668_v32 = vadd.f32 %v18366_v53, %v18344_v28  ;;  %v20306_v53 = vld [vmem:[%s24569_s6 + $0x11b8] sm:$0xff]   ;;  %v20301_v1 = vld [vmem:[%s24569_s6 + $0x1100] sm:$0xff]   ;;  %v20304_v39 = vld [vmem:[%s24569_s6 + $0x1148] sm:$0xff]  }
 0x795   : > { %18630 = vmatprep.subr.bf16.mxu0 %v20270_v56 }
 0x796   : > { %18647 = vmatpush3.bf16.msra.mxu1 %v20265_v5  ;;  %v12707_v45 = vpop.f32.mrb[160].mxu0 }
 0x797   : > { %18648 = vmatprep.subr.bf16.mxu1 %v20268_v26  ;;  %v12708_v23 = vadd.f32 %v12707_v45, %v12668_v32  ;;  %v19129_v18 = vpop.f32.mrb[161].mxu0  ;;  %v20307_v26 = vld [vmem:[%s24569_s6 + $0x1178] sm:$0xff]   ;;  %v20310_v32 = vld [vmem:[%s24569_s6 + $0x11c0] sm:$0xff]  }
 0x798   : > { %v12710_v31 = vpop.f32.mrb[162].mxu0  ;;  %18631 = vmatpush3.bf16.msra.mxu0 %v20271_v59  ;;  %v20305_v59 = vld [vmem:[%s24569_s6 + $0x1108] sm:$0xff]  }
 0x799   : > { %v24321_v63 = vadd.f32 %v12708_v23, %v24204_v41  ;;  %v19130_v43 = vpop.f32.mrb[163].mxu0  ;;  %18632 = vmatprep.subr.bf16.mxu0 %v20274_v37  ;;  %v20279_v41 = vld [vmem:[%s24569_s6 + $0xff8] sm:$0xff]   ;;  %v20308_v37 = vld [vmem:[%s24569_s6 + $0x1150] sm:$0xff]  }
 0x79a   : > { %18649 = vmatpush3.bf16.msra.mxu1 %v20269_v61  ;;  %v20311_v61 = vld [vmem:[%s24569_s6 + $0x1180] sm:$0xff]  }
 0x79b   : > { %18650 = vmatprep.subr.bf16.mxu1 %v20272_v38  ;;  %v20314_v38 = vld [vmem:[%s24569_s6 + $0x11c8] sm:$0xff]  }
 0x79c   : > { %18633 = vmatpush3.bf16.msra.mxu0 %v20275_v62  ;;  %v20309_v62 = vld [vmem:[%s24569_s6 + $0x1110] sm:$0xff]  }
 0x79d   : > { %18634 = vmatprep.subr.bf16.mxu0 %v20278_v3 }
 0x79e   : > { %18651 = vmatpush3.bf16.msra.mxu1 %v20273_v13  ;;  %v20312_v13 = vld [vmem:[%s24569_s6 + $0x1158] sm:$0xff]  }
 0x79f   : > { %18652 = vmatprep.subr.bf16.mxu1 %v20276_v49  ;;  %v20315_v49 = vld [vmem:[%s24569_s6 + $0x1188] sm:$0xff]  }
 0x7a0   : > { %18635 = vmatpush3.bf16.msra.mxu0 %v20279_v41  ;;  %v20317_v41 = vld [vmem:[%s24569_s6 + $0x11d0] sm:$0xff]  }
 0x7a1   : > { %19191 = vmatprep.subr.bf16.mxu0 %v20413_v14 }
 0x7a2   : > { %18653 = vmatpush3.bf16.msra.mxu1 %v20277_v36  ;;  %v20318_v36 = vld [vmem:[%s24569_s6 + $0x1190] sm:$0xff]  }
 0x7a3   : > { %18654 = vmatprep.subr.bf16.mxu1 %v20280_v4  ;;  %15172 = vmatmul.mubr.bf16.vlgmr.msra.gmra.mrb[192].mxu0 %v14911_v8  ;;  %v20320_v4 = vld [vmem:[%s24569_s6 + $0x11d8] sm:$0xff]   ;;  %v15333_v8 = vrot.slane %v23727_v19, 3  ;;  %v15335_v19 = vrot.slane %v23747_v46, 3 }
 0x7a4   : > { %19192 = vmatpush3.bf16.msra.mxu0 %v20282_v42  ;;  %19199 = vmatprep.mubr.msk.bf16.mxu0 %vm20414_vm3, %v20413_v14  ;;  %v20316_v42 = vld [vmem:[%s24569_s6 + $0x11e0] sm:$0xff]  }
 0x7a5   : > { %19193 = vmatprep.subr.bf16.mxu0 %v20413_v14 }
 0x7a6   : > { %18655 = vmatpush3.bf16.msra.mxu1 %v20281_v10  ;;  %v20321_v10 = vld [vmem:[%s24569_s6 + $0x1198] sm:$0xff]  }
 0x7a7   : > { %18656 = vmatprep.subr.bf16.mxu1 %v20283_v12  ;;  %v20319_v12 = vld [vmem:[%s24569_s6 + $0x11e8] sm:$0xff]  }
 0x7a8   : > { %19194 = vmatpush3.bf16.msra.mxu0 %v20285_v15  ;;  %v20322_v15 = vld [vmem:[%s24569_s6 + $0x11f0] sm:$0xff]  }
 0x7a9   : > { %19195 = vmatprep.subr.bf16.mxu0 %v20413_v14 }
 0x7aa   : > { %18657 = vmatpush3.bf16.msra.mxu1 %v20284_v11 }
 0x7ab   : > { %18669 = vmatprep.subr.bf16.mxu1 %v20286_v16  ;;  %v20323_v16 = vld [vmem:[%s24569_s6 + $0x11f8] sm:$0xff]  }
 0x7ac   : > { %19196 = vmatpush3.bf16.msra.mxu0 %v20288_v17 }
 0x7ad   : > { %15212 = vmatmul.mubr.bf16.vlgmr.msra.gmra.mrb[192].mxu1 %v14913_v0  ;;  %19197 = vmatprep.subr.bf16.mxu0 %v20413_v14 }
 0x7ae   : > { %18670 = vmatpush3.bf16.msra.mxu1 %v20287_v20  ;;  %15593 = vmatprep.mubr.bf16.mxu1 %v15334_v22 }
 0x7af   : > { %18671 = vmatprep.subr.bf16.mxu1 %v20289_v21  ;;  %v15337_v21 = vrot.slane %v23781_v54, 3 }
 0x7b0   : > { %v18391_v25 = vpop.f32.mrb[160].mxu1  ;;  %19198 = vmatpush3.bf16.msra.mxu0 %v20291_v24 }
 0x7b1   : > { %v18392_v28 = vpop.f32.mrb[161].mxu1  ;;  %18691 = vmatprep.subr.bf16.mxu0 %v20294_v35 }
 0x7b2   : > { %v18393_v40 = vadd.f32 %v18392_v28, %v18391_v25  ;;  %v18394_v44 = vpop.f32.mrb[162].mxu1  ;;  %18672 = vmatpush3.bf16.msra.mxu1 %v20290_v60 }
 0x7b3   : > { %v18395_v50 = vpop.f32.mrb[163].mxu1  ;;  %18673 = vmatprep.subr.bf16.mxu1 %v20292_v34  ;;  %19200 = vmatmul.mubr.msk.bf16.vlgmr.msra.gmra.mrb[196].mxu0 %vm4692_vm14, %v14915_v29 }
 0x7b4   : > { %18692 = vmatpush3.bf16.msra.mxu0 %v20295_v27  ;;  %15633 = vmatprep.mubr.bf16.mxu0 %v15336_v48 }
 0x7b5   : > { %18693 = vmatprep.subr.bf16.mxu0 %v20298_v33 }
 0x7b6   : > { %18674 = vmatpush3.bf16.msra.mxu1 %v20293_v47  ;;  %v18413_v7 = vpop.f32.mrb[164].mxu0 }
 0x7b7   : > { %18675 = vmatprep.subr.bf16.mxu1 %v20296_v2  ;;  %v18414_v58 = vpop.f32.mrb[165].mxu0 }
 0x7b8   : > { %v18415_v9 = vadd.f32 %v18414_v58, %v18413_v7  ;;  %v18416_v30 = vpop.f32.mrb[166].mxu0  ;;  %18694 = vmatpush3.bf16.msra.mxu0 %v20299_v51 }
 0x7b9   : > { %v18417_v56 = vpop.f32.mrb[167].mxu0  ;;  %18695 = vmatprep.subr.bf16.mxu0 %v20302_v55 }
 0x7ba   : > { %18676 = vmatpush3.bf16.msra.mxu1 %v20297_v57  ;;  %v13099_v5 = vadd.f32 %v18415_v9, %v18393_v40 }
 0x7bb   : > { %18677 = vmatprep.subr.bf16.mxu1 %v20300_v6 }
 0x7bc   : > { %18696 = vmatpush3.bf16.msra.mxu0 %v20303_v52 }
 0x7bd   : > { %18697 = vmatprep.subr.bf16.mxu0 %v20306_v53 }
 0x7be   : > { %18678 = vmatpush3.bf16.msra.mxu1 %v20301_v1 }
 0x7bf   : > { %18679 = vmatprep.subr.bf16.mxu1 %v20304_v39 }
 0x7c0   : > { %v13138_v45 = vpop.f32.mrb[164].mxu1  ;;  %18698 = vmatpush3.bf16.msra.mxu0 %v20307_v26 }
 0x7c1   : > { %v13139_v23 = vadd.f32 %v13138_v45, %v13099_v5  ;;  %v19141_v18 = vpop.f32.mrb[165].mxu1  ;;  %18699 = vmatprep.subr.bf16.mxu0 %v20310_v32 }
 0x7c2   : > { %v13141_v31 = vpop.f32.mrb[166].mxu1  ;;  %18680 = vmatpush3.bf16.msra.mxu1 %v20305_v59 }
 0x7c3   : > { %v13144_v43 = vadd.f32 %v13139_v23, %v24321_v63  ;;  %v19142_v3 = vpop.f32.mrb[167].mxu1  ;;  %18681 = vmatprep.subr.bf16.mxu1 %v20308_v37  ;;  %v20313_v63 = vld [vmem:[%s24569_s6 + $0x1118] sm:$0xff]  }
 0x7c4   : > { %18700 = vmatpush3.bf16.msra.mxu0 %v20311_v61  ;;  %v15686_v3 = vld [vmem:[%s24571_s8 + $0x8] sm:$0xff] }
 0x7c5   : > { %18701 = vmatprep.subr.bf16.mxu0 %v20314_v38 }
 0x7c6   : > { %18682 = vmatpush3.bf16.msra.mxu1 %v20309_v62 }
 0x7c7   : > { %18683 = vmatprep.subr.bf16.mxu1 %v20312_v13  ;;  %v15687_v13 = vld [vmem:[%s24571_s8 + $0x10] sm:$0xff] }
 0x7c8   : > { %18702 = vmatpush3.bf16.msra.mxu0 %v20315_v49 }
 0x7c9   : > { %18703 = vmatprep.subr.bf16.mxu0 %v20317_v41  ;;  %v20426_v41 = vmov 0.0|0.0  }
 0x7ca   : > { %18684 = vmatpush3.bf16.msra.mxu1 %v20313_v63 }
 0x7cb   : > { %19203 = vmatprep.subr.bf16.mxu1 %v20413_v14 }
 0x7cc   : > { %18704 = vmatpush3.bf16.msra.mxu0 %v20318_v36  ;;  %v15688_v36 = vld [vmem:[%s24571_s8 + $0x18] sm:$0xff] }
 0x7cd   : > { %15594 = vmatmul.mubr.bf16.vlgmr.msra.gmra.mrb[196].mxu1 %v15333_v8  ;;  %18705 = vmatprep.subr.bf16.mxu0 %v20320_v4  ;;  %v19230_v8 = vpack.c.bf16 %v15688_v36, %v15687_v13 }
 0x7ce   : > { %19204 = vmatpush3.bf16.msra.mxu1 %v20316_v42  ;;  %19211 = vmatprep.mubr.msk.bf16.mxu1 %vm20414_vm3, %v20413_v14 }
 0x7cf   : > { %19205 = vmatprep.subr.bf16.mxu1 %v20413_v14 }
 0x7d0   : > { %18706 = vmatpush3.bf16.msra.mxu0 %v20321_v10 }
 0x7d1   : > { %19226 = vmatprep.subr.bf16.mxu0 %v20426_v41 }
 0x7d2   : > { %19206 = vmatpush3.bf16.msra.mxu1 %v20319_v12 }
 0x7d3   : > { %19207 = vmatprep.subr.bf16.mxu1 %v20413_v14  ;;  %15634 = vmatmul.mubr.bf16.vlgmr.msra.gmra.mrb[200].mxu0 %v15335_v19 }
 0x7d4   : > { %19223 = vmatprep.mubr.msk.f32.mxu0 %vm20414_vm3, %v20413_v14  ;;  %vm15770_vm3 = vcmask 24576  }
 0x7d6   : > { %19208 = vmatpush3.bf16.msra.mxu1 %v20322_v15  ;;  %v18440_v11 = vpop.f32.mrb[168].mxu0 }
 0x7d7   : > { %19209 = vmatprep.subr.bf16.mxu1 %v20413_v14  ;;  %v18441_v46 = vpop.f32.mrb[169].mxu0 }
 0x7d8   : > { %v18442_v17 = vadd.f32 %v18441_v46, %v18440_v11  ;;  %v18443_v20 = vpop.f32.mrb[170].mxu0 }
 0x7d9   : > { %v18444_v0 = vpop.f32.mrb[171].mxu0 }
 0x7da   : > { %19210 = vmatpush3.bf16.msra.mxu1 %v20323_v16 }
 0x7dd   : > { %19212 = vmatmul.mubr.msk.bf16.vlgmr.msra.gmra.mrb[200].mxu1 %vm4692_vm14, %v15337_v21 }
 0x7e0   : > { %v18462_v22 = vpop.f32.mrb[168].mxu1 }
 0x7e1   : > { %v18463_v24 = vpop.f32.mrb[169].mxu1 }
 0x7e2   : > { %v18464_v35 = vadd.f32 %v18463_v24, %v18462_v22  ;;  %v18465_v60 = vpop.f32.mrb[170].mxu1 }
 0x7e3   : > { %v18466_v34 = vpop.f32.mrb[171].mxu1 }
 0x7e4   : > { %v13526_v25 = vadd.f32 %v18464_v35, %v18442_v17 }
 0x7e6   : > { %v13565_v27 = vpop.f32.mrb[172].mxu0 }
 0x7e7   : > { %v13566_v28 = vadd.f32 %v13565_v27, %v13526_v25  ;;  %v19153_v29 = vpop.f32.mrb[173].mxu0 }
 0x7e8   : > { %v13568_v33 = vpop.f32.mrb[174].mxu0 }
 0x7e9   : > { %v13571_v14 = vadd.f32 %v13566_v28, %v13144_v43  ;;  %v19154_v40 = vpop.f32.mrb[175].mxu0  ;;  %v15685_v43 = vld [vmem:[%s24571_s8] sm:$0xff] }
 0x7ea   : > { %v19227_v63 = vpack.c.bf16 %v15686_v3, %v15685_v43  ;;  %v20427_v43 = vmov 4   ;;  %v15689_v3 = vld [vmem:[%s24572_s9] sm:$0x1] }
 0x7eb   : > { %19687 = vset.pattern.permute.xlu0 %v20427_v43 }
 0x7ec   : > { %19228 = vmatpush3.bf16.msra.mxu0 %v19227_v63 }
 0x7ed   : > { %19229 = vmatprep.subr.bf16.mxu0 %v20426_v41 }
 0x7f0   : > { %19231 = vmatpush3.bf16.msra.mxu0 %v19230_v8 }
 0x800   : > { %v18489_v44 = vpop.f32.mrb[172].mxu1 }
 0x801   : > { %v18490_v47 = vpop.f32.mrb[173].mxu1 }
 0x802   : > { %v18491_v48 = vadd.f32 %v18490_v47, %v18489_v44  ;;  %v18492_v50 = vpop.f32.mrb[174].mxu1 }
 0x803   : > { %v18493_v2 = vpop.f32.mrb[175].mxu1 }
 0x806   : > { %v18511_v54 = vpop.f32.mrb[176].mxu0 }
 0x807   : > { %v18512_v51 = vpop.f32.mrb[177].mxu0 }
 0x808   : > { %v18513_v55 = vadd.f32 %v18512_v51, %v18511_v54  ;;  %v18514_v7 = vpop.f32.mrb[178].mxu0 }
 0x809   : > { %v18515_v57 = vpop.f32.mrb[179].mxu0 }
 0x80a   : > { %v13948_v58 = vadd.f32 %v18513_v55, %v18491_v48 }
 0x810   : > { %v13987_v6 = vpop.f32.mrb[176].mxu1 }
 0x811   : > { %v13988_v9 = vadd.f32 %v13987_v6, %v13948_v58  ;;  %v19165_v30 = vpop.f32.mrb[177].mxu1 }
 0x812   : > { %v13990_v52 = vpop.f32.mrb[178].mxu1 }
 0x813   : > { %v13993_v56 = vadd.f32 %v13988_v9, %v13571_v14  ;;  %v19166_v53 = vpop.f32.mrb[179].mxu1 }
 0x826   : > { %v18538_v1 = vpop.f32.mrb[180].mxu0 }
 0x827   : > { %v18539_v5 = vpop.f32.mrb[181].mxu0 }
 0x828   : > { %v18540_v39 = vadd.f32 %v18539_v5, %v18538_v1  ;;  %v18541_v26 = vpop.f32.mrb[182].mxu0 }
 0x829   : > { %v18542_v32 = vpop.f32.mrb[183].mxu0 }
 0x830   : > { %v18560_v59 = vpop.f32.mrb[180].mxu1 }
 0x831   : > { %v18561_v37 = vpop.f32.mrb[181].mxu1 }
 0x832   : > { %v18562_v45 = vadd.f32 %v18561_v37, %v18560_v59  ;;  %v18563_v61 = vpop.f32.mrb[182].mxu1 }
 0x833   : > { %v18564_v23 = vpop.f32.mrb[183].mxu1  ;;  %v15682_v61 = vld [vmem:[%s24570_s7] sm:$0x1] }
 0x834   : > { %v14370_v18 = vadd.f32 %v18562_v45, %v18540_v39 }
 0x836   : > { %v14409_v38 = vpop.f32.mrb[184].mxu0 }
 0x837   : > { %v14410_v31 = vadd.f32 %v14409_v38, %v14370_v18  ;;  %v19177_v62 = vpop.f32.mrb[185].mxu0 }
 0x838   : > { %v14412_v49 = vpop.f32.mrb[186].mxu0 }
 0x839   : > { %v14415_v4 = vadd.f32 %v14410_v31, %v13993_v56  ;;  %v19178_v42 = vpop.f32.mrb[187].mxu0 }
 0x850   : > { %v18587_v10 = vpop.f32.mrb[184].mxu1 }
 0x851   : > { %v18588_v12 = vpop.f32.mrb[185].mxu1 }
 0x852   : > { %v18589_v19 = vadd.f32 %v18588_v12, %v18587_v10  ;;  %v18590_v15 = vpop.f32.mrb[186].mxu1 }
 0x853   : > { %v18591_v11 = vpop.f32.mrb[187].mxu1 }
 0x856   : > { %v18609_v16 = vpop.f32.mrb[188].mxu0 }
 0x857   : > { %v18610_v46 = vpop.f32.mrb[189].mxu0 }
 0x858   : > { %v18611_v17 = vadd.f32 %v18610_v46, %v18609_v16  ;;  %v18612_v20 = vpop.f32.mrb[190].mxu0 }
 0x859   : > { %v18613_v0 = vpop.f32.mrb[191].mxu0 }
 0x85a   : > { %v14792_v21 = vadd.f32 %v18611_v17, %v18589_v19 }
 0x860   : > { %v14831_v22 = vpop.f32.mrb[188].mxu1 }
 0x861   : > { %v14832_v24 = vadd.f32 %v14831_v22, %v14792_v21  ;;  %v19189_v35 = vpop.f32.mrb[189].mxu1 }
 0x862   : > { %v14834_v60 = vpop.f32.mrb[190].mxu1 }
 0x863   : > { %v14837_v34 = vadd.f32 %v14832_v24, %v14415_v4  ;;  %v19190_v25 = vpop.f32.mrb[191].mxu1 }
 0x876   : > { %v18636_v27 = vpop.f32.mrb[192].mxu0 }
 0x877   : > { %v18637_v28 = vpop.f32.mrb[193].mxu0 }
 0x878   : > { %v18638_v29 = vadd.f32 %v18637_v28, %v18636_v27  ;;  %v18639_v33 = vpop.f32.mrb[194].mxu0 }
 0x879   : > { %v18640_v14 = vpop.f32.mrb[195].mxu0 }
 0x880   : > { %v18658_v40 = vpop.f32.mrb[192].mxu1 }
 0x881   : > { %v18659_v44 = vpop.f32.mrb[193].mxu1 }
 0x882   : > { %v18660_v47 = vadd.f32 %v18659_v44, %v18658_v40  ;;  %v18661_v48 = vpop.f32.mrb[194].mxu1 }
 0x883   : > { %v18662_v50 = vpop.f32.mrb[195].mxu1 }
 0x884   : > { %v15214_v2 = vadd.f32 %v18660_v47, %v18638_v29 }
 0x886   : > { %v15253_v54 = vpop.f32.mrb[196].mxu0 }
 0x887   : > { %v15254_v51 = vadd.f32 %v15253_v54, %v15214_v2  ;;  %v19201_v55 = vpop.f32.mrb[197].mxu0 }
 0x888   : > { %v15256_v7 = vpop.f32.mrb[198].mxu0 }
 0x889   : > { %v15259_v57 = vadd.f32 %v15254_v51, %v14837_v34  ;;  %v19202_v58 = vpop.f32.mrb[199].mxu0 }
 0x8a0   : > { %v18685_v6 = vpop.f32.mrb[196].mxu1 }
 0x8a1   : > { %v18686_v9 = vpop.f32.mrb[197].mxu1 }
 0x8a2   : > { %v18687_v30 = vadd.f32 %v18686_v9, %v18685_v6  ;;  %v18688_v52 = vpop.f32.mrb[198].mxu1 }
 0x8a3   : > { %v18689_v56 = vpop.f32.mrb[199].mxu1 }
 0x8a6   : > { %v18707_v53 = vpop.f32.mrb[200].mxu0 }
 0x8a7   : > { %v18708_v1 = vpop.f32.mrb[201].mxu0 }
 0x8a8   : > { %v18709_v5 = vadd.f32 %v18708_v1, %v18707_v53  ;;  %v18710_v39 = vpop.f32.mrb[202].mxu0 }
 0x8a9   : > { %v18711_v26 = vpop.f32.mrb[203].mxu0 }
 0x8aa   : > { %v15636_v32 = vadd.f32 %v18709_v5, %v18687_v30 }
 0x8b0   : > { %v15675_v59 = vpop.f32.mrb[200].mxu1 }
 0x8b1   : > { %v15676_v37 = vadd.f32 %v15675_v59, %v15636_v32  ;;  %v19213_v45 = vpop.f32.mrb[201].mxu1 }
 0x8b2   : > { %v15678_v23 = vpop.f32.mrb[202].mxu1 }
 0x8b3   : > { %v15681_v18 = vadd.f32 %v15676_v37, %v15259_v57  ;;  %v19214_v38 = vpop.f32.mrb[203].mxu1 }
 0x8b5   : > { %v15683_v31 = vadd.f32 %v15682_v61, %v15681_v18 }
 0x8b7   : > { %v15684_v62 = vmax.f32 %v15683_v31, 0.0 }
 0x8b9   : > { %19224 = vmatmul.mubr.msk.f32.vlgmr.msra.gmra.mrb[204].mxu0 %vm24702_vm1, %v15684_v62 }
 0x98c   : > { %v15760_v13 = vpop.f32.mrb[204].mxu0 }
 0x98d   : > { %v15761_v49 = vadd.f32 %v15760_v13, %v15689_v3  ;;  %v19225_v41 = vpop.f32.mrb[205].mxu0 }
 0x98f   : > { %15766 = vperm.xlu0 %19687, %v15761_v49   ;;  %v15771_v63 = vsel %vm15770_vm3, %v15761_v49, 0.0 }
 0x990   : > { %15772 = vadd.xlane.f32.xlu1 %v15771_v63 }
 0xa0e   : > { %v15767_v36 = vpop.permute.xlu0 %15766 }
 0xa0f   : > { %v15769_v42 = vadd.f32 %v15767_v36, %v15761_v49 }
 0xa1d   : > { %v15773_v4 = vpop.xlane.xlu1 %15772 }
 0xa1e   : > { %v15775_v8 = vmul.f32 0.25, %v15773_v4 }
 0xa20   : > { %v15776_v10 = vsub.f32 %v15769_v42, %v15775_v8 }
 0xa22   : > { %15777 = vst.msk [vmem:[%s351_s27] sm:$0x1] %vm15770_vm3, %v15776_v10 }
 0xa23   : > { %20348 = shalt.err (!%p20345_p3)
}
 0xa24   : > { %s20349_s26 = scalar_lea.hbm %s24520_s30, 16  ;;  %s20353_s21 = scalar_lea.hbm %s24573_s10, 32 }
 0xa25   : > { %p20350_p4 = scmp.ne.s32.totalorder %s24520_s30, %s20349_s26  ;;  %p20354_p9 = scmp.lt.u32.totalorder %s24520_s30, %s24573_s10 }
 0xa26   : > { %p20355_p10 = scmp.lt.u32.totalorder %s20353_s21, %s20349_s26  ;;  %p20357_p12 = scmp.lt.u32.totalorder %s20349_s26, %s24520_s30 }
 0xa27   : > { %p20351_p7 = pnand %p20350_p4, %p20522_p5 }
 0xa28   : > { %p20356_p11 = por %p20355_p10, %p20354_p9 }
 0xa29   : > { %p20352_p8 = pneg %p20351_p7 }
 0xa2a   : > { %p20358_p13 = por %p20357_p12, %p20356_p11 }
 0xa2c   : > { %p20359_p0 = pnand %p20358_p13, %p20352_p8 }
 0xa2e   : > { %20362 = shalt.err (!%p20359_p0)
}
 0xa2f   : > { %19617 = dma.vmem_to_hbm [thread:$0]  (%p20522_p5), %s24522_s28, 16, %s24520_s30, %s15779_s11  }
 0xa30 PF: > { %p19623_p1 = scmp.ge.s32.totalorder %s20397_s16, 2  ;;  %s15803_s12 = sand.u32 1, %s20385_s13  }
 0xa31   : > { %s15804_s18 = scalar_lea.sflag [#allocation4], %s15803_s12 }
 0xa32   : > { %p19620_p2 = pnand %p19623_p1, %p20526_p6 }
 0xa34   : > { %20380 = dma.done.wait (!%p19620_p2), %s15804_s18, 16  }
 0xa35   : > { %20382 = vsyncadd (!%p19620_p2), %s15804_s18, 4294967280  ;;  %p20_p3 = scmp.ge.s32.totalorder %s20509_s19, 4   ;;  %s24703_s13 = smov %s20389_s14 }
 0xa36   : > { %s24704_s14 = smov %s20393_s15  ;;  %s24705_s15 = smov %s20520_s22 }
 0xa37   : > { %s24706_s16 = smov %s20509_s19  ;;  %22 = sbr.rel (!%p20_p3) target bundleno = 3 (0x3), region = 158 }
 0xa3e   :  { %15808 = vsyncpa [#allocation4], 1 }
 0xa3f   :  { %15810 = vsyncpa [#allocation4 + $0x1], 1 }

</bundles_post_ra>
